<compile_context>
chip_gen: v6e
topology: v6e:2x2x1
jax: 0.10.0
libtpu: 0.0.40
codegen_flags: <defaults>
</compile_context>

<pallas_src>
import functools

import jax
import jax.numpy as jnp
from jax.experimental import pallas as pl
from jax.experimental.pallas import tpu as pltpu


# ----------------------------------------------------------------------------
# In-kernel helpers (pure functions on jnp values)
# ----------------------------------------------------------------------------
def _layernorm(x, g, b, eps=1e-5):
    mean = jnp.mean(x, axis=-1, keepdims=True)
    xc = x - mean
    var = jnp.mean(xc * xc, axis=-1, keepdims=True)
    return xc * jax.lax.rsqrt(var + eps) * g + b


def _mha_heads(q_all, k_all, v_all, n_heads, d_head, bias=None):
    """Multi-head SDPA on full-width operands.

    q_all: (Lq, E); k_all / v_all: (Lk, E); softmax over Lk, per head.
    `bias` (Lq, Lk) is an additive mask applied BEFORE the row-max subtraction.
    Returns (Lq, E) with per-head outputs concatenated along lanes.
    """
    scale = 1.0 / float(d_head) ** 0.5
    outs = []
    for h in range(n_heads):
        c0 = h * d_head
        q = q_all[:, c0:c0 + d_head]
        k = k_all[:, c0:c0 + d_head]
        v = v_all[:, c0:c0 + d_head]
        s = jax.lax.dot_general(q, k, (((1,), (1,)), ((), ())),
                                preferred_element_type=jnp.float32) * scale
        if bias is not None:
            s = s + bias
        s = s - jnp.max(s, axis=-1, keepdims=True)
        p = jnp.exp(s)
        p = p / jnp.sum(p, axis=-1, keepdims=True)       # exact division (torch parity)
        outs.append(jnp.dot(p, v, preferred_element_type=jnp.float32))
    return jnp.concatenate(outs, axis=-1)


# ----------------------------------------------------------------------------
# The single fused kernel
# ----------------------------------------------------------------------------
def _han_kernel(xs_ref, ws_ref, bs_ref,
                xc_ref, wc_ref, bc_ref,
                bias_ref,
                wqkv_ref, bqkv_ref, wo_ref, bo_ref, ln1w_ref, ln1b_ref,
                w1_ref, b1_ref, w2_ref, b2_ref, ln2w_ref, ln2b_ref,
                cwq_ref, cbq_ref, cwkv_ref, cbkv_ref, cwo_ref, cbo_ref,
                fcw_ref, fcb_ref,
                out_ref,
                *, s_len, l_len, n_heads, n_layers):
    e = ws_ref.shape[1]
    d_head = e // n_heads
    ff_dim = w1_ref.shape[1]

    # ---- embeddings: sequence tokens + combined macro/fund/sent context ----
    x = (jnp.dot(xs_ref[...], ws_ref[...], preferred_element_type=jnp.float32)
         + bs_ref[...])                                               # (M, E)
    ctx = (jnp.dot(xc_ref[...], wc_ref[...], preferred_element_type=jnp.float32)
           + bc_ref[...])                                             # (B, E)

    attn_bias = bias_ref[...]        # (M, M) block-diagonal additive mask

    # ---- transformer encoder layers (post-LN, relu), all VMEM-resident ----
    for li in range(n_layers):
        r0 = li * e
        qkv = (jnp.dot(x, wqkv_ref[r0:r0 + e, :],
                       preferred_element_type=jnp.float32)
               + bqkv_ref[li:li + 1, :])                              # (M, 3E)
        sa = _mha_heads(qkv[:, :e], qkv[:, e:2 * e], qkv[:, 2 * e:],
                        n_heads, d_head, bias=attn_bias)
        sa = (jnp.dot(sa, wo_ref[r0:r0 + e, :],
                      preferred_element_type=jnp.float32)
              + bo_ref[li:li + 1, :])
        x1 = _layernorm(x + sa, ln1w_ref[li:li + 1, :], ln1b_ref[li:li + 1, :])

        h1 = jnp.maximum(
            jnp.dot(x1, w1_ref[r0:r0 + e, :],
                    preferred_element_type=jnp.float32) + b1_ref[li:li + 1, :],
            0.0)
        ffo = (jnp.dot(h1, w2_ref[li * ff_dim:(li + 1) * ff_dim, :],
                       preferred_element_type=jnp.float32)
               + b2_ref[li:li + 1, :])
        x = _layernorm(x1 + ffo, ln2w_ref[li:li + 1, :], ln2b_ref[li:li + 1, :])

    # ---- context attention: K/V projected ONCE on the (B, E) context and
    #      shared by every attention batch -> one score matmul over all rows ----
    q_all = (jnp.dot(x, cwq_ref[...], preferred_element_type=jnp.float32)
             + cbq_ref[...])                                          # (M, E)
    kv = (jnp.dot(ctx, cwkv_ref[...], preferred_element_type=jnp.float32)
          + cbkv_ref[...])                                            # (B, 2E)
    comb = _mha_heads(q_all, kv[:, :e], kv[:, e:], n_heads, d_head)
    comb = (jnp.dot(comb, cwo_ref[...], preferred_element_type=jnp.float32)
            + cbo_ref[...])                                           # (M, E)

    # ---- mean over the S axis (tree reduction over s-major row blocks) ----
    blocks = [comb[t * l_len:(t + 1) * l_len, :] for t in range(s_len)]
    while len(blocks) > 1:
        nxt = [blocks[i] + blocks[i + 1] for i in range(0, len(blocks) - 1, 2)]
        if len(blocks) % 2:
            nxt.append(blocks[-1])
        blocks = nxt
    pooled = blocks[0] * (1.0 / float(s_len))                          # (B, E)

    y = (jnp.dot(pooled, fcw_ref[...], preferred_element_type=jnp.float32)
         + fcb_ref[...])
    out_ref[...] = 1.0 / (1.0 + jnp.exp(-y))


# ----------------------------------------------------------------------------
# Wrapper: weight prep + one pallas_call
# ----------------------------------------------------------------------------
def han_forward(params, sequences, macro, fundamental, sentiment, *, n_heads):
    B, S, D_in = sequences.shape
    E = params["seq_emb_w"].shape[0]
    layers = params["layers"]
    L = len(layers)
    FF = layers[0]["linear1_w"].shape[0]
    M = S * B

    # s-major token layout: row = s*B + b (each attention batch is contiguous)
    xs = jnp.transpose(sequences, (1, 0, 2)).reshape(M, D_in)

    # macro_emb + fund_emb + sent_emb == concat(inputs) @ concat(weights)^T + Σb
    xc = jnp.concatenate([macro, fundamental, sentiment], axis=-1)
    Dc = xc.shape[1]
    wc = jnp.concatenate([params["mac_emb_w"], params["fun_emb_w"],
                          params["sen_emb_w"]], axis=1).T              # (Dc, E)
    bc = (params["mac_emb_b"] + params["fun_emb_b"]
          + params["sen_emb_b"]).reshape(1, E)

    # block-diagonal additive mask: only same-s (same attention batch) pairs attend
    blk = jnp.arange(M, dtype=jnp.int32) // B
    attn_bias = jnp.where(blk[:, None] == blk[None, :],
                          jnp.float32(0.0), jnp.float32(-1e30))

    # stacked encoder-layer weights (PyTorch layouts -> matmul-ready, 2-D stacks)
    wqkv = jnp.concatenate([lp["self_attn"]["in_proj_weight"].T for lp in layers], 0)   # (L*E, 3E)
    bqkv = jnp.stack([lp["self_attn"]["in_proj_bias"] for lp in layers], 0)             # (L, 3E)
    wo = jnp.concatenate([lp["self_attn"]["out_proj_weight"].T for lp in layers], 0)    # (L*E, E)
    bo = jnp.stack([lp["self_attn"]["out_proj_bias"] for lp in layers], 0)              # (L, E)
    ln1w = jnp.stack([lp["norm1_w"] for lp in layers], 0)                               # (L, E)
    ln1b = jnp.stack([lp["norm1_b"] for lp in layers], 0)
    w1 = jnp.concatenate([lp["linear1_w"].T for lp in layers], 0)                       # (L*E, FF)
    b1 = jnp.stack([lp["linear1_b"] for lp in layers], 0)                               # (L, FF)
    w2 = jnp.concatenate([lp["linear2_w"].T for lp in layers], 0)                       # (L*FF, E)
    b2 = jnp.stack([lp["linear2_b"] for lp in layers], 0)                               # (L, E)
    ln2w = jnp.stack([lp["norm2_w"] for lp in layers], 0)
    ln2b = jnp.stack([lp["norm2_b"] for lp in layers], 0)

    ca = params["ctx_attn"]
    cwq = ca["in_proj_weight"][:E].T                                    # (E, E)
    cbq = ca["in_proj_bias"][:E].reshape(1, E)
    cwkv = ca["in_proj_weight"][E:].T                                   # (E, 2E)
    cbkv = ca["in_proj_bias"][E:].reshape(1, 2 * E)
    cwo = ca["out_proj_weight"].T
    cbo = ca["out_proj_bias"].reshape(1, E)

    fcw = params["fc_w"].T                                              # (E, 1)
    fcb = params["fc_b"].reshape(1, 1)

    full = lambda i: (0, 0)
    spec = lambda shape: pl.BlockSpec(shape, full)

    kern = functools.partial(_han_kernel, s_len=S, l_len=B,
                             n_heads=n_heads, n_layers=L)

    return pl.pallas_call(
        kern,
        out_shape=jax.ShapeDtypeStruct((B, 1), jnp.float32),
        grid=(1,),
        in_specs=[
            spec((M, D_in)), spec((D_in, E)), spec((1, E)),
            spec((B, Dc)), spec((Dc, E)), spec((1, E)),
            spec((M, M)),
            spec((L * E, 3 * E)), spec((L, 3 * E)),
            spec((L * E, E)), spec((L, E)),
            spec((L, E)), spec((L, E)),
            spec((L * E, FF)), spec((L, FF)),
            spec((L * FF, E)), spec((L, E)),
            spec((L, E)), spec((L, E)),
            spec((E, E)), spec((1, E)),
            spec((E, 2 * E)), spec((1, 2 * E)),
            spec((E, E)), spec((1, E)),
            spec((E, 1)), spec((1, 1)),
        ],
        out_specs=pl.BlockSpec((B, 1), full),
        compiler_params=pltpu.CompilerParams(
            dimension_semantics=("arbitrary",)),
    )(xs, params["seq_emb_w"].T, params["seq_emb_b"].reshape(1, E),
      xc, wc, bc,
      attn_bias,
      wqkv, bqkv, wo, bo, ln1w, ln1b, w1, b1, w2, b2, ln2w, ln2b,
      cwq, cbq, cwkv, cbkv, cwo, cbo,
      fcw, fcb)


# ----------------------------------------------------------------------------
# Deterministic synthetic parameter init (PyTorch-style layouts)
# ----------------------------------------------------------------------------
def _dense_init(key, out_dim, in_dim):
    kw, kb = jax.random.split(key)
    w = jax.random.normal(kw, (out_dim, in_dim), jnp.float32) * 0.05
    b = jax.random.normal(kb, (out_dim,), jnp.float32) * 0.01
    return w, b


def _mha_init(key, embed_dim):
    k1, k2 = jax.random.split(key)
    return dict(
        in_proj_weight=jax.random.normal(
            k1, (3 * embed_dim, embed_dim), jnp.float32) * 0.05,
        in_proj_bias=jnp.zeros((3 * embed_dim,), jnp.float32),
        out_proj_weight=jax.random.normal(
            k2, (embed_dim, embed_dim), jnp.float32) * 0.05,
        out_proj_bias=jnp.zeros((embed_dim,), jnp.float32),
    )


def init_params(key, input_dim, macro_dim, fund_dim, sent_dim, embed_dim,
                n_layers, dim_feedforward=2048):
    keys = jax.random.split(key, 6 + n_layers)
    p = {}
    p["seq_emb_w"], p["seq_emb_b"] = _dense_init(keys[0], embed_dim, input_dim)
    p["mac_emb_w"], p["mac_emb_b"] = _dense_init(keys[1], embed_dim, macro_dim)
    p["fun_emb_w"], p["fun_emb_b"] = _dense_init(keys[2], embed_dim, fund_dim)
    p["sen_emb_w"], p["sen_emb_b"] = _dense_init(keys[3], embed_dim, sent_dim)

    layers = []
    for li in range(n_layers):
        lk = jax.random.split(keys[4 + li], 3)
        l1w, l1b = _dense_init(lk[1], dim_feedforward, embed_dim)
        l2w, l2b = _dense_init(lk[2], embed_dim, dim_feedforward)
        layers.append(dict(
            self_attn=_mha_init(lk[0], embed_dim),
            linear1_w=l1w, linear1_b=l1b,
            linear2_w=l2w, linear2_b=l2b,
            norm1_w=jnp.ones((embed_dim,), jnp.float32),
            norm1_b=jnp.zeros((embed_dim,), jnp.float32),
            norm2_w=jnp.ones((embed_dim,), jnp.float32),
            norm2_b=jnp.zeros((embed_dim,), jnp.float32),
        ))
    p["layers"] = layers
    p["ctx_attn"] = _mha_init(keys[4 + n_layers], embed_dim)
    p["fc_w"], p["fc_b"] = _dense_init(keys[5 + n_layers], 1, embed_dim)
    return p


# ----------------------------------------------------------------------------
if __name__ == "__main__":
    B, S = 4, 8
    INPUT_DIM, MACRO_DIM, FUND_DIM, SENT_DIM = 10, 5, 6, 7
    EMBED_DIM, N_HEADS, N_LAYERS = 32, 4, 2

    root = jax.random.PRNGKey(0)
    kp, k1, k2, k3, k4 = jax.random.split(root, 5)

    params = init_params(kp, INPUT_DIM, MACRO_DIM, FUND_DIM, SENT_DIM,
                         EMBED_DIM, N_LAYERS)

    sequences = jax.random.normal(k1, (B, S, INPUT_DIM), jnp.float32)
    macro = jax.random.normal(k2, (B, MACRO_DIM), jnp.float32)
    fundamental = jax.random.normal(k3, (B, FUND_DIM), jnp.float32)
    sentiment = jax.random.normal(k4, (B, SENT_DIM), jnp.float32)

    fwd = jax.jit(functools.partial(han_forward, n_heads=N_HEADS))
    out = fwd(params, sequences, macro, fundamental, sentiment)
    out = jax.block_until_ready(out)

    assert out.shape == (B, 1), out.shape
    assert bool(jnp.all(jnp.isfinite(out))) and bool(jnp.all((out > 0) & (out < 1)))
    print("KERNEL_OK")
</pallas_src>

<mosaic_0001>
module attributes {stable_mosaic.version = 11 : i64} {
  func.func @_han_kernel(%arg0: i32, %arg1: memref<32x10xf32, #tpu.memory_space<vmem>>, %arg2: memref<10x32xf32, #tpu.memory_space<vmem>>, %arg3: memref<1x32xf32, #tpu.memory_space<vmem>>, %arg4: memref<4x18xf32, #tpu.memory_space<vmem>>, %arg5: memref<18x32xf32, #tpu.memory_space<vmem>>, %arg6: memref<1x32xf32, #tpu.memory_space<vmem>>, %arg7: memref<32x32xf32, #tpu.memory_space<vmem>>, %arg8: memref<64x96xf32, #tpu.memory_space<vmem>>, %arg9: memref<2x96xf32, #tpu.memory_space<vmem>>, %arg10: memref<64x32xf32, #tpu.memory_space<vmem>>, %arg11: memref<2x32xf32, #tpu.memory_space<vmem>>, %arg12: memref<2x32xf32, #tpu.memory_space<vmem>>, %arg13: memref<2x32xf32, #tpu.memory_space<vmem>>, %arg14: memref<64x2048xf32, #tpu.memory_space<vmem>>, %arg15: memref<2x2048xf32, #tpu.memory_space<vmem>>, %arg16: memref<4096x32xf32, #tpu.memory_space<vmem>>, %arg17: memref<2x32xf32, #tpu.memory_space<vmem>>, %arg18: memref<2x32xf32, #tpu.memory_space<vmem>>, %arg19: memref<2x32xf32, #tpu.memory_space<vmem>>, %arg20: memref<32x32xf32, #tpu.memory_space<vmem>>, %arg21: memref<1x32xf32, #tpu.memory_space<vmem>>, %arg22: memref<32x64xf32, #tpu.memory_space<vmem>>, %arg23: memref<1x64xf32, #tpu.memory_space<vmem>>, %arg24: memref<32x32xf32, #tpu.memory_space<vmem>>, %arg25: memref<1x32xf32, #tpu.memory_space<vmem>>, %arg26: memref<32x1xf32, #tpu.memory_space<vmem>>, %arg27: memref<1x1xf32, #tpu.memory_space<vmem>>, %arg28: memref<4x1xf32, #tpu.memory_space<vmem>>) attributes {dimension_semantics = [#tpu.dimension_semantics<arbitrary>], iteration_bounds = array<i64: 1>, scalar_prefetch = 0 : i64, scratch_operands = 0 : i64, tpu.core_type = #tpu.core_type<tc>, window_params = [{pipeline_mode = #tpu.pipeline_mode<synchronous>, transform_indices = @transform_0, window_bounds = array<i64: 32, 10>}, {pipeline_mode = #tpu.pipeline_mode<synchronous>, transform_indices = @transform_1, window_bounds = array<i64: 10, 32>}, {pipeline_mode = #tpu.pipeline_mode<synchronous>, transform_indices = @transform_2, window_bounds = array<i64: 1, 32>}, {pipeline_mode = #tpu.pipeline_mode<synchronous>, transform_indices = @transform_3, window_bounds = array<i64: 4, 18>}, {pipeline_mode = #tpu.pipeline_mode<synchronous>, transform_indices = @transform_4, window_bounds = array<i64: 18, 32>}, {pipeline_mode = #tpu.pipeline_mode<synchronous>, transform_indices = @transform_5, window_bounds = array<i64: 1, 32>}, {pipeline_mode = #tpu.pipeline_mode<synchronous>, transform_indices = @transform_6, window_bounds = array<i64: 32, 32>}, {pipeline_mode = #tpu.pipeline_mode<synchronous>, transform_indices = @transform_7, window_bounds = array<i64: 64, 96>}, {pipeline_mode = #tpu.pipeline_mode<synchronous>, transform_indices = @transform_8, window_bounds = array<i64: 2, 96>}, {pipeline_mode = #tpu.pipeline_mode<synchronous>, transform_indices = @transform_9, window_bounds = array<i64: 64, 32>}, {pipeline_mode = #tpu.pipeline_mode<synchronous>, transform_indices = @transform_10, window_bounds = array<i64: 2, 32>}, {pipeline_mode = #tpu.pipeline_mode<synchronous>, transform_indices = @transform_11, window_bounds = array<i64: 2, 32>}, {pipeline_mode = #tpu.pipeline_mode<synchronous>, transform_indices = @transform_12, window_bounds = array<i64: 2, 32>}, {pipeline_mode = #tpu.pipeline_mode<synchronous>, transform_indices = @transform_13, window_bounds = array<i64: 64, 2048>}, {pipeline_mode = #tpu.pipeline_mode<synchronous>, transform_indices = @transform_14, window_bounds = array<i64: 2, 2048>}, {pipeline_mode = #tpu.pipeline_mode<synchronous>, transform_indices = @transform_15, window_bounds = array<i64: 4096, 32>}, {pipeline_mode = #tpu.pipeline_mode<synchronous>, transform_indices = @transform_16, window_bounds = array<i64: 2, 32>}, {pipeline_mode = #tpu.pipeline_mode<synchronous>, transform_indices = @transform_17, window_bounds = array<i64: 2, 32>}, {pipeline_mode = #tpu.pipeline_mode<synchronous>, transform_indices = @transform_18, window_bounds = array<i64: 2, 32>}, {pipeline_mode = #tpu.pipeline_mode<synchronous>, transform_indices = @transform_19, window_bounds = array<i64: 32, 32>}, {pipeline_mode = #tpu.pipeline_mode<synchronous>, transform_indices = @transform_20, window_bounds = array<i64: 1, 32>}, {pipeline_mode = #tpu.pipeline_mode<synchronous>, transform_indices = @transform_21, window_bounds = array<i64: 32, 64>}, {pipeline_mode = #tpu.pipeline_mode<synchronous>, transform_indices = @transform_22, window_bounds = array<i64: 1, 64>}, {pipeline_mode = #tpu.pipeline_mode<synchronous>, transform_indices = @transform_23, window_bounds = array<i64: 32, 32>}, {pipeline_mode = #tpu.pipeline_mode<synchronous>, transform_indices = @transform_24, window_bounds = array<i64: 1, 32>}, {pipeline_mode = #tpu.pipeline_mode<synchronous>, transform_indices = @transform_25, window_bounds = array<i64: 32, 1>}, {pipeline_mode = #tpu.pipeline_mode<synchronous>, transform_indices = @transform_26, window_bounds = array<i64: 1, 1>}, {pipeline_mode = #tpu.pipeline_mode<synchronous>, transform_indices = @transform_27, window_bounds = array<i64: 4, 1>}]} {
    %c0 = arith.constant 0 : index
    %c0_0 = arith.constant 0 : index
    %0 = vector.load %arg1[%c0, %c0_0] : memref<32x10xf32, #tpu.memory_space<vmem>>, vector<32x10xf32>
    %c0_1 = arith.constant 0 : index
    %c0_2 = arith.constant 0 : index
    %1 = vector.load %arg2[%c0_1, %c0_2] : memref<10x32xf32, #tpu.memory_space<vmem>>, vector<10x32xf32>
    %cst = arith.constant dense<0.000000e+00> : vector<32x32xf32>
    %2 = tpu.matmul %0, %1, %cst {dimension_numbers = #tpu.dot_dimension_numbers<[1], [0], [0], [1], [0, 0, 1, 1], [], []>} : vector<32x10xf32>, vector<10x32xf32>, vector<32x32xf32> -> vector<32x32xf32>
    %c0_3 = arith.constant 0 : index
    %c0_4 = arith.constant 0 : index
    %3 = vector.load %arg3[%c0_3, %c0_4] : memref<1x32xf32, #tpu.memory_space<vmem>>, vector<1x32xf32>
    %4 = vector.broadcast %3 : vector<1x32xf32> to vector<32x32xf32>
    %5 = arith.addf %2, %4 : vector<32x32xf32>
    %c0_5 = arith.constant 0 : index
    %c0_6 = arith.constant 0 : index
    %6 = vector.load %arg4[%c0_5, %c0_6] : memref<4x18xf32, #tpu.memory_space<vmem>>, vector<4x18xf32>
    %c0_7 = arith.constant 0 : index
    %c0_8 = arith.constant 0 : index
    %7 = vector.load %arg5[%c0_7, %c0_8] : memref<18x32xf32, #tpu.memory_space<vmem>>, vector<18x32xf32>
    %cst_9 = arith.constant dense<0.000000e+00> : vector<4x32xf32>
    %8 = tpu.matmul %6, %7, %cst_9 {dimension_numbers = #tpu.dot_dimension_numbers<[1], [0], [0], [1], [0, 0, 1, 1], [], []>} : vector<4x18xf32>, vector<18x32xf32>, vector<4x32xf32> -> vector<4x32xf32>
    %c0_10 = arith.constant 0 : index
    %c0_11 = arith.constant 0 : index
    %9 = vector.load %arg6[%c0_10, %c0_11] : memref<1x32xf32, #tpu.memory_space<vmem>>, vector<1x32xf32>
    %10 = vector.broadcast %9 : vector<1x32xf32> to vector<4x32xf32>
    %11 = arith.addf %8, %10 : vector<4x32xf32>
    %c0_12 = arith.constant 0 : index
    %c0_13 = arith.constant 0 : index
    %12 = vector.load %arg7[%c0_12, %c0_13] : memref<32x32xf32, #tpu.memory_space<vmem>>, vector<32x32xf32>
    %c0_14 = arith.constant 0 : index
    %c0_15 = arith.constant 0 : index
    %13 = vector.load %arg8[%c0_14, %c0_15] : memref<64x96xf32, #tpu.memory_space<vmem>>, vector<32x96xf32>
    %cst_16 = arith.constant dense<0.000000e+00> : vector<32x96xf32>
    %14 = tpu.matmul %5, %13, %cst_16 {dimension_numbers = #tpu.dot_dimension_numbers<[1], [0], [0], [1], [0, 0, 1, 1], [], []>} : vector<32x32xf32>, vector<32x96xf32>, vector<32x96xf32> -> vector<32x96xf32>
    %c0_17 = arith.constant 0 : index
    %c0_18 = arith.constant 0 : index
    %15 = vector.load %arg9[%c0_17, %c0_18] : memref<2x96xf32, #tpu.memory_space<vmem>>, vector<1x96xf32>
    %16 = vector.broadcast %15 : vector<1x96xf32> to vector<32x96xf32>
    %17 = arith.addf %14, %16 : vector<32x96xf32>
    %18 = vector.extract_strided_slice %17 {offsets = [0, 0], sizes = [32, 32], strides = [1, 1]} : vector<32x96xf32> to vector<32x32xf32>
    %19 = vector.extract_strided_slice %17 {offsets = [0, 32], sizes = [32, 32], strides = [1, 1]} : vector<32x96xf32> to vector<32x32xf32>
    %20 = vector.extract_strided_slice %17 {offsets = [0, 64], sizes = [32, 32], strides = [1, 1]} : vector<32x96xf32> to vector<32x32xf32>
    %21 = vector.extract_strided_slice %18 {offsets = [0, 0], sizes = [32, 8], strides = [1, 1]} : vector<32x32xf32> to vector<32x8xf32>
    %22 = vector.extract_strided_slice %19 {offsets = [0, 0], sizes = [32, 8], strides = [1, 1]} : vector<32x32xf32> to vector<32x8xf32>
    %23 = vector.extract_strided_slice %20 {offsets = [0, 0], sizes = [32, 8], strides = [1, 1]} : vector<32x32xf32> to vector<32x8xf32>
    %cst_19 = arith.constant dense<0.000000e+00> : vector<32x32xf32>
    %24 = tpu.matmul %21, %22, %cst_19 {dimension_numbers = #tpu.dot_dimension_numbers<[1], [1], [0], [0], [0, 0, 1, 0], [], []>} : vector<32x8xf32>, vector<32x8xf32>, vector<32x32xf32> -> vector<32x32xf32>
    %cst_20 = arith.constant 0.353553385 : f32
    %25 = vector.broadcast %cst_20 : f32 to vector<32x32xf32>
    %26 = arith.mulf %24, %25 : vector<32x32xf32>
    %27 = arith.addf %26, %12 : vector<32x32xf32>
    %cst_21 = arith.constant dense<0xFF800000> : vector<32xf32>
    %28 = vector.multi_reduction <maximumf>, %27, %cst_21 [1] : vector<32x32xf32> to vector<32xf32>
    %29 = vector.shape_cast %28 : vector<32xf32> to vector<32x1xf32>
    %30 = vector.broadcast %29 : vector<32x1xf32> to vector<32x32xf32>
    %31 = arith.subf %27, %30 : vector<32x32xf32>
    %32 = math.exp %31 : vector<32x32xf32>
    %cst_22 = arith.constant dense<0.000000e+00> : vector<32xf32>
    %33 = vector.multi_reduction <add>, %32, %cst_22 [1] : vector<32x32xf32> to vector<32xf32>
    %34 = vector.shape_cast %33 : vector<32xf32> to vector<32x1xf32>
    %35 = vector.broadcast %34 : vector<32x1xf32> to vector<32x32xf32>
    %36 = arith.divf %32, %35 : vector<32x32xf32>
    %cst_23 = arith.constant dense<0.000000e+00> : vector<32x8xf32>
    %37 = tpu.matmul %36, %23, %cst_23 {dimension_numbers = #tpu.dot_dimension_numbers<[1], [0], [0], [1], [0, 0, 1, 1], [], []>} : vector<32x32xf32>, vector<32x8xf32>, vector<32x8xf32> -> vector<32x8xf32>
    %38 = vector.extract_strided_slice %18 {offsets = [0, 8], sizes = [32, 8], strides = [1, 1]} : vector<32x32xf32> to vector<32x8xf32>
    %39 = vector.extract_strided_slice %19 {offsets = [0, 8], sizes = [32, 8], strides = [1, 1]} : vector<32x32xf32> to vector<32x8xf32>
    %40 = vector.extract_strided_slice %20 {offsets = [0, 8], sizes = [32, 8], strides = [1, 1]} : vector<32x32xf32> to vector<32x8xf32>
    %cst_24 = arith.constant dense<0.000000e+00> : vector<32x32xf32>
    %41 = tpu.matmul %38, %39, %cst_24 {dimension_numbers = #tpu.dot_dimension_numbers<[1], [1], [0], [0], [0, 0, 1, 0], [], []>} : vector<32x8xf32>, vector<32x8xf32>, vector<32x32xf32> -> vector<32x32xf32>
    %cst_25 = arith.constant 0.353553385 : f32
    %42 = vector.broadcast %cst_25 : f32 to vector<32x32xf32>
    %43 = arith.mulf %41, %42 : vector<32x32xf32>
    %44 = arith.addf %43, %12 : vector<32x32xf32>
    %cst_26 = arith.constant dense<0xFF800000> : vector<32xf32>
    %45 = vector.multi_reduction <maximumf>, %44, %cst_26 [1] : vector<32x32xf32> to vector<32xf32>
    %46 = vector.shape_cast %45 : vector<32xf32> to vector<32x1xf32>
    %47 = vector.broadcast %46 : vector<32x1xf32> to vector<32x32xf32>
    %48 = arith.subf %44, %47 : vector<32x32xf32>
    %49 = math.exp %48 : vector<32x32xf32>
    %cst_27 = arith.constant dense<0.000000e+00> : vector<32xf32>
    %50 = vector.multi_reduction <add>, %49, %cst_27 [1] : vector<32x32xf32> to vector<32xf32>
    %51 = vector.shape_cast %50 : vector<32xf32> to vector<32x1xf32>
    %52 = vector.broadcast %51 : vector<32x1xf32> to vector<32x32xf32>
    %53 = arith.divf %49, %52 : vector<32x32xf32>
    %cst_28 = arith.constant dense<0.000000e+00> : vector<32x8xf32>
    %54 = tpu.matmul %53, %40, %cst_28 {dimension_numbers = #tpu.dot_dimension_numbers<[1], [0], [0], [1], [0, 0, 1, 1], [], []>} : vector<32x32xf32>, vector<32x8xf32>, vector<32x8xf32> -> vector<32x8xf32>
    %55 = vector.extract_strided_slice %18 {offsets = [0, 16], sizes = [32, 8], strides = [1, 1]} : vector<32x32xf32> to vector<32x8xf32>
    %56 = vector.extract_strided_slice %19 {offsets = [0, 16], sizes = [32, 8], strides = [1, 1]} : vector<32x32xf32> to vector<32x8xf32>
    %57 = vector.extract_strided_slice %20 {offsets = [0, 16], sizes = [32, 8], strides = [1, 1]} : vector<32x32xf32> to vector<32x8xf32>
    %cst_29 = arith.constant dense<0.000000e+00> : vector<32x32xf32>
    %58 = tpu.matmul %55, %56, %cst_29 {dimension_numbers = #tpu.dot_dimension_numbers<[1], [1], [0], [0], [0, 0, 1, 0], [], []>} : vector<32x8xf32>, vector<32x8xf32>, vector<32x32xf32> -> vector<32x32xf32>
    %cst_30 = arith.constant 0.353553385 : f32
    %59 = vector.broadcast %cst_30 : f32 to vector<32x32xf32>
    %60 = arith.mulf %58, %59 : vector<32x32xf32>
    %61 = arith.addf %60, %12 : vector<32x32xf32>
    %cst_31 = arith.constant dense<0xFF800000> : vector<32xf32>
    %62 = vector.multi_reduction <maximumf>, %61, %cst_31 [1] : vector<32x32xf32> to vector<32xf32>
    %63 = vector.shape_cast %62 : vector<32xf32> to vector<32x1xf32>
    %64 = vector.broadcast %63 : vector<32x1xf32> to vector<32x32xf32>
    %65 = arith.subf %61, %64 : vector<32x32xf32>
    %66 = math.exp %65 : vector<32x32xf32>
    %cst_32 = arith.constant dense<0.000000e+00> : vector<32xf32>
    %67 = vector.multi_reduction <add>, %66, %cst_32 [1] : vector<32x32xf32> to vector<32xf32>
    %68 = vector.shape_cast %67 : vector<32xf32> to vector<32x1xf32>
    %69 = vector.broadcast %68 : vector<32x1xf32> to vector<32x32xf32>
    %70 = arith.divf %66, %69 : vector<32x32xf32>
    %cst_33 = arith.constant dense<0.000000e+00> : vector<32x8xf32>
    %71 = tpu.matmul %70, %57, %cst_33 {dimension_numbers = #tpu.dot_dimension_numbers<[1], [0], [0], [1], [0, 0, 1, 1], [], []>} : vector<32x32xf32>, vector<32x8xf32>, vector<32x8xf32> -> vector<32x8xf32>
    %72 = vector.extract_strided_slice %18 {offsets = [0, 24], sizes = [32, 8], strides = [1, 1]} : vector<32x32xf32> to vector<32x8xf32>
    %73 = vector.extract_strided_slice %19 {offsets = [0, 24], sizes = [32, 8], strides = [1, 1]} : vector<32x32xf32> to vector<32x8xf32>
    %74 = vector.extract_strided_slice %20 {offsets = [0, 24], sizes = [32, 8], strides = [1, 1]} : vector<32x32xf32> to vector<32x8xf32>
    %cst_34 = arith.constant dense<0.000000e+00> : vector<32x32xf32>
    %75 = tpu.matmul %72, %73, %cst_34 {dimension_numbers = #tpu.dot_dimension_numbers<[1], [1], [0], [0], [0, 0, 1, 0], [], []>} : vector<32x8xf32>, vector<32x8xf32>, vector<32x32xf32> -> vector<32x32xf32>
    %cst_35 = arith.constant 0.353553385 : f32
    %76 = vector.broadcast %cst_35 : f32 to vector<32x32xf32>
    %77 = arith.mulf %75, %76 : vector<32x32xf32>
    %78 = arith.addf %77, %12 : vector<32x32xf32>
    %cst_36 = arith.constant dense<0xFF800000> : vector<32xf32>
    %79 = vector.multi_reduction <maximumf>, %78, %cst_36 [1] : vector<32x32xf32> to vector<32xf32>
    %80 = vector.shape_cast %79 : vector<32xf32> to vector<32x1xf32>
    %81 = vector.broadcast %80 : vector<32x1xf32> to vector<32x32xf32>
    %82 = arith.subf %78, %81 : vector<32x32xf32>
    %83 = math.exp %82 : vector<32x32xf32>
    %cst_37 = arith.constant dense<0.000000e+00> : vector<32xf32>
    %84 = vector.multi_reduction <add>, %83, %cst_37 [1] : vector<32x32xf32> to vector<32xf32>
    %85 = vector.shape_cast %84 : vector<32xf32> to vector<32x1xf32>
    %86 = vector.broadcast %85 : vector<32x1xf32> to vector<32x32xf32>
    %87 = arith.divf %83, %86 : vector<32x32xf32>
    %cst_38 = arith.constant dense<0.000000e+00> : vector<32x8xf32>
    %88 = tpu.matmul %87, %74, %cst_38 {dimension_numbers = #tpu.dot_dimension_numbers<[1], [0], [0], [1], [0, 0, 1, 1], [], []>} : vector<32x32xf32>, vector<32x8xf32>, vector<32x8xf32> -> vector<32x8xf32>
    %89 = tpu.concatenate %37, %54, %71, %88 in 1 : vector<32x8xf32>, vector<32x8xf32>, vector<32x8xf32>, vector<32x8xf32> -> vector<32x32xf32>
    %c0_39 = arith.constant 0 : index
    %c0_40 = arith.constant 0 : index
    %90 = vector.load %arg10[%c0_39, %c0_40] : memref<64x32xf32, #tpu.memory_space<vmem>>, vector<32x32xf32>
    %cst_41 = arith.constant dense<0.000000e+00> : vector<32x32xf32>
    %91 = tpu.matmul %89, %90, %cst_41 {dimension_numbers = #tpu.dot_dimension_numbers<[1], [0], [0], [1], [0, 0, 1, 1], [], []>} : vector<32x32xf32>, vector<32x32xf32>, vector<32x32xf32> -> vector<32x32xf32>
    %c0_42 = arith.constant 0 : index
    %c0_43 = arith.constant 0 : index
    %92 = vector.load %arg11[%c0_42, %c0_43] : memref<2x32xf32, #tpu.memory_space<vmem>>, vector<1x32xf32>
    %93 = vector.broadcast %92 : vector<1x32xf32> to vector<32x32xf32>
    %94 = arith.addf %91, %93 : vector<32x32xf32>
    %95 = arith.addf %5, %94 : vector<32x32xf32>
    %c0_44 = arith.constant 0 : index
    %c0_45 = arith.constant 0 : index
    %96 = vector.load %arg12[%c0_44, %c0_45] : memref<2x32xf32, #tpu.memory_space<vmem>>, vector<1x32xf32>
    %c0_46 = arith.constant 0 : index
    %c0_47 = arith.constant 0 : index
    %97 = vector.load %arg13[%c0_46, %c0_47] : memref<2x32xf32, #tpu.memory_space<vmem>>, vector<1x32xf32>
    %cst_48 = arith.constant dense<0.000000e+00> : vector<32xf32>
    %98 = vector.multi_reduction <add>, %95, %cst_48 [1] : vector<32x32xf32> to vector<32xf32>
    %99 = vector.shape_cast %98 : vector<32xf32> to vector<32x1xf32>
    %cst_49 = arith.constant 3.200000e+01 : f32
    %100 = vector.broadcast %cst_49 : f32 to vector<32x1xf32>
    %101 = arith.divf %99, %100 : vector<32x1xf32>
    %102 = vector.broadcast %101 : vector<32x1xf32> to vector<32x32xf32>
    %103 = arith.subf %95, %102 : vector<32x32xf32>
    %104 = arith.mulf %103, %103 : vector<32x32xf32>
    %cst_50 = arith.constant dense<0.000000e+00> : vector<32xf32>
    %105 = vector.multi_reduction <add>, %104, %cst_50 [1] : vector<32x32xf32> to vector<32xf32>
    %106 = vector.shape_cast %105 : vector<32xf32> to vector<32x1xf32>
    %cst_51 = arith.constant 3.200000e+01 : f32
    %107 = vector.broadcast %cst_51 : f32 to vector<32x1xf32>
    %108 = arith.divf %106, %107 : vector<32x1xf32>
    %cst_52 = arith.constant 9.99999974E-6 : f32
    %109 = vector.broadcast %cst_52 : f32 to vector<32x1xf32>
    %110 = arith.addf %108, %109 : vector<32x1xf32>
    %111 = math.rsqrt %110 : vector<32x1xf32>
    %112 = vector.broadcast %111 : vector<32x1xf32> to vector<32x32xf32>
    %113 = arith.mulf %103, %112 : vector<32x32xf32>
    %114 = vector.broadcast %96 : vector<1x32xf32> to vector<32x32xf32>
    %115 = arith.mulf %113, %114 : vector<32x32xf32>
    %116 = vector.broadcast %97 : vector<1x32xf32> to vector<32x32xf32>
    %117 = arith.addf %115, %116 : vector<32x32xf32>
    %c0_53 = arith.constant 0 : index
    %c0_54 = arith.constant 0 : index
    %118 = vector.load %arg14[%c0_53, %c0_54] : memref<64x2048xf32, #tpu.memory_space<vmem>>, vector<32x2048xf32>
    %cst_55 = arith.constant dense<0.000000e+00> : vector<32x2048xf32>
    %119 = tpu.matmul %117, %118, %cst_55 {dimension_numbers = #tpu.dot_dimension_numbers<[1], [0], [0], [1], [0, 0, 1, 1], [], []>} : vector<32x32xf32>, vector<32x2048xf32>, vector<32x2048xf32> -> vector<32x2048xf32>
    %c0_56 = arith.constant 0 : index
    %c0_57 = arith.constant 0 : index
    %120 = vector.load %arg15[%c0_56, %c0_57] : memref<2x2048xf32, #tpu.memory_space<vmem>>, vector<1x2048xf32>
    %121 = vector.broadcast %120 : vector<1x2048xf32> to vector<32x2048xf32>
    %122 = arith.addf %119, %121 : vector<32x2048xf32>
    %cst_58 = arith.constant 0.000000e+00 : f32
    %123 = vector.broadcast %cst_58 : f32 to vector<32x2048xf32>
    %124 = arith.maximumf %122, %123 : vector<32x2048xf32>
    %c0_59 = arith.constant 0 : index
    %c0_60 = arith.constant 0 : index
    %125 = vector.load %arg16[%c0_59, %c0_60] : memref<4096x32xf32, #tpu.memory_space<vmem>>, vector<2048x32xf32>
    %cst_61 = arith.constant dense<0.000000e+00> : vector<32x32xf32>
    %126 = tpu.matmul %124, %125, %cst_61 {dimension_numbers = #tpu.dot_dimension_numbers<[1], [0], [0], [1], [0, 0, 1, 1], [], []>} : vector<32x2048xf32>, vector<2048x32xf32>, vector<32x32xf32> -> vector<32x32xf32>
    %c0_62 = arith.constant 0 : index
    %c0_63 = arith.constant 0 : index
    %127 = vector.load %arg17[%c0_62, %c0_63] : memref<2x32xf32, #tpu.memory_space<vmem>>, vector<1x32xf32>
    %128 = vector.broadcast %127 : vector<1x32xf32> to vector<32x32xf32>
    %129 = arith.addf %126, %128 : vector<32x32xf32>
    %130 = arith.addf %117, %129 : vector<32x32xf32>
    %c0_64 = arith.constant 0 : index
    %c0_65 = arith.constant 0 : index
    %131 = vector.load %arg18[%c0_64, %c0_65] : memref<2x32xf32, #tpu.memory_space<vmem>>, vector<1x32xf32>
    %c0_66 = arith.constant 0 : index
    %c0_67 = arith.constant 0 : index
    %132 = vector.load %arg19[%c0_66, %c0_67] : memref<2x32xf32, #tpu.memory_space<vmem>>, vector<1x32xf32>
    %cst_68 = arith.constant dense<0.000000e+00> : vector<32xf32>
    %133 = vector.multi_reduction <add>, %130, %cst_68 [1] : vector<32x32xf32> to vector<32xf32>
    %134 = vector.shape_cast %133 : vector<32xf32> to vector<32x1xf32>
    %cst_69 = arith.constant 3.200000e+01 : f32
    %135 = vector.broadcast %cst_69 : f32 to vector<32x1xf32>
    %136 = arith.divf %134, %135 : vector<32x1xf32>
    %137 = vector.broadcast %136 : vector<32x1xf32> to vector<32x32xf32>
    %138 = arith.subf %130, %137 : vector<32x32xf32>
    %139 = arith.mulf %138, %138 : vector<32x32xf32>
    %cst_70 = arith.constant dense<0.000000e+00> : vector<32xf32>
    %140 = vector.multi_reduction <add>, %139, %cst_70 [1] : vector<32x32xf32> to vector<32xf32>
    %141 = vector.shape_cast %140 : vector<32xf32> to vector<32x1xf32>
    %cst_71 = arith.constant 3.200000e+01 : f32
    %142 = vector.broadcast %cst_71 : f32 to vector<32x1xf32>
    %143 = arith.divf %141, %142 : vector<32x1xf32>
    %cst_72 = arith.constant 9.99999974E-6 : f32
    %144 = vector.broadcast %cst_72 : f32 to vector<32x1xf32>
    %145 = arith.addf %143, %144 : vector<32x1xf32>
    %146 = math.rsqrt %145 : vector<32x1xf32>
    %147 = vector.broadcast %146 : vector<32x1xf32> to vector<32x32xf32>
    %148 = arith.mulf %138, %147 : vector<32x32xf32>
    %149 = vector.broadcast %131 : vector<1x32xf32> to vector<32x32xf32>
    %150 = arith.mulf %148, %149 : vector<32x32xf32>
    %151 = vector.broadcast %132 : vector<1x32xf32> to vector<32x32xf32>
    %152 = arith.addf %150, %151 : vector<32x32xf32>
    %c32 = arith.constant 32 : index
    %c0_73 = arith.constant 0 : index
    %153 = vector.load %arg8[%c32, %c0_73] : memref<64x96xf32, #tpu.memory_space<vmem>>, vector<32x96xf32>
    %cst_74 = arith.constant dense<0.000000e+00> : vector<32x96xf32>
    %154 = tpu.matmul %152, %153, %cst_74 {dimension_numbers = #tpu.dot_dimension_numbers<[1], [0], [0], [1], [0, 0, 1, 1], [], []>} : vector<32x32xf32>, vector<32x96xf32>, vector<32x96xf32> -> vector<32x96xf32>
    %c1 = arith.constant 1 : index
    %c0_75 = arith.constant 0 : index
    %155 = vector.load %arg9[%c1, %c0_75] : memref<2x96xf32, #tpu.memory_space<vmem>>, vector<1x96xf32>
    %156 = vector.broadcast %155 : vector<1x96xf32> to vector<32x96xf32>
    %157 = arith.addf %154, %156 : vector<32x96xf32>
    %158 = vector.extract_strided_slice %157 {offsets = [0, 0], sizes = [32, 32], strides = [1, 1]} : vector<32x96xf32> to vector<32x32xf32>
    %159 = vector.extract_strided_slice %157 {offsets = [0, 32], sizes = [32, 32], strides = [1, 1]} : vector<32x96xf32> to vector<32x32xf32>
    %160 = vector.extract_strided_slice %157 {offsets = [0, 64], sizes = [32, 32], strides = [1, 1]} : vector<32x96xf32> to vector<32x32xf32>
    %161 = vector.extract_strided_slice %158 {offsets = [0, 0], sizes = [32, 8], strides = [1, 1]} : vector<32x32xf32> to vector<32x8xf32>
    %162 = vector.extract_strided_slice %159 {offsets = [0, 0], sizes = [32, 8], strides = [1, 1]} : vector<32x32xf32> to vector<32x8xf32>
    %163 = vector.extract_strided_slice %160 {offsets = [0, 0], sizes = [32, 8], strides = [1, 1]} : vector<32x32xf32> to vector<32x8xf32>
    %cst_76 = arith.constant dense<0.000000e+00> : vector<32x32xf32>
    %164 = tpu.matmul %161, %162, %cst_76 {dimension_numbers = #tpu.dot_dimension_numbers<[1], [1], [0], [0], [0, 0, 1, 0], [], []>} : vector<32x8xf32>, vector<32x8xf32>, vector<32x32xf32> -> vector<32x32xf32>
    %cst_77 = arith.constant 0.353553385 : f32
    %165 = vector.broadcast %cst_77 : f32 to vector<32x32xf32>
    %166 = arith.mulf %164, %165 : vector<32x32xf32>
    %167 = arith.addf %166, %12 : vector<32x32xf32>
    %cst_78 = arith.constant dense<0xFF800000> : vector<32xf32>
    %168 = vector.multi_reduction <maximumf>, %167, %cst_78 [1] : vector<32x32xf32> to vector<32xf32>
    %169 = vector.shape_cast %168 : vector<32xf32> to vector<32x1xf32>
    %170 = vector.broadcast %169 : vector<32x1xf32> to vector<32x32xf32>
    %171 = arith.subf %167, %170 : vector<32x32xf32>
    %172 = math.exp %171 : vector<32x32xf32>
    %cst_79 = arith.constant dense<0.000000e+00> : vector<32xf32>
    %173 = vector.multi_reduction <add>, %172, %cst_79 [1] : vector<32x32xf32> to vector<32xf32>
    %174 = vector.shape_cast %173 : vector<32xf32> to vector<32x1xf32>
    %175 = vector.broadcast %174 : vector<32x1xf32> to vector<32x32xf32>
    %176 = arith.divf %172, %175 : vector<32x32xf32>
    %cst_80 = arith.constant dense<0.000000e+00> : vector<32x8xf32>
    %177 = tpu.matmul %176, %163, %cst_80 {dimension_numbers = #tpu.dot_dimension_numbers<[1], [0], [0], [1], [0, 0, 1, 1], [], []>} : vector<32x32xf32>, vector<32x8xf32>, vector<32x8xf32> -> vector<32x8xf32>
    %178 = vector.extract_strided_slice %158 {offsets = [0, 8], sizes = [32, 8], strides = [1, 1]} : vector<32x32xf32> to vector<32x8xf32>
    %179 = vector.extract_strided_slice %159 {offsets = [0, 8], sizes = [32, 8], strides = [1, 1]} : vector<32x32xf32> to vector<32x8xf32>
    %180 = vector.extract_strided_slice %160 {offsets = [0, 8], sizes = [32, 8], strides = [1, 1]} : vector<32x32xf32> to vector<32x8xf32>
    %cst_81 = arith.constant dense<0.000000e+00> : vector<32x32xf32>
    %181 = tpu.matmul %178, %179, %cst_81 {dimension_numbers = #tpu.dot_dimension_numbers<[1], [1], [0], [0], [0, 0, 1, 0], [], []>} : vector<32x8xf32>, vector<32x8xf32>, vector<32x32xf32> -> vector<32x32xf32>
    %cst_82 = arith.constant 0.353553385 : f32
    %182 = vector.broadcast %cst_82 : f32 to vector<32x32xf32>
    %183 = arith.mulf %181, %182 : vector<32x32xf32>
    %184 = arith.addf %183, %12 : vector<32x32xf32>
    %cst_83 = arith.constant dense<0xFF800000> : vector<32xf32>
    %185 = vector.multi_reduction <maximumf>, %184, %cst_83 [1] : vector<32x32xf32> to vector<32xf32>
    %186 = vector.shape_cast %185 : vector<32xf32> to vector<32x1xf32>
    %187 = vector.broadcast %186 : vector<32x1xf32> to vector<32x32xf32>
    %188 = arith.subf %184, %187 : vector<32x32xf32>
    %189 = math.exp %188 : vector<32x32xf32>
    %cst_84 = arith.constant dense<0.000000e+00> : vector<32xf32>
    %190 = vector.multi_reduction <add>, %189, %cst_84 [1] : vector<32x32xf32> to vector<32xf32>
    %191 = vector.shape_cast %190 : vector<32xf32> to vector<32x1xf32>
    %192 = vector.broadcast %191 : vector<32x1xf32> to vector<32x32xf32>
    %193 = arith.divf %189, %192 : vector<32x32xf32>
    %cst_85 = arith.constant dense<0.000000e+00> : vector<32x8xf32>
    %194 = tpu.matmul %193, %180, %cst_85 {dimension_numbers = #tpu.dot_dimension_numbers<[1], [0], [0], [1], [0, 0, 1, 1], [], []>} : vector<32x32xf32>, vector<32x8xf32>, vector<32x8xf32> -> vector<32x8xf32>
    %195 = vector.extract_strided_slice %158 {offsets = [0, 16], sizes = [32, 8], strides = [1, 1]} : vector<32x32xf32> to vector<32x8xf32>
    %196 = vector.extract_strided_slice %159 {offsets = [0, 16], sizes = [32, 8], strides = [1, 1]} : vector<32x32xf32> to vector<32x8xf32>
    %197 = vector.extract_strided_slice %160 {offsets = [0, 16], sizes = [32, 8], strides = [1, 1]} : vector<32x32xf32> to vector<32x8xf32>
    %cst_86 = arith.constant dense<0.000000e+00> : vector<32x32xf32>
    %198 = tpu.matmul %195, %196, %cst_86 {dimension_numbers = #tpu.dot_dimension_numbers<[1], [1], [0], [0], [0, 0, 1, 0], [], []>} : vector<32x8xf32>, vector<32x8xf32>, vector<32x32xf32> -> vector<32x32xf32>
    %cst_87 = arith.constant 0.353553385 : f32
    %199 = vector.broadcast %cst_87 : f32 to vector<32x32xf32>
    %200 = arith.mulf %198, %199 : vector<32x32xf32>
    %201 = arith.addf %200, %12 : vector<32x32xf32>
    %cst_88 = arith.constant dense<0xFF800000> : vector<32xf32>
    %202 = vector.multi_reduction <maximumf>, %201, %cst_88 [1] : vector<32x32xf32> to vector<32xf32>
    %203 = vector.shape_cast %202 : vector<32xf32> to vector<32x1xf32>
    %204 = vector.broadcast %203 : vector<32x1xf32> to vector<32x32xf32>
    %205 = arith.subf %201, %204 : vector<32x32xf32>
    %206 = math.exp %205 : vector<32x32xf32>
    %cst_89 = arith.constant dense<0.000000e+00> : vector<32xf32>
    %207 = vector.multi_reduction <add>, %206, %cst_89 [1] : vector<32x32xf32> to vector<32xf32>
    %208 = vector.shape_cast %207 : vector<32xf32> to vector<32x1xf32>
    %209 = vector.broadcast %208 : vector<32x1xf32> to vector<32x32xf32>
    %210 = arith.divf %206, %209 : vector<32x32xf32>
    %cst_90 = arith.constant dense<0.000000e+00> : vector<32x8xf32>
    %211 = tpu.matmul %210, %197, %cst_90 {dimension_numbers = #tpu.dot_dimension_numbers<[1], [0], [0], [1], [0, 0, 1, 1], [], []>} : vector<32x32xf32>, vector<32x8xf32>, vector<32x8xf32> -> vector<32x8xf32>
    %212 = vector.extract_strided_slice %158 {offsets = [0, 24], sizes = [32, 8], strides = [1, 1]} : vector<32x32xf32> to vector<32x8xf32>
    %213 = vector.extract_strided_slice %159 {offsets = [0, 24], sizes = [32, 8], strides = [1, 1]} : vector<32x32xf32> to vector<32x8xf32>
    %214 = vector.extract_strided_slice %160 {offsets = [0, 24], sizes = [32, 8], strides = [1, 1]} : vector<32x32xf32> to vector<32x8xf32>
    %cst_91 = arith.constant dense<0.000000e+00> : vector<32x32xf32>
    %215 = tpu.matmul %212, %213, %cst_91 {dimension_numbers = #tpu.dot_dimension_numbers<[1], [1], [0], [0], [0, 0, 1, 0], [], []>} : vector<32x8xf32>, vector<32x8xf32>, vector<32x32xf32> -> vector<32x32xf32>
    %cst_92 = arith.constant 0.353553385 : f32
    %216 = vector.broadcast %cst_92 : f32 to vector<32x32xf32>
    %217 = arith.mulf %215, %216 : vector<32x32xf32>
    %218 = arith.addf %217, %12 : vector<32x32xf32>
    %cst_93 = arith.constant dense<0xFF800000> : vector<32xf32>
    %219 = vector.multi_reduction <maximumf>, %218, %cst_93 [1] : vector<32x32xf32> to vector<32xf32>
    %220 = vector.shape_cast %219 : vector<32xf32> to vector<32x1xf32>
    %221 = vector.broadcast %220 : vector<32x1xf32> to vector<32x32xf32>
    %222 = arith.subf %218, %221 : vector<32x32xf32>
    %223 = math.exp %222 : vector<32x32xf32>
    %cst_94 = arith.constant dense<0.000000e+00> : vector<32xf32>
    %224 = vector.multi_reduction <add>, %223, %cst_94 [1] : vector<32x32xf32> to vector<32xf32>
    %225 = vector.shape_cast %224 : vector<32xf32> to vector<32x1xf32>
    %226 = vector.broadcast %225 : vector<32x1xf32> to vector<32x32xf32>
    %227 = arith.divf %223, %226 : vector<32x32xf32>
    %cst_95 = arith.constant dense<0.000000e+00> : vector<32x8xf32>
    %228 = tpu.matmul %227, %214, %cst_95 {dimension_numbers = #tpu.dot_dimension_numbers<[1], [0], [0], [1], [0, 0, 1, 1], [], []>} : vector<32x32xf32>, vector<32x8xf32>, vector<32x8xf32> -> vector<32x8xf32>
    %229 = tpu.concatenate %177, %194, %211, %228 in 1 : vector<32x8xf32>, vector<32x8xf32>, vector<32x8xf32>, vector<32x8xf32> -> vector<32x32xf32>
    %c32_96 = arith.constant 32 : index
    %c0_97 = arith.constant 0 : index
    %230 = vector.load %arg10[%c32_96, %c0_97] : memref<64x32xf32, #tpu.memory_space<vmem>>, vector<32x32xf32>
    %cst_98 = arith.constant dense<0.000000e+00> : vector<32x32xf32>
    %231 = tpu.matmul %229, %230, %cst_98 {dimension_numbers = #tpu.dot_dimension_numbers<[1], [0], [0], [1], [0, 0, 1, 1], [], []>} : vector<32x32xf32>, vector<32x32xf32>, vector<32x32xf32> -> vector<32x32xf32>
    %c1_99 = arith.constant 1 : index
    %c0_100 = arith.constant 0 : index
    %232 = vector.load %arg11[%c1_99, %c0_100] : memref<2x32xf32, #tpu.memory_space<vmem>>, vector<1x32xf32>
    %233 = vector.broadcast %232 : vector<1x32xf32> to vector<32x32xf32>
    %234 = arith.addf %231, %233 : vector<32x32xf32>
    %235 = arith.addf %152, %234 : vector<32x32xf32>
    %c1_101 = arith.constant 1 : index
    %c0_102 = arith.constant 0 : index
    %236 = vector.load %arg12[%c1_101, %c0_102] : memref<2x32xf32, #tpu.memory_space<vmem>>, vector<1x32xf32>
    %c1_103 = arith.constant 1 : index
    %c0_104 = arith.constant 0 : index
    %237 = vector.load %arg13[%c1_103, %c0_104] : memref<2x32xf32, #tpu.memory_space<vmem>>, vector<1x32xf32>
    %cst_105 = arith.constant dense<0.000000e+00> : vector<32xf32>
    %238 = vector.multi_reduction <add>, %235, %cst_105 [1] : vector<32x32xf32> to vector<32xf32>
    %239 = vector.shape_cast %238 : vector<32xf32> to vector<32x1xf32>
    %cst_106 = arith.constant 3.200000e+01 : f32
    %240 = vector.broadcast %cst_106 : f32 to vector<32x1xf32>
    %241 = arith.divf %239, %240 : vector<32x1xf32>
    %242 = vector.broadcast %241 : vector<32x1xf32> to vector<32x32xf32>
    %243 = arith.subf %235, %242 : vector<32x32xf32>
    %244 = arith.mulf %243, %243 : vector<32x32xf32>
    %cst_107 = arith.constant dense<0.000000e+00> : vector<32xf32>
    %245 = vector.multi_reduction <add>, %244, %cst_107 [1] : vector<32x32xf32> to vector<32xf32>
    %246 = vector.shape_cast %245 : vector<32xf32> to vector<32x1xf32>
    %cst_108 = arith.constant 3.200000e+01 : f32
    %247 = vector.broadcast %cst_108 : f32 to vector<32x1xf32>
    %248 = arith.divf %246, %247 : vector<32x1xf32>
    %cst_109 = arith.constant 9.99999974E-6 : f32
    %249 = vector.broadcast %cst_109 : f32 to vector<32x1xf32>
    %250 = arith.addf %248, %249 : vector<32x1xf32>
    %251 = math.rsqrt %250 : vector<32x1xf32>
    %252 = vector.broadcast %251 : vector<32x1xf32> to vector<32x32xf32>
    %253 = arith.mulf %243, %252 : vector<32x32xf32>
    %254 = vector.broadcast %236 : vector<1x32xf32> to vector<32x32xf32>
    %255 = arith.mulf %253, %254 : vector<32x32xf32>
    %256 = vector.broadcast %237 : vector<1x32xf32> to vector<32x32xf32>
    %257 = arith.addf %255, %256 : vector<32x32xf32>
    %c32_110 = arith.constant 32 : index
    %c0_111 = arith.constant 0 : index
    %258 = vector.load %arg14[%c32_110, %c0_111] : memref<64x2048xf32, #tpu.memory_space<vmem>>, vector<32x2048xf32>
    %cst_112 = arith.constant dense<0.000000e+00> : vector<32x2048xf32>
    %259 = tpu.matmul %257, %258, %cst_112 {dimension_numbers = #tpu.dot_dimension_numbers<[1], [0], [0], [1], [0, 0, 1, 1], [], []>} : vector<32x32xf32>, vector<32x2048xf32>, vector<32x2048xf32> -> vector<32x2048xf32>
    %c1_113 = arith.constant 1 : index
    %c0_114 = arith.constant 0 : index
    %260 = vector.load %arg15[%c1_113, %c0_114] : memref<2x2048xf32, #tpu.memory_space<vmem>>, vector<1x2048xf32>
    %261 = vector.broadcast %260 : vector<1x2048xf32> to vector<32x2048xf32>
    %262 = arith.addf %259, %261 : vector<32x2048xf32>
    %cst_115 = arith.constant 0.000000e+00 : f32
    %263 = vector.broadcast %cst_115 : f32 to vector<32x2048xf32>
    %264 = arith.maximumf %262, %263 : vector<32x2048xf32>
    %c2048 = arith.constant 2048 : index
    %c0_116 = arith.constant 0 : index
    %265 = vector.load %arg16[%c2048, %c0_116] : memref<4096x32xf32, #tpu.memory_space<vmem>>, vector<2048x32xf32>
    %cst_117 = arith.constant dense<0.000000e+00> : vector<32x32xf32>
    %266 = tpu.matmul %264, %265, %cst_117 {dimension_numbers = #tpu.dot_dimension_numbers<[1], [0], [0], [1], [0, 0, 1, 1], [], []>} : vector<32x2048xf32>, vector<2048x32xf32>, vector<32x32xf32> -> vector<32x32xf32>
    %c1_118 = arith.constant 1 : index
    %c0_119 = arith.constant 0 : index
    %267 = vector.load %arg17[%c1_118, %c0_119] : memref<2x32xf32, #tpu.memory_space<vmem>>, vector<1x32xf32>
    %268 = vector.broadcast %267 : vector<1x32xf32> to vector<32x32xf32>
    %269 = arith.addf %266, %268 : vector<32x32xf32>
    %270 = arith.addf %257, %269 : vector<32x32xf32>
    %c1_120 = arith.constant 1 : index
    %c0_121 = arith.constant 0 : index
    %271 = vector.load %arg18[%c1_120, %c0_121] : memref<2x32xf32, #tpu.memory_space<vmem>>, vector<1x32xf32>
    %c1_122 = arith.constant 1 : index
    %c0_123 = arith.constant 0 : index
    %272 = vector.load %arg19[%c1_122, %c0_123] : memref<2x32xf32, #tpu.memory_space<vmem>>, vector<1x32xf32>
    %cst_124 = arith.constant dense<0.000000e+00> : vector<32xf32>
    %273 = vector.multi_reduction <add>, %270, %cst_124 [1] : vector<32x32xf32> to vector<32xf32>
    %274 = vector.shape_cast %273 : vector<32xf32> to vector<32x1xf32>
    %cst_125 = arith.constant 3.200000e+01 : f32
    %275 = vector.broadcast %cst_125 : f32 to vector<32x1xf32>
    %276 = arith.divf %274, %275 : vector<32x1xf32>
    %277 = vector.broadcast %276 : vector<32x1xf32> to vector<32x32xf32>
    %278 = arith.subf %270, %277 : vector<32x32xf32>
    %279 = arith.mulf %278, %278 : vector<32x32xf32>
    %cst_126 = arith.constant dense<0.000000e+00> : vector<32xf32>
    %280 = vector.multi_reduction <add>, %279, %cst_126 [1] : vector<32x32xf32> to vector<32xf32>
    %281 = vector.shape_cast %280 : vector<32xf32> to vector<32x1xf32>
    %cst_127 = arith.constant 3.200000e+01 : f32
    %282 = vector.broadcast %cst_127 : f32 to vector<32x1xf32>
    %283 = arith.divf %281, %282 : vector<32x1xf32>
    %cst_128 = arith.constant 9.99999974E-6 : f32
    %284 = vector.broadcast %cst_128 : f32 to vector<32x1xf32>
    %285 = arith.addf %283, %284 : vector<32x1xf32>
    %286 = math.rsqrt %285 : vector<32x1xf32>
    %287 = vector.broadcast %286 : vector<32x1xf32> to vector<32x32xf32>
    %288 = arith.mulf %278, %287 : vector<32x32xf32>
    %289 = vector.broadcast %271 : vector<1x32xf32> to vector<32x32xf32>
    %290 = arith.mulf %288, %289 : vector<32x32xf32>
    %291 = vector.broadcast %272 : vector<1x32xf32> to vector<32x32xf32>
    %292 = arith.addf %290, %291 : vector<32x32xf32>
    %c0_129 = arith.constant 0 : index
    %c0_130 = arith.constant 0 : index
    %293 = vector.load %arg20[%c0_129, %c0_130] : memref<32x32xf32, #tpu.memory_space<vmem>>, vector<32x32xf32>
    %cst_131 = arith.constant dense<0.000000e+00> : vector<32x32xf32>
    %294 = tpu.matmul %292, %293, %cst_131 {dimension_numbers = #tpu.dot_dimension_numbers<[1], [0], [0], [1], [0, 0, 1, 1], [], []>} : vector<32x32xf32>, vector<32x32xf32>, vector<32x32xf32> -> vector<32x32xf32>
    %c0_132 = arith.constant 0 : index
    %c0_133 = arith.constant 0 : index
    %295 = vector.load %arg21[%c0_132, %c0_133] : memref<1x32xf32, #tpu.memory_space<vmem>>, vector<1x32xf32>
    %296 = vector.broadcast %295 : vector<1x32xf32> to vector<32x32xf32>
    %297 = arith.addf %294, %296 : vector<32x32xf32>
    %c0_134 = arith.constant 0 : index
    %c0_135 = arith.constant 0 : index
    %298 = vector.load %arg22[%c0_134, %c0_135] : memref<32x64xf32, #tpu.memory_space<vmem>>, vector<32x64xf32>
    %cst_136 = arith.constant dense<0.000000e+00> : vector<4x64xf32>
    %299 = tpu.matmul %11, %298, %cst_136 {dimension_numbers = #tpu.dot_dimension_numbers<[1], [0], [0], [1], [0, 0, 1, 1], [], []>} : vector<4x32xf32>, vector<32x64xf32>, vector<4x64xf32> -> vector<4x64xf32>
    %c0_137 = arith.constant 0 : index
    %c0_138 = arith.constant 0 : index
    %300 = vector.load %arg23[%c0_137, %c0_138] : memref<1x64xf32, #tpu.memory_space<vmem>>, vector<1x64xf32>
    %301 = vector.broadcast %300 : vector<1x64xf32> to vector<4x64xf32>
    %302 = arith.addf %299, %301 : vector<4x64xf32>
    %303 = vector.extract_strided_slice %302 {offsets = [0, 0], sizes = [4, 32], strides = [1, 1]} : vector<4x64xf32> to vector<4x32xf32>
    %304 = vector.extract_strided_slice %302 {offsets = [0, 32], sizes = [4, 32], strides = [1, 1]} : vector<4x64xf32> to vector<4x32xf32>
    %305 = vector.extract_strided_slice %297 {offsets = [0, 0], sizes = [32, 8], strides = [1, 1]} : vector<32x32xf32> to vector<32x8xf32>
    %306 = vector.extract_strided_slice %303 {offsets = [0, 0], sizes = [4, 8], strides = [1, 1]} : vector<4x32xf32> to vector<4x8xf32>
    %307 = vector.extract_strided_slice %304 {offsets = [0, 0], sizes = [4, 8], strides = [1, 1]} : vector<4x32xf32> to vector<4x8xf32>
    %cst_139 = arith.constant dense<0.000000e+00> : vector<32x4xf32>
    %308 = tpu.matmul %305, %306, %cst_139 {dimension_numbers = #tpu.dot_dimension_numbers<[1], [1], [0], [0], [0, 0, 1, 0], [], []>} : vector<32x8xf32>, vector<4x8xf32>, vector<32x4xf32> -> vector<32x4xf32>
    %cst_140 = arith.constant 0.353553385 : f32
    %309 = vector.broadcast %cst_140 : f32 to vector<32x4xf32>
    %310 = arith.mulf %308, %309 : vector<32x4xf32>
    %cst_141 = arith.constant dense<0xFF800000> : vector<32xf32>
    %311 = vector.multi_reduction <maximumf>, %310, %cst_141 [1] : vector<32x4xf32> to vector<32xf32>
    %312 = vector.shape_cast %311 : vector<32xf32> to vector<32x1xf32>
    %313 = vector.broadcast %312 : vector<32x1xf32> to vector<32x4xf32>
    %314 = arith.subf %310, %313 : vector<32x4xf32>
    %315 = math.exp %314 : vector<32x4xf32>
    %cst_142 = arith.constant dense<0.000000e+00> : vector<32xf32>
    %316 = vector.multi_reduction <add>, %315, %cst_142 [1] : vector<32x4xf32> to vector<32xf32>
    %317 = vector.shape_cast %316 : vector<32xf32> to vector<32x1xf32>
    %318 = vector.broadcast %317 : vector<32x1xf32> to vector<32x4xf32>
    %319 = arith.divf %315, %318 : vector<32x4xf32>
    %cst_143 = arith.constant dense<0.000000e+00> : vector<32x8xf32>
    %320 = tpu.matmul %319, %307, %cst_143 {dimension_numbers = #tpu.dot_dimension_numbers<[1], [0], [0], [1], [0, 0, 1, 1], [], []>} : vector<32x4xf32>, vector<4x8xf32>, vector<32x8xf32> -> vector<32x8xf32>
    %321 = vector.extract_strided_slice %297 {offsets = [0, 8], sizes = [32, 8], strides = [1, 1]} : vector<32x32xf32> to vector<32x8xf32>
    %322 = vector.extract_strided_slice %303 {offsets = [0, 8], sizes = [4, 8], strides = [1, 1]} : vector<4x32xf32> to vector<4x8xf32>
    %323 = vector.extract_strided_slice %304 {offsets = [0, 8], sizes = [4, 8], strides = [1, 1]} : vector<4x32xf32> to vector<4x8xf32>
    %cst_144 = arith.constant dense<0.000000e+00> : vector<32x4xf32>
    %324 = tpu.matmul %321, %322, %cst_144 {dimension_numbers = #tpu.dot_dimension_numbers<[1], [1], [0], [0], [0, 0, 1, 0], [], []>} : vector<32x8xf32>, vector<4x8xf32>, vector<32x4xf32> -> vector<32x4xf32>
    %cst_145 = arith.constant 0.353553385 : f32
    %325 = vector.broadcast %cst_145 : f32 to vector<32x4xf32>
    %326 = arith.mulf %324, %325 : vector<32x4xf32>
    %cst_146 = arith.constant dense<0xFF800000> : vector<32xf32>
    %327 = vector.multi_reduction <maximumf>, %326, %cst_146 [1] : vector<32x4xf32> to vector<32xf32>
    %328 = vector.shape_cast %327 : vector<32xf32> to vector<32x1xf32>
    %329 = vector.broadcast %328 : vector<32x1xf32> to vector<32x4xf32>
    %330 = arith.subf %326, %329 : vector<32x4xf32>
    %331 = math.exp %330 : vector<32x4xf32>
    %cst_147 = arith.constant dense<0.000000e+00> : vector<32xf32>
    %332 = vector.multi_reduction <add>, %331, %cst_147 [1] : vector<32x4xf32> to vector<32xf32>
    %333 = vector.shape_cast %332 : vector<32xf32> to vector<32x1xf32>
    %334 = vector.broadcast %333 : vector<32x1xf32> to vector<32x4xf32>
    %335 = arith.divf %331, %334 : vector<32x4xf32>
    %cst_148 = arith.constant dense<0.000000e+00> : vector<32x8xf32>
    %336 = tpu.matmul %335, %323, %cst_148 {dimension_numbers = #tpu.dot_dimension_numbers<[1], [0], [0], [1], [0, 0, 1, 1], [], []>} : vector<32x4xf32>, vector<4x8xf32>, vector<32x8xf32> -> vector<32x8xf32>
    %337 = vector.extract_strided_slice %297 {offsets = [0, 16], sizes = [32, 8], strides = [1, 1]} : vector<32x32xf32> to vector<32x8xf32>
    %338 = vector.extract_strided_slice %303 {offsets = [0, 16], sizes = [4, 8], strides = [1, 1]} : vector<4x32xf32> to vector<4x8xf32>
    %339 = vector.extract_strided_slice %304 {offsets = [0, 16], sizes = [4, 8], strides = [1, 1]} : vector<4x32xf32> to vector<4x8xf32>
    %cst_149 = arith.constant dense<0.000000e+00> : vector<32x4xf32>
    %340 = tpu.matmul %337, %338, %cst_149 {dimension_numbers = #tpu.dot_dimension_numbers<[1], [1], [0], [0], [0, 0, 1, 0], [], []>} : vector<32x8xf32>, vector<4x8xf32>, vector<32x4xf32> -> vector<32x4xf32>
    %cst_150 = arith.constant 0.353553385 : f32
    %341 = vector.broadcast %cst_150 : f32 to vector<32x4xf32>
    %342 = arith.mulf %340, %341 : vector<32x4xf32>
    %cst_151 = arith.constant dense<0xFF800000> : vector<32xf32>
    %343 = vector.multi_reduction <maximumf>, %342, %cst_151 [1] : vector<32x4xf32> to vector<32xf32>
    %344 = vector.shape_cast %343 : vector<32xf32> to vector<32x1xf32>
    %345 = vector.broadcast %344 : vector<32x1xf32> to vector<32x4xf32>
    %346 = arith.subf %342, %345 : vector<32x4xf32>
    %347 = math.exp %346 : vector<32x4xf32>
    %cst_152 = arith.constant dense<0.000000e+00> : vector<32xf32>
    %348 = vector.multi_reduction <add>, %347, %cst_152 [1] : vector<32x4xf32> to vector<32xf32>
    %349 = vector.shape_cast %348 : vector<32xf32> to vector<32x1xf32>
    %350 = vector.broadcast %349 : vector<32x1xf32> to vector<32x4xf32>
    %351 = arith.divf %347, %350 : vector<32x4xf32>
    %cst_153 = arith.constant dense<0.000000e+00> : vector<32x8xf32>
    %352 = tpu.matmul %351, %339, %cst_153 {dimension_numbers = #tpu.dot_dimension_numbers<[1], [0], [0], [1], [0, 0, 1, 1], [], []>} : vector<32x4xf32>, vector<4x8xf32>, vector<32x8xf32> -> vector<32x8xf32>
    %353 = vector.extract_strided_slice %297 {offsets = [0, 24], sizes = [32, 8], strides = [1, 1]} : vector<32x32xf32> to vector<32x8xf32>
    %354 = vector.extract_strided_slice %303 {offsets = [0, 24], sizes = [4, 8], strides = [1, 1]} : vector<4x32xf32> to vector<4x8xf32>
    %355 = vector.extract_strided_slice %304 {offsets = [0, 24], sizes = [4, 8], strides = [1, 1]} : vector<4x32xf32> to vector<4x8xf32>
    %cst_154 = arith.constant dense<0.000000e+00> : vector<32x4xf32>
    %356 = tpu.matmul %353, %354, %cst_154 {dimension_numbers = #tpu.dot_dimension_numbers<[1], [1], [0], [0], [0, 0, 1, 0], [], []>} : vector<32x8xf32>, vector<4x8xf32>, vector<32x4xf32> -> vector<32x4xf32>
    %cst_155 = arith.constant 0.353553385 : f32
    %357 = vector.broadcast %cst_155 : f32 to vector<32x4xf32>
    %358 = arith.mulf %356, %357 : vector<32x4xf32>
    %cst_156 = arith.constant dense<0xFF800000> : vector<32xf32>
    %359 = vector.multi_reduction <maximumf>, %358, %cst_156 [1] : vector<32x4xf32> to vector<32xf32>
    %360 = vector.shape_cast %359 : vector<32xf32> to vector<32x1xf32>
    %361 = vector.broadcast %360 : vector<32x1xf32> to vector<32x4xf32>
    %362 = arith.subf %358, %361 : vector<32x4xf32>
    %363 = math.exp %362 : vector<32x4xf32>
    %cst_157 = arith.constant dense<0.000000e+00> : vector<32xf32>
    %364 = vector.multi_reduction <add>, %363, %cst_157 [1] : vector<32x4xf32> to vector<32xf32>
    %365 = vector.shape_cast %364 : vector<32xf32> to vector<32x1xf32>
    %366 = vector.broadcast %365 : vector<32x1xf32> to vector<32x4xf32>
    %367 = arith.divf %363, %366 : vector<32x4xf32>
    %cst_158 = arith.constant dense<0.000000e+00> : vector<32x8xf32>
    %368 = tpu.matmul %367, %355, %cst_158 {dimension_numbers = #tpu.dot_dimension_numbers<[1], [0], [0], [1], [0, 0, 1, 1], [], []>} : vector<32x4xf32>, vector<4x8xf32>, vector<32x8xf32> -> vector<32x8xf32>
    %369 = tpu.concatenate %320, %336, %352, %368 in 1 : vector<32x8xf32>, vector<32x8xf32>, vector<32x8xf32>, vector<32x8xf32> -> vector<32x32xf32>
    %c0_159 = arith.constant 0 : index
    %c0_160 = arith.constant 0 : index
    %370 = vector.load %arg24[%c0_159, %c0_160] : memref<32x32xf32, #tpu.memory_space<vmem>>, vector<32x32xf32>
    %cst_161 = arith.constant dense<0.000000e+00> : vector<32x32xf32>
    %371 = tpu.matmul %369, %370, %cst_161 {dimension_numbers = #tpu.dot_dimension_numbers<[1], [0], [0], [1], [0, 0, 1, 1], [], []>} : vector<32x32xf32>, vector<32x32xf32>, vector<32x32xf32> -> vector<32x32xf32>
    %c0_162 = arith.constant 0 : index
    %c0_163 = arith.constant 0 : index
    %372 = vector.load %arg25[%c0_162, %c0_163] : memref<1x32xf32, #tpu.memory_space<vmem>>, vector<1x32xf32>
    %373 = vector.broadcast %372 : vector<1x32xf32> to vector<32x32xf32>
    %374 = arith.addf %371, %373 : vector<32x32xf32>
    %375 = vector.extract_strided_slice %374 {offsets = [0, 0], sizes = [4, 32], strides = [1, 1]} : vector<32x32xf32> to vector<4x32xf32>
    %376 = vector.extract_strided_slice %374 {offsets = [4, 0], sizes = [4, 32], strides = [1, 1]} : vector<32x32xf32> to vector<4x32xf32>
    %377 = vector.extract_strided_slice %374 {offsets = [8, 0], sizes = [4, 32], strides = [1, 1]} : vector<32x32xf32> to vector<4x32xf32>
    %378 = vector.extract_strided_slice %374 {offsets = [12, 0], sizes = [4, 32], strides = [1, 1]} : vector<32x32xf32> to vector<4x32xf32>
    %379 = vector.extract_strided_slice %374 {offsets = [16, 0], sizes = [4, 32], strides = [1, 1]} : vector<32x32xf32> to vector<4x32xf32>
    %380 = vector.extract_strided_slice %374 {offsets = [20, 0], sizes = [4, 32], strides = [1, 1]} : vector<32x32xf32> to vector<4x32xf32>
    %381 = vector.extract_strided_slice %374 {offsets = [24, 0], sizes = [4, 32], strides = [1, 1]} : vector<32x32xf32> to vector<4x32xf32>
    %382 = vector.extract_strided_slice %374 {offsets = [28, 0], sizes = [4, 32], strides = [1, 1]} : vector<32x32xf32> to vector<4x32xf32>
    %383 = arith.addf %375, %376 : vector<4x32xf32>
    %384 = arith.addf %377, %378 : vector<4x32xf32>
    %385 = arith.addf %379, %380 : vector<4x32xf32>
    %386 = arith.addf %381, %382 : vector<4x32xf32>
    %387 = arith.addf %383, %384 : vector<4x32xf32>
    %388 = arith.addf %385, %386 : vector<4x32xf32>
    %389 = arith.addf %387, %388 : vector<4x32xf32>
    %cst_164 = arith.constant 1.250000e-01 : f32
    %390 = vector.broadcast %cst_164 : f32 to vector<4x32xf32>
    %391 = arith.mulf %389, %390 : vector<4x32xf32>
    %c0_165 = arith.constant 0 : index
    %c0_166 = arith.constant 0 : index
    %392 = vector.load %arg26[%c0_165, %c0_166] : memref<32x1xf32, #tpu.memory_space<vmem>>, vector<32x1xf32>
    %cst_167 = arith.constant dense<0.000000e+00> : vector<4x1xf32>
    %393 = tpu.matmul %391, %392, %cst_167 {dimension_numbers = #tpu.dot_dimension_numbers<[1], [0], [0], [1], [0, 0, 1, 1], [], []>} : vector<4x32xf32>, vector<32x1xf32>, vector<4x1xf32> -> vector<4x1xf32>
    %c0_168 = arith.constant 0 : index
    %c0_169 = arith.constant 0 : index
    %394 = vector.load %arg27[%c0_168, %c0_169] : memref<1x1xf32, #tpu.memory_space<vmem>>, vector<1x1xf32>
    %395 = vector.broadcast %394 : vector<1x1xf32> to vector<4x1xf32>
    %396 = arith.addf %393, %395 : vector<4x1xf32>
    %cst_170 = arith.constant 0.000000e+00 : f32
    %397 = vector.broadcast %cst_170 : f32 to vector<4x1xf32>
    %398 = arith.subf %397, %396 : vector<4x1xf32>
    %399 = math.exp %398 : vector<4x1xf32>
    %cst_171 = arith.constant 1.000000e+00 : f32
    %400 = vector.broadcast %cst_171 : f32 to vector<4x1xf32>
    %401 = arith.addf %400, %399 : vector<4x1xf32>
    %cst_172 = arith.constant 1.000000e+00 : f32
    %402 = vector.broadcast %cst_172 : f32 to vector<4x1xf32>
    %403 = arith.divf %402, %401 : vector<4x1xf32>
    %c0_173 = arith.constant 0 : index
    %c0_174 = arith.constant 0 : index
    %404 = vector.load %arg28[%c0_173, %c0_174] : memref<4x1xf32, #tpu.memory_space<vmem>>, vector<4x1xf32>
    tpu.vector_store %arg28[%c0_173, %c0_174], %403 {strides = array<i32>} : memref<4x1xf32, #tpu.memory_space<vmem>>, vector<4x1xf32>,
    return
  }
  func.func @transform_0(%arg0: i32) -> (i32, i32) {
    %c0_i32 = arith.constant 0 : i32
    %c0_i32_0 = arith.constant 0 : i32
    %c0_i32_1 = arith.constant 0 : i32
    return %c0_i32, %c0_i32_0 : i32, i32
  }
  func.func @transform_1(%arg0: i32) -> (i32, i32) {
    %c0_i32 = arith.constant 0 : i32
    %c0_i32_0 = arith.constant 0 : i32
    %c0_i32_1 = arith.constant 0 : i32
    return %c0_i32, %c0_i32_0 : i32, i32
  }
  func.func @transform_2(%arg0: i32) -> (i32, i32) {
    %c0_i32 = arith.constant 0 : i32
    %c0_i32_0 = arith.constant 0 : i32
    %c0_i32_1 = arith.constant 0 : i32
    return %c0_i32, %c0_i32_0 : i32, i32
  }
  func.func @transform_3(%arg0: i32) -> (i32, i32) {
    %c0_i32 = arith.constant 0 : i32
    %c0_i32_0 = arith.constant 0 : i32
    %c0_i32_1 = arith.constant 0 : i32
    return %c0_i32, %c0_i32_0 : i32, i32
  }
  func.func @transform_4(%arg0: i32) -> (i32, i32) {
    %c0_i32 = arith.constant 0 : i32
    %c0_i32_0 = arith.constant 0 : i32
    %c0_i32_1 = arith.constant 0 : i32
    return %c0_i32, %c0_i32_0 : i32, i32
  }
  func.func @transform_5(%arg0: i32) -> (i32, i32) {
    %c0_i32 = arith.constant 0 : i32
    %c0_i32_0 = arith.constant 0 : i32
    %c0_i32_1 = arith.constant 0 : i32
    return %c0_i32, %c0_i32_0 : i32, i32
  }
  func.func @transform_6(%arg0: i32) -> (i32, i32) {
    %c0_i32 = arith.constant 0 : i32
    %c0_i32_0 = arith.constant 0 : i32
    %c0_i32_1 = arith.constant 0 : i32
    return %c0_i32, %c0_i32_0 : i32, i32
  }
  func.func @transform_7(%arg0: i32) -> (i32, i32) {
    %c0_i32 = arith.constant 0 : i32
    %c0_i32_0 = arith.constant 0 : i32
    %c0_i32_1 = arith.constant 0 : i32
    return %c0_i32, %c0_i32_0 : i32, i32
  }
  func.func @transform_8(%arg0: i32) -> (i32, i32) {
    %c0_i32 = arith.constant 0 : i32
    %c0_i32_0 = arith.constant 0 : i32
    %c0_i32_1 = arith.constant 0 : i32
    return %c0_i32, %c0_i32_0 : i32, i32
  }
  func.func @transform_9(%arg0: i32) -> (i32, i32) {
    %c0_i32 = arith.constant 0 : i32
    %c0_i32_0 = arith.constant 0 : i32
    %c0_i32_1 = arith.constant 0 : i32
    return %c0_i32, %c0_i32_0 : i32, i32
  }
  func.func @transform_10(%arg0: i32) -> (i32, i32) {
    %c0_i32 = arith.constant 0 : i32
    %c0_i32_0 = arith.constant 0 : i32
    %c0_i32_1 = arith.constant 0 : i32
    return %c0_i32, %c0_i32_0 : i32, i32
  }
  func.func @transform_11(%arg0: i32) -> (i32, i32) {
    %c0_i32 = arith.constant 0 : i32
    %c0_i32_0 = arith.constant 0 : i32
    %c0_i32_1 = arith.constant 0 : i32
    return %c0_i32, %c0_i32_0 : i32, i32
  }
  func.func @transform_12(%arg0: i32) -> (i32, i32) {
    %c0_i32 = arith.constant 0 : i32
    %c0_i32_0 = arith.constant 0 : i32
    %c0_i32_1 = arith.constant 0 : i32
    return %c0_i32, %c0_i32_0 : i32, i32
  }
  func.func @transform_13(%arg0: i32) -> (i32, i32) {
    %c0_i32 = arith.constant 0 : i32
    %c0_i32_0 = arith.constant 0 : i32
    %c0_i32_1 = arith.constant 0 : i32
    return %c0_i32, %c0_i32_0 : i32, i32
  }
  func.func @transform_14(%arg0: i32) -> (i32, i32) {
    %c0_i32 = arith.constant 0 : i32
    %c0_i32_0 = arith.constant 0 : i32
    %c0_i32_1 = arith.constant 0 : i32
    return %c0_i32, %c0_i32_0 : i32, i32
  }
  func.func @transform_15(%arg0: i32) -> (i32, i32) {
    %c0_i32 = arith.constant 0 : i32
    %c0_i32_0 = arith.constant 0 : i32
    %c0_i32_1 = arith.constant 0 : i32
    return %c0_i32, %c0_i32_0 : i32, i32
  }
  func.func @transform_16(%arg0: i32) -> (i32, i32) {
    %c0_i32 = arith.constant 0 : i32
    %c0_i32_0 = arith.constant 0 : i32
    %c0_i32_1 = arith.constant 0 : i32
    return %c0_i32, %c0_i32_0 : i32, i32
  }
  func.func @transform_17(%arg0: i32) -> (i32, i32) {
    %c0_i32 = arith.constant 0 : i32
    %c0_i32_0 = arith.constant 0 : i32
    %c0_i32_1 = arith.constant 0 : i32
    return %c0_i32, %c0_i32_0 : i32, i32
  }
  func.func @transform_18(%arg0: i32) -> (i32, i32) {
    %c0_i32 = arith.constant 0 : i32
    %c0_i32_0 = arith.constant 0 : i32
    %c0_i32_1 = arith.constant 0 : i32
    return %c0_i32, %c0_i32_0 : i32, i32
  }
  func.func @transform_19(%arg0: i32) -> (i32, i32) {
    %c0_i32 = arith.constant 0 : i32
    %c0_i32_0 = arith.constant 0 : i32
    %c0_i32_1 = arith.constant 0 : i32
    return %c0_i32, %c0_i32_0 : i32, i32
  }
  func.func @transform_20(%arg0: i32) -> (i32, i32) {
    %c0_i32 = arith.constant 0 : i32
    %c0_i32_0 = arith.constant 0 : i32
    %c0_i32_1 = arith.constant 0 : i32
    return %c0_i32, %c0_i32_0 : i32, i32
  }
  func.func @transform_21(%arg0: i32) -> (i32, i32) {
    %c0_i32 = arith.constant 0 : i32
    %c0_i32_0 = arith.constant 0 : i32
    %c0_i32_1 = arith.constant 0 : i32
    return %c0_i32, %c0_i32_0 : i32, i32
  }
  func.func @transform_22(%arg0: i32) -> (i32, i32) {
    %c0_i32 = arith.constant 0 : i32
    %c0_i32_0 = arith.constant 0 : i32
    %c0_i32_1 = arith.constant 0 : i32
    return %c0_i32, %c0_i32_0 : i32, i32
  }
  func.func @transform_23(%arg0: i32) -> (i32, i32) {
    %c0_i32 = arith.constant 0 : i32
    %c0_i32_0 = arith.constant 0 : i32
    %c0_i32_1 = arith.constant 0 : i32
    return %c0_i32, %c0_i32_0 : i32, i32
  }
  func.func @transform_24(%arg0: i32) -> (i32, i32) {
    %c0_i32 = arith.constant 0 : i32
    %c0_i32_0 = arith.constant 0 : i32
    %c0_i32_1 = arith.constant 0 : i32
    return %c0_i32, %c0_i32_0 : i32, i32
  }
  func.func @transform_25(%arg0: i32) -> (i32, i32) {
    %c0_i32 = arith.constant 0 : i32
    %c0_i32_0 = arith.constant 0 : i32
    %c0_i32_1 = arith.constant 0 : i32
    return %c0_i32, %c0_i32_0 : i32, i32
  }
  func.func @transform_26(%arg0: i32) -> (i32, i32) {
    %c0_i32 = arith.constant 0 : i32
    %c0_i32_0 = arith.constant 0 : i32
    %c0_i32_1 = arith.constant 0 : i32
    return %c0_i32, %c0_i32_0 : i32, i32
  }
  func.func @transform_27(%arg0: i32) -> (i32, i32) {
    %c0_i32 = arith.constant 0 : i32
    %c0_i32_0 = arith.constant 0 : i32
    %c0_i32_1 = arith.constant 0 : i32
    return %c0_i32, %c0_i32_0 : i32, i32
  }
}

</mosaic_0001>

<bundles_post_ra>
// kernel: han_forward.1
= control target key start
LH: loop header
LB: loop body
LE: loop exit
PB: predicated region body
PF: predicated region fallthrough
CT: control target
= control target key end

     0   :  { %vm114_vm0 = vcmask 1041408   ;;  %vm101_vm1 = vcmask 80896   ;;  %v14494_v10 = vmov 0.0   ;;  %vm304_vm2 = vcmask 261120   ;;  %s14470_s30 = smov 72   ;;  %s14428_s1 = inlined_call_operand.vmem [shape: f32[10,32], index: 1, kind: input, shape index: {}]   ;;  %s14429_s0 = inlined_call_operand.vmem [shape: f32[32,10], index: 0, kind: input, shape index: {}]   ;;  %s14430_s7 = inlined_call_operand.vmem [shape: f32[64,96], index: 7, kind: input, shape index: {}]   ;;  %s14431_s4 = inlined_call_operand.vmem [shape: f32[18,32], index: 4, kind: input, shape index: {}]   ;;  %s14432_s2 = inlined_call_operand.vmem [shape: f32[1,32], index: 2, kind: input, shape index: {}]   ;;  %s14433_s3 = inlined_call_operand.vmem [shape: f32[4,18], index: 3, kind: input, shape index: {}]   ;;  %s14434_s8 = inlined_call_operand.vmem [shape: f32[2,96], index: 8, kind: input, shape index: {}]   ;;  %s14435_s6 = inlined_call_operand.vmem [shape: f32[32,32], index: 6, kind: input, shape index: {}]   ;;  %s14436_s9 = inlined_call_operand.vmem [shape: f32[64,32], index: 9, kind: input, shape index: {}]   ;;  %s14437_s10 = inlined_call_operand.vmem [shape: f32[2,32], index: 10, kind: input, shape index: {}]   ;;  %s14438_s13 = inlined_call_operand.vmem [shape: f32[64,2048], index: 13, kind: input, shape index: {}]   ;;  %s14439_s11 = inlined_call_operand.vmem [shape: f32[2,32], index: 11, kind: input, shape index: {}]   ;;  %s14440_s12 = inlined_call_operand.vmem [shape: f32[2,32], index: 12, kind: input, shape index: {}]   ;;  %s14441_s15 = inlined_call_operand.vmem [shape: f32[4096,32], index: 15, kind: input, shape index: {}]   ;;  %s14442_s14 = inlined_call_operand.vmem [shape: f32[2,2048], index: 14, kind: input, shape index: {}]   ;;  %s14443_s16 = inlined_call_operand.vmem [shape: f32[2,32], index: 16, kind: input, shape index: {}]   ;;  %s14444_s17 = inlined_call_operand.vmem [shape: f32[2,32], index: 17, kind: input, shape index: {}]   ;;  %s14445_s18 = inlined_call_operand.vmem [shape: f32[2,32], index: 18, kind: input, shape index: {}]   ;;  %s14446_s21 = inlined_call_operand.vmem [shape: f32[32,64], index: 21, kind: input, shape index: {}]   ;;  %s14447_s5 = inlined_call_operand.vmem [shape: f32[1,32], index: 5, kind: input, shape index: {}]   ;;  %s14448_s19 = inlined_call_operand.vmem [shape: f32[32,32], index: 19, kind: input, shape index: {}]   ;;  %s14449_s22 = inlined_call_operand.vmem [shape: f32[1,64], index: 22, kind: input, shape index: {}]   ;;  %s14450_s20 = inlined_call_operand.vmem [shape: f32[1,32], index: 20, kind: input, shape index: {}]   ;;  %s14451_s23 = inlined_call_operand.vmem [shape: f32[32,32], index: 23, kind: input, shape index: {}]   ;;  %s14452_s25 = inlined_call_operand.vmem [shape: f32[32,1], index: 25, kind: input, shape index: {}]   ;;  %s14453_s26 = inlined_call_operand.<no memory space> [shape: f32[1,1], index: 26, kind: input, shape index: {}]   ;;  %s14454_s24 = inlined_call_operand.vmem [shape: f32[1,32], index: 24, kind: input, shape index: {}]   ;;  %s14455_s27 = inlined_call_operand.vmem [shape: f32[4,1], index: 27, kind: output, shape index: {}]  }
   0x1   :  { %14519 = sst [smem:[#allocation13_spill]] %s14428_s1  ;;  %9808 = vmatprep.subr.mxu1 %v14494_v10  ;;  %vm10460_vm3 = vmmov 0   ;;  %vm214_vm4 = vcmask 146432   ;;  %vm414_vm5 = vcmask 64512   ;;  %vm1563_vm6 = vcmask 130048  }
   0x2   :  { %14520 = sst [smem:[#allocation14_spill]] %s14429_s0  ;;  %9814 = vmatprep.mubr.msk.f32.mxu1 %vm10460_vm3, %v14494_v10  ;;  %vm1568_vm7 = vcmask 195584   ;;  %vm7409_vm8 = vcmask 31744   ;;  %vm7468_vm9 = vcmask 1043456   ;;  %vm8596_vm10 = vcmask 3072  }
   0x3   :  { %14521 = sst [smem:[#allocation15_spill]] %s14430_s7  ;;  %s14474_s7 = smov 112  }
   0x4   :  { %14522 = sst [smem:[#allocation16_spill]] %s14431_s4 }
   0x5   :  { %14523 = sst [smem:[#allocation17_spill]] %s14432_s2  ;;  %s14478_s2 = smov 56  }
   0x6   :  { %14524 = sst [smem:[#allocation18_spill]] %s14433_s3  ;;  %s14468_s3 = smov 40  }
   0x7   :  { %14525 = sst [smem:[#allocation19_spill]] %s14434_s8  ;;  %s14480_s8 = smov 64  }
   0x8   :  { %14526 = sst [smem:[#allocation20_spill]] %s14435_s6 }
   0x9   :  { %14527 = sst [smem:[#allocation21_spill]] %s14436_s9 }
   0xa   :  { %14528 = sst [smem:[#allocation22_spill]] %s14437_s10  ;;  %s14466_s10 = smov 104  }
   0xb   :  { %14529 = sst [smem:[#allocation23_spill]] %s14438_s13  ;;  %s14484_s13 = smov 88  }
   0xc   :  { %14530 = sst [smem:[#allocation24_spill]] %s14439_s11 }
   0xd   :  { %14531 = sst [smem:[#allocation25_spill]] %s14451_s23 }
   0xe   :  { %14532 = sst [smem:[#allocation26_spill]] %s14452_s25 }
   0xf   :  { %14533 = sst [smem:[#allocation27_spill]] %s14453_s26 }
  0x10   :  { %14534 = sst [smem:[#allocation28_spill]] %s14454_s24  ;;  %s14565_s24 = smov 112  }
  0x11   :  { %14535 = sst [smem:[#allocation29_spill]] %s14455_s27 }
  0x12   :  { %s14536_s9 = sld [smem:[#allocation13_spill]] }
  0x13   :  { %s14537_s0 = sld [smem:[#allocation14_spill]] }
  0x14   :  { %s14538_s11 = sld [smem:[#allocation15_spill]] }
  0x15   :  { %s14539_s1 = sld [smem:[#allocation16_spill]] }
  0x16   :  { %s14540_s4 = sld [smem:[#allocation17_spill]] }
  0x17   :  { %s14541_s28 = sld [smem:[#allocation18_spill]] }
  0x18   :  { %v93_v0 = vld [vmem:[%s14536_s9 + $0x8] sm:$0x3]  ;;  %v92_v1 = vld [vmem:[%s14536_s9] sm:$0xff]  ;;  %s14542_s29 = sld [smem:[#allocation19_spill]]  ;;  %s14472_s9 = smov 48  }
  0x19   :  { %v88_v2 = vld [vmem:[%s14537_s0] sm:$0xff]  ;;  %9798 = vmatprep.subr.msk.mxu0 %vm114_vm0, %v93_v0  ;;  %v89_v3 = vld [vmem:[%s14537_s0 + $0x8] sm:$0xff]  ;;  %v90_v5 = vld [vmem:[%s14537_s0 + $0x10] sm:$0xff]  ;;  %s14544_s6 = sld [smem:[#allocation20_spill]] }
  0x1a   :  { %9802 = vmatprep.mubr.msk.f32.mxu0 %vm101_vm1, %v88_v2  ;;  %9799 = vmatpush3.msk.msra.mxu0 %vm114_vm0, %v93_v0  ;;  %v298_v4 = vld [vmem:[%s14538_s11 + $0x18] sm:$0xff]  ;;  %v297_v7 = vld [vmem:[%s14538_s11 + $0x10] sm:$0xff]  ;;  %v296_v8 = vld [vmem:[%s14538_s11 + $0x8] sm:$0xff]  ;;  %s14548_s27 = sld [smem:[#allocation24_spill]] }
  0x1b   :  { %9800 = vmatprep.subr.mxu0 %v92_v1  ;;  %v91_v6 = vld [vmem:[%s14537_s0 + $0x18] sm:$0xff]  ;;  %v295_v9 = vld [vmem:[%s14538_s11] sm:$0xff]  ;;  %v206_v11 = vld [vmem:[%s14539_s1 + $0x10] sm:$0x3]  ;;  %s14482_s0 = smov 120   ;;  %s14589_s23 = sld [smem:[#allocation26_spill]] }
  0x1c   :  { %9801 = vmatpush3.msra.mxu0 %v92_v1  ;;  %9809 = vmatpush3.msk.msra.mxu1 %vm114_vm0, %v206_v11  ;;  %v8602_v13 = vld [vmem:[%s14540_s4] ss:$0 sm:$0xff]  ;;  %v205_v21 = vld [vmem:[%s14539_s1 + $0x8] sm:$0xff]  ;;  %s14476_s4 = smov 80  }
  0x1d   :  { %9803 = vmatmul.mubr.msk.f32.vlgmr.msra.gmra.mxu0 %vm101_vm1, %v89_v3  ;;  %9817 = vmatprep.subr.mxu0 %v298_v4  ;;  %v204_v22 = vld [vmem:[%s14539_s1] sm:$0xff]  ;;  %s14492_s1 = smov 96  }
  0x1e   :  { %9805 = vmatprep.mubr.msk.f32.mxu0 %vm101_vm1, %v90_v5  ;;  %9818 = vmatpush3.msra.mxu0 %v298_v4  ;;  %v203_v23 = vld [vmem:[%s14541_s28] sm:$0xf]  ;;  %s14490_s28 = smov 8  }
  0x1f   :  { %9819 = vmatprep.subr.mxu0 %v297_v7  ;;  %9810 = vmatprep.subr.mxu1 %v14494_v10  ;;  %v8611_v24 = vld [vmem:[%s14542_s29] ss:$0 sm:$0xff]  ;;  %v10736_v44 = vld [vmem:[%s14544_s6 + $0x8] sm:$0xff]  ;;  %v10747_v51 = vld [vmem:[%s14544_s6 + $0x18] sm:$0xff] }
  0x20   :  { %9820 = vmatpush3.msra.mxu0 %v297_v7  ;;  %9811 = vmatpush3.msra.mxu1 %v205_v21  ;;  %v10741_v47 = vld [vmem:[%s14544_s6] sm:$0xff]  ;;  %v10756_v59 = vld [vmem:[%s14544_s6 + $0x10] sm:$0xff] }
  0x21   :  { %9806 = vmatmul.mubr.msk.f32.gmra.mxu0 %vm101_vm1, %v91_v6  ;;  %9821 = vmatprep.subr.mxu0 %v296_v8 }
  0x22   :  { %9822 = vmatpush3.msra.mxu0 %v296_v8  ;;  %9812 = vmatprep.subr.mxu1 %v14494_v10 }
  0x23   :  { %9823 = vmatprep.subr.mxu0 %v295_v9  ;;  %9813 = vmatpush3.msra.mxu1 %v204_v22 }
  0x24   :  { %9824 = vmatpush3.msra.mxu0 %v295_v9  ;;  %9815 = vmatmul.mubr.msk.f32.vlgmr.msra.gmra.mxu1 %vm214_vm4, %v203_v23 }
  0xdd   :  { %v9804_v12 = vpop.f32.mrf.mxu0 }
  0xde   :  { %v10662_v16 = vadd.f32 %v9804_v12, %v8602_v13 }
  0xdf   :  { %v184_v14 = vpop.f32.mrf.mxu0 }
  0xe0   :  { %v10660_v15 = vadd.f32 %v8602_v13, %v184_v14 }
  0xe1   :  { %v9807_v17 = vpop.f32.mrf.mxu0 }
  0xe2   :  { %9825 = vmatprep.mubr.msk.f32.mxu0 %vm304_vm2, %v10660_v15  ;;  %v10670_v20 = vadd.f32 %v9807_v17, %v8602_v13 }
  0xe3   :  { %v194_v18 = vpop.f32.mrf.mxu0  ;;  %9826 = vmatmul.mubr.msk.f32.vlgmr.msra.gmra.mxu0 %vm304_vm2, %v10662_v16 }
  0xe4   :  { %v10668_v19 = vadd.f32 %v8602_v13, %v194_v18  ;;  %v10717_v33 = vpop.f32.mrf.mxu1 }
  0xe5   :  { %14543 = vst [vmem:[#allocation3_spill] sm:$0xff] %v10717_v33 }
  0xe6   :  { %9828 = vmatprep.mubr.msk.f32.mxu0 %vm304_vm2, %v10668_v19  ;;  %v9816_v34 = vpop.f32.mrf.mxu1 }
  0xe7   :  { %9829 = vmatmul.mubr.msk.f32.gmra.mxu0 %vm304_vm2, %v10670_v20 }
 0x1a3   :  { %v9827_v25 = vpop.f32.mrf.mxu0 }
 0x1a4   :  { %v10691_v26 = vadd.f32 %v9827_v25, %v8611_v24 }
 0x1a5   :  { %v383_v27 = vpop.f32.mrf.mxu0 }
 0x1a6   :  { %v10693_v28 = vadd.f32 %v8611_v24, %v383_v27  ;;  %408 = vrot.lane.b32.xlu1 %v10691_v26, %s14492_s1 }
 0x1a7   :  { %v9830_v29 = vpop.f32.mrf.mxu0 }
 0x1a8   :  { %v10697_v30 = vadd.f32 %v9830_v29, %v8611_v24  ;;  %9839 = vmatprep.mubr.msk.f32.mxu1 %vm414_vm5, %v10693_v28 }
 0x1a9   :  { %v393_v31 = vpop.f32.mrf.mxu0 }
 0x1aa   :  { %412 = vrot.lane.b32.xlu0 %v10697_v30, %s14492_s1  ;;  %406 = vrot.lane.b32.xlu1 %v10693_v28, %s14492_s1  ;;  %v10705_v32 = vadd.f32 %v8611_v24, %v393_v31 }
 0x1ae   :  { %410 = vrot.lane.b32.xlu0 %v10705_v32, %s14492_s1  ;;  %574 = vrot.lane.b32.xlu1 %v10697_v30, %s14480_s8  ;;  %s14559_s1 = smov 96  }
 0x1b2   :  { %572 = vrot.lane.b32.xlu0 %v10705_v32, %s14480_s8  ;;  %570 = vrot.lane.b32.xlu1 %v10691_v26, %s14480_s8 }
 0x1b6   :  { %568 = vrot.lane.b32.xlu1 %v10693_v28, %s14480_s8  ;;  %s14568_s8 = smov 104  }
 0x218   :  { %v409_v35 = vpop.permute.xlu1 %408 }
 0x21c   :  { %v413_v36 = vpop.permute.xlu0 %412  ;;  %v407_v37 = vpop.permute.xlu1 %406 }
 0x21d   :  { %9831 = vmatprep.subr.msk.mxu1 %vm414_vm5, %v413_v36 }
 0x21e   :  { %9832 = vmatpush3.xpose.msk.msra.mxu1 %vm414_vm5, %v413_v36 }
 0x220   :  { %v411_v38 = vpop.permute.xlu0 %410  ;;  %v575_v39 = vpop.permute.xlu1 %574 }
 0x221   :  { %9833 = vmatprep.subr.msk.mxu1 %vm414_vm5, %v411_v38  ;;  %9845 = vmatprep.subr.mxu0 %v575_v39 }
 0x222   :  { %9834 = vmatpush3.xpose.msk.msra.mxu1 %vm414_vm5, %v411_v38  ;;  %9846 = vmatpush3.msra.mxu0 %v575_v39 }
 0x223   :  { %9835 = vmatprep.subr.msk.mxu1 %vm414_vm5, %v409_v35 }
 0x224   :  { %v573_v40 = vpop.permute.xlu0 %572  ;;  %v571_v41 = vpop.permute.xlu1 %570 }
 0x225   :  { %9847 = vmatprep.subr.mxu0 %v573_v40 }
 0x226   :  { %9836 = vmatpush3.xpose.msk.msra.mxu1 %vm414_vm5, %v409_v35  ;;  %9848 = vmatpush3.msra.mxu0 %v573_v40 }
 0x227   :  { %9837 = vmatprep.subr.msk.mxu1 %vm414_vm5, %v407_v37  ;;  %9849 = vmatprep.subr.mxu0 %v571_v41 }
 0x228   :  { %9850 = vmatpush3.msra.mxu0 %v571_v41  ;;  %v569_v42 = vpop.permute.xlu1 %568 }
 0x229   :  { %9851 = vmatprep.subr.mxu0 %v569_v42 }
 0x22a   :  { %9838 = vmatpush3.xpose.msk.msra.mxu1 %vm414_vm5, %v407_v37  ;;  %9852 = vmatpush3.msra.mxu0 %v569_v42 }
 0x22d   :  { %9840 = vmatmul.mubr.msk.f32.vlgmr.msra.gmra.mxu1 %vm414_vm5, %v10691_v26 }
 0x22e   :  { %9842 = vmatprep.mubr.msk.f32.mxu1 %vm414_vm5, %v10705_v32 }
 0x231   :  { %9843 = vmatmul.mubr.msk.f32.gmra.mxu1 %vm414_vm5, %v10697_v30 }
 0x2ed   :  { %v9841_v43 = vpop.f32.mrf.mxu1 }
 0x2ee   :  { %v517_v45 = vmul.f32 0.35355338, %v9841_v43 }
 0x2ef   :  { %v497_v46 = vpop.f32.mrf.mxu1 }
 0x2f0   :  { %v516_v48 = vmul.f32 0.35355338, %v497_v46  ;;  %v521_v49 = vadd.f32 %v517_v45, %v10736_v44 }
 0x2f1   :  { %v9844_v50 = vpop.f32.mrf.mxu1 }
 0x2f2   :  { %v519_v52 = vmul.f32 0.35355338, %v9844_v50  ;;  %v527_v53 = vsel %vm304_vm2, %v521_v49, -inf  ;;  %v520_v54 = vadd.f32 %v516_v48, %v10741_v47 }
 0x2f3   :  { %528 = vmax.xlane.f32.xlu1 %v527_v53  ;;  %v507_v55 = vpop.f32.mrf.mxu1 }
 0x2f4   :  { %v518_v56 = vmul.f32 0.35355338, %v507_v55  ;;  %v524_v57 = vsel %vm304_vm2, %v520_v54, -inf  ;;  %v523_v58 = vadd.f32 %v519_v52, %v10747_v51 }
 0x2f5   :  { %525 = vmax.xlane.f32.xlu0 %v524_v57 }
 0x2f6   :  { %v533_v60 = vsel %vm304_vm2, %v523_v58, -inf  ;;  %v522_v61 = vadd.f32 %v518_v56, %v10756_v59 }
 0x2f8   :  { %v530_v62 = vsel %vm304_vm2, %v522_v61, -inf }
 0x2f9   :  { %534 = vmax.xlane.f32.xlu0 %v533_v60 }
 0x2fd   :  { %531 = vmax.xlane.f32.xlu0 %v530_v62 }
 0x304   :  { %689 = vrot.lane.b32.xlu1 %v10705_v32, %s14484_s13 }
 0x313   :  { %691 = vrot.lane.b32.xlu0 %v10697_v30, %s14484_s13 }
 0x37c   :  { %v529_v63 = vpop.xlane.xlu1 %528 }
 0x37d   :  { %v537_v0 = vsub.f32 %v521_v49, %v529_v63 }
 0x37e   :  { %v526_v1 = vpop.xlane.xlu0 %525 }
 0x37f   :  { %v542_v2 = vmul.f32 1.442695, %v537_v0  ;;  %v536_v3 = vsub.f32 %v520_v54, %v526_v1 }
 0x380   :  { %v690_v25 = vpop.permute.xlu1 %689 }
 0x381   :  { %10227 = vpow2.f32 %v542_v2  ;;  %v540_v4 = vmul.f32 1.442695, %v536_v3 }
 0x382   :  { %v535_v5 = vpop.xlane.xlu0 %534 }
 0x383   :  { %10229 = vpow2.f32 %v540_v4  ;;  %v539_v13 = vsub.f32 %v523_v58, %v535_v5 }
 0x385   :  { %v546_v17 = vmul.f32 1.442695, %v539_v13 }
 0x386   :  { %v532_v6 = vpop.xlane.xlu0 %531 }
 0x387   :  { %v538_v14 = vsub.f32 %v522_v61, %v532_v6  ;;  %10231 = vpow2.f32 %v546_v17 }
 0x389   :  { %v544_v18 = vmul.f32 1.442695, %v538_v14 }
 0x38a   :  { %v692_v7 = vpop.permute.xlu0 %691 }
 0x38b   :  { %9859 = vmatprep.subr.msk.mxu0 %vm414_vm5, %v692_v7  ;;  %10233 = vpow2.f32 %v544_v18 }
 0x38e   :  { %v10228_v8 = vpop.eup %10227 }
 0x38f   :  { %v551_v9 = vsel %vm304_vm2, %v10228_v8, 0.0 }
 0x390   :  { %v10230_v11 = vpop.eup %10229  ;;  %552 = vadd.xlane.f32.xlu0 %v551_v9 }
 0x391   :  { %v548_v12 = vsel %vm304_vm2, %v10230_v11, 0.0 }
 0x392   :  { %549 = vadd.xlane.f32.xlu1 %v548_v12 }
 0x394   :  { %v10232_v21 = vpop.eup %10231 }
 0x395   :  { %v557_v23 = vsel %vm304_vm2, %v10232_v21, 0.0 }
 0x398   :  { %v10234_v22 = vpop.eup %10233 }
 0x399   :  { %v554_v24 = vsel %vm304_vm2, %v10234_v22, 0.0 }
 0x3a3   :  { %685 = vrot.lane.b32.xlu1 %v10693_v28, %s14484_s13 }
 0x3a6   :  { %687 = vrot.lane.b32.xlu0 %v10691_v26, %s14484_s13  ;;  %s14571_s13 = smov 8  }
 0x3c5   :  { %558 = vadd.xlane.f32.xlu0 %v557_v23 }
 0x3c7   :  { %555 = vadd.xlane.f32.xlu1 %v554_v24 }
 0x3d8   :  { %679 = vrot.lane.b32.xlu1 %v10691_v26, %s14482_s0 }
 0x3db   :  { %677 = vrot.lane.b32.xlu0 %v10693_v28, %s14482_s0 }
 0x3dc   :  { %683 = vrot.lane.b32.xlu1 %v10697_v30, %s14482_s0 }
 0x3df   :  { %681 = vrot.lane.b32.xlu0 %v10705_v32, %s14482_s0  ;;  %s14546_s0 = sld [smem:[#allocation22_spill]] }
 0x3e0   :  { %852 = vrot.lane.b32.xlu1 %v10697_v30, %s14478_s2 }
 0x3e3   :  { %850 = vrot.lane.b32.xlu0 %v10705_v32, %s14478_s2 }
 0x3e4   :  { %848 = vrot.lane.b32.xlu1 %v10691_v26, %s14478_s2 }
 0x3e8   :  { %846 = vrot.lane.b32.xlu1 %v10693_v28, %s14478_s2  ;;  %s14561_s2 = smov 120  }
 0x419   :  { %v553_v27 = vpop.xlane.xlu0 %552 }
 0x41a   :  { %10235 = vrcp.f32 %v553_v27 }
 0x41b   :  { %v550_v29 = vpop.xlane.xlu1 %549 }
 0x41c   :  { %10237 = vrcp.f32 %v550_v29 }
 0x41d   :  { %v688_v37 = vpop.permute.xlu0 %687 }
 0x41f   :  { %v686_v38 = vpop.permute.xlu1 %685 }
 0x427   :  { %v10236_v31 = vpop.eup %10235 }
 0x428   :  { %v563_v36 = vmul.f32 %v10236_v31, %v10228_v8 }
 0x429   :  { %v10238_v34 = vpop.eup %10237 }
 0x42a   :  { %v561_v35 = vmul.f32 %v10238_v34, %v10230_v11 }
 0x42c   :  { %9853 = vmatprep.mubr.msk.f32.mxu0 %vm304_vm2, %v561_v35 }
 0x42d   :  { %9854 = vmatmul.mubr.msk.f32.vlgmr.msra.gmra.mxu0 %vm304_vm2, %v563_v36 }
 0x42e   :  { %9860 = vmatpush3.xpose.msk.msra.mxu0 %vm414_vm5, %v692_v7 }
 0x42f   :  { %9861 = vmatprep.subr.msk.mxu0 %vm414_vm5, %v690_v25 }
 0x432   :  { %9862 = vmatpush3.xpose.msk.msra.mxu0 %vm414_vm5, %v690_v25 }
 0x433   :  { %9863 = vmatprep.subr.msk.mxu0 %vm414_vm5, %v688_v37 }
 0x436   :  { %9864 = vmatpush3.xpose.msk.msra.mxu0 %vm414_vm5, %v688_v37 }
 0x437   :  { %9865 = vmatprep.subr.msk.mxu0 %vm414_vm5, %v686_v38 }
 0x43a   :  { %9866 = vmatpush3.xpose.msk.msra.mxu0 %vm414_vm5, %v686_v38 }
 0x44e   :  { %v559_v39 = vpop.xlane.xlu0 %558 }
 0x44f   :  { %10239 = vrcp.f32 %v559_v39 }
 0x450   :  { %v556_v40 = vpop.xlane.xlu1 %555 }
 0x451   :  { %10241 = vrcp.f32 %v556_v40 }
 0x452   :  { %v678_v41 = vpop.permute.xlu0 %677 }
 0x454   :  { %v680_v42 = vpop.permute.xlu1 %679 }
 0x456   :  { %v682_v43 = vpop.permute.xlu0 %681 }
 0x458   :  { %v684_v45 = vpop.permute.xlu1 %683 }
 0x45a   :  { %v851_v50 = vpop.permute.xlu0 %850 }
 0x45c   :  { %v853_v46 = vpop.permute.xlu1 %852  ;;  %v10240_v48 = vpop.eup %10239 }
 0x45d   :  { %9873 = vmatprep.subr.mxu1 %v853_v46  ;;  %v567_v54 = vmul.f32 %v10240_v48, %v10232_v21 }
 0x45e   :  { %v10242_v49 = vpop.eup %10241  ;;  %9874 = vmatpush3.msra.mxu1 %v853_v46 }
 0x45f   :  { %9875 = vmatprep.subr.mxu1 %v851_v50  ;;  %v565_v52 = vmul.f32 %v10242_v49, %v10234_v22 }
 0x460   :  { %v849_v53 = vpop.permute.xlu1 %848  ;;  %9876 = vmatpush3.msra.mxu1 %v851_v50 }
 0x461   :  { %9856 = vmatprep.mubr.msk.f32.mxu0 %vm304_vm2, %v565_v52  ;;  %9877 = vmatprep.subr.mxu1 %v849_v53 }
 0x462   :  { %9857 = vmatmul.mubr.msk.f32.gmra.mxu0 %vm304_vm2, %v567_v54  ;;  %9878 = vmatpush3.msra.mxu1 %v849_v53 }
 0x463   :  { %9867 = vmatprep.mubr.msk.f32.mxu0 %vm414_vm5, %v678_v41 }
 0x464   :  { %v847_v55 = vpop.permute.xlu1 %846 }
 0x465   :  { %9879 = vmatprep.subr.mxu1 %v847_v55 }
 0x466   :  { %9868 = vmatmul.mubr.msk.f32.vlgmr.msra.gmra.mxu0 %vm414_vm5, %v680_v42  ;;  %9880 = vmatpush3.msra.mxu1 %v847_v55 }
 0x467   :  { %9870 = vmatprep.mubr.msk.f32.mxu0 %vm414_vm5, %v682_v43 }
 0x46a   :  { %9871 = vmatmul.mubr.msk.f32.gmra.mxu0 %vm414_vm5, %v684_v45 }
 0x4ed   :  { %v10805_v56 = vpop.f32.mrf.mxu0 }
 0x4ef   :  { %v10807_v57 = vpop.f32.mrf.mxu0 }
 0x522   :  { %v10809_v58 = vpop.f32.mrf.mxu0 }
 0x524   :  { %v10811_v60 = vpop.f32.mrf.mxu0 }
 0x526   :  { %v9869_v61 = vpop.f32.mrf.mxu0 }
 0x527   :  { %v795_v62 = vmul.f32 0.35355338, %v9869_v61 }
 0x528   :  { %v775_v63 = vpop.f32.mrf.mxu0 }
 0x529   :  { %v794_v0 = vmul.f32 0.35355338, %v775_v63  ;;  %v799_v1 = vadd.f32 %v795_v62, %v10736_v44 }
 0x52a   :  { %v9872_v2 = vpop.f32.mrf.mxu0 }
 0x52b   :  { %v797_v3 = vmul.f32 0.35355338, %v9872_v2  ;;  %v805_v4 = vsel %vm304_vm2, %v799_v1, -inf  ;;  %v798_v5 = vadd.f32 %v794_v0, %v10741_v47 }
 0x52c   :  { %806 = vmax.xlane.f32.xlu1 %v805_v4  ;;  %v785_v6 = vpop.f32.mrf.mxu0 }
 0x52d   :  { %v796_v7 = vmul.f32 0.35355338, %v785_v6  ;;  %v802_v8 = vsel %vm304_vm2, %v798_v5, -inf  ;;  %v801_v9 = vadd.f32 %v797_v3, %v10747_v51 }
 0x52e   :  { %803 = vmax.xlane.f32.xlu0 %v802_v8 }
 0x52f   :  { %v811_v11 = vsel %vm304_vm2, %v801_v9, -inf  ;;  %v800_v12 = vadd.f32 %v796_v7, %v10756_v59 }
 0x531   :  { %v808_v13 = vsel %vm304_vm2, %v800_v12, -inf }
 0x532   :  { %812 = vmax.xlane.f32.xlu0 %v811_v11 }
 0x536   :  { %809 = vmax.xlane.f32.xlu0 %v808_v13 }
 0x53d   :  { %967 = vrot.lane.b32.xlu1 %v10705_v32, %s14476_s4 }
 0x54c   :  { %969 = vrot.lane.b32.xlu0 %v10697_v30, %s14476_s4 }
 0x5b5   :  { %v807_v14 = vpop.xlane.xlu1 %806 }
 0x5b6   :  { %v815_v17 = vsub.f32 %v799_v1, %v807_v14 }
 0x5b7   :  { %v804_v18 = vpop.xlane.xlu0 %803 }
 0x5b8   :  { %v820_v21 = vmul.f32 1.442695, %v815_v17  ;;  %v814_v22 = vsub.f32 %v798_v5, %v804_v18 }
 0x5b9   :  { %v968_v45 = vpop.permute.xlu1 %967 }
 0x5ba   :  { %10243 = vpow2.f32 %v820_v21  ;;  %v818_v23 = vmul.f32 1.442695, %v814_v22 }
 0x5bb   :  { %v813_v24 = vpop.xlane.xlu0 %812 }
 0x5bc   :  { %10245 = vpow2.f32 %v818_v23  ;;  %v817_v36 = vsub.f32 %v801_v9, %v813_v24 }
 0x5be   :  { %v824_v38 = vmul.f32 1.442695, %v817_v36 }
 0x5bf   :  { %v810_v25 = vpop.xlane.xlu0 %809 }
 0x5c0   :  { %v816_v37 = vsub.f32 %v800_v12, %v810_v25  ;;  %10247 = vpow2.f32 %v824_v38 }
 0x5c2   :  { %v822_v39 = vmul.f32 1.442695, %v816_v37 }
 0x5c3   :  { %v970_v27 = vpop.permute.xlu0 %969 }
 0x5c4   :  { %9887 = vmatprep.subr.msk.mxu1 %vm414_vm5, %v970_v27  ;;  %10249 = vpow2.f32 %v822_v39 }
 0x5c7   :  { %v10244_v29 = vpop.eup %10243 }
 0x5c8   :  { %v829_v31 = vsel %vm304_vm2, %v10244_v29, 0.0 }
 0x5c9   :  { %v10246_v34 = vpop.eup %10245  ;;  %830 = vadd.xlane.f32.xlu0 %v829_v31 }
 0x5ca   :  { %v826_v35 = vsel %vm304_vm2, %v10246_v34, 0.0 }
 0x5cb   :  { %827 = vadd.xlane.f32.xlu1 %v826_v35 }
 0x5cd   :  { %v10248_v40 = vpop.eup %10247 }
 0x5ce   :  { %v835_v42 = vsel %vm304_vm2, %v10248_v40, 0.0 }
 0x5d1   :  { %v10250_v41 = vpop.eup %10249 }
 0x5d2   :  { %v832_v43 = vsel %vm304_vm2, %v10250_v41, 0.0 }
 0x5dc   :  { %963 = vrot.lane.b32.xlu1 %v10693_v28, %s14476_s4 }
 0x5df   :  { %965 = vrot.lane.b32.xlu0 %v10691_v26, %s14476_s4  ;;  %s14564_s4 = smov 80  }
 0x5fe   :  { %836 = vadd.xlane.f32.xlu0 %v835_v42 }
 0x600   :  { %833 = vadd.xlane.f32.xlu1 %v832_v43 }
 0x611   :  { %957 = vrot.lane.b32.xlu1 %v10691_v26, %s14474_s7 }
 0x614   :  { %955 = vrot.lane.b32.xlu0 %v10693_v28, %s14474_s7 }
 0x615   :  { %961 = vrot.lane.b32.xlu1 %v10697_v30, %s14474_s7 }
 0x618   :  { %959 = vrot.lane.b32.xlu0 %v10705_v32, %s14474_s7  ;;  %s14547_s7 = sld [smem:[#allocation23_spill]] }
 0x619   :  { %1130 = vrot.lane.b32.xlu1 %v10697_v30, %s14472_s9 }
 0x61c   :  { %1128 = vrot.lane.b32.xlu0 %v10705_v32, %s14472_s9 }
 0x61d   :  { %1126 = vrot.lane.b32.xlu1 %v10691_v26, %s14472_s9 }
 0x621   :  { %1124 = vrot.lane.b32.xlu1 %v10693_v28, %s14472_s9  ;;  %s14545_s9 = sld [smem:[#allocation21_spill]] }
 0x652   :  { %v831_v46 = vpop.xlane.xlu0 %830 }
 0x653   :  { %10251 = vrcp.f32 %v831_v46 }
 0x654   :  { %v828_v48 = vpop.xlane.xlu1 %827 }
 0x655   :  { %10253 = vrcp.f32 %v828_v48 }
 0x656   :  { %v966_v54 = vpop.permute.xlu0 %965 }
 0x658   :  { %v964_v55 = vpop.permute.xlu1 %963 }
 0x660   :  { %v10252_v49 = vpop.eup %10251 }
 0x661   :  { %v841_v53 = vmul.f32 %v10252_v49, %v10244_v29 }
 0x662   :  { %v10254_v50 = vpop.eup %10253 }
 0x663   :  { %v839_v52 = vmul.f32 %v10254_v50, %v10246_v34 }
 0x665   :  { %9881 = vmatprep.mubr.msk.f32.mxu1 %vm304_vm2, %v839_v52 }
 0x666   :  { %9882 = vmatmul.mubr.msk.f32.vlgmr.msra.gmra.mxu1 %vm304_vm2, %v841_v53 }
 0x667   :  { %9888 = vmatpush3.xpose.msk.msra.mxu1 %vm414_vm5, %v970_v27 }
 0x668   :  { %9889 = vmatprep.subr.msk.mxu1 %vm414_vm5, %v968_v45 }
 0x66b   :  { %9890 = vmatpush3.xpose.msk.msra.mxu1 %vm414_vm5, %v968_v45 }
 0x66c   :  { %9891 = vmatprep.subr.msk.mxu1 %vm414_vm5, %v966_v54 }
 0x66f   :  { %9892 = vmatpush3.xpose.msk.msra.mxu1 %vm414_vm5, %v966_v54 }
 0x670   :  { %9893 = vmatprep.subr.msk.mxu1 %vm414_vm5, %v964_v55 }
 0x673   :  { %9894 = vmatpush3.xpose.msk.msra.mxu1 %vm414_vm5, %v964_v55 }
 0x687   :  { %v837_v61 = vpop.xlane.xlu0 %836 }
 0x688   :  { %10255 = vrcp.f32 %v837_v61 }
 0x689   :  { %v834_v62 = vpop.xlane.xlu1 %833 }
 0x68a   :  { %10257 = vrcp.f32 %v834_v62 }
 0x68b   :  { %v956_v63 = vpop.permute.xlu0 %955 }
 0x68d   :  { %v958_v0 = vpop.permute.xlu1 %957 }
 0x68f   :  { %v960_v1 = vpop.permute.xlu0 %959 }
 0x691   :  { %v962_v2 = vpop.permute.xlu1 %961 }
 0x693   :  { %v1129_v6 = vpop.permute.xlu0 %1128 }
 0x695   :  { %v1131_v3 = vpop.permute.xlu1 %1130  ;;  %v10256_v4 = vpop.eup %10255 }
 0x696   :  { %9901 = vmatprep.subr.mxu0 %v1131_v3  ;;  %v845_v9 = vmul.f32 %v10256_v4, %v10248_v40 }
 0x697   :  { %v10258_v5 = vpop.eup %10257  ;;  %9902 = vmatpush3.msra.mxu0 %v1131_v3 }
 0x698   :  { %9903 = vmatprep.subr.mxu0 %v1129_v6  ;;  %v843_v7 = vmul.f32 %v10258_v5, %v10250_v41 }
 0x699   :  { %v1127_v8 = vpop.permute.xlu1 %1126  ;;  %9904 = vmatpush3.msra.mxu0 %v1129_v6 }
 0x69a   :  { %9884 = vmatprep.mubr.msk.f32.mxu1 %vm304_vm2, %v843_v7  ;;  %9905 = vmatprep.subr.mxu0 %v1127_v8 }
 0x69b   :  { %9885 = vmatmul.mubr.msk.f32.gmra.mxu1 %vm304_vm2, %v845_v9  ;;  %9906 = vmatpush3.msra.mxu0 %v1127_v8 }
 0x69c   :  { %9895 = vmatprep.mubr.msk.f32.mxu1 %vm414_vm5, %v956_v63 }
 0x69d   :  { %v1125_v11 = vpop.permute.xlu1 %1124 }
 0x69e   :  { %9907 = vmatprep.subr.mxu0 %v1125_v11 }
 0x69f   :  { %9896 = vmatmul.mubr.msk.f32.vlgmr.msra.gmra.mxu1 %vm414_vm5, %v958_v0  ;;  %9908 = vmatpush3.msra.mxu0 %v1125_v11 }
 0x6a0   :  { %9898 = vmatprep.mubr.msk.f32.mxu1 %vm414_vm5, %v960_v1 }
 0x6a3   :  { %9899 = vmatmul.mubr.msk.f32.gmra.mxu1 %vm414_vm5, %v962_v2 }
 0x726   :  { %v10865_v12 = vpop.f32.mrf.mxu1 }
 0x728   :  { %v10867_v13 = vpop.f32.mrf.mxu1 }
 0x75b   :  { %v10869_v14 = vpop.f32.mrf.mxu1 }
 0x75d   :  { %v10871_v17 = vpop.f32.mrf.mxu1 }
 0x75f   :  { %v9897_v18 = vpop.f32.mrf.mxu1 }
 0x760   :  { %v1073_v21 = vmul.f32 0.35355338, %v9897_v18 }
 0x761   :  { %v1053_v22 = vpop.f32.mrf.mxu1 }
 0x762   :  { %v1072_v23 = vmul.f32 0.35355338, %v1053_v22  ;;  %v1077_v24 = vadd.f32 %v1073_v21, %v10736_v44 }
 0x763   :  { %v9900_v25 = vpop.f32.mrf.mxu1 }
 0x764   :  { %v1075_v27 = vmul.f32 0.35355338, %v9900_v25  ;;  %v1083_v29 = vsel %vm304_vm2, %v1077_v24, -inf  ;;  %v1076_v31 = vadd.f32 %v1072_v23, %v10741_v47 }
 0x765   :  { %1084 = vmax.xlane.f32.xlu1 %v1083_v29  ;;  %v1063_v34 = vpop.f32.mrf.mxu1 }
 0x766   :  { %v1074_v35 = vmul.f32 0.35355338, %v1063_v34  ;;  %v1080_v36 = vsel %vm304_vm2, %v1076_v31, -inf  ;;  %v1079_v37 = vadd.f32 %v1075_v27, %v10747_v51 }
 0x767   :  { %1081 = vmax.xlane.f32.xlu0 %v1080_v36 }
 0x768   :  { %v1089_v38 = vsel %vm304_vm2, %v1079_v37, -inf  ;;  %v1078_v39 = vadd.f32 %v1074_v35, %v10756_v59 }
 0x76a   :  { %v1086_v40 = vsel %vm304_vm2, %v1078_v39, -inf }
 0x76b   :  { %1090 = vmax.xlane.f32.xlu0 %v1089_v38 }
 0x76f   :  { %1087 = vmax.xlane.f32.xlu0 %v1086_v40 }
 0x776   :  { %1245 = vrot.lane.b32.xlu1 %v10705_v32, %s14470_s30 }
 0x785   :  { %1247 = vrot.lane.b32.xlu0 %v10697_v30, %s14470_s30 }
 0x7ee   :  { %v1085_v41 = vpop.xlane.xlu1 %1084 }
 0x7ef   :  { %v1093_v42 = vsub.f32 %v1077_v24, %v1085_v41 }
 0x7f0   :  { %v1082_v43 = vpop.xlane.xlu0 %1081 }
 0x7f1   :  { %v1098_v45 = vmul.f32 1.442695, %v1093_v42  ;;  %v1092_v46 = vsub.f32 %v1076_v31, %v1082_v43 }
 0x7f2   :  { %v1246_v6 = vpop.permute.xlu1 %1245 }
 0x7f3   :  { %10259 = vpow2.f32 %v1098_v45  ;;  %v1096_v48 = vmul.f32 1.442695, %v1092_v46 }
 0x7f4   :  { %v1091_v49 = vpop.xlane.xlu0 %1090 }
 0x7f5   :  { %10261 = vpow2.f32 %v1096_v48  ;;  %v1095_v62 = vsub.f32 %v1079_v37, %v1091_v49 }
 0x7f7   :  { %v1102_v0 = vmul.f32 1.442695, %v1095_v62 }
 0x7f8   :  { %v1088_v50 = vpop.xlane.xlu0 %1087 }
 0x7f9   :  { %v1094_v63 = vsub.f32 %v1078_v39, %v1088_v50  ;;  %10263 = vpow2.f32 %v1102_v0 }
 0x7fb   :  { %v1100_v1 = vmul.f32 1.442695, %v1094_v63 }
 0x7fc   :  { %v1248_v52 = vpop.permute.xlu0 %1247 }
 0x7fd   :  { %9915 = vmatprep.subr.msk.mxu0 %vm414_vm5, %v1248_v52  ;;  %10265 = vpow2.f32 %v1100_v1 }
 0x800   :  { %v10260_v53 = vpop.eup %10259 }
 0x801   :  { %v1107_v54 = vsel %vm304_vm2, %v10260_v53, 0.0 }
 0x802   :  { %v10262_v55 = vpop.eup %10261  ;;  %1108 = vadd.xlane.f32.xlu0 %v1107_v54 }
 0x803   :  { %v1104_v61 = vsel %vm304_vm2, %v10262_v55, 0.0 }
 0x804   :  { %1105 = vadd.xlane.f32.xlu1 %v1104_v61 }
 0x806   :  { %v10264_v2 = vpop.eup %10263 }
 0x807   :  { %v1113_v4 = vsel %vm304_vm2, %v10264_v2, 0.0 }
 0x80a   :  { %v10266_v3 = vpop.eup %10265 }
 0x80b   :  { %v1110_v5 = vsel %vm304_vm2, %v10266_v3, 0.0 }
 0x815   :  { %1241 = vrot.lane.b32.xlu1 %v10693_v28, %s14470_s30 }
 0x818   :  { %1243 = vrot.lane.b32.xlu0 %v10691_v26, %s14470_s30  ;;  %s14486_s30 = smov 24  }
 0x837   :  { %1114 = vadd.xlane.f32.xlu0 %v1113_v4 }
 0x839   :  { %1111 = vadd.xlane.f32.xlu1 %v1110_v5 }
 0x84a   :  { %1235 = vrot.lane.b32.xlu1 %v10691_v26, %s14466_s10 }
 0x84d   :  { %1233 = vrot.lane.b32.xlu0 %v10693_v28, %s14466_s10 }
 0x84e   :  { %1239 = vrot.lane.b32.xlu1 %v10697_v30, %s14466_s10 }
 0x851   :  { %1237 = vrot.lane.b32.xlu0 %v10705_v32, %s14466_s10  ;;  %s14488_s10 = smov 16  }
 0x88b   :  { %v1109_v7 = vpop.xlane.xlu0 %1108 }
 0x88c   :  { %10267 = vrcp.f32 %v1109_v7 }
 0x88d   :  { %v1106_v8 = vpop.xlane.xlu1 %1105 }
 0x88e   :  { %10269 = vrcp.f32 %v1106_v8 }
 0x88f   :  { %v1244_v22 = vpop.permute.xlu0 %1243 }
 0x891   :  { %v1242_v23 = vpop.permute.xlu1 %1241 }
 0x899   :  { %v10268_v9 = vpop.eup %10267 }
 0x89a   :  { %v1119_v21 = vmul.f32 %v10268_v9, %v10260_v53 }
 0x89b   :  { %v10270_v11 = vpop.eup %10269 }
 0x89c   :  { %v1117_v18 = vmul.f32 %v10270_v11, %v10262_v55 }
 0x89e   :  { %9909 = vmatprep.mubr.msk.f32.mxu0 %vm304_vm2, %v1117_v18 }
 0x89f   :  { %9910 = vmatmul.mubr.msk.f32.vlgmr.msra.gmra.mxu0 %vm304_vm2, %v1119_v21 }
 0x8a0   :  { %9916 = vmatpush3.xpose.msk.msra.mxu0 %vm414_vm5, %v1248_v52 }
 0x8a1   :  { %9917 = vmatprep.subr.msk.mxu0 %vm414_vm5, %v1246_v6 }
 0x8a4   :  { %9918 = vmatpush3.xpose.msk.msra.mxu0 %vm414_vm5, %v1246_v6 }
 0x8a5   :  { %9919 = vmatprep.subr.msk.mxu0 %vm414_vm5, %v1244_v22 }
 0x8a8   :  { %9920 = vmatpush3.xpose.msk.msra.mxu0 %vm414_vm5, %v1244_v22 }
 0x8a9   :  { %9921 = vmatprep.subr.msk.mxu0 %vm414_vm5, %v1242_v23 }
 0x8ac   :  { %9922 = vmatpush3.xpose.msk.msra.mxu0 %vm414_vm5, %v1242_v23 }
 0x8c0   :  { %v1115_v24 = vpop.xlane.xlu0 %1114 }
 0x8c1   :  { %10271 = vrcp.f32 %v1115_v24 }
 0x8c2   :  { %v1112_v25 = vpop.xlane.xlu1 %1111 }
 0x8c3   :  { %10273 = vrcp.f32 %v1112_v25 }
 0x8c4   :  { %v1234_v34 = vpop.permute.xlu0 %1233 }
 0x8c6   :  { %v1236_v36 = vpop.permute.xlu1 %1235 }
 0x8c8   :  { %v1238_v37 = vpop.permute.xlu0 %1237 }
 0x8ca   :  { %v1240_v38 = vpop.permute.xlu1 %1239 }
 0x8ce   :  { %v10272_v27 = vpop.eup %10271 }
 0x8cf   :  { %v1123_v35 = vmul.f32 %v10272_v27, %v10264_v2 }
 0x8d0   :  { %v10274_v29 = vpop.eup %10273 }
 0x8d1   :  { %v1121_v31 = vmul.f32 %v10274_v29, %v10266_v3 }
 0x8d3   :  { %9912 = vmatprep.mubr.msk.f32.mxu0 %vm304_vm2, %v1121_v31 }
 0x8d4   :  { %9913 = vmatmul.mubr.msk.f32.gmra.mxu0 %vm304_vm2, %v1123_v35 }
 0x8d5   :  { %9923 = vmatprep.mubr.msk.f32.mxu0 %vm414_vm5, %v1234_v34 }
 0x8d8   :  { %9924 = vmatmul.mubr.msk.f32.vlgmr.msra.gmra.mxu0 %vm414_vm5, %v1236_v36 }
 0x8d9   :  { %9926 = vmatprep.mubr.msk.f32.mxu0 %vm414_vm5, %v1238_v37 }
 0x8dc   :  { %9927 = vmatmul.mubr.msk.f32.gmra.mxu0 %vm414_vm5, %v1240_v38 }
 0x8dd   :  { %1979 = vmatprep.mubr.f32.mxu0 %v14494_v10 }
 0x95f   :  { %v10918_v39 = vpop.f32.mrf.mxu0 }
 0x961   :  { %v10920_v40 = vpop.f32.mrf.mxu0 }
 0x994   :  { %v10922_v41 = vpop.f32.mrf.mxu0 }
 0x996   :  { %v10924_v42 = vpop.f32.mrf.mxu0 }
 0x998   :  { %v9925_v43 = vpop.f32.mrf.mxu0 }
 0x999   :  { %v1351_v45 = vmul.f32 0.35355338, %v9925_v43 }
 0x99a   :  { %v1331_v46 = vpop.f32.mrf.mxu0 }
 0x99b   :  { %v1350_v48 = vmul.f32 0.35355338, %v1331_v46  ;;  %v1355_v49 = vadd.f32 %v1351_v45, %v10736_v44  ;;  %v1576_v46 = vld [vmem:[%s14545_s9 + $0x18] sm:$0xff] }
 0x99c   :  { %v9928_v50 = vpop.f32.mrf.mxu0 }
 0x99d   :  { %v1361_v52 = vsel %vm304_vm2, %v1355_v49, -inf  ;;  %v1354_v53 = vadd.f32 %v1350_v48, %v10741_v47  ;;  %v1353_v55 = vmul.f32 0.35355338, %v9928_v50  ;;  %v1575_v48 = vld [vmem:[%s14545_s9 + $0x10] sm:$0xff]  ;;  %v1573_v50 = vld [vmem:[%s14545_s9] sm:$0xff] }
 0x99e   :  { %1362 = vmax.xlane.f32.xlu1 %v1361_v52  ;;  %v1341_v54 = vpop.f32.mrf.mxu0 }
 0x99f   :  { %v1352_v61 = vmul.f32 0.35355338, %v1341_v54  ;;  %v1358_v62 = vsel %vm304_vm2, %v1354_v53, -inf  ;;  %v1357_v1 = vadd.f32 %v1353_v55, %v10747_v51 }
 0x9a0   :  { %1359 = vmax.xlane.f32.xlu0 %v1358_v62 }
 0x9a1   :  { %v1356_v63 = vadd.f32 %v1352_v61, %v10756_v59  ;;  %v1367_v44 = vsel %vm304_vm2, %v1357_v1, -inf }
 0x9a3   :  { %v1364_v0 = vsel %vm304_vm2, %v1356_v63, -inf }
 0x9a4   :  { %1365 = vmax.xlane.f32.xlu0 %v1364_v0 }
 0x9a8   :  { %1368 = vmax.xlane.f32.xlu0 %v1367_v44 }
 0x9af   :  { %1408 = vrot.lane.b32.xlu1 %v10697_v30, %s14468_s3 }
 0x9be   :  { %1406 = vrot.lane.b32.xlu0 %v10705_v32, %s14468_s3 }
 0xa27   :  { %v1363_v47 = vpop.xlane.xlu1 %1362 }
 0xa28   :  { %v1371_v2 = vsub.f32 %v1355_v49, %v1363_v47  ;;  %v1574_v49 = vld [vmem:[%s14545_s9 + $0x8] sm:$0xff] }
 0xa29   :  { %v1360_v3 = vpop.xlane.xlu0 %1359 }
 0xa2a   :  { %v1376_v4 = vmul.f32 1.442695, %v1371_v2  ;;  %v1370_v59 = vsub.f32 %v1354_v53, %v1360_v3 }
 0xa2b   :  { %v1409_v5 = vpop.permute.xlu1 %1408 }
 0xa2c   :  { %10275 = vpow2.f32 %v1376_v4  ;;  %v1374_v6 = vmul.f32 1.442695, %v1370_v59  ;;  %9929 = vmatprep.subr.mxu1 %v1409_v5 }
 0xa2d   :  { %9930 = vmatpush3.msra.mxu1 %v1409_v5  ;;  %v1366_v51 = vpop.xlane.xlu0 %1365 }
 0xa2e   :  { %10277 = vpow2.f32 %v1374_v6  ;;  %v1372_v7 = vsub.f32 %v1356_v63, %v1366_v51 }
 0xa30   :  { %v1378_v8 = vmul.f32 1.442695, %v1372_v7 }
 0xa31   :  { %v1369_v9 = vpop.xlane.xlu0 %1368 }
 0xa32   :  { %10279 = vpow2.f32 %v1378_v8  ;;  %v1373_v30 = vsub.f32 %v1357_v1, %v1369_v9 }
 0xa34   :  { %v1380_v11 = vmul.f32 1.442695, %v1373_v30 }
 0xa35   :  { %v1407_v18 = vpop.permute.xlu0 %1406 }
 0xa36   :  { %10281 = vpow2.f32 %v1380_v11  ;;  %9931 = vmatprep.subr.mxu1 %v1407_v18 }
 0xa37   :  { %9932 = vmatpush3.msra.mxu1 %v1407_v18 }
 0xa39   :  { %v10276_v32 = vpop.eup %10275 }
 0xa3a   :  { %v1385_v21 = vsel %vm304_vm2, %v10276_v32, 0.0 }
 0xa3b   :  { %v10278_v22 = vpop.eup %10277  ;;  %1386 = vadd.xlane.f32.xlu0 %v1385_v21 }
 0xa3c   :  { %v1382_v23 = vsel %vm304_vm2, %v10278_v22, 0.0 }
 0xa3d   :  { %1383 = vadd.xlane.f32.xlu1 %v1382_v23 }
 0xa3f   :  { %v10280_v24 = vpop.eup %10279 }
 0xa40   :  { %v1388_v25 = vsel %vm304_vm2, %v10280_v24, 0.0 }
 0xa41   :  { %1389 = vadd.xlane.f32.xlu1 %v1388_v25 }
 0xa43   :  { %v10282_v27 = vpop.eup %10281 }
 0xa44   :  { %v1391_v29 = vsel %vm304_vm2, %v10282_v27, 0.0 }
 0xa45   :  { %1392 = vadd.xlane.f32.xlu0 %v1391_v29 }
 0xa52   :  { %1404 = vrot.lane.b32.xlu1 %v10691_v26, %s14468_s3 }
 0xa56   :  { %1515 = vrot.lane.b32.xlu1 %v10867_v13, %s14490_s28 }
 0xa5a   :  { %1517 = vrot.lane.b32.xlu1 %v10865_v12, %s14490_s28 }
 0xa5b   :  { %1402 = vrot.lane.b32.xlu0 %v10693_v28, %s14468_s3  ;;  %s14566_s3 = smov 48  }
 0xa5e   :  { %1533 = vrot.lane.b32.xlu1 %v10918_v39, %s14488_s10 }
 0xa5f   :  { %1531 = vrot.lane.b32.xlu0 %v10920_v40, %s14488_s10 }
 0xac4   :  { %v1387_v31 = vpop.xlane.xlu0 %1386 }
 0xac5   :  { %10283 = vrcp.f32 %v1387_v31 }
 0xac6   :  { %v1384_v26 = vpop.xlane.xlu1 %1383 }
 0xac7   :  { %10285 = vrcp.f32 %v1384_v26 }
 0xaca   :  { %v1390_v34 = vpop.xlane.xlu1 %1389 }
 0xacb   :  { %10287 = vrcp.f32 %v1390_v34 }
 0xace   :  { %v1405_v13 = vpop.permute.xlu1 %1404  ;;  %v1393_v35 = vpop.xlane.xlu0 %1392 }
 0xacf   :  { %10289 = vrcp.f32 %v1393_v35  ;;  %9933 = vmatprep.subr.mxu1 %v1405_v13 }
 0xad0   :  { %9934 = vmatpush3.msra.mxu1 %v1405_v13 }
 0xad2   :  { %v1403_v12 = vpop.permute.xlu0 %1402  ;;  %v10284_v28 = vpop.eup %10283 }
 0xad3   :  { %9935 = vmatprep.subr.mxu1 %v1403_v12  ;;  %v1397_v38 = vmul.f32 %v10284_v28, %v10276_v32  ;;  %v1516_v61 = vpop.permute.xlu1 %1515 }
 0xad4   :  { %v10286_v36 = vpop.eup %10285  ;;  %9936 = vmatpush3.msra.mxu1 %v1403_v12 }
 0xad5   :  { %v1395_v37 = vmul.f32 %v10286_v36, %v10278_v22  ;;  %9943 = vmatprep.subr.mxu1 %v1576_v46 }
 0xad6   :  { %v1532_v0 = vpop.permute.xlu0 %1531 }
 0xad7   :  { %9937 = vmatprep.mubr.msk.f32.mxu1 %vm304_vm2, %v1395_v37  ;;  %v1518_v62 = vpop.permute.xlu1 %1517 }
 0xad8   :  { %v10288_v39 = vpop.eup %10287  ;;  %9938 = vmatmul.mubr.msk.f32.vlgmr.msra.gmra.mxu1 %vm304_vm2, %v1397_v38 }
 0xad9   :  { %v1399_v40 = vmul.f32 %v10288_v39, %v10280_v24  ;;  %9944 = vmatpush3.msra.mxu1 %v1576_v46 }
 0xada   :  { %9945 = vmatprep.subr.mxu1 %v1575_v48 }
 0xadb   :  { %9940 = vmatprep.mubr.msk.f32.mxu1 %vm304_vm2, %v1399_v40  ;;  %9946 = vmatpush3.msra.mxu1 %v1575_v48  ;;  %v1534_v63 = vpop.permute.xlu1 %1533 }
 0xadc   :  { %v10290_v43 = vpop.eup %10289  ;;  %9947 = vmatprep.subr.mxu1 %v1574_v49 }
 0xadd   :  { %v1401_v45 = vmul.f32 %v10290_v43, %v10282_v27  ;;  %9948 = vmatpush3.msra.mxu1 %v1574_v49 }
 0xade   :  { %9949 = vmatprep.subr.mxu1 %v1573_v50 }
 0xadf   :  { %9941 = vmatmul.mubr.msk.f32.gmra.mxu1 %vm304_vm2, %v1401_v45 }
 0xae0   :  { %9950 = vmatpush3.msra.mxu1 %v1573_v50 }
 0xb98   :  { %v9939_v52 = vpop.f32.mrf.mxu1 }
 0xb99   :  { %1549 = vrot.lane.b32.xlu1 %v9939_v52, %s14486_s30 }
 0xb9a   :  { %v1492_v53 = vpop.f32.mrf.mxu1 }
 0xb9b   :  { %1547 = vrot.lane.b32.xlu0 %v1492_v53, %s14486_s30 }
 0xb9d   :  { %1521 = vrot.lane.b32.xlu1 %v10869_v14, %s14490_s28 }
 0xb9f   :  { %1519 = vrot.lane.b32.xlu0 %v10871_v17, %s14490_s28  ;;  %v9942_v54 = vpop.f32.mrf.mxu1  ;;  %v1559_v17 = vsel %vm414_vm5, %v10807_v57, %v1516_v61  ;;  %v1805_v61 = vld [vmem:[%s14547_s7 + $0x198] sm:$0xff]  ;;  %s14563_s28 = smov 56  }
 0xba0   :  { %2028 = vmatprep.subr.mxu1 %v1805_v61 }
 0xba1   :  { %1537 = vrot.lane.b32.xlu1 %v10922_v41, %s14488_s10  ;;  %v1502_v55 = vpop.f32.mrf.mxu1  ;;  %v1560_v41 = vsel %vm414_vm5, %v10805_v56, %v1518_v62  ;;  %v1802_v62 = vld [vmem:[%s14547_s7 + $0x180] sm:$0xff] }
 0xba2   :  { %v1565_v44 = vsel %vm1563_vm6, %v1560_v41, %v1534_v63  ;;  %v1804_v63 = vld [vmem:[%s14547_s7 + $0x190] sm:$0xff] }
 0xba3   :  { %1535 = vrot.lane.b32.xlu0 %v10924_v42, %s14488_s10  ;;  %v1564_v42 = vsel %vm1563_vm6, %v1559_v17, %v1532_v0  ;;  %v1787_v0 = vld [vmem:[%s14547_s7 + $0x108] sm:$0xff]  ;;  %v1786_v17 = vld [vmem:[%s14547_s7 + $0x100] sm:$0xff]  ;;  %v1788_v41 = vld [vmem:[%s14547_s7 + $0x110] sm:$0xff]  ;;  %s14572_s10 = smov 16  }
 0xba5   :  { %1553 = vrot.lane.b32.xlu1 %v9942_v54, %s14486_s30 }
 0xba7   :  { %1551 = vrot.lane.b32.xlu0 %v1502_v55, %s14486_s30  ;;  %v1803_v55 = vld [vmem:[%s14547_s7 + $0x188] sm:$0xff]  ;;  %s14570_s30 = smov 40  }
 0xba8   :  { %1939 = vmatprep.subr.mxu0 %v1803_v55 }
 0xba9   :  { %1940 = vmatpush1.msra.mxu0 %v1802_v62 }
 0xbaa   :  { %1941 = vmatprep.subr.mxu0 %v1787_v0  ;;  %v1795_v0 = vld [vmem:[%s14547_s7 + $0x148] sm:$0xff] }
 0xbab   :  { %1942 = vmatpush1.msra.mxu0 %v1786_v17  ;;  %v1794_v17 = vld [vmem:[%s14547_s7 + $0x140] sm:$0xff] }
 0xc0b   :  { %v1550_v14 = vpop.permute.xlu1 %1549 }
 0xc0c   :  { %v1570_v2 = vsel %vm1568_vm7, %v1565_v44, %v1550_v14  ;;  %v1789_v14 = vld [vmem:[%s14547_s7 + $0x118] sm:$0xff]  ;;  %v1770_v44 = vld [vmem:[%s14547_s7 + $0x80] sm:$0xff] }
 0xc0d   :  { %v1548_v1 = vpop.permute.xlu0 %1547 }
 0xc0e   :  { %v1569_v47 = vsel %vm1568_vm7, %v1564_v42, %v1548_v1  ;;  %v1771_v42 = vld [vmem:[%s14547_s7 + $0x88] sm:$0xff]  ;;  %v1773_v1 = vld [vmem:[%s14547_s7 + $0x98] sm:$0xff] }
 0xc0f   :  { %v1522_v3 = vpop.permute.xlu1 %1521  ;;  %9951 = vmatprep.mubr.msk.f32.mxu1 %vm304_vm2, %v1569_v47  ;;  %1943 = vmatprep.subr.mxu0 %v1771_v42  ;;  %v1772_v47 = vld [vmem:[%s14547_s7 + $0x90] sm:$0xff]  ;;  %v1779_v42 = vld [vmem:[%s14547_s7 + $0xc8] sm:$0xff] }
 0xc10   :  { %9952 = vmatmul.mubr.msk.f32.vlgmr.msra.gmra.mxu1 %vm304_vm2, %v1570_v2  ;;  %v1562_v6 = vsel %vm414_vm5, %v10809_v58, %v1522_v3  ;;  %1944 = vmatpush1.msra.mxu0 %v1770_v44  ;;  %v1755_v2 = vld [vmem:[%s14547_s7 + $0x8] sm:$0xff]  ;;  %v1757_v3 = vld [vmem:[%s14547_s7 + $0x18] sm:$0xff]  ;;  %v1778_v44 = vld [vmem:[%s14547_s7 + $0xc0] sm:$0xff] }
 0xc11   :  { %v1520_v4 = vpop.permute.xlu0 %1519  ;;  %2029 = vmatpush1.msra.mxu1 %v1804_v63  ;;  %1945 = vmatprep.subr.mxu0 %v1755_v2  ;;  %v1812_v63 = vld [vmem:[%s14547_s7 + $0x1d0] sm:$0xff]  ;;  %v1763_v2 = vld [vmem:[%s14547_s7 + $0x48] sm:$0xff] }
 0xc12   :  { %v1561_v56 = vsel %vm414_vm5, %v10811_v60, %v1520_v4  ;;  %v8664_v60 = vld [vmem:[%s14546_s0] ss:$0 sm:$0xff]  ;;  %2030 = vmatprep.subr.mxu1 %v1789_v14  ;;  %v1797_v14 = vld [vmem:[%s14547_s7 + $0x158] sm:$0xff] }
 0xc13   :  { %v1538_v57 = vpop.permute.xlu1 %1537  ;;  %2031 = vmatpush1.msra.mxu1 %v1788_v41  ;;  %v1754_v4 = vld [vmem:[%s14547_s7] sm:$0xff]  ;;  %v1796_v41 = vld [vmem:[%s14547_s7 + $0x150] sm:$0xff] }
 0xc14   :  { %v1567_v8 = vsel %vm1563_vm6, %v1562_v6, %v1538_v57  ;;  %2032 = vmatprep.subr.mxu1 %v1773_v1  ;;  %v1756_v57 = vld [vmem:[%s14547_s7 + $0x10] sm:$0xff]  ;;  %1946 = vmatpush1.msra.mxu0 %v1754_v4  ;;  %v1781_v1 = vld [vmem:[%s14547_s7 + $0xd8] sm:$0xff]  ;;  %v1762_v4 = vld [vmem:[%s14547_s7 + $0x40] sm:$0xff] }
 0xc15   :  { %v1536_v59 = vpop.permute.xlu0 %1535  ;;  %2033 = vmatpush1.msra.mxu1 %v1772_v47  ;;  %v1780_v47 = vld [vmem:[%s14547_s7 + $0xd0] sm:$0xff] }
 0xc16   :  { %v1566_v51 = vsel %vm1563_vm6, %v1561_v56, %v1536_v59  ;;  %2034 = vmatprep.subr.mxu1 %v1757_v3  ;;  %v1807_v59 = vld [vmem:[%s14547_s7 + $0x1a8] sm:$0xff]  ;;  %v1809_v56 = vld [vmem:[%s14547_s7 + $0x1b8] sm:$0xff] }
 0xc17   :  { %v1554_v5 = vpop.permute.xlu1 %1553  ;;  %2035 = vmatpush1.msra.mxu1 %v1756_v57  ;;  %2117 = vmatprep.subr.mxu0 %v1807_v59  ;;  %v1765_v3 = vld [vmem:[%s14547_s7 + $0x58] sm:$0xff]  ;;  %v1764_v57 = vld [vmem:[%s14547_s7 + $0x50] sm:$0xff]  ;;  %v1815_v59 = vld [vmem:[%s14547_s7 + $0x1e8] sm:$0xff] }
 0xc18   :  { %v1572_v30 = vsel %vm1568_vm7, %v1567_v8, %v1554_v5  ;;  %2206 = vmatprep.subr.mxu1 %v1809_v56  ;;  %v1817_v56 = vld [vmem:[%s14547_s7 + $0x1f8] sm:$0xff] }
 0xc19   :  { %v1552_v7 = vpop.permute.xlu0 %1551 }
 0xc1a   :  { %v1571_v9 = vsel %vm1568_vm7, %v1566_v51, %v1552_v7 }
 0xc1b   :  { %9954 = vmatprep.mubr.msk.f32.mxu1 %vm304_vm2, %v1571_v9 }
 0xc1c   :  { %9955 = vmatmul.mubr.msk.f32.gmra.mxu1 %vm304_vm2, %v1572_v30 }
 0xc1d   :  { %2068 = vmatprep.mubr.f32.mxu1 %v14494_v10 }
 0xcd0   :  { %v9953_v58 = vpop.f32.mrf.mxu1 }
 0xcd1   :  { %v1666_v11 = vadd.f32 %v9953_v58, %v8664_v60 }
 0xcd2   :  { %v1660_v18 = vpop.f32.mrf.mxu1 }
 0xcd3   :  { %v1661_v32 = vadd.f32 %v8664_v60, %v1660_v18  ;;  %v1680_v21 = vadd.f32 %v1666_v11, %v10662_v16 }
 0xcd5   :  { %v1688_v22 = vsel %vm304_vm2, %v1680_v21, 0.0  ;;  %v1679_v23 = vadd.f32 %v1661_v32, %v10660_v15 }
 0xcd6   :  { %1689 = vadd.xlane.f32.xlu1 %v1688_v22 }
 0xcd7   :  { %v1685_v24 = vsel %vm304_vm2, %v1679_v23, 0.0 }
 0xcd8   :  { %1686 = vadd.xlane.f32.xlu0 %v1685_v24 }
 0xcdc   :  { %v9956_v25 = vpop.f32.mrf.mxu1 }
 0xcdd   :  { %v1676_v29 = vadd.f32 %v9956_v25, %v8664_v60  ;;  %v8669_v25 = vld [vmem:[%s14548_s27] ss:$0 sm:$0xff] }
 0xcde   :  { %v1670_v27 = vpop.f32.mrf.mxu1 }
 0xcdf   :  { %v1671_v31 = vadd.f32 %v8664_v60, %v1670_v27  ;;  %v1682_v13 = vadd.f32 %v1676_v29, %v10670_v20  ;;  %v8670_v29 = vld [vmem:[%s14440_s12] ss:$0 sm:$0xff] }
 0xce1   :  { %v1681_v26 = vadd.f32 %v1671_v31, %v10668_v19  ;;  %v1694_v16 = vsel %vm304_vm2, %v1682_v13, 0.0 }
 0xce3   :  { %v1691_v34 = vsel %vm304_vm2, %v1681_v26, 0.0 }
 0xce4   :  { %1692 = vadd.xlane.f32.xlu0 %v1691_v34  ;;  %v1806_v34 = vld [vmem:[%s14547_s7 + $0x1a0] sm:$0xff] }
 0xce8   :  { %1695 = vadd.xlane.f32.xlu0 %v1694_v16  ;;  %v1791_v16 = vld [vmem:[%s14547_s7 + $0x128] sm:$0xff] }
 0xd5f   :  { %v1690_v35 = vpop.xlane.xlu1 %1689 }
 0xd60   :  { %v1699_v15 = vmul.f32 0.03125, %v1690_v35  ;;  %v1793_v35 = vld [vmem:[%s14547_s7 + $0x138] sm:$0xff] }
 0xd61   :  { %v1687_v12 = vpop.xlane.xlu0 %1686 }
 0xd62   :  { %v11014_v28 = vsub.f32 %v1680_v21, %v1699_v15  ;;  %v1698_v36 = vmul.f32 0.03125, %v1687_v12  ;;  %v1790_v12 = vld [vmem:[%s14547_s7 + $0x120] sm:$0xff] }
 0xd64   :  { %v11016_v37 = vsub.f32 %v1679_v23, %v1698_v36  ;;  %v1707_v38 = vmul.f32 %v11014_v28, %v11014_v28  ;;  %v1775_v36 = vld [vmem:[%s14547_s7 + $0xa8] sm:$0xff] }
 0xd66   :  { %v1713_v19 = vsel %vm304_vm2, %v1707_v38, 0.0  ;;  %v1706_v20 = vmul.f32 %v11016_v37, %v11016_v37 }
 0xd67   :  { %1714 = vadd.xlane.f32.xlu0 %v1713_v19  ;;  %v1774_v19 = vld [vmem:[%s14547_s7 + $0xa0] sm:$0xff] }
 0xd68   :  { %v1710_v39 = vsel %vm304_vm2, %v1706_v20, 0.0  ;;  %v1776_v20 = vld [vmem:[%s14547_s7 + $0xb0] sm:$0xff] }
 0xd69   :  { %1711 = vadd.xlane.f32.xlu1 %v1710_v39 }
 0xd6d   :  { %v1693_v40 = vpop.xlane.xlu0 %1692 }
 0xd6e   :  { %v1700_v43 = vmul.f32 0.03125, %v1693_v40  ;;  %v1759_v40 = vld [vmem:[%s14547_s7 + $0x28] sm:$0xff] }
 0xd70   :  { %v11024_v45 = vsub.f32 %v1681_v26, %v1700_v43  ;;  %v1761_v43 = vld [vmem:[%s14547_s7 + $0x38] sm:$0xff] }
 0xd71   :  { %v1696_v46 = vpop.xlane.xlu0 %1695 }
 0xd72   :  { %v1701_v48 = vmul.f32 0.03125, %v1696_v46  ;;  %v1708_v49 = vmul.f32 %v11024_v45, %v11024_v45  ;;  %v1758_v46 = vld [vmem:[%s14547_s7 + $0x20] sm:$0xff] }
 0xd74   :  { %v11028_v50 = vsub.f32 %v1682_v13, %v1701_v48  ;;  %v1716_v52 = vsel %vm304_vm2, %v1708_v49, 0.0  ;;  %v1808_v13 = vld [vmem:[%s14547_s7 + $0x1b0] sm:$0xff]  ;;  %v1811_v49 = vld [vmem:[%s14547_s7 + $0x1c8] sm:$0xff] }
 0xd75   :  { %1717 = vadd.xlane.f32.xlu1 %v1716_v52  ;;  %v1813_v52 = vld [vmem:[%s14547_s7 + $0x1d8] sm:$0xff] }
 0xd76   :  { %v1709_v53 = vmul.f32 %v11028_v50, %v11028_v50 }
 0xd78   :  { %v1719_v54 = vsel %vm304_vm2, %v1709_v53, 0.0 }
 0xd79   :  { %1720 = vadd.xlane.f32.xlu0 %v1719_v54 }
 0xdf0   :  { %v1715_v5 = vpop.xlane.xlu0 %1714 }
 0xdf1   :  { %v1723_v6 = vmul.f32 0.03125, %v1715_v5  ;;  %v1814_v5 = vld [vmem:[%s14547_s7 + $0x1e0] sm:$0xff] }
 0xdf2   :  { %v1712_v51 = vpop.xlane.xlu1 %1711 }
 0xdf3   :  { %v1727_v7 = vadd.f32 1e-05, %v1723_v6  ;;  %v1722_v8 = vmul.f32 0.03125, %v1712_v51  ;;  %v1816_v6 = vld [vmem:[%s14547_s7 + $0x1f0] sm:$0xff]  ;;  %v1799_v51 = vld [vmem:[%s14547_s7 + $0x168] sm:$0xff] }
 0xdf5   :  { %10291 = vrsqrt.f32 %v1727_v7  ;;  %v1726_v9 = vadd.f32 1e-05, %v1722_v8  ;;  %v1801_v7 = vld [vmem:[%s14547_s7 + $0x178] sm:$0xff]  ;;  %v1798_v8 = vld [vmem:[%s14547_s7 + $0x160] sm:$0xff] }
 0xdf7   :  { %10293 = vrsqrt.f32 %v1726_v9  ;;  %v1800_v9 = vld [vmem:[%s14547_s7 + $0x170] sm:$0xff] }
 0xdfe   :  { %v1718_v30 = vpop.xlane.xlu1 %1717 }
 0xdff   :  { %v1724_v60 = vmul.f32 0.03125, %v1718_v30  ;;  %v1783_v30 = vld [vmem:[%s14547_s7 + $0xe8] sm:$0xff] }
 0xe01   :  { %v1728_v58 = vadd.f32 1e-05, %v1724_v60  ;;  %v1785_v60 = vld [vmem:[%s14547_s7 + $0xf8] sm:$0xff] }
 0xe02   :  { %v10292_v11 = vpop.eup %10291  ;;  %v1721_v18 = vpop.xlane.xlu0 %1720 }
 0xe03   :  { %10295 = vrsqrt.f32 %v1728_v58  ;;  %v1725_v32 = vmul.f32 0.03125, %v1721_v18  ;;  %v1735_v22 = vmul.f32 %v10292_v11, %v11014_v28  ;;  %v1792_v28 = vld [vmem:[%s14547_s7 + $0x130] sm:$0xff]  ;;  %v1782_v58 = vld [vmem:[%s14547_s7 + $0xe0] sm:$0xff]  ;;  %v1767_v18 = vld [vmem:[%s14547_s7 + $0x68] sm:$0xff] }
 0xe04   :  { %v10294_v21 = vpop.eup %10293  ;;  %v1784_v11 = vld [vmem:[%s14547_s7 + $0xf0] sm:$0xff] }
 0xe05   :  { %v1734_v23 = vmul.f32 %v10294_v21, %v11016_v37  ;;  %v1729_v24 = vadd.f32 1e-05, %v1725_v32  ;;  %v1743_v31 = vmul.f32 %v8669_v25, %v1735_v22  ;;  %v1777_v37 = vld [vmem:[%s14547_s7 + $0xb8] sm:$0xff]  ;;  %v1766_v21 = vld [vmem:[%s14547_s7 + $0x60] sm:$0xff]  ;;  %v1768_v22 = vld [vmem:[%s14547_s7 + $0x70] sm:$0xff] }
 0xe06   :  { %v1769_v32 = vld [vmem:[%s14547_s7 + $0x78] sm:$0xff] }
 0xe07   :  { %v1742_v27 = vmul.f32 %v8669_v25, %v1734_v23  ;;  %10297 = vrsqrt.f32 %v1729_v24  ;;  %v11116_v15 = vadd.f32 %v8670_v29, %v1743_v31  ;;  %v2722_v23 = vld [vmem:[%s14441_s15 + $0xf8] sm:$0xff]  ;;  %v2753_v31 = vld [vmem:[%s14441_s15 + $0x1f0] sm:$0xff] }
 0xe08   :  { %v2754_v24 = vld [vmem:[%s14441_s15 + $0x1f8] sm:$0xff] }
 0xe09   :  { %v11096_v26 = vadd.f32 %v8670_v29, %v1742_v27  ;;  %v2738_v27 = vld [vmem:[%s14441_s15 + $0x178] sm:$0xff] }
 0xe0b   :  { %8672 = vmatmul.mubr.msk.f32.vlgmr.msra.gmra.mxu0 %vm304_vm2, %v11096_v26  ;;  %8676 = vmatmul.mubr.msk.f32.vlgmr.msra.gmra.mxu1 %vm304_vm2, %v11096_v26 }
 0xe0c   :  { %1985 = vmatprep.mubr.f32.mxu0 %v14494_v10  ;;  %2074 = vmatprep.mubr.f32.mxu1 %v14494_v10 }
 0xe0d   :  { %2118 = vmatpush1.msra.mxu0 %v1806_v34  ;;  %2207 = vmatpush1.msra.mxu1 %v1808_v13  ;;  %v2705_v34 = vld [vmem:[%s14441_s15 + $0x70] sm:$0xff] }
 0xe0e   :  { %2119 = vmatprep.subr.mxu0 %v1791_v16  ;;  %2208 = vmatprep.subr.mxu1 %v1793_v35  ;;  %v2737_v13 = vld [vmem:[%s14441_s15 + $0x170] sm:$0xff]  ;;  %v2720_v16 = vld [vmem:[%s14441_s15 + $0xe8] sm:$0xff] }
 0xe0f   :  { %8673 = vmatmul.mubr.msk.f32.gmra.mxu0 %vm304_vm2, %v11116_v15  ;;  %8677 = vmatmul.mubr.msk.f32.gmra.mxu1 %vm304_vm2, %v11116_v15  ;;  %v2752_v35 = vld [vmem:[%s14441_s15 + $0x1e8] sm:$0xff] }
 0xe10   :  { %v10296_v38 = vpop.eup %10295  ;;  %1991 = vmatprep.mubr.f32.mxu0 %v14494_v10  ;;  %2080 = vmatprep.mubr.f32.mxu1 %v14494_v10 }
 0xe11   :  { %v1736_v39 = vmul.f32 %v10296_v38, %v11024_v45  ;;  %2120 = vmatpush1.msra.mxu0 %v1790_v12  ;;  %2209 = vmatpush1.msra.mxu1 %v1792_v28  ;;  %v1760_v45 = vld [vmem:[%s14547_s7 + $0x30] sm:$0xff]  ;;  %v2704_v12 = vld [vmem:[%s14441_s15 + $0x68] sm:$0xff]  ;;  %v2703_v38 = vld [vmem:[%s14441_s15 + $0x60] sm:$0xff] }
 0xe12   :  { %2121 = vmatprep.subr.mxu0 %v1775_v36  ;;  %2210 = vmatprep.subr.mxu1 %v1777_v37  ;;  %v2736_v28 = vld [vmem:[%s14441_s15 + $0x168] sm:$0xff]  ;;  %v2719_v36 = vld [vmem:[%s14441_s15 + $0xe0] sm:$0xff] }
 0xe13   :  { %v1744_v48 = vmul.f32 %v8669_v25, %v1736_v39  ;;  %2122 = vmatpush1.msra.mxu0 %v1774_v19  ;;  %2211 = vmatpush1.msra.mxu1 %v1776_v20  ;;  %v2751_v37 = vld [vmem:[%s14441_s15 + $0x1e0] sm:$0xff]  ;;  %v2718_v20 = vld [vmem:[%s14441_s15 + $0xd8] sm:$0xff] }
 0xe14   :  { %v10298_v53 = vpop.eup %10297  ;;  %2123 = vmatprep.subr.mxu0 %v1759_v40  ;;  %2212 = vmatprep.subr.mxu1 %v1761_v43  ;;  %v2735_v19 = vld [vmem:[%s14441_s15 + $0x160] sm:$0xff]  ;;  %v2750_v39 = vld [vmem:[%s14441_s15 + $0x1d8] sm:$0xff] }
 0xe15   :  { %v11161_v54 = vadd.f32 %v8670_v29, %v1744_v48  ;;  %v1737_v55 = vmul.f32 %v10298_v53, %v11028_v50  ;;  %2124 = vmatpush1.msra.mxu0 %v1758_v46  ;;  %2213 = vmatpush1.msra.mxu1 %v1760_v45  ;;  %v1810_v50 = vld [vmem:[%s14547_s7 + $0x1c0] sm:$0xff]  ;;  %v2702_v40 = vld [vmem:[%s14441_s15 + $0x58] sm:$0xff]  ;;  %v2717_v46 = vld [vmem:[%s14441_s15 + $0xd0] sm:$0xff] }
 0xe16   :  { %2295 = vmatprep.subr.mxu0 %v1811_v49  ;;  %2384 = vmatprep.subr.mxu1 %v1813_v52  ;;  %v2734_v43 = vld [vmem:[%s14441_s15 + $0x158] sm:$0xff]  ;;  %v2749_v45 = vld [vmem:[%s14441_s15 + $0x1d0] sm:$0xff]  ;;  %v2716_v52 = vld [vmem:[%s14441_s15 + $0xc8] sm:$0xff] }
 0xe17   :  { %v1745_v61 = vmul.f32 %v8669_v25, %v1737_v55  ;;  %8674 = vmatmul.mubr.msk.f32.gmra.mxu0 %vm304_vm2, %v11161_v54  ;;  %8678 = vmatmul.mubr.msk.f32.gmra.mxu1 %vm304_vm2, %v11161_v54  ;;  %v2706_v25 = vld [vmem:[%s14441_s15 + $0x78] sm:$0xff]  ;;  %v2701_v48 = vld [vmem:[%s14441_s15 + $0x50] sm:$0xff]  ;;  %v2748_v53 = vld [vmem:[%s14441_s15 + $0x1c8] sm:$0xff] }
 0xe18   :  { %1997 = vmatprep.mubr.f32.mxu0 %v14494_v10  ;;  %2086 = vmatprep.mubr.f32.mxu1 %v14494_v10  ;;  %v2733_v49 = vld [vmem:[%s14441_s15 + $0x150] sm:$0xff]  ;;  %v2700_v55 = vld [vmem:[%s14441_s15 + $0x48] sm:$0xff] }
 0xe19   :  { %v11170_v62 = vadd.f32 %v8670_v29, %v1745_v61  ;;  %v2721_v29 = vld [vmem:[%s14441_s15 + $0xf0] sm:$0xff]  ;;  %v2732_v61 = vld [vmem:[%s14441_s15 + $0x148] sm:$0xff] }
 0xe1b   :  { %14549 = vst [vmem:[#allocation4_spill] sm:$0xff] %v11170_v62  ;;  %8675 = vmatmul.mubr.msk.f32.gmra.mxu0 %vm304_vm2, %v11170_v62  ;;  %8679 = vmatmul.mubr.msk.f32.gmra.mxu1 %vm304_vm2, %v11170_v62 }
 0xe1c   :  { %2157 = vmatprep.mubr.f32.mxu0 %v14494_v10  ;;  %2246 = vmatprep.mubr.f32.mxu1 %v14494_v10 }
 0xe1f   :  { %8680 = vmatmul.mubr.msk.f32.vlgmr.msra.gmra.mxu0 %vm304_vm2, %v11096_v26  ;;  %8684 = vmatmul.mubr.msk.f32.vlgmr.msra.gmra.mxu1 %vm304_vm2, %v11096_v26 }
 0xe20   :  { %2163 = vmatprep.mubr.f32.mxu0 %v14494_v10  ;;  %2252 = vmatprep.mubr.f32.mxu1 %v14494_v10 }
 0xe21   :  { %2296 = vmatpush1.msra.mxu0 %v1810_v50  ;;  %2385 = vmatpush1.msra.mxu1 %v1812_v63  ;;  %v2715_v50 = vld [vmem:[%s14441_s15 + $0xc0] sm:$0xff] }
 0xe22   :  { %2297 = vmatprep.subr.mxu0 %v1795_v0  ;;  %2386 = vmatprep.subr.mxu1 %v1797_v14  ;;  %v2747_v63 = vld [vmem:[%s14441_s15 + $0x1c0] sm:$0xff] }
 0xe23   :  { %8681 = vmatmul.mubr.msk.f32.gmra.mxu0 %vm304_vm2, %v11116_v15  ;;  %8685 = vmatmul.mubr.msk.f32.gmra.mxu1 %vm304_vm2, %v11116_v15  ;;  %v2699_v0 = vld [vmem:[%s14441_s15 + $0x40] sm:$0xff] }
 0xe24   :  { %2169 = vmatprep.mubr.f32.mxu0 %v14494_v10  ;;  %2258 = vmatprep.mubr.f32.mxu1 %v14494_v10  ;;  %v2731_v14 = vld [vmem:[%s14441_s15 + $0x140] sm:$0xff] }
 0xe25   :  { %2298 = vmatpush1.msra.mxu0 %v1794_v17  ;;  %2387 = vmatpush1.msra.mxu1 %v1796_v41  ;;  %v2714_v17 = vld [vmem:[%s14441_s15 + $0xb8] sm:$0xff] }
 0xe26   :  { %2299 = vmatprep.subr.mxu0 %v1779_v42  ;;  %2388 = vmatprep.subr.mxu1 %v1781_v1  ;;  %v2746_v41 = vld [vmem:[%s14441_s15 + $0x1b8] sm:$0xff] }
 0xe27   :  { %8682 = vmatmul.mubr.msk.f32.gmra.mxu0 %vm304_vm2, %v11161_v54  ;;  %8686 = vmatmul.mubr.msk.f32.gmra.mxu1 %vm304_vm2, %v11161_v54  ;;  %v2698_v42 = vld [vmem:[%s14441_s15 + $0x38] sm:$0xff] }
 0xe28   :  { %2175 = vmatprep.mubr.f32.mxu0 %v14494_v10  ;;  %2264 = vmatprep.mubr.f32.mxu1 %v14494_v10  ;;  %v2730_v1 = vld [vmem:[%s14441_s15 + $0x138] sm:$0xff] }
 0xe29   :  { %2300 = vmatpush1.msra.mxu0 %v1778_v44  ;;  %2389 = vmatpush1.msra.mxu1 %v1780_v47  ;;  %v2713_v44 = vld [vmem:[%s14441_s15 + $0xb0] sm:$0xff] }
 0xe2a   :  { %2301 = vmatprep.subr.mxu0 %v1763_v2  ;;  %2390 = vmatprep.subr.mxu1 %v1765_v3  ;;  %v2745_v47 = vld [vmem:[%s14441_s15 + $0x1b0] sm:$0xff] }
 0xe2b   :  { %8683 = vmatmul.mubr.msk.f32.gmra.mxu0 %vm304_vm2, %v11170_v62  ;;  %8687 = vmatmul.mubr.msk.f32.gmra.mxu1 %vm304_vm2, %v11170_v62  ;;  %v2697_v2 = vld [vmem:[%s14441_s15 + $0x30] sm:$0xff] }
 0xe2c   :  { %2302 = vmatpush1.msra.mxu0 %v1762_v4  ;;  %2335 = vmatprep.mubr.f32.mxu0 %v14494_v10  ;;  %v2729_v3 = vld [vmem:[%s14441_s15 + $0x130] sm:$0xff]  ;;  %v2712_v4 = vld [vmem:[%s14441_s15 + $0xa8] sm:$0xff] }
 0xe2d   :  { %2391 = vmatpush1.msra.mxu1 %v1764_v57  ;;  %2424 = vmatprep.mubr.f32.mxu1 %v14494_v10  ;;  %v2744_v57 = vld [vmem:[%s14441_s15 + $0x1a8] sm:$0xff] }
 0xe2e   :  { %2473 = vmatprep.subr.mxu0 %v1815_v59  ;;  %2562 = vmatprep.subr.mxu1 %v1817_v56  ;;  %v2696_v59 = vld [vmem:[%s14441_s15 + $0x28] sm:$0xff] }
 0xe2f   :  { %8688 = vmatmul.mubr.msk.f32.vlgmr.msra.gmra.mxu0 %vm304_vm2, %v11096_v26  ;;  %8692 = vmatmul.mubr.msk.f32.vlgmr.msra.gmra.mxu1 %vm304_vm2, %v11096_v26  ;;  %v2728_v56 = vld [vmem:[%s14441_s15 + $0x128] sm:$0xff] }
 0xe30   :  { %2341 = vmatprep.mubr.f32.mxu0 %v14494_v10  ;;  %2430 = vmatprep.mubr.f32.mxu1 %v14494_v10 }
 0xe31   :  { %2474 = vmatpush1.msra.mxu0 %v1814_v5  ;;  %2563 = vmatpush1.msra.mxu1 %v1816_v6  ;;  %v2711_v5 = vld [vmem:[%s14441_s15 + $0xa0] sm:$0xff] }
 0xe32   :  { %2475 = vmatprep.subr.mxu0 %v1799_v51  ;;  %2564 = vmatprep.subr.mxu1 %v1801_v7  ;;  %v2743_v6 = vld [vmem:[%s14441_s15 + $0x1a0] sm:$0xff] }
 0xe33   :  { %8689 = vmatmul.mubr.msk.f32.gmra.mxu0 %vm304_vm2, %v11116_v15  ;;  %8693 = vmatmul.mubr.msk.f32.gmra.mxu1 %vm304_vm2, %v11116_v15  ;;  %v2695_v51 = vld [vmem:[%s14441_s15 + $0x20] sm:$0xff] }
 0xe34   :  { %2347 = vmatprep.mubr.f32.mxu0 %v14494_v10  ;;  %2436 = vmatprep.mubr.f32.mxu1 %v14494_v10  ;;  %v2727_v7 = vld [vmem:[%s14441_s15 + $0x120] sm:$0xff] }
 0xe35   :  { %2476 = vmatpush1.msra.mxu0 %v1798_v8  ;;  %2565 = vmatpush1.msra.mxu1 %v1800_v9  ;;  %v2710_v8 = vld [vmem:[%s14441_s15 + $0x98] sm:$0xff] }
 0xe36   :  { %2477 = vmatprep.subr.mxu0 %v1783_v30  ;;  %2566 = vmatprep.subr.mxu1 %v1785_v60  ;;  %v2742_v9 = vld [vmem:[%s14441_s15 + $0x198] sm:$0xff] }
 0xe37   :  { %8690 = vmatmul.mubr.msk.f32.gmra.mxu0 %vm304_vm2, %v11161_v54  ;;  %8694 = vmatmul.mubr.msk.f32.gmra.mxu1 %vm304_vm2, %v11161_v54  ;;  %v2694_v30 = vld [vmem:[%s14441_s15 + $0x18] sm:$0xff] }
 0xe38   :  { %2353 = vmatprep.mubr.f32.mxu0 %v14494_v10  ;;  %2442 = vmatprep.mubr.f32.mxu1 %v14494_v10  ;;  %v2726_v60 = vld [vmem:[%s14441_s15 + $0x118] sm:$0xff] }
 0xe39   :  { %2478 = vmatpush1.msra.mxu0 %v1782_v58  ;;  %2567 = vmatpush1.msra.mxu1 %v1784_v11  ;;  %v2709_v58 = vld [vmem:[%s14441_s15 + $0x90] sm:$0xff] }
 0xe3a   :  { %2479 = vmatprep.subr.mxu0 %v1767_v18  ;;  %2568 = vmatprep.subr.mxu1 %v1769_v32  ;;  %v2741_v11 = vld [vmem:[%s14441_s15 + $0x190] sm:$0xff] }
 0xe3b   :  { %8691 = vmatmul.mubr.msk.f32.gmra.mxu0 %vm304_vm2, %v11170_v62  ;;  %8695 = vmatmul.mubr.msk.f32.gmra.mxu1 %vm304_vm2, %v11170_v62  ;;  %v2693_v18 = vld [vmem:[%s14441_s15 + $0x10] sm:$0xff] }
 0xe3c   :  { %2480 = vmatpush1.msra.mxu0 %v1766_v21  ;;  %2513 = vmatprep.mubr.f32.mxu0 %v14494_v10  ;;  %v2725_v32 = vld [vmem:[%s14441_s15 + $0x110] sm:$0xff]  ;;  %v2708_v21 = vld [vmem:[%s14441_s15 + $0x88] sm:$0xff] }
 0xe3d   :  { %2569 = vmatpush1.msra.mxu1 %v1768_v22  ;;  %2602 = vmatprep.mubr.f32.mxu1 %v14494_v10  ;;  %v2740_v22 = vld [vmem:[%s14441_s15 + $0x188] sm:$0xff] }
 0xe3e   :  { %8948 = vmatprep.subr.mxu0 %v2722_v23  ;;  %8992 = vmatprep.subr.mxu1 %v2754_v24  ;;  %v2692_v23 = vld [vmem:[%s14441_s15 + $0x8] sm:$0xff] }
 0xe3f   :  { %8696 = vmatmul.mubr.msk.f32.vlgmr.msra.gmra.mxu0 %vm304_vm2, %v11096_v26  ;;  %8700 = vmatmul.mubr.msk.f32.vlgmr.msra.gmra.mxu1 %vm304_vm2, %v11096_v26  ;;  %v2724_v24 = vld [vmem:[%s14441_s15 + $0x108] sm:$0xff] }
 0xe40   :  { %2519 = vmatprep.mubr.f32.mxu0 %v14494_v10  ;;  %2608 = vmatprep.mubr.f32.mxu1 %v14494_v10 }
 0xe41   :  { %8949 = vmatpush3.msra.mxu0 %v2706_v25  ;;  %8993 = vmatpush3.msra.mxu1 %v2738_v27  ;;  %v2707_v25 = vld [vmem:[%s14441_s15 + $0x80] sm:$0xff] }
 0xe42   :  { %8950 = vmatprep.subr.mxu0 %v2721_v29  ;;  %8994 = vmatprep.subr.mxu1 %v2753_v31  ;;  %v2739_v27 = vld [vmem:[%s14441_s15 + $0x180] sm:$0xff] }
 0xe43   :  { %8697 = vmatmul.mubr.msk.f32.gmra.mxu0 %vm304_vm2, %v11116_v15  ;;  %8701 = vmatmul.mubr.msk.f32.gmra.mxu1 %vm304_vm2, %v11116_v15  ;;  %v2691_v29 = vld [vmem:[%s14441_s15] sm:$0xff] }
 0xe44   :  { %2525 = vmatprep.mubr.f32.mxu0 %v14494_v10  ;;  %2614 = vmatprep.mubr.f32.mxu1 %v14494_v10  ;;  %v2723_v31 = vld [vmem:[%s14441_s15 + $0x100] sm:$0xff] }
 0xe45   :  { %8951 = vmatpush3.msra.mxu0 %v2705_v34  ;;  %8995 = vmatpush3.msra.mxu1 %v2737_v13  ;;  %v2786_v34 = vld [vmem:[%s14441_s15 + $0x2f8] sm:$0xff] }
 0xe46   :  { %8952 = vmatprep.subr.mxu0 %v2720_v16  ;;  %8996 = vmatprep.subr.mxu1 %v2752_v35  ;;  %v2818_v13 = vld [vmem:[%s14441_s15 + $0x3f8] sm:$0xff]  ;;  %v1823_v16 = vlaneseq }
 0xe47   :  { %8698 = vmatmul.mubr.msk.f32.gmra.mxu0 %vm304_vm2, %v11161_v54  ;;  %8702 = vmatmul.mubr.msk.f32.gmra.mxu1 %vm304_vm2, %v11161_v54 }
 0xe48   :  { %2531 = vmatprep.mubr.f32.mxu0 %v14494_v10  ;;  %2620 = vmatprep.mubr.f32.mxu1 %v14494_v10  ;;  %v11536_v35 = vshrl.u32 %v1823_v16, 7 }
 0xe49   :  { %8953 = vmatpush3.msra.mxu0 %v2704_v12  ;;  %8997 = vmatpush3.msra.mxu1 %v2736_v28 }
 0xe4a   :  { %8954 = vmatprep.subr.mxu0 %v2719_v36  ;;  %8998 = vmatprep.subr.mxu1 %v2751_v37  ;;  %v11539_v12 = vsub.s32 0, %v11536_v35  ;;  %v11542_v28 = vsub.s32 2, %v11536_v35  ;;  %v11547_v36 = vld [vmem:[%s14442_s14] ss:$2 sm:$0xff]  ;;  %v11550_v37 = vsub.s32 1, %v11536_v35 }
 0xe4b   :  { %8699 = vmatmul.mubr.msk.f32.gmra.mxu0 %vm304_vm2, %v11170_v62  ;;  %8703 = vmatmul.mubr.msk.f32.gmra.mxu1 %vm304_vm2, %v11170_v62 }
 0xe4c   :  { %8955 = vmatpush3.msra.mxu0 %v2703_v38  ;;  %8999 = vmatpush3.msra.mxu1 %v2735_v19  ;;  %14550 = vst [vmem:[#allocation5_spill] sm:$0xff] %v11539_v12  ;;  %14551 = vst [vmem:[#allocation6_spill] sm:$0xff] %v11542_v28  ;;  %v11553_v38 = vsub.s32 3, %v11536_v35  ;;  %v11557_v19 = vrot.slane %v11547_v36, %v11539_v12 }
 0xe4d   :  { %8956 = vmatprep.subr.mxu0 %v2718_v20  ;;  %9000 = vmatprep.subr.mxu1 %v2750_v39  ;;  %14552 = vst [vmem:[#allocation7_spill] sm:$0xff] %v11550_v37  ;;  %v11561_v20 = vrot.slane %v11547_v36, %v11542_v28  ;;  %v11565_v39 = vrot.slane %v11547_v36, %v11550_v37 }
 0xe4e   :  { %8957 = vmatpush3.msra.mxu0 %v2702_v40  ;;  %9001 = vmatpush3.msra.mxu1 %v2734_v43  ;;  %14553 = vst [vmem:[#allocation8_spill] sm:$0xff] %v11553_v38  ;;  %v11569_v40 = vrot.slane %v11547_v36, %v11553_v38 }
 0xe4f   :  { %8958 = vmatprep.subr.mxu0 %v2717_v46  ;;  %9002 = vmatprep.subr.mxu1 %v2749_v45 }
 0xe50   :  { %8959 = vmatpush3.msra.mxu0 %v2701_v48  ;;  %9003 = vmatpush3.msra.mxu1 %v2733_v49 }
 0xe51   :  { %8960 = vmatprep.subr.mxu0 %v2716_v52  ;;  %9004 = vmatprep.subr.mxu1 %v2748_v53 }
 0xe52   :  { %8961 = vmatpush3.msra.mxu0 %v2700_v55  ;;  %9005 = vmatpush3.msra.mxu1 %v2732_v61 }
 0xe53   :  { %8962 = vmatprep.subr.mxu0 %v2715_v50  ;;  %9006 = vmatprep.subr.mxu1 %v2747_v63 }
 0xe54   :  { %8963 = vmatpush3.msra.mxu0 %v2699_v0  ;;  %9007 = vmatpush3.msra.mxu1 %v2731_v14 }
 0xe55   :  { %8964 = vmatprep.subr.mxu0 %v2714_v17  ;;  %9008 = vmatprep.subr.mxu1 %v2746_v41 }
 0xe56   :  { %8965 = vmatpush3.msra.mxu0 %v2698_v42  ;;  %9009 = vmatpush3.msra.mxu1 %v2730_v1  ;;  %v2770_v1 = vld [vmem:[%s14441_s15 + $0x278] sm:$0xff] }
 0xe57   :  { %8966 = vmatprep.subr.mxu0 %v2713_v44  ;;  %9010 = vmatprep.subr.mxu1 %v2745_v47  ;;  %v2802_v44 = vld [vmem:[%s14441_s15 + $0x378] sm:$0xff] }
 0xe58   :  { %8967 = vmatpush3.msra.mxu0 %v2697_v2  ;;  %9011 = vmatpush3.msra.mxu1 %v2729_v3  ;;  %v2785_v3 = vld [vmem:[%s14441_s15 + $0x2f0] sm:$0xff] }
 0xe59   :  { %8968 = vmatprep.subr.mxu0 %v2712_v4  ;;  %9012 = vmatprep.subr.mxu1 %v2744_v57  ;;  %v2817_v4 = vld [vmem:[%s14441_s15 + $0x3f0] sm:$0xff] }
 0xe5a   :  { %8969 = vmatpush3.msra.mxu0 %v2696_v59  ;;  %9013 = vmatpush3.msra.mxu1 %v2728_v56  ;;  %v2769_v56 = vld [vmem:[%s14441_s15 + $0x270] sm:$0xff] }
 0xe5b   :  { %8970 = vmatprep.subr.mxu0 %v2711_v5  ;;  %9014 = vmatprep.subr.mxu1 %v2743_v6  ;;  %v2801_v5 = vld [vmem:[%s14441_s15 + $0x370] sm:$0xff] }
 0xe5c   :  { %8971 = vmatpush3.msra.mxu0 %v2695_v51  ;;  %9015 = vmatpush3.msra.mxu1 %v2727_v7  ;;  %v2784_v7 = vld [vmem:[%s14441_s15 + $0x2e8] sm:$0xff] }
 0xe5d   :  { %8972 = vmatprep.subr.mxu0 %v2710_v8  ;;  %9016 = vmatprep.subr.mxu1 %v2742_v9  ;;  %v2816_v8 = vld [vmem:[%s14441_s15 + $0x3e8] sm:$0xff] }
 0xe5e   :  { %8973 = vmatpush3.msra.mxu0 %v2694_v30  ;;  %9017 = vmatpush3.msra.mxu1 %v2726_v60 }
 0xe5f   :  { %8974 = vmatprep.subr.mxu0 %v2709_v58  ;;  %9018 = vmatprep.subr.mxu1 %v2741_v11  ;;  %v2768_v11 = vld [vmem:[%s14441_s15 + $0x268] sm:$0xff] }
 0xe60   :  { %8975 = vmatpush3.msra.mxu0 %v2693_v18  ;;  %9019 = vmatpush3.msra.mxu1 %v2725_v32  ;;  %v2800_v18 = vld [vmem:[%s14441_s15 + $0x368] sm:$0xff]  ;;  %v2783_v32 = vld [vmem:[%s14441_s15 + $0x2e0] sm:$0xff] }
 0xe61   :  { %8976 = vmatprep.subr.mxu0 %v2708_v21  ;;  %9020 = vmatprep.subr.mxu1 %v2740_v22  ;;  %v2815_v21 = vld [vmem:[%s14441_s15 + $0x3e0] sm:$0xff] }
 0xe62   :  { %8977 = vmatpush3.msra.mxu0 %v2692_v23  ;;  %9021 = vmatpush3.msra.mxu1 %v2724_v24  ;;  %v2767_v24 = vld [vmem:[%s14441_s15 + $0x260] sm:$0xff] }
 0xe63   :  { %8978 = vmatprep.subr.mxu0 %v2707_v25  ;;  %9022 = vmatprep.subr.mxu1 %v2739_v27  ;;  %v2799_v25 = vld [vmem:[%s14441_s15 + $0x360] sm:$0xff] }
 0xe64   :  { %8979 = vmatpush3.msra.mxu0 %v2691_v29  ;;  %9023 = vmatpush3.msra.mxu1 %v2723_v31  ;;  %v2782_v31 = vld [vmem:[%s14441_s15 + $0x2d8] sm:$0xff] }
 0xe65   :  { %9036 = vmatprep.subr.mxu0 %v2786_v34  ;;  %9080 = vmatprep.subr.mxu1 %v2818_v13  ;;  %v2814_v34 = vld [vmem:[%s14441_s15 + $0x3d8] sm:$0xff] }
 0xecb   :  { %v1981_v43 = vpop.f32.mrf.mxu0  ;;  %v2070_v46 = vpop.f32.mrf.mxu1 }
 0xecc   :  { %v1982_v45 = vadd.f32 %v1981_v43, %v11557_v19  ;;  %v2071_v48 = vadd.f32 %v2070_v46, %v11561_v20  ;;  %v2766_v43 = vld [vmem:[%s14441_s15 + $0x258] sm:$0xff] }
 0xecd   :  { %v1983_v49 = vpop.f32.mrf.mxu0  ;;  %v2072_v52 = vpop.f32.mrf.mxu1  ;;  %v2798_v46 = vld [vmem:[%s14441_s15 + $0x358] sm:$0xff] }
 0xece   :  { %v1984_v53 = vadd.f32 %v1983_v49, %v11565_v39  ;;  %v2073_v55 = vadd.f32 %v2072_v52, %v11569_v40  ;;  %v2627_v14 = vmax.f32 %v1982_v45, 0.0  ;;  %v2629_v17 = vmax.f32 %v2071_v48, 0.0  ;;  %v2781_v45 = vld [vmem:[%s14441_s15 + $0x2d0] sm:$0xff] }
 0xecf   :  { %v1987_v61 = vpop.f32.mrf.mxu0  ;;  %v2076_v50 = vpop.f32.mrf.mxu1  ;;  %v2813_v48 = vld [vmem:[%s14441_s15 + $0x3d0] sm:$0xff]  ;;  %v11642_v49 = vsub.s32 5, %v11536_v35 }
 0xed0   :  { %v2628_v63 = vmax.f32 %v1984_v53, 0.0  ;;  %v2630_v0 = vmax.f32 %v2073_v55, 0.0  ;;  %v1988_v57 = vadd.f32 %v1987_v61, %v11557_v19  ;;  %v2077_v59 = vadd.f32 %v2076_v50, %v11561_v20 }
 0xed1   :  { %v1989_v41 = vpop.f32.mrf.mxu0  ;;  %v2078_v42 = vpop.f32.mrf.mxu1  ;;  %14554 = vst [vmem:[#allocation9_spill] sm:$0xff] %v11642_v49 }
 0xed2   :  { %v1990_v47 = vadd.f32 %v1989_v41, %v11565_v39  ;;  %v2079_v2 = vadd.f32 %v2078_v42, %v11569_v40  ;;  %3016 = vmatprep.mubr.f32.mxu0 %v2628_v63  ;;  %3101 = vmatprep.mubr.f32.mxu1 %v2630_v0  ;;  %v2643_v9 = vmax.f32 %v1988_v57, 0.0  ;;  %v2645_v30 = vmax.f32 %v2077_v59, 0.0  ;;  %v2765_v0 = vld [vmem:[%s14441_s15 + $0x250] sm:$0xff]  ;;  %v2779_v59 = vld [vmem:[%s14441_s15 + $0x2c0] sm:$0xff] }
 0xed3   :  { %3017 = vmatmul.mubr.f32.vlgmr.msra.gmra.mxu0 %v2627_v14  ;;  %3102 = vmatmul.mubr.f32.vlgmr.msra.gmra.mxu1 %v2629_v17  ;;  %v2797_v14 = vld [vmem:[%s14441_s15 + $0x350] sm:$0xff]  ;;  %v11653_v17 = vsub.s32 7, %v11536_v35  ;;  %v11675_v57 = vrot.slane %v11547_v36, %v11642_v49 }
 0xed4   :  { %v2644_v6 = vmax.f32 %v1990_v47, 0.0  ;;  %v2646_v51 = vmax.f32 %v2079_v2, 0.0  ;;  %9037 = vmatpush3.msra.mxu0 %v2770_v1  ;;  %9081 = vmatpush3.msra.mxu1 %v2802_v44  ;;  %v2780_v1 = vld [vmem:[%s14441_s15 + $0x2c8] sm:$0xff] }
 0xed5   :  { %9038 = vmatprep.subr.mxu0 %v2785_v3  ;;  %9082 = vmatprep.subr.mxu1 %v2817_v4  ;;  %14555 = vst [vmem:[#allocation10_spill] sm:$0xff] %v11653_v17  ;;  %v2812_v44 = vld [vmem:[%s14441_s15 + $0x3c8] sm:$0xff] }
 0xed6   :  { %9039 = vmatpush3.msra.mxu0 %v2769_v56  ;;  %9083 = vmatpush3.msra.mxu1 %v2801_v5  ;;  %v2811_v56 = vld [vmem:[%s14441_s15 + $0x3c0] sm:$0xff] }
 0xed7   :  { %3021 = vmatprep.mubr.f32.mxu0 %v2644_v6  ;;  %3106 = vmatprep.mubr.f32.mxu1 %v2646_v51  ;;  %v1993_v60 = vpop.f32.mrf.mxu0  ;;  %v2082_v58 = vpop.f32.mrf.mxu1  ;;  %v11685_v6 = vrot.slane %v11547_v36, %v11653_v17 }
 0xed8   :  { %9040 = vmatprep.subr.mxu0 %v2784_v7  ;;  %9084 = vmatprep.subr.mxu1 %v2816_v8  ;;  %v1994_v52 = vadd.f32 %v1993_v60, %v11557_v19  ;;  %v2083_v53 = vadd.f32 %v2082_v58, %v11561_v20  ;;  %v2763_v60 = vld [vmem:[%s14441_s15 + $0x240] sm:$0xff] }
 0xed9   :  { %3022 = vmatmul.mubr.f32.gmra.mxu0 %v2643_v9  ;;  %3107 = vmatmul.mubr.f32.gmra.mxu1 %v2645_v30  ;;  %v1995_v22 = vpop.f32.mrf.mxu0  ;;  %v2084_v23 = vpop.f32.mrf.mxu1  ;;  %v2795_v58 = vld [vmem:[%s14441_s15 + $0x340] sm:$0xff] }
 0xeda   :  { %9041 = vmatpush3.msra.mxu0 %v2768_v11  ;;  %9085 = vmatpush3.msra.mxu1 %v2800_v18  ;;  %v1996_v27 = vadd.f32 %v1995_v22, %v11565_v39  ;;  %v2085_v29 = vadd.f32 %v2084_v23, %v11569_v40  ;;  %v2659_v3 = vmax.f32 %v1994_v52, 0.0  ;;  %v2661_v4 = vmax.f32 %v2083_v53, 0.0  ;;  %v2810_v11 = vld [vmem:[%s14441_s15 + $0x3b8] sm:$0xff]  ;;  %v2760_v52 = vld [vmem:[%s14441_s15 + $0x228] sm:$0xff] }
 0xedb   :  { %9042 = vmatprep.subr.mxu0 %v2783_v32  ;;  %9086 = vmatprep.subr.mxu1 %v2815_v21  ;;  %v1999_v13 = vpop.f32.mrf.mxu0  ;;  %v2088_v16 = vpop.f32.mrf.mxu1  ;;  %v2762_v22 = vld [vmem:[%s14441_s15 + $0x238] sm:$0xff]  ;;  %v2792_v53 = vld [vmem:[%s14441_s15 + $0x328] sm:$0xff] }
 0xedc   :  { %9043 = vmatpush3.msra.mxu0 %v2767_v24  ;;  %9087 = vmatpush3.msra.mxu1 %v2799_v25  ;;  %v2660_v55 = vmax.f32 %v1996_v27, 0.0  ;;  %v2662_v61 = vmax.f32 %v2085_v29, 0.0  ;;  %v2000_v51 = vadd.f32 %v1999_v13, %v11557_v19  ;;  %v2089_v7 = vadd.f32 %v2088_v16, %v11561_v20  ;;  %v2778_v20 = vld [vmem:[%s14441_s15 + $0x2b8] sm:$0xff]  ;;  %v2777_v24 = vld [vmem:[%s14441_s15 + $0x2b0] sm:$0xff] }
 0xedd   :  { %9044 = vmatprep.subr.mxu0 %v2782_v31  ;;  %9088 = vmatprep.subr.mxu1 %v2814_v34  ;;  %v2001_v50 = vpop.f32.mrf.mxu0  ;;  %v2090_v63 = vpop.f32.mrf.mxu1  ;;  %v2794_v23 = vld [vmem:[%s14441_s15 + $0x338] sm:$0xff]  ;;  %v2809_v25 = vld [vmem:[%s14441_s15 + $0x3b0] sm:$0xff] }
 0xede   :  { %9045 = vmatpush3.msra.mxu0 %v2766_v43  ;;  %9089 = vmatpush3.msra.mxu1 %v2798_v46  ;;  %v2002_v41 = vadd.f32 %v2001_v50, %v11565_v39  ;;  %v2091_v42 = vadd.f32 %v2090_v63, %v11569_v40  ;;  %v2764_v39 = vld [vmem:[%s14441_s15 + $0x248] sm:$0xff]  ;;  %v2675_v32 = vmax.f32 %v2000_v51, 0.0  ;;  %v2677_v21 = vmax.f32 %v2089_v7, 0.0  ;;  %v2761_v31 = vld [vmem:[%s14441_s15 + $0x230] sm:$0xff]  ;;  %v2759_v63 = vld [vmem:[%s14441_s15 + $0x220] sm:$0xff] }
 0xedf   :  { %9046 = vmatprep.subr.mxu0 %v2781_v45  ;;  %9090 = vmatprep.subr.mxu1 %v2813_v48  ;;  %v11663_v47 = vpop.f32.mrf.mxu0  ;;  %v11665_v2 = vpop.f32.mrf.mxu1  ;;  %v2796_v40 = vld [vmem:[%s14441_s15 + $0x348] sm:$0xff]  ;;  %v2793_v34 = vld [vmem:[%s14441_s15 + $0x330] sm:$0xff]  ;;  %v11732_v45 = vsub.s32 4, %v11536_v35  ;;  %v11735_v48 = vsub.s32 6, %v11536_v35  ;;  %v2807_v35 = vld [vmem:[%s14441_s15 + $0x3a0] sm:$0xff] }
 0xee0   :  { %9047 = vmatpush3.msra.mxu0 %v2765_v0  ;;  %9091 = vmatpush3.msra.mxu1 %v2797_v14  ;;  %v2676_v8 = vmax.f32 %v2002_v41, 0.0  ;;  %v2678_v9 = vmax.f32 %v2091_v42, 0.0  ;;  %v2776_v43 = vld [vmem:[%s14441_s15 + $0x2a8] sm:$0xff]  ;;  %v2791_v0 = vld [vmem:[%s14441_s15 + $0x320] sm:$0xff]  ;;  %v2774_v14 = vld [vmem:[%s14441_s15 + $0x298] sm:$0xff] }
 0xee1   :  { %3026 = vmatprep.mubr.f32.mxu0 %v2660_v55  ;;  %3111 = vmatprep.mubr.f32.mxu1 %v2662_v61  ;;  %v2161_v5 = vpop.f32.mrf.mxu0  ;;  %v2250_v30 = vpop.f32.mrf.mxu1  ;;  %v2808_v46 = vld [vmem:[%s14441_s15 + $0x3a8] sm:$0xff]  ;;  %14556 = vst [vmem:[#allocation11_spill] sm:$0xff] %v11732_v45  ;;  %14557 = vst [vmem:[#allocation12_spill] sm:$0xff] %v11735_v48  ;;  %v2775_v61 = vld [vmem:[%s14441_s15 + $0x2a0] sm:$0xff]  ;;  %v11763_v42 = vrot.slane %v11547_v36, %v11732_v45 }
 0xee2   :  { %9048 = vmatprep.subr.mxu0 %v2780_v1  ;;  %9092 = vmatprep.subr.mxu1 %v2812_v44  ;;  %v2162_v19 = vadd.f32 %v2161_v5, %v11675_v57  ;;  %v2251_v18 = vadd.f32 %v2250_v30, %v11685_v6  ;;  %v2806_v41 = vld [vmem:[%s14441_s15 + $0x398] sm:$0xff]  ;;  %v11767_v1 = vrot.slane %v11547_v36, %v11735_v48  ;;  %v2805_v36 = vld [vmem:[%s14441_s15 + $0x390] sm:$0xff]  ;;  %v2772_v5 = vld [vmem:[%s14441_s15 + $0x288] sm:$0xff] }
 0xee3   :  { %3027 = vmatmul.mubr.f32.gmra.mxu0 %v2659_v3  ;;  %3112 = vmatmul.mubr.f32.gmra.mxu1 %v2661_v4  ;;  %v11715_v29 = vpop.f32.mrf.mxu0  ;;  %v11723_v16 = vpop.f32.mrf.mxu1  ;;  %v2758_v44 = vld [vmem:[%s14441_s15 + $0x218] sm:$0xff]  ;;  %v2804_v51 = vld [vmem:[%s14441_s15 + $0x388] sm:$0xff]  ;;  %v2160_v7 = vadd.f32 %v11663_v47, %v11763_v42  ;;  %v2771_v47 = vld [vmem:[%s14441_s15 + $0x280] sm:$0xff] }
 0xee4   :  { %9049 = vmatpush3.msra.mxu0 %v2764_v39  ;;  %9093 = vmatpush3.msra.mxu1 %v2796_v40  ;;  %v2632_v27 = vmax.f32 %v2162_v19, 0.0  ;;  %v2634_v13 = vmax.f32 %v2251_v18, 0.0  ;;  %v2790_v3 = vld [vmem:[%s14441_s15 + $0x318] sm:$0xff]  ;;  %v2773_v39 = vld [vmem:[%s14441_s15 + $0x290] sm:$0xff]  ;;  %v2788_v30 = vld [vmem:[%s14441_s15 + $0x308] sm:$0xff] }
 0xee5   :  { %9050 = vmatprep.subr.mxu0 %v2779_v59  ;;  %9094 = vmatprep.subr.mxu1 %v2811_v56  ;;  %v2167_v55 = vpop.f32.mrf.mxu0  ;;  %v2256_v50 = vpop.f32.mrf.mxu1  ;;  %v2757_v59 = vld [vmem:[%s14441_s15 + $0x210] sm:$0xff]  ;;  %v2787_v18 = vld [vmem:[%s14441_s15 + $0x300] sm:$0xff] }
 0xee6   :  { %9051 = vmatpush3.msra.mxu0 %v2763_v60  ;;  %9095 = vmatpush3.msra.mxu1 %v2795_v58  ;;  %v2789_v56 = vld [vmem:[%s14441_s15 + $0x310] sm:$0xff]  ;;  %v2168_v58 = vadd.f32 %v2167_v55, %v11675_v57  ;;  %v2257_v19 = vadd.f32 %v2256_v50, %v11685_v6 }
 0xee7   :  { %3031 = vmatprep.mubr.f32.mxu0 %v2676_v8  ;;  %3116 = vmatprep.mubr.f32.mxu1 %v2678_v9  ;;  %v11775_v4 = vpop.f32.mrf.mxu0  ;;  %v11783_v40 = vpop.f32.mrf.mxu1  ;;  %v2249_v8 = vadd.f32 %v11665_v2, %v11767_v1  ;;  %v2756_v9 = vld [vmem:[%s14441_s15 + $0x208] sm:$0xff]  ;;  %v2803_v2 = vld [vmem:[%s14441_s15 + $0x380] sm:$0xff]  ;;  %v2833_v55 = vld [vmem:[%s14441_s15 + $0x470] sm:$0xff] }
 0xee8   :  { %9052 = vmatprep.subr.mxu0 %v2778_v20  ;;  %9096 = vmatprep.subr.mxu1 %v2810_v11  ;;  %v2755_v11 = vld [vmem:[%s14441_s15 + $0x200] sm:$0xff] }
 0xee9   :  { %3032 = vmatmul.mubr.f32.gmra.mxu0 %v2675_v32  ;;  %3117 = vmatmul.mubr.f32.gmra.mxu1 %v2677_v21  ;;  %v2173_v60 = vpop.f32.mrf.mxu0  ;;  %v2262_v20 = vpop.f32.mrf.mxu1  ;;  %v2631_v32 = vmax.f32 %v2160_v7, 0.0  ;;  %v2633_v21 = vmax.f32 %v2249_v8, 0.0 }
 0xeea   :  { %9053 = vmatpush3.msra.mxu0 %v2762_v22  ;;  %9097 = vmatpush3.msra.mxu1 %v2794_v23  ;;  %v2850_v22 = vld [vmem:[%s14441_s15 + $0x4f8] sm:$0xff] }
 0xeeb   :  { %9054 = vmatprep.subr.mxu0 %v2777_v24  ;;  %9098 = vmatprep.subr.mxu1 %v2809_v25  ;;  %v2882_v23 = vld [vmem:[%s14441_s15 + $0x5f8] sm:$0xff]  ;;  %v11827_v24 = vpop.f32.mrf.mxu0  ;;  %v2166_v25 = vadd.f32 %v11715_v29, %v11763_v42  ;;  %v2849_v29 = vld [vmem:[%s14441_s15 + $0x4f0] sm:$0xff] }
 0xeec   :  { %9055 = vmatpush3.msra.mxu0 %v2761_v31  ;;  %9099 = vmatpush3.msra.mxu1 %v2793_v34  ;;  %v2648_v31 = vmax.f32 %v2168_v58, 0.0  ;;  %v2650_v34 = vmax.f32 %v2257_v19, 0.0  ;;  %v2878_v58 = vld [vmem:[%s14441_s15 + $0x5d8] sm:$0xff] }
 0xeed   :  { %9056 = vmatprep.subr.mxu0 %v2776_v43  ;;  %3186 = vmatprep.mubr.f32.mxu0 %v2632_v27  ;;  %v2255_v27 = vadd.f32 %v11723_v16, %v11767_v1  ;;  %v2834_v43 = vld [vmem:[%s14441_s15 + $0x478] sm:$0xff]  ;;  %v2881_v16 = vld [vmem:[%s14441_s15 + $0x5f0] sm:$0xff]  ;;  %v2647_v50 = vmax.f32 %v2166_v25, 0.0 }
 0xeee   :  { %9100 = vmatprep.subr.mxu1 %v2808_v46  ;;  %3271 = vmatprep.mubr.f32.mxu1 %v2634_v13  ;;  %v2266_v13 = vpop.f32.mrf.mxu1  ;;  %v2866_v46 = vld [vmem:[%s14441_s15 + $0x578] sm:$0xff] }
 0xeef   :  { %9057 = vmatpush3.msra.mxu0 %v2760_v52  ;;  %9101 = vmatpush3.msra.mxu1 %v2792_v53  ;;  %v2174_v52 = vadd.f32 %v2173_v60, %v11675_v57  ;;  %v2263_v53 = vadd.f32 %v2262_v20, %v11685_v6  ;;  %v11890_v60 = vld [vmem:[%s14442_s14 + $0x10] ss:$2 sm:$0xff] }
 0xef0   :  { %9058 = vmatprep.subr.mxu0 %v2775_v61  ;;  %9102 = vmatprep.subr.mxu1 %v2807_v35  ;;  %v2865_v61 = vld [vmem:[%s14441_s15 + $0x570] sm:$0xff]  ;;  %v2179_v35 = vpop.f32.mrf.mxu0  ;;  %v11904_v20 = vrot.slane %v11890_v60, %v11553_v38  ;;  %v2862_v25 = vld [vmem:[%s14441_s15 + $0x558] sm:$0xff] }
 0xef1   :  { %9059 = vmatpush3.msra.mxu0 %v2759_v63  ;;  %9103 = vmatpush3.msra.mxu1 %v2791_v0  ;;  %v2649_v63 = vmax.f32 %v2255_v27, 0.0  ;;  %v2268_v0 = vpop.f32.mrf.mxu1  ;;  %v2829_v27 = vld [vmem:[%s14441_s15 + $0x450] sm:$0xff] }
 0xef2   :  { %9060 = vmatprep.subr.mxu0 %v2774_v14  ;;  %9104 = vmatprep.subr.mxu1 %v2806_v41  ;;  %v2848_v14 = vld [vmem:[%s14441_s15 + $0x4e8] sm:$0xff]  ;;  %v2269_v7 = vadd.f32 %v2268_v0, %v11685_v6  ;;  %v2842_v0 = vld [vmem:[%s14441_s15 + $0x4b8] sm:$0xff] }
 0xef3   :  { %9061 = vmatpush3.msra.mxu0 %v2758_v44  ;;  %9105 = vmatpush3.msra.mxu1 %v2790_v3  ;;  %v2880_v41 = vld [vmem:[%s14441_s15 + $0x5e8] sm:$0xff]  ;;  %v2172_v44 = vadd.f32 %v11775_v4, %v11763_v42  ;;  %v2261_v3 = vadd.f32 %v11783_v40, %v11767_v1  ;;  %v2847_v4 = vld [vmem:[%s14441_s15 + $0x4e0] sm:$0xff]  ;;  %v11879_v8 = vpop.f32.mrf.mxu1 }
 0xef4   :  { %9062 = vmatprep.subr.mxu0 %v2773_v39  ;;  %9106 = vmatprep.subr.mxu1 %v2805_v36  ;;  %v2664_v39 = vmax.f32 %v2174_v52, 0.0  ;;  %v2666_v36 = vmax.f32 %v2263_v53, 0.0  ;;  %v2879_v40 = vld [vmem:[%s14441_s15 + $0x5e0] sm:$0xff]  ;;  %v2860_v53 = vld [vmem:[%s14441_s15 + $0x548] sm:$0xff] }
 0xef5   :  { %9063 = vmatpush3.msra.mxu0 %v2757_v59  ;;  %9107 = vmatpush3.msra.mxu1 %v2789_v56  ;;  %v2832_v59 = vld [vmem:[%s14441_s15 + $0x468] sm:$0xff]  ;;  %v2665_v6 = vmax.f32 %v2261_v3, 0.0 }
 0xef6   :  { %9064 = vmatprep.subr.mxu0 %v2772_v5  ;;  %9108 = vmatprep.subr.mxu1 %v2804_v51  ;;  %v2864_v56 = vld [vmem:[%s14441_s15 + $0x568] sm:$0xff]  ;;  %v11869_v5 = vpop.f32.mrf.mxu0  ;;  %v2180_v51 = vadd.f32 %v2179_v35, %v11675_v57  ;;  %v2663_v57 = vmax.f32 %v2172_v44, 0.0  ;;  %v2875_v35 = vld [vmem:[%s14441_s15 + $0x5c0] sm:$0xff]  ;;  %v2858_v44 = vld [vmem:[%s14441_s15 + $0x538] sm:$0xff] }
 0xef7   :  { %9065 = vmatpush3.msra.mxu0 %v2756_v9  ;;  %9109 = vmatpush3.msra.mxu1 %v2788_v30  ;;  %v2831_v9 = vld [vmem:[%s14441_s15 + $0x460] sm:$0xff] }
 0xef8   :  { %9066 = vmatprep.subr.mxu0 %v2771_v47  ;;  %9110 = vmatprep.subr.mxu1 %v2803_v2  ;;  %v2863_v30 = vld [vmem:[%s14441_s15 + $0x560] sm:$0xff]  ;;  %v11894_v47 = vrot.slane %v11890_v60, %v11550_v37  ;;  %v2846_v2 = vld [vmem:[%s14441_s15 + $0x4d8] sm:$0xff]  ;;  %v2339_v19 = vpop.f32.mrf.mxu0 }
 0xef9   :  { %9067 = vmatpush3.msra.mxu0 %v2755_v11  ;;  %9111 = vmatpush3.msra.mxu1 %v2787_v18  ;;  %v2178_v11 = vadd.f32 %v11827_v24, %v11763_v42  ;;  %v2267_v18 = vadd.f32 %v2266_v13, %v11767_v1  ;;  %v2845_v42 = vld [vmem:[%s14441_s15 + $0x4d0] sm:$0xff] }
 0xefa   :  { %3187 = vmatmul.mubr.f32.vlgmr.msra.gmra.mxu0 %v2631_v32  ;;  %3272 = vmatmul.mubr.f32.vlgmr.msra.gmra.mxu1 %v2633_v21  ;;  %v2680_v32 = vmax.f32 %v2180_v51, 0.0  ;;  %v2682_v21 = vmax.f32 %v2269_v7, 0.0  ;;  %v2877_v1 = vld [vmem:[%s14441_s15 + $0x5d0] sm:$0xff]  ;;  %v2340_v24 = vadd.f32 %v2339_v19, %v11894_v47  ;;  %v11965_v3 = vpop.f32.mrf.mxu0  ;;  %v2872_v51 = vld [vmem:[%s14441_s15 + $0x5a8] sm:$0xff]  ;;  %v2855_v19 = vld [vmem:[%s14441_s15 + $0x520] sm:$0xff] }
 0xefb   :  { %9124 = vmatprep.subr.mxu0 %v2850_v22  ;;  %9168 = vmatprep.subr.mxu1 %v2882_v23  ;;  %v2428_v22 = vpop.f32.mrf.mxu1  ;;  %v2830_v23 = vld [vmem:[%s14441_s15 + $0x458] sm:$0xff]  ;;  %v2679_v13 = vmax.f32 %v2178_v11, 0.0  ;;  %v2824_v7 = vld [vmem:[%s14441_s15 + $0x428] sm:$0xff] }
 0xefc   :  { %3191 = vmatprep.mubr.f32.mxu0 %v2648_v31  ;;  %3276 = vmatprep.mubr.f32.mxu1 %v2650_v34  ;;  %v2861_v31 = vld [vmem:[%s14441_s15 + $0x550] sm:$0xff]  ;;  %v2429_v34 = vadd.f32 %v2428_v22, %v11904_v20  ;;  %v2636_v52 = vmax.f32 %v2340_v24, 0.0  ;;  %v2838_v11 = vld [vmem:[%s14441_s15 + $0x498] sm:$0xff] }
 0xefd   :  { %9125 = vmatpush3.msra.mxu0 %v2834_v43  ;;  %9169 = vmatpush3.msra.mxu1 %v2866_v46  ;;  %v2681_v43 = vmax.f32 %v2267_v18, 0.0  ;;  %v2844_v46 = vld [vmem:[%s14441_s15 + $0x4c8] sm:$0xff]  ;;  %v2870_v18 = vld [vmem:[%s14441_s15 + $0x598] sm:$0xff] }
 0xefe   :  { %9126 = vmatprep.subr.mxu0 %v2849_v29  ;;  %9170 = vmatprep.subr.mxu1 %v2881_v16  ;;  %v2876_v29 = vld [vmem:[%s14441_s15 + $0x5c8] sm:$0xff]  ;;  %v2822_v22 = vld [vmem:[%s14441_s15 + $0x418] sm:$0xff] }
 0xeff   :  { %9127 = vmatpush3.msra.mxu0 %v2833_v55  ;;  %9171 = vmatpush3.msra.mxu1 %v2865_v61  ;;  %v2828_v16 = vld [vmem:[%s14441_s15 + $0x448] sm:$0xff]  ;;  %v2638_v55 = vmax.f32 %v2429_v34, 0.0  ;;  %v2843_v61 = vld [vmem:[%s14441_s15 + $0x4c0] sm:$0xff] }
 0xf00   :  { %3192 = vmatmul.mubr.f32.gmra.mxu0 %v2647_v50  ;;  %3277 = vmatmul.mubr.f32.gmra.mxu1 %v2649_v63  ;;  %v2827_v50 = vld [vmem:[%s14441_s15 + $0x440] sm:$0xff]  ;;  %v2836_v34 = vld [vmem:[%s14441_s15 + $0x488] sm:$0xff] }
 0xf01   :  { %9128 = vmatprep.subr.mxu0 %v2848_v14  ;;  %9172 = vmatprep.subr.mxu1 %v2880_v41  ;;  %v2859_v63 = vld [vmem:[%s14441_s15 + $0x540] sm:$0xff]  ;;  %v2874_v14 = vld [vmem:[%s14441_s15 + $0x5b8] sm:$0xff] }
 0xf02   :  { %3196 = vmatprep.mubr.f32.mxu0 %v2664_v39  ;;  %3281 = vmatprep.mubr.f32.mxu1 %v2666_v36  ;;  %v2826_v41 = vld [vmem:[%s14441_s15 + $0x438] sm:$0xff]  ;;  %v2841_v39 = vld [vmem:[%s14441_s15 + $0x4b0] sm:$0xff] }
 0xf03   :  { %9129 = vmatpush3.msra.mxu0 %v2832_v59  ;;  %9173 = vmatpush3.msra.mxu1 %v2864_v56  ;;  %v2873_v36 = vld [vmem:[%s14441_s15 + $0x5b0] sm:$0xff]  ;;  %v11973_v59 = vpop.f32.mrf.mxu1 }
 0xf04   :  { %9130 = vmatprep.subr.mxu0 %v2847_v4  ;;  %9174 = vmatprep.subr.mxu1 %v2879_v40  ;;  %v2825_v56 = vld [vmem:[%s14441_s15 + $0x430] sm:$0xff]  ;;  %v2840_v40 = vld [vmem:[%s14441_s15 + $0x4a8] sm:$0xff] }
 0xf05   :  { %9131 = vmatpush3.msra.mxu0 %v2831_v9  ;;  %9175 = vmatpush3.msra.mxu1 %v2863_v30  ;;  %v2857_v4 = vld [vmem:[%s14441_s15 + $0x530] sm:$0xff]  ;;  %v2856_v9 = vld [vmem:[%s14441_s15 + $0x528] sm:$0xff]  ;;  %v2345_v30 = vpop.f32.mrf.mxu0 }
 0xf06   :  { %3197 = vmatmul.mubr.f32.gmra.mxu0 %v2663_v57  ;;  %3282 = vmatmul.mubr.f32.gmra.mxu1 %v2665_v6  ;;  %v2839_v57 = vld [vmem:[%s14441_s15 + $0x4a0] sm:$0xff] }
 0xf07   :  { %9132 = vmatprep.subr.mxu0 %v2846_v2  ;;  %9176 = vmatprep.subr.mxu1 %v2878_v58  ;;  %v2871_v6 = vld [vmem:[%s14441_s15 + $0x5a0] sm:$0xff]  ;;  %v2434_v2 = vpop.f32.mrf.mxu1 }
 0xf08   :  { %3201 = vmatprep.mubr.f32.mxu0 %v2680_v32  ;;  %3286 = vmatprep.mubr.f32.mxu1 %v2682_v21  ;;  %v2823_v58 = vld [vmem:[%s14441_s15 + $0x420] sm:$0xff]  ;;  %v12013_v32 = vrot.slane %v11890_v60, %v11539_v12  ;;  %v12017_v21 = vrot.slane %v11890_v60, %v11542_v28 }
 0xf09   :  { %9133 = vmatpush3.msra.mxu0 %v2830_v23  ;;  %9177 = vmatpush3.msra.mxu1 %v2862_v25  ;;  %v2854_v23 = vld [vmem:[%s14441_s15 + $0x518] sm:$0xff]  ;;  %v12025_v25 = vpop.f32.mrf.mxu0  ;;  %v12033_v24 = vpop.f32.mrf.mxu1 }
 0xf0a   :  { %9134 = vmatprep.subr.mxu0 %v2845_v42  ;;  %9178 = vmatprep.subr.mxu1 %v2877_v1  ;;  %v2837_v42 = vld [vmem:[%s14441_s15 + $0x490] sm:$0xff] }
 0xf0b   :  { %9135 = vmatpush3.msra.mxu0 %v2829_v27  ;;  %9179 = vmatpush3.msra.mxu1 %v2861_v31  ;;  %v2869_v1 = vld [vmem:[%s14441_s15 + $0x590] sm:$0xff] }
 0xf0c   :  { %3202 = vmatmul.mubr.f32.gmra.mxu0 %v2679_v13  ;;  %3287 = vmatmul.mubr.f32.gmra.mxu1 %v2681_v43  ;;  %v2821_v27 = vld [vmem:[%s14441_s15 + $0x410] sm:$0xff]  ;;  %v2868_v13 = vld [vmem:[%s14441_s15 + $0x588] sm:$0xff]  ;;  %v2338_v43 = vadd.f32 %v11869_v5, %v12013_v32  ;;  %v2835_v5 = vld [vmem:[%s14441_s15 + $0x480] sm:$0xff] }
 0xf0d   :  { %9136 = vmatprep.subr.mxu0 %v2844_v46  ;;  %9180 = vmatprep.subr.mxu1 %v2876_v29  ;;  %v2853_v31 = vld [vmem:[%s14441_s15 + $0x510] sm:$0xff]  ;;  %v2427_v46 = vadd.f32 %v11879_v8, %v12017_v21  ;;  %v2820_v29 = vld [vmem:[%s14441_s15 + $0x408] sm:$0xff]  ;;  %v2867_v8 = vld [vmem:[%s14441_s15 + $0x580] sm:$0xff] }
 0xf0e   :  { %9137 = vmatpush3.msra.mxu0 %v2828_v16  ;;  %3356 = vmatprep.mubr.f32.mxu0 %v2636_v52  ;;  %v2852_v16 = vld [vmem:[%s14441_s15 + $0x508] sm:$0xff]  ;;  %v2351_v52 = vpop.f32.mrf.mxu0 }
 0xf0f   :  { %9181 = vmatpush3.msra.mxu1 %v2860_v53  ;;  %3441 = vmatprep.mubr.f32.mxu1 %v2638_v55  ;;  %v2346_v53 = vadd.f32 %v2345_v30, %v11894_v47  ;;  %v2435_v55 = vadd.f32 %v2434_v2, %v11904_v20 }
 0xf10   :  { %9138 = vmatprep.subr.mxu0 %v2843_v61  ;;  %9182 = vmatprep.subr.mxu1 %v2875_v35  ;;  %v2440_v61 = vpop.f32.mrf.mxu1  ;;  %v2819_v35 = vld [vmem:[%s14441_s15 + $0x400] sm:$0xff] }
 0xf11   :  { %9139 = vmatpush3.msra.mxu0 %v2827_v50  ;;  %9183 = vmatpush3.msra.mxu1 %v2859_v63  ;;  %v2851_v50 = vld [vmem:[%s14441_s15 + $0x500] sm:$0xff]  ;;  %v2635_v63 = vmax.f32 %v2338_v43, 0.0  ;;  %v2441_v30 = vadd.f32 %v2440_v61, %v11904_v20  ;;  %v12149_v61 = vrot.slane %v11890_v60, %v11653_v17 }
 0xf12   :  { %9140 = vmatprep.subr.mxu0 %v2842_v0  ;;  %9184 = vmatprep.subr.mxu1 %v2874_v14  ;;  %v2637_v0 = vmax.f32 %v2427_v46, 0.0  ;;  %v2914_v14 = vld [vmem:[%s14441_s15 + $0x6f8] sm:$0xff] }
 0xf13   :  { %9141 = vmatpush3.msra.mxu0 %v2826_v41  ;;  %9185 = vmatpush3.msra.mxu1 %v2858_v44  ;;  %v2946_v41 = vld [vmem:[%s14441_s15 + $0x7f8] sm:$0xff]  ;;  %v12077_v44 = vpop.f32.mrf.mxu0 }
 0xf14   :  { %9142 = vmatprep.subr.mxu0 %v2841_v39  ;;  %9186 = vmatprep.subr.mxu1 %v2873_v36  ;;  %v2344_v39 = vadd.f32 %v11965_v3, %v12013_v32  ;;  %v2433_v36 = vadd.f32 %v11973_v59, %v12017_v21  ;;  %v2913_v3 = vld [vmem:[%s14441_s15 + $0x6f0] sm:$0xff] }
 0xf15   :  { %9143 = vmatpush3.msra.mxu0 %v2825_v56  ;;  %9187 = vmatpush3.msra.mxu1 %v2857_v4  ;;  %v2652_v56 = vmax.f32 %v2346_v53, 0.0  ;;  %v2654_v4 = vmax.f32 %v2435_v55, 0.0  ;;  %v2945_v59 = vld [vmem:[%s14441_s15 + $0x7f0] sm:$0xff]  ;;  %v2357_v2 = vpop.f32.mrf.mxu0  ;;  %v2942_v53 = vld [vmem:[%s14441_s15 + $0x7d8] sm:$0xff] }
 0xf16   :  { %9144 = vmatprep.subr.mxu0 %v2840_v40  ;;  %9188 = vmatprep.subr.mxu1 %v2872_v51  ;;  %v2444_v40 = vpop.f32.mrf.mxu1  ;;  %v2898_v51 = vld [vmem:[%s14441_s15 + $0x678] sm:$0xff]  ;;  %v2358_v43 = vadd.f32 %v2357_v2, %v11894_v47  ;;  %v2939_v2 = vld [vmem:[%s14441_s15 + $0x7c0] sm:$0xff] }
 0xf17   :  { %9145 = vmatpush3.msra.mxu0 %v2824_v7  ;;  %9189 = vmatpush3.msra.mxu1 %v2856_v9  ;;  %v2930_v7 = vld [vmem:[%s14441_s15 + $0x778] sm:$0xff]  ;;  %v2352_v9 = vadd.f32 %v2351_v52, %v11894_v47  ;;  %v2927_v52 = vld [vmem:[%s14441_s15 + $0x760] sm:$0xff]  ;;  %v12139_v47 = vrot.slane %v11890_v60, %v11642_v49 }
 0xf18   :  { %9146 = vmatprep.subr.mxu0 %v2839_v57  ;;  %9190 = vmatprep.subr.mxu1 %v2871_v6  ;;  %v2897_v57 = vld [vmem:[%s14441_s15 + $0x670] sm:$0xff] }
 0xf19   :  { %9147 = vmatpush3.msra.mxu0 %v2823_v58  ;;  %9191 = vmatpush3.msra.mxu1 %v2855_v19  ;;  %v2929_v6 = vld [vmem:[%s14441_s15 + $0x770] sm:$0xff]  ;;  %v2651_v58 = vmax.f32 %v2344_v39, 0.0  ;;  %v2653_v19 = vmax.f32 %v2433_v36, 0.0  ;;  %v2926_v39 = vld [vmem:[%s14441_s15 + $0x758] sm:$0xff] }
 0xf1a   :  { %9148 = vmatprep.subr.mxu0 %v2838_v11  ;;  %9192 = vmatprep.subr.mxu1 %v2870_v18  ;;  %v2446_v11 = vpop.f32.mrf.mxu1  ;;  %v2912_v18 = vld [vmem:[%s14441_s15 + $0x6e8] sm:$0xff]  ;;  %v2893_v36 = vld [vmem:[%s14441_s15 + $0x650] sm:$0xff] }
 0xf1b   :  { %9149 = vmatpush3.msra.mxu0 %v2822_v22  ;;  %9193 = vmatpush3.msra.mxu1 %v2854_v23  ;;  %v2944_v22 = vld [vmem:[%s14441_s15 + $0x7e8] sm:$0xff]  ;;  %v2350_v23 = vadd.f32 %v12025_v25, %v12013_v32  ;;  %v2911_v25 = vld [vmem:[%s14441_s15 + $0x6e0] sm:$0xff]  ;;  %v2447_v46 = vadd.f32 %v2446_v11, %v11904_v20  ;;  %v2910_v20 = vld [vmem:[%s14441_s15 + $0x6d8] sm:$0xff] }
 0xf1c   :  { %9150 = vmatprep.subr.mxu0 %v2837_v42  ;;  %9194 = vmatprep.subr.mxu1 %v2869_v1  ;;  %v2439_v42 = vadd.f32 %v12033_v24, %v12017_v21  ;;  %v2668_v1 = vmax.f32 %v2352_v9, 0.0  ;;  %v2943_v24 = vld [vmem:[%s14441_s15 + $0x7e0] sm:$0xff] }
 0xf1d   :  { %9151 = vmatpush3.msra.mxu0 %v2821_v27  ;;  %9195 = vmatpush3.msra.mxu1 %v2853_v31  ;;  %v2670_v27 = vmax.f32 %v2441_v30, 0.0  ;;  %v2896_v31 = vld [vmem:[%s14441_s15 + $0x668] sm:$0xff]  ;;  %v2891_v11 = vld [vmem:[%s14441_s15 + $0x640] sm:$0xff] }
 0xf1e   :  { %9152 = vmatprep.subr.mxu0 %v2836_v34  ;;  %9196 = vmatprep.subr.mxu1 %v2868_v13  ;;  %v2928_v34 = vld [vmem:[%s14441_s15 + $0x768] sm:$0xff]  ;;  %v12119_v13 = vpop.f32.mrf.mxu0 }
 0xf1f   :  { %9153 = vmatpush3.msra.mxu0 %v2820_v29  ;;  %9197 = vmatpush3.msra.mxu1 %v2852_v16  ;;  %v12129_v29 = vpop.f32.mrf.mxu1  ;;  %v2895_v16 = vld [vmem:[%s14441_s15 + $0x660] sm:$0xff]  ;;  %v2924_v30 = vld [vmem:[%s14441_s15 + $0x748] sm:$0xff] }
 0xf20   :  { %9154 = vmatprep.subr.mxu0 %v2835_v5  ;;  %9198 = vmatprep.subr.mxu1 %v2867_v8  ;;  %v2667_v5 = vmax.f32 %v2350_v23, 0.0  ;;  %v2669_v8 = vmax.f32 %v2439_v42, 0.0  ;;  %v2517_v55 = vpop.f32.mrf.mxu0  ;;  %v2938_v23 = vld [vmem:[%s14441_s15 + $0x7b8] sm:$0xff] }
 0xf21   :  { %9155 = vmatpush3.msra.mxu0 %v2819_v35  ;;  %9199 = vmatpush3.msra.mxu1 %v2851_v50  ;;  %v2356_v35 = vadd.f32 %v12077_v44, %v12013_v32  ;;  %v2445_v50 = vadd.f32 %v2444_v40, %v12017_v21  ;;  %v2909_v32 = vld [vmem:[%s14441_s15 + $0x6d0] sm:$0xff]  ;;  %v2518_v44 = vadd.f32 %v2517_v55, %v12139_v47  ;;  %v2890_v42 = vld [vmem:[%s14441_s15 + $0x638] sm:$0xff] }
 0xf22   :  { %3357 = vmatmul.mubr.f32.vlgmr.msra.gmra.mxu0 %v2635_v63  ;;  %3442 = vmatmul.mubr.f32.vlgmr.msra.gmra.mxu1 %v2637_v0  ;;  %v2684_v63 = vmax.f32 %v2358_v43, 0.0  ;;  %v2686_v0 = vmax.f32 %v2447_v46, 0.0  ;;  %v2941_v21 = vld [vmem:[%s14441_s15 + $0x7d0] sm:$0xff]  ;;  %v2904_v46 = vld [vmem:[%s14441_s15 + $0x6a8] sm:$0xff] }
 0xf23   :  { %9212 = vmatprep.subr.mxu0 %v2914_v14  ;;  %9256 = vmatprep.subr.mxu1 %v2946_v41  ;;  %v2606_v14 = vpop.f32.mrf.mxu1  ;;  %v2894_v41 = vld [vmem:[%s14441_s15 + $0x658] sm:$0xff]  ;;  %v2683_v40 = vmax.f32 %v2356_v35, 0.0  ;;  %v2640_v9 = vmax.f32 %v2518_v44, 0.0  ;;  %v2921_v43 = vld [vmem:[%s14441_s15 + $0x730] sm:$0xff]  ;;  %v2887_v35 = vld [vmem:[%s14441_s15 + $0x620] sm:$0xff] }
 0xf24   :  { %3361 = vmatprep.mubr.f32.mxu0 %v2652_v56  ;;  %3446 = vmatprep.mubr.f32.mxu1 %v2654_v4  ;;  %v2925_v56 = vld [vmem:[%s14441_s15 + $0x750] sm:$0xff]  ;;  %v2607_v4 = vadd.f32 %v2606_v14, %v12149_v61  ;;  %v12262_v14 = vrot.slane %v11890_v60, %v11732_v45 }
 0xf25   :  { %9213 = vmatpush3.msra.mxu0 %v2898_v51  ;;  %9257 = vmatpush3.msra.mxu1 %v2930_v7  ;;  %v2685_v51 = vmax.f32 %v2445_v50, 0.0  ;;  %v2908_v7 = vld [vmem:[%s14441_s15 + $0x6c8] sm:$0xff]  ;;  %v2919_v50 = vld [vmem:[%s14441_s15 + $0x720] sm:$0xff] }
 0xf26   :  { %9214 = vmatprep.subr.mxu0 %v2913_v3  ;;  %9258 = vmatprep.subr.mxu1 %v2945_v59  ;;  %v2940_v3 = vld [vmem:[%s14441_s15 + $0x7c8] sm:$0xff] }
 0xf27   :  { %9215 = vmatpush3.msra.mxu0 %v2897_v57  ;;  %9259 = vmatpush3.msra.mxu1 %v2929_v6  ;;  %v2892_v59 = vld [vmem:[%s14441_s15 + $0x648] sm:$0xff]  ;;  %v2642_v57 = vmax.f32 %v2607_v4, 0.0  ;;  %v2907_v6 = vld [vmem:[%s14441_s15 + $0x6c0] sm:$0xff]  ;;  %v2917_v4 = vld [vmem:[%s14441_s15 + $0x710] sm:$0xff] }
 0xf28   :  { %3362 = vmatmul.mubr.f32.gmra.mxu0 %v2651_v58  ;;  %3447 = vmatmul.mubr.f32.gmra.mxu1 %v2653_v19  ;;  %v12192_v58 = vpop.f32.mrf.mxu0  ;;  %v12194_v19 = vpop.f32.mrf.mxu1 }
 0xf29   :  { %9216 = vmatprep.subr.mxu0 %v2912_v18  ;;  %9260 = vmatprep.subr.mxu1 %v2944_v22  ;;  %v2923_v18 = vld [vmem:[%s14441_s15 + $0x740] sm:$0xff]  ;;  %v2906_v22 = vld [vmem:[%s14441_s15 + $0x6b8] sm:$0xff] }
 0xf2a   :  { %3366 = vmatprep.mubr.f32.mxu0 %v2668_v1  ;;  %3451 = vmatprep.mubr.f32.mxu1 %v2670_v27  ;;  %v2922_v1 = vld [vmem:[%s14441_s15 + $0x738] sm:$0xff]  ;;  %v2905_v27 = vld [vmem:[%s14441_s15 + $0x6b0] sm:$0xff] }
 0xf2b   :  { %9217 = vmatpush3.msra.mxu0 %v2896_v31  ;;  %9261 = vmatpush3.msra.mxu1 %v2928_v34  ;;  %v2937_v31 = vld [vmem:[%s14441_s15 + $0x7b0] sm:$0xff]  ;;  %v2523_v34 = vpop.f32.mrf.mxu0 }
 0xf2c   :  { %9218 = vmatprep.subr.mxu0 %v2911_v25  ;;  %9262 = vmatprep.subr.mxu1 %v2943_v24  ;;  %v2612_v25 = vpop.f32.mrf.mxu1  ;;  %v2889_v24 = vld [vmem:[%s14441_s15 + $0x630] sm:$0xff] }
 0xf2d   :  { %9219 = vmatpush3.msra.mxu0 %v2895_v16  ;;  %9263 = vmatpush3.msra.mxu1 %v2927_v52  ;;  %v2936_v16 = vld [vmem:[%s14441_s15 + $0x7a8] sm:$0xff] }
 0xf2e   :  { %3367 = vmatmul.mubr.f32.gmra.mxu0 %v2667_v5  ;;  %3452 = vmatmul.mubr.f32.gmra.mxu1 %v2669_v8  ;;  %v2888_v52 = vld [vmem:[%s14441_s15 + $0x628] sm:$0xff]  ;;  %v2903_v8 = vld [vmem:[%s14441_s15 + $0x6a0] sm:$0xff]  ;;  %v12246_v55 = vpop.f32.mrf.mxu1 }
 0xf2f   :  { %9220 = vmatprep.subr.mxu0 %v2910_v20  ;;  %9264 = vmatprep.subr.mxu1 %v2942_v53  ;;  %v2920_v5 = vld [vmem:[%s14441_s15 + $0x728] sm:$0xff]  ;;  %v2935_v20 = vld [vmem:[%s14441_s15 + $0x7a0] sm:$0xff]  ;;  %v12244_v53 = vpop.f32.mrf.mxu0 }
 0xf30   :  { %3371 = vmatprep.mubr.f32.mxu0 %v2684_v63  ;;  %3456 = vmatprep.mubr.f32.mxu1 %v2686_v0  ;;  %v2902_v63 = vld [vmem:[%s14441_s15 + $0x698] sm:$0xff] }
 0xf31   :  { %9221 = vmatpush3.msra.mxu0 %v2894_v41  ;;  %9265 = vmatpush3.msra.mxu1 %v2926_v39  ;;  %v2934_v0 = vld [vmem:[%s14441_s15 + $0x798] sm:$0xff]  ;;  %v12266_v41 = vrot.slane %v11890_v60, %v11735_v48  ;;  %v2933_v60 = vld [vmem:[%s14441_s15 + $0x790] sm:$0xff]  ;;  %v2529_v44 = vpop.f32.mrf.mxu0 }
 0xf32   :  { %9222 = vmatprep.subr.mxu0 %v2909_v32  ;;  %9266 = vmatprep.subr.mxu1 %v2941_v21  ;;  %v2886_v39 = vld [vmem:[%s14441_s15 + $0x618] sm:$0xff]  ;;  %v2901_v21 = vld [vmem:[%s14441_s15 + $0x690] sm:$0xff] }
 0xf33   :  { %9223 = vmatpush3.msra.mxu0 %v2893_v36  ;;  %9267 = vmatpush3.msra.mxu1 %v2925_v56  ;;  %v2918_v32 = vld [vmem:[%s14441_s15 + $0x718] sm:$0xff]  ;;  %v2618_v36 = vpop.f32.mrf.mxu1  ;;  %v2885_v56 = vld [vmem:[%s14441_s15 + $0x610] sm:$0xff] }
 0xf34   :  { %3372 = vmatmul.mubr.f32.gmra.mxu0 %v2683_v40  ;;  %3457 = vmatmul.mubr.f32.gmra.mxu1 %v2685_v51  ;;  %v2900_v40 = vld [vmem:[%s14441_s15 + $0x688] sm:$0xff] }
 0xf35   :  { %9224 = vmatprep.subr.mxu0 %v2908_v7  ;;  %9268 = vmatprep.subr.mxu1 %v2940_v3  ;;  %v2932_v51 = vld [vmem:[%s14441_s15 + $0x788] sm:$0xff]  ;;  %v2516_v7 = vadd.f32 %v12119_v13, %v12262_v14  ;;  %v2605_v3 = vadd.f32 %v12129_v29, %v12266_v41  ;;  %v2899_v13 = vld [vmem:[%s14441_s15 + $0x680] sm:$0xff] }
 0xf36   :  { %9225 = vmatpush3.msra.mxu0 %v2892_v59  ;;  %3526 = vmatprep.mubr.f32.mxu0 %v2640_v9  ;;  %v2884_v59 = vld [vmem:[%s14441_s15 + $0x608] sm:$0xff]  ;;  %v2931_v29 = vld [vmem:[%s14441_s15 + $0x780] sm:$0xff] }
 0xf37   :  { %9269 = vmatpush3.msra.mxu1 %v2924_v30  ;;  %3611 = vmatprep.mubr.f32.mxu1 %v2642_v57  ;;  %v2916_v9 = vld [vmem:[%s14441_s15 + $0x708] sm:$0xff]  ;;  %v2524_v30 = vadd.f32 %v2523_v34, %v12139_v47  ;;  %v2613_v57 = vadd.f32 %v2612_v25, %v12149_v61  ;;  %v2530_v34 = vadd.f32 %v2529_v44, %v12139_v47 }
 0xf38   :  { %9226 = vmatprep.subr.mxu0 %v2907_v6  ;;  %9270 = vmatprep.subr.mxu1 %v2939_v2  ;;  %v2533_v6 = vpop.f32.mrf.mxu0  ;;  %v2622_v2 = vpop.f32.mrf.mxu1  ;;  %v2619_v25 = vadd.f32 %v2618_v36, %v12149_v61 }
 0xf39   :  { %9227 = vmatpush3.msra.mxu0 %v2891_v11  ;;  %9271 = vmatpush3.msra.mxu1 %v2923_v18  ;;  %v2883_v11 = vld [vmem:[%s14441_s15 + $0x600] sm:$0xff] }
 0xf3a   :  { %9228 = vmatprep.subr.mxu0 %v2906_v22  ;;  %9272 = vmatprep.subr.mxu1 %v2938_v23  ;;  %v2915_v18 = vld [vmem:[%s14441_s15 + $0x700] sm:$0xff]  ;;  %v2639_v22 = vmax.f32 %v2516_v7, 0.0  ;;  %v2641_v23 = vmax.f32 %v2605_v3, 0.0 }
 0xf3b   :  { %9229 = vmatpush3.msra.mxu0 %v2890_v42  ;;  %9273 = vmatpush3.msra.mxu1 %v2922_v1  ;;  %v2522_v42 = vadd.f32 %v12192_v58, %v12262_v14  ;;  %v2611_v1 = vadd.f32 %v12194_v19, %v12266_v41  ;;  %v2528_v19 = vadd.f32 %v12244_v53, %v12262_v14 }
 0xf3c   :  { %9230 = vmatprep.subr.mxu0 %v2905_v27  ;;  %9274 = vmatprep.subr.mxu1 %v2937_v31  ;;  %v2656_v27 = vmax.f32 %v2524_v30, 0.0  ;;  %v2658_v31 = vmax.f32 %v2613_v57, 0.0 }
 0xf3d   :  { %9231 = vmatpush3.msra.mxu0 %v2889_v24  ;;  %9275 = vmatpush3.msra.mxu1 %v2921_v43  ;;  %v2535_v24 = vpop.f32.mrf.mxu0  ;;  %v2624_v43 = vpop.f32.mrf.mxu1  ;;  %v2655_v58 = vmax.f32 %v2522_v42, 0.0 }
 0xf3e   :  { %9232 = vmatprep.subr.mxu0 %v2904_v46  ;;  %9276 = vmatprep.subr.mxu1 %v2936_v16  ;;  %v2657_v46 = vmax.f32 %v2611_v1, 0.0  ;;  %v2617_v16 = vadd.f32 %v12246_v55, %v12266_v41 }
 0xf3f   :  { %9233 = vmatpush3.msra.mxu0 %v2888_v52  ;;  %9277 = vmatpush3.msra.mxu1 %v2920_v5  ;;  %v2672_v52 = vmax.f32 %v2530_v34, 0.0  ;;  %v2674_v5 = vmax.f32 %v2619_v25, 0.0 }
 0xf40   :  { %9234 = vmatprep.subr.mxu0 %v2903_v8  ;;  %9278 = vmatprep.subr.mxu1 %v2935_v20  ;;  %v2536_v8 = vadd.f32 %v2535_v24, %v12139_v47  ;;  %v2625_v20 = vadd.f32 %v2624_v43, %v12149_v61 }
 0xf41   :  { %9235 = vmatpush3.msra.mxu0 %v2887_v35  ;;  %9279 = vmatpush3.msra.mxu1 %v2919_v50  ;;  %v2671_v35 = vmax.f32 %v2528_v19, 0.0  ;;  %v2673_v50 = vmax.f32 %v2617_v16, 0.0 }
 0xf42   :  { %9236 = vmatprep.subr.mxu0 %v2902_v63  ;;  %9280 = vmatprep.subr.mxu1 %v2934_v0  ;;  %v2534_v63 = vadd.f32 %v2533_v6, %v12262_v14  ;;  %v2623_v0 = vadd.f32 %v2622_v2, %v12266_v41  ;;  %v2688_v53 = vmax.f32 %v2536_v8, 0.0 }
 0xf43   :  { %9237 = vmatpush3.msra.mxu0 %v2886_v39  ;;  %9281 = vmatpush3.msra.mxu1 %v2918_v32  ;;  %v2690_v39 = vmax.f32 %v2625_v20, 0.0  ;;  %v8704_v20 = vld [vmem:[%s14443_s16] ss:$0 sm:$0xff] }
 0xf44   :  { %9238 = vmatprep.subr.mxu0 %v2901_v21  ;;  %9282 = vmatprep.subr.mxu1 %v2933_v60  ;;  %v2687_v55 = vmax.f32 %v2534_v63, 0.0  ;;  %v2689_v47 = vmax.f32 %v2623_v0, 0.0 }
 0xf45   :  { %9239 = vmatpush3.msra.mxu0 %v2885_v56  ;;  %9283 = vmatpush3.msra.mxu1 %v2917_v4 }
 0xf46   :  { %9240 = vmatprep.subr.mxu0 %v2900_v40  ;;  %9284 = vmatprep.subr.mxu1 %v2932_v51 }
 0xf47   :  { %9241 = vmatpush3.msra.mxu0 %v2884_v59  ;;  %9285 = vmatpush3.msra.mxu1 %v2916_v9 }
 0xf48   :  { %9242 = vmatprep.subr.mxu0 %v2899_v13  ;;  %9286 = vmatprep.subr.mxu1 %v2931_v29 }
 0xf49   :  { %9243 = vmatpush3.msra.mxu0 %v2883_v11  ;;  %9287 = vmatpush3.msra.mxu1 %v2915_v18 }
 0xf4a   :  { %3527 = vmatmul.mubr.f32.vlgmr.msra.gmra.mxu0 %v2639_v22  ;;  %3612 = vmatmul.mubr.f32.vlgmr.msra.gmra.mxu1 %v2641_v23 }
 0xf4b   :  { %3531 = vmatprep.mubr.f32.mxu0 %v2656_v27  ;;  %3616 = vmatprep.mubr.f32.mxu1 %v2658_v31 }
 0xf4e   :  { %3532 = vmatmul.mubr.f32.gmra.mxu0 %v2655_v58  ;;  %3617 = vmatmul.mubr.f32.gmra.mxu1 %v2657_v46 }
 0xf4f   :  { %3536 = vmatprep.mubr.f32.mxu0 %v2672_v52  ;;  %3621 = vmatprep.mubr.f32.mxu1 %v2674_v5 }
 0xf52   :  { %3537 = vmatmul.mubr.f32.gmra.mxu0 %v2671_v35  ;;  %3622 = vmatmul.mubr.f32.gmra.mxu1 %v2673_v50 }
 0xf53   :  { %3541 = vmatprep.mubr.f32.mxu0 %v2688_v53  ;;  %3626 = vmatprep.mubr.f32.mxu1 %v2690_v39 }
 0xf56   :  { %3542 = vmatmul.mubr.f32.gmra.mxu0 %v2687_v55  ;;  %3627 = vmatmul.mubr.f32.gmra.mxu1 %v2689_v47 }
 0xf93   :  { %v8980_v61 = vpop.f32.mrf.mxu0  ;;  %v9024_v32 = vpop.f32.mrf.mxu1 }
 0xf95   :  { %v8981_v21 = vpop.f32.mrf.mxu0  ;;  %v9025_v60 = vpop.f32.mrf.mxu1 }
 0xf96   :  { %v8982_v8 = vadd.f32 %v8981_v21, %v8980_v61  ;;  %v9026_v53 = vadd.f32 %v9025_v60, %v9024_v32 }
 0xf98   :  { %v3019_v63 = vadd.f32 %v8982_v8, %v8704_v20 }
 0xf99   :  { %v8983_v44 = vpop.f32.mrf.mxu0  ;;  %v9027_v36 = vpop.f32.mrf.mxu1 }
 0xf9a   :  { %v3104_v33 = vadd.f32 %v9026_v53, %v3019_v63 }
 0xf9b   :  { %v8984_v56 = vpop.f32.mrf.mxu0  ;;  %v9028_v14 = vpop.f32.mrf.mxu1 }
 0xf9c   :  { %v8985_v0 = vadd.f32 %v8984_v56, %v8983_v44  ;;  %v9029_v45 = vadd.f32 %v9028_v14, %v9027_v36 }
 0xf9e   :  { %v3024_v48 = vadd.f32 %v8985_v0, %v8704_v20 }
 0xfa0   :  { %v3109_v37 = vadd.f32 %v9029_v45, %v3024_v48 }
 0xfa3   :  { %v8986_v4 = vpop.f32.mrf.mxu0  ;;  %v9030_v41 = vpop.f32.mrf.mxu1 }
 0xfa5   :  { %v8987_v40 = vpop.f32.mrf.mxu0  ;;  %v9031_v51 = vpop.f32.mrf.mxu1 }
 0xfa6   :  { %v8988_v55 = vadd.f32 %v8987_v40, %v8986_v4  ;;  %v9032_v8 = vadd.f32 %v9031_v51, %v9030_v41 }
 0xfa8   :  { %v3029_v38 = vadd.f32 %v8988_v55, %v8704_v20 }
 0xfa9   :  { %v8989_v7 = vpop.f32.mrf.mxu0  ;;  %v12330_v3 = vpop.f32.mrf.mxu1 }
 0xfaa   :  { %v3114_v56 = vadd.f32 %v9032_v8, %v3029_v38 }
 0xfab   :  { %v8990_v59 = vpop.f32.mrf.mxu0  ;;  %v12332_v9 = vpop.f32.mrf.mxu1 }
 0xfac   :  { %v8991_v28 = vadd.f32 %v8990_v59, %v8989_v7  ;;  %v9035_v45 = vadd.f32 %v12332_v9, %v12330_v3 }
 0xfba   :  { %v9068_v30 = vpop.f32.mrf.mxu0  ;;  %v9112_v57 = vpop.f32.mrf.mxu1 }
 0xfbc   :  { %v9069_v13 = vpop.f32.mrf.mxu0  ;;  %v9113_v29 = vpop.f32.mrf.mxu1 }
 0xfbd   :  { %v9070_v39 = vadd.f32 %v9069_v13, %v9068_v30  ;;  %v9114_v12 = vadd.f32 %v9113_v29, %v9112_v57  ;;  %v3034_v30 = vadd.f32 %v8991_v28, %v8704_v20 }
 0xfbf   :  { %v3189_v17 = vadd.f32 %v9070_v39, %v3104_v33  ;;  %v3119_v38 = vadd.f32 %v9035_v45, %v3034_v30 }
 0xfc0   :  { %v9071_v6 = vpop.f32.mrf.mxu0  ;;  %v9115_v2 = vpop.f32.mrf.mxu1 }
 0xfc1   :  { %v3274_v32 = vadd.f32 %v9114_v12, %v3189_v17 }
 0xfc2   :  { %v9072_v11 = vpop.f32.mrf.mxu0  ;;  %v9116_v18 = vpop.f32.mrf.mxu1 }
 0xfc3   :  { %v9073_v49 = vadd.f32 %v9072_v11, %v9071_v6  ;;  %v9117_v13 = vadd.f32 %v9116_v18, %v9115_v2 }
 0xfc5   :  { %v3194_v60 = vadd.f32 %v9073_v49, %v3109_v37 }
 0xfc6   :  { %v9074_v22 = vpop.f32.mrf.mxu0  ;;  %v9118_v23 = vpop.f32.mrf.mxu1 }
 0xfc7   :  { %v3279_v48 = vadd.f32 %v9117_v13, %v3194_v60 }
 0xfc8   :  { %v9075_v42 = vpop.f32.mrf.mxu0  ;;  %v9119_v1 = vpop.f32.mrf.mxu1 }
 0xfc9   :  { %v9076_v44 = vadd.f32 %v9075_v42, %v9074_v22  ;;  %v9120_v41 = vadd.f32 %v9119_v1, %v9118_v23 }
 0xfcb   :  { %v3199_v14 = vadd.f32 %v9076_v44, %v3114_v56 }
 0xfcc   :  { %v9077_v27 = vpop.f32.mrf.mxu0  ;;  %v12334_v31 = vpop.f32.mrf.mxu1 }
 0xfcd   :  { %v3284_v57 = vadd.f32 %v9120_v41, %v3199_v14 }
 0xfce   :  { %v9078_v34 = vpop.f32.mrf.mxu0  ;;  %v12336_v25 = vpop.f32.mrf.mxu1 }
 0xfcf   :  { %v9079_v7 = vadd.f32 %v9078_v34, %v9077_v27  ;;  %v9123_v3 = vadd.f32 %v12336_v25, %v12334_v31 }
 0xfd1   :  { %v3204_v2 = vadd.f32 %v9079_v7, %v3119_v38 }
 0xfe2   :  { %v9156_v24 = vpop.f32.mrf.mxu0  ;;  %v9200_v43 = vpop.f32.mrf.mxu1 }
 0xfe4   :  { %v9157_v58 = vpop.f32.mrf.mxu0  ;;  %v9201_v46 = vpop.f32.mrf.mxu1 }
 0xfe5   :  { %v9158_v62 = vadd.f32 %v9157_v58, %v9156_v24  ;;  %v9202_v59 = vadd.f32 %v9201_v46, %v9200_v43 }
 0xfe7   :  { %v3359_v36 = vadd.f32 %v9158_v62, %v3274_v32 }
 0xfe8   :  { %v9159_v19 = vpop.f32.mrf.mxu0  ;;  %v9203_v16 = vpop.f32.mrf.mxu1 }
 0xfe9   :  { %v3444_v49 = vadd.f32 %v9202_v59, %v3359_v36 }
 0xfea   :  { %v9160_v52 = vpop.f32.mrf.mxu0  ;;  %v9204_v5 = vpop.f32.mrf.mxu1 }
 0xfeb   :  { %v9161_v33 = vadd.f32 %v9160_v52, %v9159_v19  ;;  %v9205_v18 = vadd.f32 %v9204_v5, %v9203_v16  ;;  %v3289_v52 = vadd.f32 %v9123_v3, %v3204_v2  ;;  %v3707_v3 = vld [vmem:[%s14538_s11 + $0x28] sm:$0xff] }
 0xfed   :  { %v3364_v17 = vadd.f32 %v9161_v33, %v3279_v48 }
 0xfee   :  { %v9162_v35 = vpop.f32.mrf.mxu0  ;;  %v9206_v50 = vpop.f32.mrf.mxu1 }
 0xfef   :  { %v3449_v1 = vadd.f32 %v9205_v18, %v3364_v17 }
 0xff0   :  { %v9163_v47 = vpop.f32.mrf.mxu0  ;;  %v9207_v10 = vpop.f32.mrf.mxu1 }
 0xff1   :  { %v9164_v51 = vadd.f32 %v9163_v47, %v9162_v35  ;;  %v9208_v58 = vadd.f32 %v9207_v10, %v9206_v50 }
 0xff3   :  { %v3369_v9 = vadd.f32 %v9164_v51, %v3284_v57 }
 0xff4   :  { %v9165_v61 = vpop.f32.mrf.mxu0  ;;  %v12341_v21 = vpop.f32.mrf.mxu1 }
 0xff5   :  { %v3454_v5 = vadd.f32 %v9208_v58, %v3369_v9  ;;  %v3706_v9 = vld [vmem:[%s14538_s11 + $0x20] sm:$0xff] }
 0xff6   :  { %v9166_v4 = vpop.f32.mrf.mxu0  ;;  %v9210_v40 = vpop.f32.mrf.mxu1 }
 0xff7   :  { %v9167_v34 = vadd.f32 %v9166_v4, %v9165_v61  ;;  %v9211_v10 = vadd.f32 %v9210_v40, %v12341_v21  ;;  %v14558_v21 = vld [vmem:[#allocation4_spill] sm:$0xff] }
 0xff9   :  { %v3374_v53 = vadd.f32 %v9167_v34, %v3289_v52 }
0x100a   :  { %v9244_v6 = vpop.f32.mrf.mxu0  ;;  %v9288_v11 = vpop.f32.mrf.mxu1 }
0x100c   :  { %v9245_v12 = vpop.f32.mrf.mxu0  ;;  %v9289_v37 = vpop.f32.mrf.mxu1 }
0x100d   :  { %v9246_v28 = vadd.f32 %v9245_v12, %v9244_v6  ;;  %v9290_v42 = vadd.f32 %v9289_v37, %v9288_v11 }
0x100e   :  { %v9247_v62 = vpop.f32.mrf.mxu0  ;;  %v9291_v29 = vpop.f32.mrf.mxu1 }
0x100f   :  { %v3529_v22 = vadd.f32 %v9246_v28, %v3444_v49 }
0x1010   :  { %v9248_v27 = vpop.f32.mrf.mxu0  ;;  %v9292_v23 = vpop.f32.mrf.mxu1 }
0x1011   :  { %v3614_v24 = vadd.f32 %v9290_v42, %v3529_v22  ;;  %v9249_v43 = vadd.f32 %v9248_v27, %v9247_v62  ;;  %v9293_v35 = vadd.f32 %v9292_v23, %v9291_v29  ;;  %v3709_v22 = vld [vmem:[%s14538_s11 + $0x38] sm:$0xff]  ;;  %v3708_v42 = vld [vmem:[%s14538_s11 + $0x30] sm:$0xff]  ;;  %s14567_s11 = smov 72  }
0x1012   :  { %v9250_v46 = vpop.f32.mrf.mxu0  ;;  %v9294_v19 = vpop.f32.mrf.mxu1  ;;  %9957 = vmatprep.subr.mxu0 %v3709_v22 }
0x1013   :  { %v3534_v20 = vadd.f32 %v9249_v43, %v3449_v1  ;;  %v3632_v16 = vadd.f32 %v3614_v24, %v11096_v26  ;;  %v3459_v26 = vadd.f32 %v9211_v10, %v3374_v53  ;;  %9958 = vmatpush3.msra.mxu0 %v3709_v22 }
0x1014   :  { %v9251_v63 = vpop.f32.mrf.mxu0  ;;  %v9295_v0 = vpop.f32.mrf.mxu1  ;;  %9959 = vmatprep.subr.mxu0 %v3708_v42 }
0x1015   :  { %v3619_v31 = vadd.f32 %v9293_v35, %v3534_v20  ;;  %v9252_v25 = vadd.f32 %v9251_v63, %v9250_v46  ;;  %v3638_v39 = vsel %vm304_vm2, %v3632_v16, 0.0  ;;  %v9296_v61 = vadd.f32 %v9295_v0, %v9294_v19  ;;  %9960 = vmatpush3.msra.mxu0 %v3708_v42  ;;  %v8706_v0 = vld [vmem:[%s14445_s18] ss:$0 sm:$0xff] }
0x1016   :  { %v9253_v55 = vpop.f32.mrf.mxu0  ;;  %v9297_v47 = vpop.f32.mrf.mxu1  ;;  %3639 = vadd.xlane.f32.xlu1 %v3638_v39  ;;  %9961 = vmatprep.subr.mxu0 %v3707_v3 }
0x1017   :  { %v3539_v50 = vadd.f32 %v9252_v25, %v3454_v5  ;;  %v3633_v8 = vadd.f32 %v3619_v31, %v11116_v15  ;;  %9962 = vmatpush3.msra.mxu0 %v3707_v3  ;;  %v8705_v5 = vld [vmem:[%s14444_s17] ss:$0 sm:$0xff] }
0x1018   :  { %v9254_v44 = vpop.f32.mrf.mxu0  ;;  %v9298_v32 = vpop.f32.mrf.mxu1  ;;  %9963 = vmatprep.subr.mxu0 %v3706_v9 }
0x1019   :  { %v3624_v60 = vadd.f32 %v9296_v61, %v3539_v50  ;;  %v9255_v56 = vadd.f32 %v9254_v44, %v9253_v55  ;;  %v3641_v4 = vsel %vm304_vm2, %v3633_v8, 0.0  ;;  %v9299_v13 = vadd.f32 %v9298_v32, %v9297_v47  ;;  %9964 = vmatpush3.msra.mxu0 %v3706_v9 }
0x101a   :  { %3642 = vadd.xlane.f32.xlu0 %v3641_v4  ;;  %v8707_v4 = vld [vmem:[%s14542_s29 + $0x1] ss:$0 sm:$0xff]  ;;  %s14560_s29 = smov 88  }
0x101b   :  { %v3544_v30 = vadd.f32 %v9255_v56, %v3459_v26  ;;  %v3634_v36 = vadd.f32 %v3624_v60, %v11161_v54 }
0x101d   :  { %v3629_v33 = vadd.f32 %v9299_v13, %v3544_v30  ;;  %v3644_v14 = vsel %vm304_vm2, %v3634_v36, 0.0 }
0x101e   :  { %3645 = vadd.xlane.f32.xlu1 %v3644_v14 }
0x101f   :  { %v3635_v40 = vadd.f32 %v3629_v33, %v14558_v21 }
0x1021   :  { %v3647_v15 = vsel %vm304_vm2, %v3635_v40, 0.0 }
0x1022   :  { %3648 = vadd.xlane.f32.xlu0 %v3647_v15 }
0x109f   :  { %v3640_v6 = vpop.xlane.xlu1 %3639 }
0x10a0   :  { %v3650_v11 = vmul.f32 0.03125, %v3640_v6 }
0x10a2   :  { %v3654_v45 = vsub.f32 %v3632_v16, %v3650_v11 }
0x10a3   :  { %v3643_v48 = vpop.xlane.xlu0 %3642 }
0x10a4   :  { %v3651_v7 = vmul.f32 0.03125, %v3643_v48  ;;  %v3658_v59 = vmul.f32 %v3654_v45, %v3654_v45 }
0x10a6   :  { %v3655_v41 = vsub.f32 %v3633_v8, %v3651_v7  ;;  %v3662_v51 = vsel %vm304_vm2, %v3658_v59, 0.0 }
0x10a7   :  { %3663 = vadd.xlane.f32.xlu1 %v3662_v51  ;;  %v3646_v54 = vpop.xlane.xlu1 %3645 }
0x10a8   :  { %v3652_v12 = vmul.f32 0.03125, %v3646_v54  ;;  %v3659_v37 = vmul.f32 %v3655_v41, %v3655_v41 }
0x10aa   :  { %v3656_v38 = vsub.f32 %v3634_v36, %v3652_v12  ;;  %v3665_v49 = vsel %vm304_vm2, %v3659_v37, 0.0 }
0x10ab   :  { %3666 = vadd.xlane.f32.xlu0 %v3665_v49  ;;  %v3649_v17 = vpop.xlane.xlu0 %3648 }
0x10ac   :  { %v3653_v28 = vmul.f32 0.03125, %v3649_v17  ;;  %v3660_v57 = vmul.f32 %v3656_v38, %v3656_v38 }
0x10ae   :  { %v3657_v62 = vsub.f32 %v3635_v40, %v3653_v28  ;;  %v3668_v29 = vsel %vm304_vm2, %v3660_v57, 0.0  ;;  %v12460_v28 = vld [vmem:[%s14544_s6 + $0x8] sm:$0xff] }
0x10af   :  { %3669 = vadd.xlane.f32.xlu1 %v3668_v29 }
0x10b0   :  { %v3661_v2 = vmul.f32 %v3657_v62, %v3657_v62 }
0x10b2   :  { %v3671_v18 = vsel %vm304_vm2, %v3661_v2, 0.0  ;;  %v12466_v2 = vld [vmem:[%s14544_s6] sm:$0xff] }
0x10b3   :  { %3672 = vadd.xlane.f32.xlu0 %v3671_v18 }
0x1130   :  { %v3664_v27 = vpop.xlane.xlu1 %3663 }
0x1131   :  { %v3674_v23 = vmul.f32 0.03125, %v3664_v27 }
0x1133   :  { %v3678_v1 = vadd.f32 1e-05, %v3674_v23  ;;  %v12474_v23 = vld [vmem:[%s14544_s6 + $0x10] sm:$0xff] }
0x1134   :  { %v3667_v34 = vpop.xlane.xlu0 %3666 }
0x1135   :  { %10299 = vrsqrt.f32 %v3678_v1  ;;  %v3675_v24 = vmul.f32 0.03125, %v3667_v34  ;;  %v12480_v34 = vld [vmem:[%s14544_s6 + $0x18] sm:$0xff]  ;;  %s14562_s6 = smov 64  }
0x1137   :  { %v3679_v43 = vadd.f32 1e-05, %v3675_v24 }
0x1138   :  { %v3670_v58 = vpop.xlane.xlu1 %3669 }
0x1139   :  { %10301 = vrsqrt.f32 %v3679_v43  ;;  %v3676_v46 = vmul.f32 0.03125, %v3670_v58 }
0x113b   :  { %v3680_v19 = vadd.f32 1e-05, %v3676_v46 }
0x113c   :  { %v3673_v52 = vpop.xlane.xlu0 %3672 }
0x113d   :  { %10303 = vrsqrt.f32 %v3680_v19  ;;  %v3677_v20 = vmul.f32 0.03125, %v3673_v52 }
0x113f   :  { %v3681_v35 = vadd.f32 1e-05, %v3677_v20 }
0x1141   :  { %10305 = vrsqrt.f32 %v3681_v35 }
0x1142   :  { %v10300_v16 = vpop.eup %10299 }
0x1143   :  { %v3686_v63 = vmul.f32 %v10300_v16, %v3654_v45 }
0x1145   :  { %v3694_v53 = vmul.f32 %v8705_v5, %v3686_v63 }
0x1146   :  { %v10302_v31 = vpop.eup %10301 }
0x1147   :  { %v3687_v25 = vmul.f32 %v10302_v31, %v3655_v41  ;;  %v12378_v39 = vadd.f32 %v8706_v0, %v3694_v53 }
0x1149   :  { %v3695_v55 = vmul.f32 %v8705_v5, %v3687_v25  ;;  %9965 = vmatprep.mubr.msk.f32.mxu0 %vm304_vm2, %v12378_v39 }
0x114a   :  { %v10304_v47 = vpop.eup %10303 }
0x114b   :  { %v12382_v10 = vadd.f32 %v8706_v0, %v3695_v55  ;;  %v3688_v50 = vmul.f32 %v10304_v47, %v3656_v38 }
0x114d   :  { %9966 = vmatmul.mubr.msk.f32.vlgmr.msra.gmra.mxu0 %vm304_vm2, %v12382_v10  ;;  %v3696_v61 = vmul.f32 %v8705_v5, %v3688_v50 }
0x114e   :  { %v10306_v8 = vpop.eup %10305 }
0x114f   :  { %v12386_v44 = vadd.f32 %v8706_v0, %v3696_v61  ;;  %v3689_v32 = vmul.f32 %v10306_v8, %v3657_v62 }
0x1151   :  { %9968 = vmatprep.mubr.msk.f32.mxu0 %vm304_vm2, %v12386_v44  ;;  %v3697_v26 = vmul.f32 %v8705_v5, %v3689_v32 }
0x1153   :  { %v12390_v60 = vadd.f32 %v8706_v0, %v3697_v26 }
0x1155   :  { %9969 = vmatmul.mubr.msk.f32.gmra.mxu0 %vm304_vm2, %v12390_v60 }
0x120d   :  { %v9967_v56 = vpop.f32.mrf.mxu0 }
0x120e   :  { %v12407_v40 = vadd.f32 %v9967_v56, %v8707_v4 }
0x120f   :  { %v3793_v30 = vpop.f32.mrf.mxu0 }
0x1210   :  { %v12397_v13 = vadd.f32 %v8707_v4, %v3793_v30 }
0x1212   :  { %9979 = vmatprep.mubr.msk.f32.mxu1 %vm414_vm5, %v12397_v13 }
0x1215   :  { %v9970_v36 = vpop.f32.mrf.mxu0 }
0x1216   :  { %v12401_v33 = vadd.f32 %v9970_v36, %v8707_v4 }
0x1217   :  { %v3803_v14 = vpop.f32.mrf.mxu0 }
0x1218   :  { %v12403_v21 = vadd.f32 %v8707_v4, %v3803_v14  ;;  %3822 = vrot.lane.b32.xlu1 %v12401_v33, %s14559_s1 }
0x121a   :  { %3820 = vrot.lane.b32.xlu0 %v12403_v21, %s14559_s1 }
0x121c   :  { %3818 = vrot.lane.b32.xlu1 %v12407_v40, %s14559_s1 }
0x121e   :  { %4100 = vrot.lane.b32.xlu0 %v12401_v33, %s14560_s29 }
0x1220   :  { %3816 = vrot.lane.b32.xlu1 %v12397_v13, %s14559_s1 }
0x1222   :  { %4096 = vrot.lane.b32.xlu0 %v12407_v40, %s14560_s29 }
0x1224   :  { %4098 = vrot.lane.b32.xlu1 %v12403_v21, %s14560_s29 }
0x1226   :  { %4086 = vrot.lane.b32.xlu0 %v12397_v13, %s14561_s2 }
0x1228   :  { %4094 = vrot.lane.b32.xlu1 %v12397_v13, %s14560_s29 }
0x122a   :  { %4090 = vrot.lane.b32.xlu0 %v12403_v21, %s14561_s2 }
0x122c   :  { %4088 = vrot.lane.b32.xlu1 %v12407_v40, %s14561_s2 }
0x1230   :  { %4092 = vrot.lane.b32.xlu1 %v12401_v33, %s14561_s2 }
0x128a   :  { %v3823_v15 = vpop.permute.xlu1 %3822 }
0x128b   :  { %9971 = vmatprep.subr.msk.mxu1 %vm414_vm5, %v3823_v15 }
0x128c   :  { %9972 = vmatpush3.xpose.msk.msra.mxu1 %vm414_vm5, %v3823_v15  ;;  %v3821_v6 = vpop.permute.xlu0 %3820 }
0x128d   :  { %9973 = vmatprep.subr.msk.mxu1 %vm414_vm5, %v3821_v6 }
0x128e   :  { %v3819_v11 = vpop.permute.xlu1 %3818 }
0x1290   :  { %9974 = vmatpush3.xpose.msk.msra.mxu1 %vm414_vm5, %v3821_v6  ;;  %v4101_v45 = vpop.permute.xlu0 %4100 }
0x1291   :  { %9975 = vmatprep.subr.msk.mxu1 %vm414_vm5, %v3819_v11 }
0x1292   :  { %v3817_v48 = vpop.permute.xlu1 %3816 }
0x1294   :  { %9976 = vmatpush3.xpose.msk.msra.mxu1 %vm414_vm5, %v3819_v11  ;;  %v4097_v7 = vpop.permute.xlu0 %4096 }
0x1295   :  { %9977 = vmatprep.subr.msk.mxu1 %vm414_vm5, %v3817_v48 }
0x1296   :  { %v4099_v59 = vpop.permute.xlu1 %4098 }
0x1298   :  { %9978 = vmatpush3.xpose.msk.msra.mxu1 %vm414_vm5, %v3817_v48  ;;  %v4087_v41 = vpop.permute.xlu0 %4086 }
0x1299   :  { %9999 = vmatprep.subr.msk.mxu1 %vm414_vm5, %v4101_v45 }
0x129a   :  { %v4095_v51 = vpop.permute.xlu1 %4094 }
0x129b   :  { %9980 = vmatmul.mubr.msk.f32.vlgmr.msra.gmra.mxu1 %vm414_vm5, %v12407_v40 }
0x129c   :  { %9982 = vmatprep.mubr.msk.f32.mxu1 %vm414_vm5, %v12403_v21  ;;  %10000 = vmatpush3.xpose.msk.msra.mxu1 %vm414_vm5, %v4101_v45  ;;  %v4091_v12 = vpop.permute.xlu0 %4090 }
0x129d   :  { %10001 = vmatprep.subr.msk.mxu1 %vm414_vm5, %v4099_v59 }
0x129e   :  { %v4089_v54 = vpop.permute.xlu1 %4088 }
0x129f   :  { %9983 = vmatmul.mubr.msk.f32.gmra.mxu1 %vm414_vm5, %v12401_v33 }
0x12a0   :  { %10002 = vmatpush3.xpose.msk.msra.mxu1 %vm414_vm5, %v4099_v59  ;;  %10007 = vmatprep.mubr.msk.f32.mxu1 %vm414_vm5, %v4087_v41 }
0x12a1   :  { %10003 = vmatprep.subr.msk.mxu1 %vm414_vm5, %v4097_v7 }
0x12a2   :  { %v4093_v37 = vpop.permute.xlu1 %4092 }
0x12a4   :  { %10004 = vmatpush3.xpose.msk.msra.mxu1 %vm414_vm5, %v4097_v7 }
0x12a5   :  { %10005 = vmatprep.subr.msk.mxu1 %vm414_vm5, %v4095_v51 }
0x12a8   :  { %10006 = vmatpush3.xpose.msk.msra.mxu1 %vm414_vm5, %v4095_v51 }
0x12ab   :  { %10008 = vmatmul.mubr.msk.f32.vlgmr.msra.gmra.mxu1 %vm414_vm5, %v4089_v54 }
0x12ac   :  { %10010 = vmatprep.mubr.msk.f32.mxu1 %vm414_vm5, %v4091_v12 }
0x12af   :  { %10011 = vmatmul.mubr.msk.f32.gmra.mxu1 %vm414_vm5, %v4093_v37 }
0x135b   :  { %v9981_v38 = vpop.f32.mrf.mxu1 }
0x135c   :  { %v3926_v49 = vmul.f32 0.35355338, %v9981_v38 }
0x135d   :  { %v3906_v17 = vpop.f32.mrf.mxu1 }
0x135e   :  { %v3930_v57 = vadd.f32 %v12460_v28, %v3926_v49  ;;  %v3925_v62 = vmul.f32 0.35355338, %v3906_v17 }
0x135f   :  { %v9984_v29 = vpop.f32.mrf.mxu1 }
0x1360   :  { %v3929_v18 = vadd.f32 %v12466_v2, %v3925_v62  ;;  %v3936_v22 = vsel %vm304_vm2, %v3930_v57, -inf  ;;  %v3928_v3 = vmul.f32 0.35355338, %v9984_v29 }
0x1361   :  { %3937 = vmax.xlane.f32.xlu1 %v3936_v22  ;;  %v3916_v42 = vpop.f32.mrf.mxu1 }
0x1362   :  { %v3927_v9 = vmul.f32 0.35355338, %v3916_v42  ;;  %v3933_v27 = vsel %vm304_vm2, %v3929_v18, -inf  ;;  %v3932_v24 = vadd.f32 %v12480_v34, %v3928_v3 }
0x1363   :  { %3934 = vmax.xlane.f32.xlu0 %v3933_v27 }
0x1364   :  { %v3931_v1 = vadd.f32 %v12474_v23, %v3927_v9  ;;  %v3942_v58 = vsel %vm304_vm2, %v3932_v24, -inf }
0x1366   :  { %v3939_v43 = vsel %vm304_vm2, %v3931_v1, -inf }
0x1367   :  { %3940 = vmax.xlane.f32.xlu0 %v3939_v43 }
0x136b   :  { %3943 = vmax.xlane.f32.xlu0 %v3942_v58  ;;  %v10009_v46 = vpop.f32.mrf.mxu1 }
0x136c   :  { %v4204_v19 = vmul.f32 0.35355338, %v10009_v46 }
0x136d   :  { %v4184_v52 = vpop.f32.mrf.mxu1 }
0x136e   :  { %v4208_v20 = vadd.f32 %v12460_v28, %v4204_v19  ;;  %v4203_v35 = vmul.f32 0.35355338, %v4184_v52 }
0x136f   :  { %v10012_v16 = vpop.f32.mrf.mxu1 }
0x1370   :  { %v12487_v5 = vadd.f32 %v12466_v2, %v4203_v35  ;;  %v4206_v63 = vmul.f32 0.35355338, %v10012_v16  ;;  %v4214_v0 = vsel %vm304_vm2, %v4208_v20, -inf }
0x1371   :  { %4215 = vmax.xlane.f32.xlu0 %v4214_v0  ;;  %v4194_v55 = vpop.f32.mrf.mxu1 }
0x1372   :  { %v12491_v53 = vadd.f32 %v12480_v34, %v4206_v63  ;;  %v4211_v31 = vsel %vm304_vm2, %v12487_v5, -inf  ;;  %v4205_v47 = vmul.f32 0.35355338, %v4194_v55 }
0x1373   :  { %4212 = vmax.xlane.f32.xlu1 %v4211_v31 }
0x1374   :  { %v4220_v25 = vsel %vm304_vm2, %v12491_v53, -inf  ;;  %v12512_v50 = vadd.f32 %v12474_v23, %v4205_v47 }
0x1375   :  { %4221 = vmax.xlane.f32.xlu0 %v4220_v25 }
0x1376   :  { %v4217_v61 = vsel %vm304_vm2, %v12512_v50, -inf }
0x1384   :  { %3981 = vrot.lane.b32.xlu1 %v12403_v21, %s14562_s6 }
0x1388   :  { %3977 = vrot.lane.b32.xlu1 %v12397_v13, %s14562_s6 }
0x138b   :  { %3983 = vrot.lane.b32.xlu0 %v12401_v33, %s14562_s6 }
0x138c   :  { %4259 = vrot.lane.b32.xlu1 %v12403_v21, %s14563_s28 }
0x138f   :  { %3979 = vrot.lane.b32.xlu0 %v12407_v40, %s14562_s6  ;;  %s14573_s6 = smov 24  }
0x1393   :  { %4261 = vrot.lane.b32.xlu0 %v12401_v33, %s14563_s28 }
0x1397   :  { %4257 = vrot.lane.b32.xlu0 %v12407_v40, %s14563_s28 }
0x13b0   :  { %4218 = vmax.xlane.f32.xlu1 %v4217_v61 }
0x13c1   :  { %4255 = vrot.lane.b32.xlu1 %v12397_v13, %s14563_s28 }
0x13ea   :  { %v3938_v8 = vpop.xlane.xlu1 %3937 }
0x13eb   :  { %v3946_v32 = vsub.f32 %v3930_v57, %v3938_v8 }
0x13ec   :  { %v3935_v26 = vpop.xlane.xlu0 %3934 }
0x13ed   :  { %v3951_v56 = vmul.f32 1.442695, %v3946_v32  ;;  %v3945_v4 = vsub.f32 %v3929_v18, %v3935_v26 }
0x13ef   :  { %10307 = vpow2.f32 %v3951_v56  ;;  %v3949_v30 = vmul.f32 1.442695, %v3945_v4 }
0x13f0   :  { %v3941_v36 = vpop.xlane.xlu0 %3940 }
0x13f1   :  { %10309 = vpow2.f32 %v3949_v30  ;;  %v3947_v14 = vsub.f32 %v3931_v1, %v3941_v36 }
0x13f3   :  { %v3953_v15 = vmul.f32 1.442695, %v3947_v14 }
0x13f4   :  { %v3944_v6 = vpop.xlane.xlu0 %3943 }
0x13f5   :  { %10311 = vpow2.f32 %v3953_v15  ;;  %v3948_v11 = vsub.f32 %v3932_v24, %v3944_v6 }
0x13f7   :  { %v3955_v45 = vmul.f32 1.442695, %v3948_v11 }
0x13f9   :  { %10313 = vpow2.f32 %v3955_v45 }
0x13fa   :  { %v4216_v48 = vpop.xlane.xlu0 %4215 }
0x13fb   :  { %v4224_v7 = vsub.f32 %v4208_v20, %v4216_v48 }
0x13fc   :  { %v12518_v59 = vpop.eup %10307  ;;  %v4213_v41 = vpop.xlane.xlu1 %4212 }
0x13fd   :  { %v4229_v51 = vmul.f32 1.442695, %v4224_v7  ;;  %v3960_v54 = vsel %vm304_vm2, %v12518_v59, 0.0  ;;  %v4223_v1 = vsub.f32 %v12487_v5, %v4213_v41 }
0x13fe   :  { %v12522_v12 = vpop.eup %10309  ;;  %3961 = vadd.xlane.f32.xlu0 %v3960_v54  ;;  %v4222_v37 = vpop.xlane.xlu0 %4221 }
0x13ff   :  { %10315 = vpow2.f32 %v4229_v51  ;;  %v3957_v38 = vsel %vm304_vm2, %v12522_v12, 0.0  ;;  %v4227_v24 = vmul.f32 1.442695, %v4223_v1  ;;  %v4226_v43 = vsub.f32 %v12491_v53, %v4222_v37 }
0x1400   :  { %3958 = vadd.xlane.f32.xlu1 %v3957_v38  ;;  %v3982_v17 = vpop.permute.xlu1 %3981 }
0x1401   :  { %10317 = vpow2.f32 %v4227_v24  ;;  %v4233_v58 = vmul.f32 1.442695, %v4226_v43 }
0x1402   :  { %v12526_v49 = vpop.eup %10311  ;;  %v3984_v57 = vpop.permute.xlu0 %3983 }
0x1403   :  { %9985 = vmatprep.subr.mxu0 %v3984_v57  ;;  %v3963_v62 = vsel %vm304_vm2, %v12526_v49, 0.0  ;;  %10319 = vpow2.f32 %v4233_v58 }
0x1404   :  { %3964 = vadd.xlane.f32.xlu1 %v3963_v62  ;;  %9986 = vmatpush3.msra.mxu0 %v3984_v57  ;;  %v3978_v42 = vpop.permute.xlu1 %3977 }
0x1405   :  { %9987 = vmatprep.subr.mxu0 %v3982_v17 }
0x1406   :  { %v12530_v29 = vpop.eup %10313  ;;  %9988 = vmatpush3.msra.mxu0 %v3982_v17  ;;  %v3980_v18 = vpop.permute.xlu0 %3979 }
0x1407   :  { %9989 = vmatprep.subr.mxu0 %v3980_v18  ;;  %v3966_v22 = vsel %vm304_vm2, %v12530_v29, 0.0 }
0x1408   :  { %3967 = vadd.xlane.f32.xlu0 %v3966_v22  ;;  %9990 = vmatpush3.msra.mxu0 %v3980_v18  ;;  %v4260_v46 = vpop.permute.xlu1 %4259 }
0x1409   :  { %9991 = vmatprep.subr.mxu0 %v3978_v42 }
0x140a   :  { %9992 = vmatpush3.msra.mxu0 %v3978_v42  ;;  %v4262_v3 = vpop.permute.xlu0 %4261 }
0x140b   :  { %10013 = vmatprep.subr.mxu0 %v4262_v3 }
0x140c   :  { %v12534_v9 = vpop.eup %10315 }
0x140d   :  { %v4238_v27 = vsel %vm304_vm2, %v12534_v9, 0.0 }
0x140e   :  { %4239 = vadd.xlane.f32.xlu0 %v4238_v27  ;;  %v10318_v19 = vpop.eup %10317  ;;  %v4258_v31 = vpop.permute.xlu0 %4257 }
0x140f   :  { %v4235_v16 = vsel %vm304_vm2, %v10318_v19, 0.0 }
0x1410   :  { %v12556_v5 = vpop.eup %10319 }
0x1411   :  { %v4244_v63 = vsel %vm304_vm2, %v12556_v5, 0.0 }
0x1415   :  { %4376 = vrot.lane.b32.xlu1 %v12403_v21, %s14564_s4 }
0x1419   :  { %4372 = vrot.lane.b32.xlu1 %v12397_v13, %s14564_s4 }
0x1424   :  { %4378 = vrot.lane.b32.xlu0 %v12401_v33, %s14564_s4 }
0x1428   :  { %4374 = vrot.lane.b32.xlu0 %v12407_v40, %s14564_s4 }
0x142c   :  { %4364 = vrot.lane.b32.xlu0 %v12397_v13, %s14565_s24 }
0x1430   :  { %4368 = vrot.lane.b32.xlu0 %v12403_v21, %s14565_s24 }
0x1434   :  { %4537 = vrot.lane.b32.xlu0 %v12403_v21, %s14566_s3 }
0x1439   :  { %v4219_v52 = vpop.xlane.xlu1 %4218 }
0x143a   :  { %v4225_v20 = vsub.f32 %v12512_v50, %v4219_v52 }
0x143c   :  { %v4231_v35 = vmul.f32 1.442695, %v4225_v20 }
0x143d   :  { %4236 = vadd.xlane.f32.xlu1 %v4235_v16  ;;  %v4256_v25 = vpop.permute.xlu1 %4255 }
0x143e   :  { %10321 = vpow2.f32 %v4231_v35 }
0x1441   :  { %4245 = vadd.xlane.f32.xlu1 %v4244_v63 }
0x144b   :  { %v12560_v0 = vpop.eup %10321 }
0x144c   :  { %v4241_v53 = vsel %vm304_vm2, %v12560_v0, 0.0 }
0x144d   :  { %4242 = vadd.xlane.f32.xlu1 %v4241_v53 }
0x145e   :  { %4366 = vrot.lane.b32.xlu1 %v12407_v40, %s14565_s24 }
0x1462   :  { %4370 = vrot.lane.b32.xlu1 %v12401_v33, %s14565_s24 }
0x1466   :  { %4539 = vrot.lane.b32.xlu1 %v12401_v33, %s14566_s3 }
0x146a   :  { %4535 = vrot.lane.b32.xlu1 %v12407_v40, %s14566_s3 }
0x146e   :  { %4533 = vrot.lane.b32.xlu1 %v12397_v13, %s14566_s3 }
0x1487   :  { %v3962_v55 = vpop.xlane.xlu0 %3961 }
0x1488   :  { %10323 = vrcp.f32 %v3962_v55 }
0x1489   :  { %v3959_v47 = vpop.xlane.xlu1 %3958 }
0x148a   :  { %10325 = vrcp.f32 %v3959_v47 }
0x148d   :  { %v3965_v50 = vpop.xlane.xlu1 %3964 }
0x148e   :  { %10327 = vrcp.f32 %v3965_v50 }
0x1491   :  { %v3968_v61 = vpop.xlane.xlu0 %3967  ;;  %v4377_v11 = vpop.permute.xlu1 %4376 }
0x1492   :  { %10329 = vrcp.f32 %v3968_v61 }
0x1495   :  { %v10324_v8 = vpop.eup %10323  ;;  %v4373_v45 = vpop.permute.xlu1 %4372 }
0x1496   :  { %v3972_v56 = vmul.f32 %v10324_v8, %v12518_v59 }
0x1497   :  { %v10326_v32 = vpop.eup %10325  ;;  %v4240_v30 = vpop.xlane.xlu0 %4239 }
0x1498   :  { %v3970_v26 = vmul.f32 %v10326_v32, %v12522_v12  ;;  %10331 = vrcp.f32 %v4240_v30 }
0x149a   :  { %9993 = vmatprep.mubr.msk.f32.mxu0 %vm304_vm2, %v3970_v26 }
0x149b   :  { %v10328_v4 = vpop.eup %10327  ;;  %9994 = vmatmul.mubr.msk.f32.vlgmr.msra.gmra.mxu0 %vm304_vm2, %v3972_v56  ;;  %v4379_v6 = vpop.permute.xlu0 %4378 }
0x149c   :  { %10014 = vmatpush3.msra.mxu0 %v4262_v3  ;;  %v3974_v36 = vmul.f32 %v10328_v4, %v12526_v49 }
0x149d   :  { %10015 = vmatprep.subr.mxu0 %v4260_v46 }
0x149e   :  { %10016 = vmatpush3.msra.mxu0 %v4260_v46  ;;  %9996 = vmatprep.mubr.msk.f32.mxu0 %vm304_vm2, %v3974_v36 }
0x149f   :  { %v10330_v14 = vpop.eup %10329  ;;  %10017 = vmatprep.subr.mxu0 %v4258_v31  ;;  %v4375_v7 = vpop.permute.xlu0 %4374 }
0x14a0   :  { %10018 = vmatpush3.msra.mxu0 %v4258_v31  ;;  %v3976_v15 = vmul.f32 %v10330_v14, %v12530_v29 }
0x14a1   :  { %10019 = vmatprep.subr.mxu0 %v4256_v25 }
0x14a2   :  { %10020 = vmatpush3.msra.mxu0 %v4256_v25 }
0x14a3   :  { %9997 = vmatmul.mubr.msk.f32.gmra.mxu0 %vm304_vm2, %v3976_v15  ;;  %10027 = vmatprep.subr.msk.mxu0 %vm414_vm5, %v4379_v6  ;;  %v4365_v38 = vpop.permute.xlu0 %4364 }
0x14a5   :  { %v10332_v41 = vpop.eup %10331 }
0x14a6   :  { %v4250_v12 = vmul.f32 %v10332_v41, %v12534_v9 }
0x14a7   :  { %v4369_v17 = vpop.permute.xlu0 %4368 }
0x14ab   :  { %v4538_v22 = vpop.permute.xlu0 %4537 }
0x14c6   :  { %v4237_v48 = vpop.xlane.xlu1 %4236 }
0x14c7   :  { %10333 = vrcp.f32 %v4237_v48 }
0x14ca   :  { %v4246_v59 = vpop.xlane.xlu1 %4245 }
0x14cb   :  { %10335 = vrcp.f32 %v4246_v59 }
0x14d4   :  { %v10334_v51 = vpop.eup %10333 }
0x14d5   :  { %v4248_v54 = vmul.f32 %v10334_v51, %v10318_v19 }
0x14d6   :  { %v4243_v37 = vpop.xlane.xlu1 %4242 }
0x14d7   :  { %10337 = vrcp.f32 %v4243_v37  ;;  %10021 = vmatprep.mubr.msk.f32.mxu0 %vm304_vm2, %v4248_v54 }
0x14d8   :  { %10022 = vmatmul.mubr.msk.f32.vlgmr.msra.gmra.mxu0 %vm304_vm2, %v4250_v12  ;;  %v10336_v29 = vpop.eup %10335 }
0x14d9   :  { %10028 = vmatpush3.xpose.msk.msra.mxu0 %vm414_vm5, %v4379_v6  ;;  %v4254_v9 = vmul.f32 %v10336_v29, %v12556_v5 }
0x14da   :  { %10029 = vmatprep.subr.msk.mxu0 %vm414_vm5, %v4377_v11  ;;  %v4367_v49 = vpop.permute.xlu1 %4366 }
0x14dd   :  { %10030 = vmatpush3.xpose.msk.msra.mxu0 %vm414_vm5, %v4377_v11 }
0x14de   :  { %10031 = vmatprep.subr.msk.mxu0 %vm414_vm5, %v4375_v7  ;;  %v4371_v57 = vpop.permute.xlu1 %4370 }
0x14e1   :  { %10032 = vmatpush3.xpose.msk.msra.mxu0 %vm414_vm5, %v4375_v7 }
0x14e2   :  { %10033 = vmatprep.subr.msk.mxu0 %vm414_vm5, %v4373_v45  ;;  %v4540_v62 = vpop.permute.xlu1 %4539 }
0x14e3   :  { %10041 = vmatprep.subr.mxu1 %v4540_v62 }
0x14e4   :  { %v10338_v18 = vpop.eup %10337  ;;  %10042 = vmatpush3.msra.mxu1 %v4540_v62 }
0x14e5   :  { %10034 = vmatpush3.xpose.msk.msra.mxu0 %vm414_vm5, %v4373_v45  ;;  %10043 = vmatprep.subr.mxu1 %v4538_v22  ;;  %v4252_v42 = vmul.f32 %v10338_v18, %v12560_v0 }
0x14e6   :  { %v4536_v3 = vpop.permute.xlu1 %4535  ;;  %10044 = vmatpush3.msra.mxu1 %v4538_v22 }
0x14e7   :  { %10024 = vmatprep.mubr.msk.f32.mxu0 %vm304_vm2, %v4252_v42  ;;  %10045 = vmatprep.subr.mxu1 %v4536_v3 }
0x14e8   :  { %10025 = vmatmul.mubr.msk.f32.gmra.mxu0 %vm304_vm2, %v4254_v9  ;;  %10046 = vmatpush3.msra.mxu1 %v4536_v3 }
0x14e9   :  { %10035 = vmatprep.mubr.msk.f32.mxu0 %vm414_vm5, %v4365_v38 }
0x14ea   :  { %v4534_v27 = vpop.permute.xlu1 %4533 }
0x14eb   :  { %10047 = vmatprep.subr.mxu1 %v4534_v27 }
0x14ec   :  { %10036 = vmatmul.mubr.msk.f32.vlgmr.msra.gmra.mxu0 %vm414_vm5, %v4367_v49  ;;  %10048 = vmatpush3.msra.mxu1 %v4534_v27 }
0x14ed   :  { %10038 = vmatprep.mubr.msk.f32.mxu0 %vm414_vm5, %v4369_v17 }
0x14f0   :  { %10039 = vmatmul.mubr.msk.f32.gmra.mxu0 %vm414_vm5, %v4371_v57 }
0x155b   :  { %v12601_v1 = vpop.f32.mrf.mxu0 }
0x155d   :  { %v12603_v24 = vpop.f32.mrf.mxu0 }
0x1563   :  { %v12605_v43 = vpop.f32.mrf.mxu0 }
0x1565   :  { %v12607_v58 = vpop.f32.mrf.mxu0 }
0x1598   :  { %v12609_v46 = vpop.f32.mrf.mxu0 }
0x159a   :  { %v12611_v19 = vpop.f32.mrf.mxu0 }
0x15a8   :  { %v12613_v52 = vpop.f32.mrf.mxu0 }
0x15aa   :  { %v12615_v20 = vpop.f32.mrf.mxu0 }
0x15ac   :  { %v10037_v35 = vpop.f32.mrf.mxu0 }
0x15ad   :  { %v4482_v16 = vmul.f32 0.35355338, %v10037_v35 }
0x15ae   :  { %v4462_v5 = vpop.f32.mrf.mxu0 }
0x15af   :  { %v4486_v63 = vadd.f32 %v12460_v28, %v4482_v16  ;;  %v4481_v0 = vmul.f32 0.35355338, %v4462_v5 }
0x15b0   :  { %v10040_v53 = vpop.f32.mrf.mxu0 }
0x15b1   :  { %v4485_v31 = vadd.f32 %v12466_v2, %v4481_v0  ;;  %v4484_v25 = vmul.f32 0.35355338, %v10040_v53  ;;  %v4492_v55 = vsel %vm304_vm2, %v4486_v63, -inf }
0x15b2   :  { %4493 = vmax.xlane.f32.xlu1 %v4492_v55  ;;  %v4472_v47 = vpop.f32.mrf.mxu0 }
0x15b3   :  { %v4488_v50 = vadd.f32 %v12480_v34, %v4484_v25  ;;  %v4483_v61 = vmul.f32 0.35355338, %v4472_v47  ;;  %v4489_v8 = vsel %vm304_vm2, %v4485_v31, -inf }
0x15b4   :  { %4490 = vmax.xlane.f32.xlu0 %v4489_v8  ;;  %v14569_v8 = vmov 0.0  }
0x15b5   :  { %v4487_v32 = vadd.f32 %v12474_v23, %v4483_v61  ;;  %v4498_v26 = vsel %vm304_vm2, %v4488_v50, -inf }
0x15b7   :  { %v4495_v56 = vsel %vm304_vm2, %v4487_v32, -inf }
0x15b8   :  { %4499 = vmax.xlane.f32.xlu0 %v4498_v26 }
0x15bc   :  { %4496 = vmax.xlane.f32.xlu0 %v4495_v56 }
0x15c3   :  { %4654 = vrot.lane.b32.xlu1 %v12403_v21, %s14567_s11 }
0x15d2   :  { %4656 = vrot.lane.b32.xlu0 %v12401_v33, %s14567_s11 }
0x163b   :  { %v4494_v4 = vpop.xlane.xlu1 %4493 }
0x163c   :  { %v4502_v30 = vsub.f32 %v4486_v63, %v4494_v4 }
0x163d   :  { %v4491_v36 = vpop.xlane.xlu0 %4490 }
0x163e   :  { %v4507_v14 = vmul.f32 1.442695, %v4502_v30  ;;  %v4501_v15 = vsub.f32 %v4485_v31, %v4491_v36 }
0x163f   :  { %v4655_v29 = vpop.permute.xlu1 %4654 }
0x1640   :  { %10339 = vpow2.f32 %v4507_v14  ;;  %v4505_v6 = vmul.f32 1.442695, %v4501_v15 }
0x1641   :  { %v4500_v11 = vpop.xlane.xlu0 %4499 }
0x1642   :  { %10341 = vpow2.f32 %v4505_v6  ;;  %v4504_v54 = vsub.f32 %v4488_v50, %v4500_v11 }
0x1644   :  { %v4511_v37 = vmul.f32 1.442695, %v4504_v54 }
0x1645   :  { %v4497_v45 = vpop.xlane.xlu0 %4496 }
0x1646   :  { %v4503_v12 = vsub.f32 %v4487_v32, %v4497_v45  ;;  %10343 = vpow2.f32 %v4511_v37 }
0x1648   :  { %v4509_v38 = vmul.f32 1.442695, %v4503_v12 }
0x1649   :  { %v4657_v48 = vpop.permute.xlu0 %4656 }
0x164a   :  { %10055 = vmatprep.subr.msk.mxu1 %vm414_vm5, %v4657_v48  ;;  %10345 = vpow2.f32 %v4509_v38 }
0x164d   :  { %v10340_v7 = vpop.eup %10339 }
0x164e   :  { %v4516_v59 = vsel %vm304_vm2, %v10340_v7, 0.0 }
0x164f   :  { %v10342_v41 = vpop.eup %10341  ;;  %4517 = vadd.xlane.f32.xlu0 %v4516_v59 }
0x1650   :  { %v4513_v51 = vsel %vm304_vm2, %v10342_v41, 0.0 }
0x1651   :  { %4514 = vadd.xlane.f32.xlu1 %v4513_v51 }
0x1653   :  { %v10344_v49 = vpop.eup %10343 }
0x1654   :  { %v4522_v57 = vsel %vm304_vm2, %v10344_v49, 0.0 }
0x1657   :  { %v10346_v17 = vpop.eup %10345 }
0x1658   :  { %v4519_v62 = vsel %vm304_vm2, %v10346_v17, 0.0 }
0x1662   :  { %4650 = vrot.lane.b32.xlu1 %v12397_v13, %s14567_s11 }
0x1665   :  { %4652 = vrot.lane.b32.xlu0 %v12407_v40, %s14567_s11 }
0x1684   :  { %4523 = vadd.xlane.f32.xlu0 %v4522_v57 }
0x1686   :  { %4520 = vadd.xlane.f32.xlu1 %v4519_v62 }
0x1697   :  { %4644 = vrot.lane.b32.xlu1 %v12407_v40, %s14568_s8 }
0x169a   :  { %4642 = vrot.lane.b32.xlu0 %v12397_v13, %s14568_s8 }
0x169b   :  { %4648 = vrot.lane.b32.xlu1 %v12401_v33, %s14568_s8 }
0x169e   :  { %4646 = vrot.lane.b32.xlu0 %v12403_v21, %s14568_s8 }
0x16d8   :  { %v4518_v18 = vpop.xlane.xlu0 %4517 }
0x16d9   :  { %10347 = vrcp.f32 %v4518_v18 }
0x16da   :  { %v4515_v22 = vpop.xlane.xlu1 %4514 }
0x16db   :  { %10349 = vrcp.f32 %v4515_v22 }
0x16dc   :  { %v4653_v35 = vpop.permute.xlu0 %4652 }
0x16de   :  { %v4651_v16 = vpop.permute.xlu1 %4650 }
0x16e6   :  { %v10348_v42 = vpop.eup %10347 }
0x16e7   :  { %v4528_v27 = vmul.f32 %v10348_v42, %v10340_v7 }
0x16e8   :  { %v10350_v3 = vpop.eup %10349 }
0x16e9   :  { %v4526_v9 = vmul.f32 %v10350_v3, %v10342_v41 }
0x16eb   :  { %10049 = vmatprep.mubr.msk.f32.mxu1 %vm304_vm2, %v4526_v9 }
0x16ec   :  { %10050 = vmatmul.mubr.msk.f32.vlgmr.msra.gmra.mxu1 %vm304_vm2, %v4528_v27 }
0x16ed   :  { %10056 = vmatpush3.xpose.msk.msra.mxu1 %vm414_vm5, %v4657_v48 }
0x16ee   :  { %10057 = vmatprep.subr.msk.mxu1 %vm414_vm5, %v4655_v29 }
0x16f1   :  { %10058 = vmatpush3.xpose.msk.msra.mxu1 %vm414_vm5, %v4655_v29 }
0x16f2   :  { %10059 = vmatprep.subr.msk.mxu1 %vm414_vm5, %v4653_v35 }
0x16f5   :  { %10060 = vmatpush3.xpose.msk.msra.mxu1 %vm414_vm5, %v4653_v35 }
0x16f6   :  { %10061 = vmatprep.subr.msk.mxu1 %vm414_vm5, %v4651_v16 }
0x16f9   :  { %10062 = vmatpush3.xpose.msk.msra.mxu1 %vm414_vm5, %v4651_v16 }
0x170d   :  { %v4524_v5 = vpop.xlane.xlu0 %4523 }
0x170e   :  { %10351 = vrcp.f32 %v4524_v5 }
0x170f   :  { %v4521_v63 = vpop.xlane.xlu1 %4520 }
0x1710   :  { %10353 = vrcp.f32 %v4521_v63 }
0x1711   :  { %v4643_v25 = vpop.permute.xlu0 %4642 }
0x1713   :  { %v4645_v47 = vpop.permute.xlu1 %4644 }
0x1715   :  { %v4647_v50 = vpop.permute.xlu0 %4646 }
0x1717   :  { %v4649_v61 = vpop.permute.xlu1 %4648 }
0x171b   :  { %v10352_v0 = vpop.eup %10351 }
0x171c   :  { %v4532_v55 = vmul.f32 %v10352_v0, %v10344_v49 }
0x171d   :  { %v10354_v53 = vpop.eup %10353 }
0x171e   :  { %v4530_v31 = vmul.f32 %v10354_v53, %v10346_v17 }
0x1720   :  { %10052 = vmatprep.mubr.msk.f32.mxu1 %vm304_vm2, %v4530_v31 }
0x1721   :  { %10053 = vmatmul.mubr.msk.f32.gmra.mxu1 %vm304_vm2, %v4532_v55 }
0x1722   :  { %10063 = vmatprep.mubr.msk.f32.mxu1 %vm414_vm5, %v4643_v25 }
0x1725   :  { %10064 = vmatmul.mubr.msk.f32.vlgmr.msra.gmra.mxu1 %vm414_vm5, %v4645_v47 }
0x1726   :  { %10066 = vmatprep.mubr.msk.f32.mxu1 %vm414_vm5, %v4647_v50 }
0x1729   :  { %10067 = vmatmul.mubr.msk.f32.gmra.mxu1 %vm414_vm5, %v4649_v61 }
0x172a   :  { %5386 = vmatprep.mubr.f32.mxu1 %v14569_v8 }
0x17ac   :  { %v12662_v32 = vpop.f32.mrf.mxu1 }
0x17ae   :  { %v12664_v26 = vpop.f32.mrf.mxu1 }
0x17e1   :  { %v12666_v56 = vpop.f32.mrf.mxu1 }
0x17e3   :  { %v12668_v4 = vpop.f32.mrf.mxu1 }
0x17e5   :  { %v10065_v30 = vpop.f32.mrf.mxu1 }
0x17e6   :  { %v4760_v36 = vmul.f32 0.35355338, %v10065_v30 }
0x17e7   :  { %v4740_v14 = vpop.f32.mrf.mxu1 }
0x17e8   :  { %v4764_v15 = vadd.f32 %v12460_v28, %v4760_v36  ;;  %v4759_v6 = vmul.f32 0.35355338, %v4740_v14  ;;  %v4983_v36 = vld [vmem:[%s14545_s9 + $0x38] sm:$0xff]  ;;  %v4982_v14 = vld [vmem:[%s14545_s9 + $0x30] sm:$0xff] }
0x17e9   :  { %v10068_v11 = vpop.f32.mrf.mxu1 }
0x17ea   :  { %v4763_v45 = vadd.f32 %v12466_v2, %v4759_v6  ;;  %v4770_v48 = vsel %vm304_vm2, %v4764_v15, -inf  ;;  %v4762_v59 = vmul.f32 0.35355338, %v10068_v11  ;;  %v4980_v6 = vld [vmem:[%s14545_s9 + $0x20] sm:$0xff] }
0x17eb   :  { %4771 = vmax.xlane.f32.xlu1 %v4770_v48  ;;  %v4750_v7 = vpop.f32.mrf.mxu1 }
0x17ec   :  { %v4761_v41 = vmul.f32 0.35355338, %v4750_v7  ;;  %v4767_v51 = vsel %vm304_vm2, %v4763_v45, -inf  ;;  %v4766_v12 = vadd.f32 %v12480_v34, %v4762_v59 }
0x17ed   :  { %4768 = vmax.xlane.f32.xlu0 %v4767_v51 }
0x17ee   :  { %v4765_v54 = vadd.f32 %v12474_v23, %v4761_v41  ;;  %v4776_v28 = vsel %vm304_vm2, %v4766_v12, -inf }
0x17f0   :  { %v4773_v37 = vsel %vm304_vm2, %v4765_v54, -inf }
0x17f1   :  { %4774 = vmax.xlane.f32.xlu0 %v4773_v37 }
0x17f5   :  { %4777 = vmax.xlane.f32.xlu0 %v4776_v28 }
0x17fc   :  { %4817 = vrot.lane.b32.xlu1 %v12401_v33, %s14570_s30 }
0x180b   :  { %4815 = vrot.lane.b32.xlu0 %v12403_v21, %s14570_s30 }
0x1874   :  { %v4772_v2 = vpop.xlane.xlu1 %4771 }
0x1875   :  { %v4780_v38 = vsub.f32 %v4764_v15, %v4772_v2  ;;  %v4981_v15 = vld [vmem:[%s14545_s9 + $0x28] sm:$0xff]  ;;  %s14590_s9 = sld [smem:[#allocation27_spill]] }
0x1876   :  { %v4769_v49 = vpop.xlane.xlu0 %4768 }
0x1877   :  { %v4785_v17 = vmul.f32 1.442695, %v4780_v38  ;;  %v4779_v57 = vsub.f32 %v4763_v45, %v4769_v49 }
0x1878   :  { %v4818_v23 = vpop.permute.xlu1 %4817 }
0x1879   :  { %10355 = vpow2.f32 %v4785_v17  ;;  %v4783_v34 = vmul.f32 1.442695, %v4779_v57  ;;  %10069 = vmatprep.subr.mxu0 %v4818_v23 }
0x187a   :  { %10070 = vmatpush3.msra.mxu0 %v4818_v23  ;;  %v4775_v62 = vpop.xlane.xlu0 %4774 }
0x187b   :  { %10357 = vpow2.f32 %v4783_v34  ;;  %v4781_v29 = vsub.f32 %v4765_v54, %v4775_v62 }
0x187d   :  { %v4787_v18 = vmul.f32 1.442695, %v4781_v29 }
0x187e   :  { %v4778_v22 = vpop.xlane.xlu0 %4777 }
0x187f   :  { %10359 = vpow2.f32 %v4787_v18  ;;  %v4782_v33 = vsub.f32 %v4766_v12, %v4778_v22 }
0x1881   :  { %v4789_v42 = vmul.f32 1.442695, %v4782_v33 }
0x1882   :  { %v4816_v3 = vpop.permute.xlu0 %4815 }
0x1883   :  { %10361 = vpow2.f32 %v4789_v42  ;;  %10071 = vmatprep.subr.mxu0 %v4816_v3 }
0x1884   :  { %10072 = vmatpush3.msra.mxu0 %v4816_v3 }
0x1886   :  { %v10356_v21 = vpop.eup %10355 }
0x1887   :  { %v4794_v9 = vsel %vm304_vm2, %v10356_v21, 0.0 }
0x1888   :  { %v10358_v27 = vpop.eup %10357  ;;  %4795 = vadd.xlane.f32.xlu0 %v4794_v9 }
0x1889   :  { %v4791_v35 = vsel %vm304_vm2, %v10358_v27, 0.0 }
0x188a   :  { %4792 = vadd.xlane.f32.xlu1 %v4791_v35 }
0x188c   :  { %v10360_v16 = vpop.eup %10359 }
0x188d   :  { %v4797_v5 = vsel %vm304_vm2, %v10360_v16, 0.0 }
0x188e   :  { %4798 = vadd.xlane.f32.xlu1 %v4797_v5 }
0x1890   :  { %v10362_v63 = vpop.eup %10361 }
0x1891   :  { %v4800_v0 = vsel %vm304_vm2, %v10362_v63, 0.0 }
0x1892   :  { %4801 = vadd.xlane.f32.xlu0 %v4800_v0 }
0x189f   :  { %4813 = vrot.lane.b32.xlu1 %v12407_v40, %s14570_s30 }
0x18a3   :  { %4924 = vrot.lane.b32.xlu1 %v12611_v19, %s14571_s13 }
0x18a7   :  { %4926 = vrot.lane.b32.xlu1 %v12609_v46, %s14571_s13 }
0x18a8   :  { %4811 = vrot.lane.b32.xlu0 %v12397_v13, %s14570_s30  ;;  %s14588_s30 = smov 24  }
0x18ab   :  { %4942 = vrot.lane.b32.xlu1 %v12662_v32, %s14572_s10 }
0x18ac   :  { %4940 = vrot.lane.b32.xlu0 %v12664_v26, %s14572_s10 }
0x1911   :  { %v4796_v53 = vpop.xlane.xlu0 %4795 }
0x1912   :  { %10363 = vrcp.f32 %v4796_v53 }
0x1913   :  { %v4793_v31 = vpop.xlane.xlu1 %4792 }
0x1914   :  { %10365 = vrcp.f32 %v4793_v31 }
0x1917   :  { %v4799_v40 = vpop.xlane.xlu1 %4798 }
0x1918   :  { %10367 = vrcp.f32 %v4799_v40 }
0x191b   :  { %v4814_v25 = vpop.permute.xlu1 %4813  ;;  %v4802_v19 = vpop.xlane.xlu0 %4801 }
0x191c   :  { %10369 = vrcp.f32 %v4802_v19  ;;  %10073 = vmatprep.subr.mxu0 %v4814_v25 }
0x191d   :  { %10074 = vmatpush3.msra.mxu0 %v4814_v25 }
0x191f   :  { %v4812_v46 = vpop.permute.xlu0 %4811  ;;  %v10364_v55 = vpop.eup %10363 }
0x1920   :  { %10075 = vmatprep.subr.mxu0 %v4812_v46  ;;  %v4806_v50 = vmul.f32 %v10364_v55, %v10356_v21  ;;  %v4925_v59 = vpop.permute.xlu1 %4924 }
0x1921   :  { %v10366_v13 = vpop.eup %10365  ;;  %10076 = vmatpush3.msra.mxu0 %v4812_v46 }
0x1922   :  { %v4804_v47 = vmul.f32 %v10366_v13, %v10358_v27  ;;  %10083 = vmatprep.subr.mxu0 %v4983_v36 }
0x1923   :  { %v4941_v54 = vpop.permute.xlu0 %4940 }
0x1924   :  { %10077 = vmatprep.mubr.msk.f32.mxu0 %vm304_vm2, %v4804_v47  ;;  %v4927_v41 = vpop.permute.xlu1 %4926 }
0x1925   :  { %v10368_v61 = vpop.eup %10367  ;;  %10078 = vmatmul.mubr.msk.f32.vlgmr.msra.gmra.mxu0 %vm304_vm2, %v4806_v50 }
0x1926   :  { %v4808_v32 = vmul.f32 %v10368_v61, %v10360_v16  ;;  %10084 = vmatpush3.msra.mxu0 %v4983_v36 }
0x1927   :  { %10085 = vmatprep.subr.mxu0 %v4982_v14 }
0x1928   :  { %10080 = vmatprep.mubr.msk.f32.mxu0 %vm304_vm2, %v4808_v32  ;;  %10086 = vmatpush3.msra.mxu0 %v4982_v14  ;;  %v4943_v51 = vpop.permute.xlu1 %4942 }
0x1929   :  { %v10370_v26 = vpop.eup %10369  ;;  %10087 = vmatprep.subr.mxu0 %v4981_v15 }
0x192a   :  { %v4810_v30 = vmul.f32 %v10370_v26, %v10362_v63  ;;  %10088 = vmatpush3.msra.mxu0 %v4981_v15 }
0x192b   :  { %10089 = vmatprep.subr.mxu0 %v4980_v6 }
0x192c   :  { %10081 = vmatmul.mubr.msk.f32.gmra.mxu0 %vm304_vm2, %v4810_v30 }
0x192d   :  { %10090 = vmatpush3.msra.mxu0 %v4980_v6 }
0x19e5   :  { %v10079_v11 = vpop.f32.mrf.mxu0 }
0x19e6   :  { %4958 = vrot.lane.b32.xlu1 %v10079_v11, %s14573_s6 }
0x19e7   :  { %v4901_v45 = vpop.f32.mrf.mxu0 }
0x19e8   :  { %4956 = vrot.lane.b32.xlu0 %v4901_v45, %s14573_s6 }
0x19ea   :  { %4930 = vrot.lane.b32.xlu1 %v12613_v52, %s14571_s13 }
0x19ec   :  { %4928 = vrot.lane.b32.xlu0 %v12615_v20, %s14571_s13  ;;  %v10082_v48 = vpop.f32.mrf.mxu0  ;;  %v4968_v20 = vsel %vm414_vm5, %v12603_v24, %v4925_v59  ;;  %v5208_v59 = vld [vmem:[%s14547_s7 + $0x380] sm:$0xff] }
0x19ed   :  { %v4972_v12 = vsel %vm1563_vm6, %v4968_v20, %v4941_v54  ;;  %v5195_v54 = vld [vmem:[%s14547_s7 + $0x318] sm:$0xff]  ;;  %v5194_v20 = vld [vmem:[%s14547_s7 + $0x310] sm:$0xff] }
0x19ee   :  { %4946 = vrot.lane.b32.xlu1 %v12666_v56, %s14572_s10  ;;  %v4911_v7 = vpop.f32.mrf.mxu0  ;;  %v4969_v56 = vsel %vm414_vm5, %v12601_v1, %v4927_v41  ;;  %v5210_v41 = vld [vmem:[%s14547_s7 + $0x390] sm:$0xff] }
0x19f0   :  { %4944 = vrot.lane.b32.xlu0 %v12668_v4, %s14572_s10  ;;  %v4973_v4 = vsel %vm1563_vm6, %v4969_v56, %v4943_v51  ;;  %v5193_v51 = vld [vmem:[%s14547_s7 + $0x308] sm:$0xff] }
0x19f1   :  { %v5177_v56 = vld [vmem:[%s14547_s7 + $0x288] sm:$0xff] }
0x19f2   :  { %4962 = vrot.lane.b32.xlu1 %v10082_v48, %s14573_s6  ;;  %v5209_v48 = vld [vmem:[%s14547_s7 + $0x388] sm:$0xff] }
0x19f3   :  { %5346 = vmatprep.subr.mxu1 %v5209_v48 }
0x19f4   :  { %4960 = vrot.lane.b32.xlu0 %v4911_v7, %s14573_s6  ;;  %v5211_v7 = vld [vmem:[%s14547_s7 + $0x398] sm:$0xff]  ;;  %5347 = vmatpush1.msra.mxu1 %v5208_v59  ;;  %v5218_v59 = vld [vmem:[%s14547_s7 + $0x3d0] sm:$0xff] }
0x19f5   :  { %5435 = vmatprep.subr.mxu0 %v5211_v7  ;;  %5348 = vmatprep.subr.mxu1 %v5193_v51  ;;  %v5203_v51 = vld [vmem:[%s14547_s7 + $0x358] sm:$0xff] }
0x1a58   :  { %v4959_v52 = vpop.permute.xlu1 %4958 }
0x1a59   :  { %v4977_v2 = vsel %vm1568_vm7, %v4973_v4, %v4959_v52  ;;  %v5192_v52 = vld [vmem:[%s14547_s7 + $0x300] sm:$0xff]  ;;  %v5178_v4 = vld [vmem:[%s14547_s7 + $0x290] sm:$0xff] }
0x1a5a   :  { %v4957_v37 = vpop.permute.xlu0 %4956  ;;  %5349 = vmatpush1.msra.mxu1 %v5192_v52  ;;  %v5202_v52 = vld [vmem:[%s14547_s7 + $0x350] sm:$0xff] }
0x1a5b   :  { %v4976_v28 = vsel %vm1568_vm7, %v4972_v12, %v4957_v37  ;;  %v5179_v12 = vld [vmem:[%s14547_s7 + $0x298] sm:$0xff]  ;;  %5350 = vmatprep.subr.mxu1 %v5177_v56  ;;  %v5176_v37 = vld [vmem:[%s14547_s7 + $0x280] sm:$0xff] }
0x1a5c   :  { %v4931_v38 = vpop.permute.xlu1 %4930  ;;  %10091 = vmatprep.mubr.msk.f32.mxu0 %vm304_vm2, %v4976_v28  ;;  %5351 = vmatpush1.msra.mxu1 %v5176_v37  ;;  %v5161_v28 = vld [vmem:[%s14547_s7 + $0x208] sm:$0xff]  ;;  %v5187_v56 = vld [vmem:[%s14547_s7 + $0x2d8] sm:$0xff]  ;;  %v5186_v37 = vld [vmem:[%s14547_s7 + $0x2d0] sm:$0xff] }
0x1a5d   :  { %10092 = vmatmul.mubr.msk.f32.vlgmr.msra.gmra.mxu0 %vm304_vm2, %v4977_v2  ;;  %v4971_v23 = vsel %vm414_vm5, %v12605_v43, %v4931_v38  ;;  %v5163_v2 = vld [vmem:[%s14547_s7 + $0x218] sm:$0xff]  ;;  %5352 = vmatprep.subr.mxu1 %v5161_v28  ;;  %v5160_v38 = vld [vmem:[%s14547_s7 + $0x200] sm:$0xff] }
0x1a5e   :  { %v4929_v49 = vpop.permute.xlu0 %4928  ;;  %5436 = vmatpush1.msra.mxu0 %v5210_v41  ;;  %5353 = vmatpush1.msra.mxu1 %v5160_v38  ;;  %v5201_v41 = vld [vmem:[%s14547_s7 + $0x348] sm:$0xff]  ;;  %v5171_v28 = vld [vmem:[%s14547_s7 + $0x258] sm:$0xff]  ;;  %v5170_v38 = vld [vmem:[%s14547_s7 + $0x250] sm:$0xff] }
0x1a5f   :  { %v4970_v1 = vsel %vm414_vm5, %v12607_v58, %v4929_v49  ;;  %v8760_v58 = vld [vmem:[%s14546_s0 + $0x1] ss:$0 sm:$0xff]  ;;  %5437 = vmatprep.subr.mxu0 %v5195_v54  ;;  %v5162_v49 = vld [vmem:[%s14547_s7 + $0x210] sm:$0xff] }
0x1a60   :  { %v4947_v17 = vpop.permute.xlu1 %4946  ;;  %5438 = vmatpush1.msra.mxu0 %v5194_v20  ;;  %v5200_v54 = vld [vmem:[%s14547_s7 + $0x340] sm:$0xff]  ;;  %v5185_v20 = vld [vmem:[%s14547_s7 + $0x2c8] sm:$0xff] }
0x1a61   :  { %v4975_v29 = vsel %vm1563_vm6, %v4971_v23, %v4947_v17  ;;  %5439 = vmatprep.subr.mxu0 %v5179_v12  ;;  %v5213_v17 = vld [vmem:[%s14547_s7 + $0x3a8] sm:$0xff]  ;;  %v5184_v12 = vld [vmem:[%s14547_s7 + $0x2c0] sm:$0xff] }
0x1a62   :  { %v4945_v24 = vpop.permute.xlu0 %4944  ;;  %5440 = vmatpush1.msra.mxu0 %v5178_v4  ;;  %5524 = vmatprep.subr.mxu1 %v5213_v17  ;;  %v5169_v4 = vld [vmem:[%s14547_s7 + $0x248] sm:$0xff]  ;;  %v5223_v17 = vld [vmem:[%s14547_s7 + $0x3f8] sm:$0xff] }
0x1a63   :  { %v4974_v34 = vsel %vm1563_vm6, %v4970_v1, %v4945_v24  ;;  %5441 = vmatprep.subr.mxu0 %v5163_v2  ;;  %v5215_v24 = vld [vmem:[%s14547_s7 + $0x3b8] sm:$0xff]  ;;  %v5168_v2 = vld [vmem:[%s14547_s7 + $0x240] sm:$0xff] }
0x1a64   :  { %v4963_v57 = vpop.permute.xlu1 %4962  ;;  %5442 = vmatpush1.msra.mxu0 %v5162_v49  ;;  %v5221_v49 = vld [vmem:[%s14547_s7 + $0x3e8] sm:$0xff] }
0x1a65   :  { %v4979_v22 = vsel %vm1568_vm7, %v4975_v29, %v4963_v57  ;;  %5613 = vmatprep.subr.mxu0 %v5215_v24  ;;  %v5220_v24 = vld [vmem:[%s14547_s7 + $0x3e0] sm:$0xff] }
0x1a66   :  { %v4961_v62 = vpop.permute.xlu0 %4960 }
0x1a67   :  { %v4978_v18 = vsel %vm1568_vm7, %v4974_v34, %v4961_v62 }
0x1a68   :  { %10094 = vmatprep.mubr.msk.f32.mxu0 %vm304_vm2, %v4978_v18 }
0x1a69   :  { %10095 = vmatmul.mubr.msk.f32.gmra.mxu0 %vm304_vm2, %v4979_v22 }
0x1a6a   :  { %5475 = vmatprep.mubr.f32.mxu0 %v14569_v8 }
0x1b1d   :  { %v10093_v43 = vpop.f32.mrf.mxu0 }
0x1b1e   :  { %v5073_v33 = vadd.f32 %v10093_v43, %v8760_v58 }
0x1b1f   :  { %v5067_v42 = vpop.f32.mrf.mxu0 }
0x1b20   :  { %v5087_v3 = vadd.f32 %v5073_v33, %v12382_v10  ;;  %v5068_v21 = vadd.f32 %v8760_v58, %v5067_v42 }
0x1b22   :  { %v5086_v9 = vadd.f32 %v5068_v21, %v12378_v39  ;;  %v5095_v27 = vsel %vm304_vm2, %v5087_v3, 0.0 }
0x1b23   :  { %5096 = vadd.xlane.f32.xlu1 %v5095_v27 }
0x1b24   :  { %v5092_v35 = vsel %vm304_vm2, %v5086_v9, 0.0 }
0x1b25   :  { %5093 = vadd.xlane.f32.xlu0 %v5092_v35  ;;  %v8765_v35 = vld [vmem:[%s14548_s27 + $0x1] ss:$0 sm:$0xff] }
0x1b29   :  { %v10096_v16 = vpop.f32.mrf.mxu0 }
0x1b2a   :  { %v5083_v63 = vadd.f32 %v10096_v16, %v8760_v58 }
0x1b2b   :  { %v5077_v5 = vpop.f32.mrf.mxu0 }
0x1b2c   :  { %v5078_v0 = vadd.f32 %v8760_v58, %v5077_v5  ;;  %v5089_v31 = vadd.f32 %v5083_v63, %v12390_v60  ;;  %v8766_v5 = vld [vmem:[%s14440_s12 + $0x1] ss:$0 sm:$0xff] }
0x1b2e   :  { %v5088_v53 = vadd.f32 %v5078_v0, %v12386_v44  ;;  %v5101_v10 = vsel %vm304_vm2, %v5089_v31, 0.0 }
0x1b30   :  { %v5098_v40 = vsel %vm304_vm2, %v5088_v53, 0.0 }
0x1b31   :  { %5099 = vadd.xlane.f32.xlu0 %v5098_v40  ;;  %v5197_v40 = vld [vmem:[%s14547_s7 + $0x328] sm:$0xff] }
0x1b35   :  { %5102 = vadd.xlane.f32.xlu0 %v5101_v10  ;;  %v5199_v10 = vld [vmem:[%s14547_s7 + $0x338] sm:$0xff] }
0x1bac   :  { %v5097_v39 = vpop.xlane.xlu1 %5096 }
0x1bad   :  { %v5105_v25 = vmul.f32 0.03125, %v5097_v39 }
0x1bae   :  { %v5094_v19 = vpop.xlane.xlu0 %5093 }
0x1baf   :  { %v12758_v46 = vsub.f32 %v5087_v3, %v5105_v25  ;;  %v5104_v55 = vmul.f32 0.03125, %v5094_v19  ;;  %v5196_v25 = vld [vmem:[%s14547_s7 + $0x320] sm:$0xff]  ;;  %v5198_v19 = vld [vmem:[%s14547_s7 + $0x330] sm:$0xff] }
0x1bb1   :  { %v12760_v13 = vsub.f32 %v5086_v9, %v5104_v55  ;;  %v5113_v47 = vmul.f32 %v12758_v46, %v12758_v46  ;;  %v5183_v55 = vld [vmem:[%s14547_s7 + $0x2b8] sm:$0xff] }
0x1bb3   :  { %v5119_v44 = vsel %vm304_vm2, %v5113_v47, 0.0  ;;  %v5112_v60 = vmul.f32 %v12760_v13, %v12760_v13  ;;  %v5180_v47 = vld [vmem:[%s14547_s7 + $0x2a0] sm:$0xff] }
0x1bb4   :  { %5120 = vadd.xlane.f32.xlu0 %v5119_v44  ;;  %v5182_v44 = vld [vmem:[%s14547_s7 + $0x2b0] sm:$0xff] }
0x1bb5   :  { %v5116_v50 = vsel %vm304_vm2, %v5112_v60, 0.0 }
0x1bb6   :  { %5117 = vadd.xlane.f32.xlu1 %v5116_v50  ;;  %v5165_v50 = vld [vmem:[%s14547_s7 + $0x228] sm:$0xff] }
0x1bba   :  { %v5100_v61 = vpop.xlane.xlu0 %5099 }
0x1bbb   :  { %v5106_v32 = vmul.f32 0.03125, %v5100_v61  ;;  %v5167_v61 = vld [vmem:[%s14547_s7 + $0x238] sm:$0xff] }
0x1bbd   :  { %v12768_v26 = vsub.f32 %v5088_v53, %v5106_v32  ;;  %v5212_v53 = vld [vmem:[%s14547_s7 + $0x3a0] sm:$0xff] }
0x1bbe   :  { %v5103_v30 = vpop.xlane.xlu0 %5102  ;;  %v5164_v32 = vld [vmem:[%s14547_s7 + $0x220] sm:$0xff] }
0x1bbf   :  { %v5107_v36 = vmul.f32 0.03125, %v5103_v30  ;;  %v5114_v14 = vmul.f32 %v12768_v26, %v12768_v26 }
0x1bc1   :  { %v12772_v15 = vsub.f32 %v5089_v31, %v5107_v36  ;;  %v5122_v6 = vsel %vm304_vm2, %v5114_v14, 0.0  ;;  %v5214_v31 = vld [vmem:[%s14547_s7 + $0x3b0] sm:$0xff]  ;;  %v5217_v36 = vld [vmem:[%s14547_s7 + $0x3c8] sm:$0xff]  ;;  %v5219_v14 = vld [vmem:[%s14547_s7 + $0x3d8] sm:$0xff] }
0x1bc2   :  { %5123 = vadd.xlane.f32.xlu1 %v5122_v6 }
0x1bc3   :  { %v5115_v11 = vmul.f32 %v12772_v15, %v12772_v15 }
0x1bc5   :  { %v5125_v45 = vsel %vm304_vm2, %v5115_v11, 0.0 }
0x1bc6   :  { %5126 = vadd.xlane.f32.xlu0 %v5125_v45 }
0x1c3d   :  { %v5121_v1 = vpop.xlane.xlu0 %5120 }
0x1c3e   :  { %v5129_v57 = vmul.f32 0.03125, %v5121_v1  ;;  %v5222_v1 = vld [vmem:[%s14547_s7 + $0x3f0] sm:$0xff] }
0x1c3f   :  { %v5118_v23 = vpop.xlane.xlu1 %5117 }
0x1c40   :  { %v5133_v34 = vadd.f32 1e-05, %v5129_v57  ;;  %v5128_v62 = vmul.f32 0.03125, %v5118_v23  ;;  %v5205_v57 = vld [vmem:[%s14547_s7 + $0x368] sm:$0xff]  ;;  %v5207_v23 = vld [vmem:[%s14547_s7 + $0x378] sm:$0xff] }
0x1c42   :  { %10371 = vrsqrt.f32 %v5133_v34  ;;  %v5132_v29 = vadd.f32 1e-05, %v5128_v62  ;;  %v5204_v34 = vld [vmem:[%s14547_s7 + $0x360] sm:$0xff]  ;;  %v5206_v62 = vld [vmem:[%s14547_s7 + $0x370] sm:$0xff] }
0x1c44   :  { %10373 = vrsqrt.f32 %v5132_v29  ;;  %v5189_v29 = vld [vmem:[%s14547_s7 + $0x2e8] sm:$0xff] }
0x1c4b   :  { %v5124_v18 = vpop.xlane.xlu1 %5123 }
0x1c4c   :  { %v5130_v22 = vmul.f32 0.03125, %v5124_v18  ;;  %v5191_v18 = vld [vmem:[%s14547_s7 + $0x2f8] sm:$0xff] }
0x1c4e   :  { %v5134_v58 = vadd.f32 1e-05, %v5130_v22  ;;  %v5188_v22 = vld [vmem:[%s14547_s7 + $0x2e0] sm:$0xff] }
0x1c4f   :  { %v10372_v43 = vpop.eup %10371  ;;  %v5127_v33 = vpop.xlane.xlu0 %5126 }
0x1c50   :  { %10375 = vrsqrt.f32 %v5134_v58  ;;  %v5131_v42 = vmul.f32 0.03125, %v5127_v33  ;;  %v5141_v21 = vmul.f32 %v10372_v43, %v12758_v46  ;;  %v5181_v46 = vld [vmem:[%s14547_s7 + $0x2a8] sm:$0xff]  ;;  %v5190_v58 = vld [vmem:[%s14547_s7 + $0x2f0] sm:$0xff]  ;;  %v5175_v33 = vld [vmem:[%s14547_s7 + $0x278] sm:$0xff] }
0x1c51   :  { %v10374_v3 = vpop.eup %10373  ;;  %v5173_v43 = vld [vmem:[%s14547_s7 + $0x268] sm:$0xff] }
0x1c52   :  { %v5140_v9 = vmul.f32 %v10374_v3, %v12760_v13  ;;  %v5135_v27 = vadd.f32 1e-05, %v5131_v42  ;;  %v5149_v63 = vmul.f32 %v8765_v35, %v5141_v21  ;;  %v5172_v42 = vld [vmem:[%s14547_s7 + $0x260] sm:$0xff]  ;;  %v5174_v3 = vld [vmem:[%s14547_s7 + $0x270] sm:$0xff]  ;;  %v6129_v21 = vld [vmem:[%s14441_s15 + $0x8f8] sm:$0xff] }
0x1c54   :  { %v5148_v16 = vmul.f32 %v8765_v35, %v5140_v9  ;;  %10377 = vrsqrt.f32 %v5135_v27  ;;  %v12860_v39 = vadd.f32 %v8766_v5, %v5149_v63  ;;  %v6161_v9 = vld [vmem:[%s14441_s15 + $0x9f8] sm:$0xff]  ;;  %v6112_v63 = vld [vmem:[%s14441_s15 + $0x870] sm:$0xff] }
0x1c55   :  { %v6113_v27 = vld [vmem:[%s14441_s15 + $0x878] sm:$0xff] }
0x1c56   :  { %v12840_v0 = vadd.f32 %v8766_v5, %v5148_v16  ;;  %v6128_v16 = vld [vmem:[%s14441_s15 + $0x8f0] sm:$0xff] }
0x1c58   :  { %8769 = vmatmul.mubr.msk.f32.vlgmr.msra.gmra.mxu1 %vm304_vm2, %v12840_v0  ;;  %8773 = vmatmul.mubr.msk.f32.vlgmr.msra.gmra.mxu0 %vm304_vm2, %v12840_v0 }
0x1c59   :  { %5392 = vmatprep.mubr.f32.mxu1 %v14569_v8  ;;  %5481 = vmatprep.mubr.f32.mxu0 %v14569_v8 }
0x1c5a   :  { %5525 = vmatpush1.msra.mxu1 %v5212_v53  ;;  %5614 = vmatpush1.msra.mxu0 %v5214_v31  ;;  %v6144_v53 = vld [vmem:[%s14441_s15 + $0x970] sm:$0xff]  ;;  %v6127_v31 = vld [vmem:[%s14441_s15 + $0x8e8] sm:$0xff] }
0x1c5b   :  { %5526 = vmatprep.subr.mxu1 %v5197_v40  ;;  %5615 = vmatprep.subr.mxu0 %v5199_v10  ;;  %v6159_v40 = vld [vmem:[%s14441_s15 + $0x9e8] sm:$0xff] }
0x1c5c   :  { %8770 = vmatmul.mubr.msk.f32.gmra.mxu1 %vm304_vm2, %v12860_v39  ;;  %8774 = vmatmul.mubr.msk.f32.gmra.mxu0 %vm304_vm2, %v12860_v39  ;;  %v6111_v10 = vld [vmem:[%s14441_s15 + $0x868] sm:$0xff] }
0x1c5d   :  { %v10376_v13 = vpop.eup %10375  ;;  %5398 = vmatprep.mubr.f32.mxu1 %v14569_v8  ;;  %5487 = vmatprep.mubr.f32.mxu0 %v14569_v8 }
0x1c5e   :  { %v5142_v60 = vmul.f32 %v10376_v13, %v12768_v26  ;;  %5527 = vmatpush1.msra.mxu1 %v5196_v25  ;;  %5616 = vmatpush1.msra.mxu0 %v5198_v19  ;;  %v5166_v26 = vld [vmem:[%s14547_s7 + $0x230] sm:$0xff]  ;;  %v6143_v25 = vld [vmem:[%s14441_s15 + $0x968] sm:$0xff]  ;;  %v6126_v19 = vld [vmem:[%s14441_s15 + $0x8e0] sm:$0xff] }
0x1c5f   :  { %5528 = vmatprep.subr.mxu1 %v5181_v46  ;;  %5617 = vmatprep.subr.mxu0 %v5183_v55  ;;  %v6158_v46 = vld [vmem:[%s14441_s15 + $0x9e0] sm:$0xff] }
0x1c60   :  { %v5150_v30 = vmul.f32 %v8765_v35, %v5142_v60  ;;  %5529 = vmatpush1.msra.mxu1 %v5180_v47  ;;  %5618 = vmatpush1.msra.mxu0 %v5182_v44  ;;  %v6110_v55 = vld [vmem:[%s14441_s15 + $0x860] sm:$0xff]  ;;  %v6125_v47 = vld [vmem:[%s14441_s15 + $0x8d8] sm:$0xff] }
0x1c61   :  { %v10378_v6 = vpop.eup %10377  ;;  %5530 = vmatprep.subr.mxu1 %v5165_v50  ;;  %5619 = vmatprep.subr.mxu0 %v5167_v61  ;;  %v6142_v13 = vld [vmem:[%s14441_s15 + $0x960] sm:$0xff]  ;;  %v6157_v44 = vld [vmem:[%s14441_s15 + $0x9d8] sm:$0xff]  ;;  %v6124_v61 = vld [vmem:[%s14441_s15 + $0x8d0] sm:$0xff] }
0x1c62   :  { %v12905_v11 = vadd.f32 %v8766_v5, %v5150_v30  ;;  %v5143_v45 = vmul.f32 %v10378_v6, %v12772_v15  ;;  %5531 = vmatpush1.msra.mxu1 %v5164_v32  ;;  %5620 = vmatpush1.msra.mxu0 %v5166_v26  ;;  %v5216_v15 = vld [vmem:[%s14547_s7 + $0x3c0] sm:$0xff]  ;;  %v6109_v60 = vld [vmem:[%s14441_s15 + $0x858] sm:$0xff]  ;;  %v6156_v32 = vld [vmem:[%s14441_s15 + $0x9d0] sm:$0xff] }
0x1c63   :  { %5702 = vmatprep.subr.mxu1 %v5217_v36  ;;  %5791 = vmatprep.subr.mxu0 %v5219_v14  ;;  %v6141_v50 = vld [vmem:[%s14441_s15 + $0x958] sm:$0xff]  ;;  %v6108_v26 = vld [vmem:[%s14441_s15 + $0x850] sm:$0xff]  ;;  %v6123_v36 = vld [vmem:[%s14441_s15 + $0x8c8] sm:$0xff] }
0x1c64   :  { %v5151_v48 = vmul.f32 %v8765_v35, %v5143_v45  ;;  %8771 = vmatmul.mubr.msk.f32.gmra.mxu1 %vm304_vm2, %v12905_v11  ;;  %8775 = vmatmul.mubr.msk.f32.gmra.mxu0 %vm304_vm2, %v12905_v11  ;;  %v6145_v35 = vld [vmem:[%s14441_s15 + $0x978] sm:$0xff]  ;;  %v6140_v30 = vld [vmem:[%s14441_s15 + $0x950] sm:$0xff]  ;;  %v6155_v14 = vld [vmem:[%s14441_s15 + $0x9c8] sm:$0xff] }
0x1c65   :  { %5404 = vmatprep.mubr.f32.mxu1 %v14569_v8  ;;  %5493 = vmatprep.mubr.f32.mxu0 %v14569_v8  ;;  %v6107_v6 = vld [vmem:[%s14441_s15 + $0x848] sm:$0xff] }
0x1c66   :  { %v12914_v7 = vadd.f32 %v8766_v5, %v5151_v48  ;;  %v6160_v5 = vld [vmem:[%s14441_s15 + $0x9f0] sm:$0xff]  ;;  %v6139_v45 = vld [vmem:[%s14441_s15 + $0x948] sm:$0xff]  ;;  %v6122_v48 = vld [vmem:[%s14441_s15 + $0x8c0] sm:$0xff] }
0x1c68   :  { %14574 = vst [vmem:[#allocation4_spill] sm:$0xff] %v12914_v7  ;;  %8772 = vmatmul.mubr.msk.f32.gmra.mxu1 %vm304_vm2, %v12914_v7  ;;  %8776 = vmatmul.mubr.msk.f32.gmra.mxu0 %vm304_vm2, %v12914_v7 }
0x1c69   :  { %5564 = vmatprep.mubr.f32.mxu1 %v14569_v8  ;;  %5653 = vmatprep.mubr.f32.mxu0 %v14569_v8 }
0x1c6c   :  { %8777 = vmatmul.mubr.msk.f32.vlgmr.msra.gmra.mxu1 %vm304_vm2, %v12840_v0  ;;  %8781 = vmatmul.mubr.msk.f32.vlgmr.msra.gmra.mxu0 %vm304_vm2, %v12840_v0 }
0x1c6d   :  { %5570 = vmatprep.mubr.f32.mxu1 %v14569_v8  ;;  %5659 = vmatprep.mubr.f32.mxu0 %v14569_v8 }
0x1c6e   :  { %5703 = vmatpush1.msra.mxu1 %v5216_v15  ;;  %5792 = vmatpush1.msra.mxu0 %v5218_v59  ;;  %v6154_v15 = vld [vmem:[%s14441_s15 + $0x9c0] sm:$0xff] }
0x1c6f   :  { %5704 = vmatprep.subr.mxu1 %v5201_v41  ;;  %5793 = vmatprep.subr.mxu0 %v5203_v51  ;;  %v6106_v59 = vld [vmem:[%s14441_s15 + $0x840] sm:$0xff]  ;;  %v6121_v51 = vld [vmem:[%s14441_s15 + $0x8b8] sm:$0xff] }
0x1c70   :  { %8778 = vmatmul.mubr.msk.f32.gmra.mxu1 %vm304_vm2, %v12860_v39  ;;  %8782 = vmatmul.mubr.msk.f32.gmra.mxu0 %vm304_vm2, %v12860_v39  ;;  %v6138_v41 = vld [vmem:[%s14441_s15 + $0x940] sm:$0xff] }
0x1c71   :  { %5576 = vmatprep.mubr.f32.mxu1 %v14569_v8  ;;  %5665 = vmatprep.mubr.f32.mxu0 %v14569_v8 }
0x1c72   :  { %5705 = vmatpush1.msra.mxu1 %v5200_v54  ;;  %5794 = vmatpush1.msra.mxu0 %v5202_v52  ;;  %v6153_v54 = vld [vmem:[%s14441_s15 + $0x9b8] sm:$0xff] }
0x1c73   :  { %5706 = vmatprep.subr.mxu1 %v5185_v20  ;;  %5795 = vmatprep.subr.mxu0 %v5187_v56  ;;  %v6105_v52 = vld [vmem:[%s14441_s15 + $0x838] sm:$0xff]  ;;  %v6120_v56 = vld [vmem:[%s14441_s15 + $0x8b0] sm:$0xff] }
0x1c74   :  { %8779 = vmatmul.mubr.msk.f32.gmra.mxu1 %vm304_vm2, %v12905_v11  ;;  %8783 = vmatmul.mubr.msk.f32.gmra.mxu0 %vm304_vm2, %v12905_v11  ;;  %v6137_v20 = vld [vmem:[%s14441_s15 + $0x938] sm:$0xff] }
0x1c75   :  { %5582 = vmatprep.mubr.f32.mxu1 %v14569_v8  ;;  %5671 = vmatprep.mubr.f32.mxu0 %v14569_v8 }
0x1c76   :  { %5707 = vmatpush1.msra.mxu1 %v5184_v12  ;;  %5796 = vmatpush1.msra.mxu0 %v5186_v37  ;;  %v6152_v12 = vld [vmem:[%s14441_s15 + $0x9b0] sm:$0xff] }
0x1c77   :  { %5708 = vmatprep.subr.mxu1 %v5169_v4  ;;  %5797 = vmatprep.subr.mxu0 %v5171_v28  ;;  %v6104_v37 = vld [vmem:[%s14441_s15 + $0x830] sm:$0xff]  ;;  %v6119_v28 = vld [vmem:[%s14441_s15 + $0x8a8] sm:$0xff] }
0x1c78   :  { %8780 = vmatmul.mubr.msk.f32.gmra.mxu1 %vm304_vm2, %v12914_v7  ;;  %8784 = vmatmul.mubr.msk.f32.gmra.mxu0 %vm304_vm2, %v12914_v7  ;;  %v6136_v4 = vld [vmem:[%s14441_s15 + $0x930] sm:$0xff] }
0x1c79   :  { %5709 = vmatpush1.msra.mxu1 %v5168_v2  ;;  %5742 = vmatprep.mubr.f32.mxu1 %v14569_v8  ;;  %v6151_v2 = vld [vmem:[%s14441_s15 + $0x9a8] sm:$0xff] }
0x1c7a   :  { %5798 = vmatpush1.msra.mxu0 %v5170_v38  ;;  %5831 = vmatprep.mubr.f32.mxu0 %v14569_v8  ;;  %v6103_v38 = vld [vmem:[%s14441_s15 + $0x828] sm:$0xff] }
0x1c7b   :  { %5880 = vmatprep.subr.mxu1 %v5221_v49  ;;  %5969 = vmatprep.subr.mxu0 %v5223_v17  ;;  %v6135_v49 = vld [vmem:[%s14441_s15 + $0x928] sm:$0xff]  ;;  %v6118_v17 = vld [vmem:[%s14441_s15 + $0x8a0] sm:$0xff] }
0x1c7c   :  { %8785 = vmatmul.mubr.msk.f32.vlgmr.msra.gmra.mxu1 %vm304_vm2, %v12840_v0  ;;  %8789 = vmatmul.mubr.msk.f32.vlgmr.msra.gmra.mxu0 %vm304_vm2, %v12840_v0 }
0x1c7d   :  { %5748 = vmatprep.mubr.f32.mxu1 %v14569_v8  ;;  %5837 = vmatprep.mubr.f32.mxu0 %v14569_v8 }
0x1c7e   :  { %5881 = vmatpush1.msra.mxu1 %v5220_v24  ;;  %5970 = vmatpush1.msra.mxu0 %v5222_v1  ;;  %v6150_v24 = vld [vmem:[%s14441_s15 + $0x9a0] sm:$0xff] }
0x1c7f   :  { %5882 = vmatprep.subr.mxu1 %v5205_v57  ;;  %5971 = vmatprep.subr.mxu0 %v5207_v23  ;;  %v6102_v1 = vld [vmem:[%s14441_s15 + $0x820] sm:$0xff]  ;;  %v6117_v23 = vld [vmem:[%s14441_s15 + $0x898] sm:$0xff] }
0x1c80   :  { %8786 = vmatmul.mubr.msk.f32.gmra.mxu1 %vm304_vm2, %v12860_v39  ;;  %8790 = vmatmul.mubr.msk.f32.gmra.mxu0 %vm304_vm2, %v12860_v39  ;;  %v6134_v57 = vld [vmem:[%s14441_s15 + $0x920] sm:$0xff] }
0x1c81   :  { %5754 = vmatprep.mubr.f32.mxu1 %v14569_v8  ;;  %5843 = vmatprep.mubr.f32.mxu0 %v14569_v8 }
0x1c82   :  { %5883 = vmatpush1.msra.mxu1 %v5204_v34  ;;  %5972 = vmatpush1.msra.mxu0 %v5206_v62  ;;  %v6149_v34 = vld [vmem:[%s14441_s15 + $0x998] sm:$0xff] }
0x1c83   :  { %5884 = vmatprep.subr.mxu1 %v5189_v29  ;;  %5973 = vmatprep.subr.mxu0 %v5191_v18  ;;  %v6101_v62 = vld [vmem:[%s14441_s15 + $0x818] sm:$0xff]  ;;  %v6116_v18 = vld [vmem:[%s14441_s15 + $0x890] sm:$0xff] }
0x1c84   :  { %8787 = vmatmul.mubr.msk.f32.gmra.mxu1 %vm304_vm2, %v12905_v11  ;;  %8791 = vmatmul.mubr.msk.f32.gmra.mxu0 %vm304_vm2, %v12905_v11  ;;  %v6133_v29 = vld [vmem:[%s14441_s15 + $0x918] sm:$0xff] }
0x1c85   :  { %5760 = vmatprep.mubr.f32.mxu1 %v14569_v8  ;;  %5849 = vmatprep.mubr.f32.mxu0 %v14569_v8 }
0x1c86   :  { %5885 = vmatpush1.msra.mxu1 %v5188_v22  ;;  %5974 = vmatpush1.msra.mxu0 %v5190_v58  ;;  %v6148_v22 = vld [vmem:[%s14441_s15 + $0x990] sm:$0xff] }
0x1c87   :  { %5886 = vmatprep.subr.mxu1 %v5173_v43  ;;  %5975 = vmatprep.subr.mxu0 %v5175_v33  ;;  %v6100_v58 = vld [vmem:[%s14441_s15 + $0x810] sm:$0xff]  ;;  %v6115_v33 = vld [vmem:[%s14441_s15 + $0x888] sm:$0xff] }
0x1c88   :  { %8788 = vmatmul.mubr.msk.f32.gmra.mxu1 %vm304_vm2, %v12914_v7  ;;  %8792 = vmatmul.mubr.msk.f32.gmra.mxu0 %vm304_vm2, %v12914_v7  ;;  %v6132_v43 = vld [vmem:[%s14441_s15 + $0x910] sm:$0xff] }
0x1c89   :  { %5887 = vmatpush1.msra.mxu1 %v5172_v42  ;;  %5920 = vmatprep.mubr.f32.mxu1 %v14569_v8  ;;  %v6147_v42 = vld [vmem:[%s14441_s15 + $0x988] sm:$0xff] }
0x1c8a   :  { %5976 = vmatpush1.msra.mxu0 %v5174_v3  ;;  %6009 = vmatprep.mubr.f32.mxu0 %v14569_v8  ;;  %v6099_v3 = vld [vmem:[%s14441_s15 + $0x808] sm:$0xff] }
0x1c8b   :  { %9380 = vmatprep.subr.mxu1 %v6129_v21  ;;  %9424 = vmatprep.subr.mxu0 %v6161_v9  ;;  %v6131_v21 = vld [vmem:[%s14441_s15 + $0x908] sm:$0xff]  ;;  %v6114_v9 = vld [vmem:[%s14441_s15 + $0x880] sm:$0xff] }
0x1c8c   :  { %8793 = vmatmul.mubr.msk.f32.vlgmr.msra.gmra.mxu1 %vm304_vm2, %v12840_v0  ;;  %8797 = vmatmul.mubr.msk.f32.vlgmr.msra.gmra.mxu0 %vm304_vm2, %v12840_v0 }
0x1c8d   :  { %5926 = vmatprep.mubr.f32.mxu1 %v14569_v8  ;;  %6015 = vmatprep.mubr.f32.mxu0 %v14569_v8 }
0x1c8e   :  { %9381 = vmatpush3.msra.mxu1 %v6113_v27  ;;  %9425 = vmatpush3.msra.mxu0 %v6145_v35  ;;  %v6146_v27 = vld [vmem:[%s14441_s15 + $0x980] sm:$0xff] }
0x1c8f   :  { %9382 = vmatprep.subr.mxu1 %v6128_v16  ;;  %9426 = vmatprep.subr.mxu0 %v6160_v5  ;;  %v6098_v35 = vld [vmem:[%s14441_s15 + $0x800] sm:$0xff]  ;;  %v6193_v5 = vld [vmem:[%s14441_s15 + $0xaf8] sm:$0xff] }
0x1c90   :  { %8794 = vmatmul.mubr.msk.f32.gmra.mxu1 %vm304_vm2, %v12860_v39  ;;  %8798 = vmatmul.mubr.msk.f32.gmra.mxu0 %vm304_vm2, %v12860_v39  ;;  %v6130_v16 = vld [vmem:[%s14441_s15 + $0x900] sm:$0xff] }
0x1c91   :  { %5932 = vmatprep.mubr.f32.mxu1 %v14569_v8  ;;  %6021 = vmatprep.mubr.f32.mxu0 %v14569_v8 }
0x1c92   :  { %9383 = vmatpush3.msra.mxu1 %v6112_v63  ;;  %9427 = vmatpush3.msra.mxu0 %v6144_v53  ;;  %v6225_v63 = vld [vmem:[%s14441_s15 + $0xbf8] sm:$0xff]  ;;  %v13283_v53 = vld [vmem:[%s14442_s14 + $0x1] ss:$2 sm:$0xff] }
0x1c93   :  { %9384 = vmatprep.subr.mxu1 %v6127_v31  ;;  %9428 = vmatprep.subr.mxu0 %v6159_v40  ;;  %v14575_v31 = vld [vmem:[#allocation5_spill] sm:$0xff] }
0x1c94   :  { %8795 = vmatmul.mubr.msk.f32.gmra.mxu1 %vm304_vm2, %v12905_v11  ;;  %8799 = vmatmul.mubr.msk.f32.gmra.mxu0 %vm304_vm2, %v12905_v11  ;;  %v13287_v40 = vrot.slane %v13283_v53, %v14575_v31 }
0x1c95   :  { %5938 = vmatprep.mubr.f32.mxu1 %v14569_v8  ;;  %6027 = vmatprep.mubr.f32.mxu0 %v14569_v8 }
0x1c96   :  { %9385 = vmatpush3.msra.mxu1 %v6111_v10  ;;  %9429 = vmatpush3.msra.mxu0 %v6143_v25  ;;  %v14576_v10 = vld [vmem:[#allocation6_spill] sm:$0xff] }
0x1c97   :  { %9386 = vmatprep.subr.mxu1 %v6126_v19  ;;  %9430 = vmatprep.subr.mxu0 %v6158_v46  ;;  %v13291_v25 = vrot.slane %v13283_v53, %v14576_v10  ;;  %v14577_v19 = vld [vmem:[#allocation7_spill] sm:$0xff] }
0x1c98   :  { %8796 = vmatmul.mubr.msk.f32.gmra.mxu1 %vm304_vm2, %v12914_v7  ;;  %8800 = vmatmul.mubr.msk.f32.gmra.mxu0 %vm304_vm2, %v12914_v7  ;;  %v13295_v46 = vrot.slane %v13283_v53, %v14577_v19 }
0x1c99   :  { %9387 = vmatpush3.msra.mxu1 %v6110_v55  ;;  %9431 = vmatpush3.msra.mxu0 %v6142_v13  ;;  %v14578_v55 = vld [vmem:[#allocation8_spill] sm:$0xff] }
0x1c9a   :  { %9388 = vmatprep.subr.mxu1 %v6125_v47  ;;  %9432 = vmatprep.subr.mxu0 %v6157_v44  ;;  %v13299_v13 = vrot.slane %v13283_v53, %v14578_v55 }
0x1c9b   :  { %9389 = vmatpush3.msra.mxu1 %v6109_v60  ;;  %9433 = vmatpush3.msra.mxu0 %v6141_v50 }
0x1c9c   :  { %9390 = vmatprep.subr.mxu1 %v6124_v61  ;;  %9434 = vmatprep.subr.mxu0 %v6156_v32 }
0x1c9d   :  { %9391 = vmatpush3.msra.mxu1 %v6108_v26  ;;  %9435 = vmatpush3.msra.mxu0 %v6140_v30 }
0x1c9e   :  { %9392 = vmatprep.subr.mxu1 %v6123_v36  ;;  %9436 = vmatprep.subr.mxu0 %v6155_v14 }
0x1c9f   :  { %9393 = vmatpush3.msra.mxu1 %v6107_v6  ;;  %9437 = vmatpush3.msra.mxu0 %v6139_v45 }
0x1ca0   :  { %9394 = vmatprep.subr.mxu1 %v6122_v48  ;;  %9438 = vmatprep.subr.mxu0 %v6154_v15 }
0x1ca1   :  { %9395 = vmatpush3.msra.mxu1 %v6106_v59  ;;  %9439 = vmatpush3.msra.mxu0 %v6138_v41 }
0x1ca2   :  { %9396 = vmatprep.subr.mxu1 %v6121_v51  ;;  %9440 = vmatprep.subr.mxu0 %v6153_v54  ;;  %v6177_v51 = vld [vmem:[%s14441_s15 + $0xa78] sm:$0xff] }
0x1ca3   :  { %9397 = vmatpush3.msra.mxu1 %v6105_v52  ;;  %9441 = vmatpush3.msra.mxu0 %v6137_v20  ;;  %v6209_v54 = vld [vmem:[%s14441_s15 + $0xb78] sm:$0xff] }
0x1ca4   :  { %9398 = vmatprep.subr.mxu1 %v6120_v56  ;;  %9442 = vmatprep.subr.mxu0 %v6152_v12  ;;  %v6192_v56 = vld [vmem:[%s14441_s15 + $0xaf0] sm:$0xff] }
0x1ca5   :  { %9399 = vmatpush3.msra.mxu1 %v6104_v37  ;;  %9443 = vmatpush3.msra.mxu0 %v6136_v4  ;;  %v6224_v12 = vld [vmem:[%s14441_s15 + $0xbf0] sm:$0xff] }
0x1ca6   :  { %9400 = vmatprep.subr.mxu1 %v6119_v28  ;;  %9444 = vmatprep.subr.mxu0 %v6151_v2  ;;  %v6176_v28 = vld [vmem:[%s14441_s15 + $0xa70] sm:$0xff] }
0x1ca7   :  { %9401 = vmatpush3.msra.mxu1 %v6103_v38  ;;  %9445 = vmatpush3.msra.mxu0 %v6135_v49  ;;  %v6208_v2 = vld [vmem:[%s14441_s15 + $0xb70] sm:$0xff] }
0x1ca8   :  { %9402 = vmatprep.subr.mxu1 %v6118_v17  ;;  %9446 = vmatprep.subr.mxu0 %v6150_v24  ;;  %v6191_v17 = vld [vmem:[%s14441_s15 + $0xae8] sm:$0xff] }
0x1ca9   :  { %9403 = vmatpush3.msra.mxu1 %v6102_v1  ;;  %9447 = vmatpush3.msra.mxu0 %v6134_v57  ;;  %v6223_v24 = vld [vmem:[%s14441_s15 + $0xbe8] sm:$0xff] }
0x1caa   :  { %9404 = vmatprep.subr.mxu1 %v6117_v23  ;;  %9448 = vmatprep.subr.mxu0 %v6149_v34 }
0x1cab   :  { %9405 = vmatpush3.msra.mxu1 %v6101_v62  ;;  %9449 = vmatpush3.msra.mxu0 %v6133_v29  ;;  %v6175_v62 = vld [vmem:[%s14441_s15 + $0xa68] sm:$0xff] }
0x1cac   :  { %9406 = vmatprep.subr.mxu1 %v6116_v18  ;;  %9450 = vmatprep.subr.mxu0 %v6148_v22  ;;  %v6207_v29 = vld [vmem:[%s14441_s15 + $0xb68] sm:$0xff]  ;;  %v6190_v18 = vld [vmem:[%s14441_s15 + $0xae0] sm:$0xff] }
0x1cad   :  { %9407 = vmatpush3.msra.mxu1 %v6100_v58  ;;  %9451 = vmatpush3.msra.mxu0 %v6132_v43  ;;  %v6222_v22 = vld [vmem:[%s14441_s15 + $0xbe0] sm:$0xff] }
0x1cae   :  { %9408 = vmatprep.subr.mxu1 %v6115_v33  ;;  %9452 = vmatprep.subr.mxu0 %v6147_v42  ;;  %v6174_v33 = vld [vmem:[%s14441_s15 + $0xa60] sm:$0xff] }
0x1caf   :  { %9409 = vmatpush3.msra.mxu1 %v6099_v3  ;;  %9453 = vmatpush3.msra.mxu0 %v6131_v21  ;;  %v6206_v42 = vld [vmem:[%s14441_s15 + $0xb60] sm:$0xff] }
0x1cb0   :  { %9410 = vmatprep.subr.mxu1 %v6114_v9  ;;  %9454 = vmatprep.subr.mxu0 %v6146_v27  ;;  %v6189_v9 = vld [vmem:[%s14441_s15 + $0xad8] sm:$0xff] }
0x1cb1   :  { %9411 = vmatpush3.msra.mxu1 %v6098_v35  ;;  %9455 = vmatpush3.msra.mxu0 %v6130_v16  ;;  %v6221_v27 = vld [vmem:[%s14441_s15 + $0xbd8] sm:$0xff] }
0x1cb2   :  { %9468 = vmatprep.subr.mxu1 %v6193_v5  ;;  %9512 = vmatprep.subr.mxu0 %v6225_v63  ;;  %v6173_v5 = vld [vmem:[%s14441_s15 + $0xa58] sm:$0xff] }
0x1cb3   :  { %v6205_v63 = vld [vmem:[%s14441_s15 + $0xb58] sm:$0xff] }
0x1d18   :  { %v5388_v47 = vpop.f32.mrf.mxu1  ;;  %v5477_v44 = vpop.f32.mrf.mxu0 }
0x1d19   :  { %v5389_v60 = vadd.f32 %v5388_v47, %v13287_v40  ;;  %v5478_v50 = vadd.f32 %v5477_v44, %v13291_v25  ;;  %v6188_v47 = vld [vmem:[%s14441_s15 + $0xad0] sm:$0xff] }
0x1d1a   :  { %v5390_v61 = vpop.f32.mrf.mxu1  ;;  %v5479_v32 = vpop.f32.mrf.mxu0  ;;  %v6220_v44 = vld [vmem:[%s14441_s15 + $0xbd0] sm:$0xff] }
0x1d1b   :  { %v5391_v26 = vadd.f32 %v5390_v61, %v13295_v46  ;;  %v5480_v30 = vadd.f32 %v5479_v32, %v13299_v13  ;;  %v6034_v48 = vmax.f32 %v5389_v60, 0.0  ;;  %v6036_v15 = vmax.f32 %v5478_v50, 0.0 }
0x1d1c   :  { %v5394_v36 = vpop.f32.mrf.mxu1  ;;  %v5483_v14 = vpop.f32.mrf.mxu0 }
0x1d1d   :  { %v6035_v6 = vmax.f32 %v5391_v26, 0.0  ;;  %v6037_v45 = vmax.f32 %v5480_v30, 0.0  ;;  %v5395_v37 = vadd.f32 %v5394_v36, %v13287_v40  ;;  %v5484_v4 = vadd.f32 %v5483_v14, %v13291_v25  ;;  %v6172_v36 = vld [vmem:[%s14441_s15 + $0xa50] sm:$0xff] }
0x1d1e   :  { %v5396_v59 = vpop.f32.mrf.mxu1  ;;  %v5485_v41 = vpop.f32.mrf.mxu0  ;;  %v6204_v14 = vld [vmem:[%s14441_s15 + $0xb50] sm:$0xff] }
0x1d1f   :  { %v5397_v52 = vadd.f32 %v5396_v59, %v13295_v46  ;;  %v5486_v20 = vadd.f32 %v5485_v41, %v13299_v13  ;;  %6423 = vmatprep.mubr.f32.mxu1 %v6035_v6  ;;  %6508 = vmatprep.mubr.f32.mxu0 %v6037_v45  ;;  %v6050_v1 = vmax.f32 %v5395_v37, 0.0  ;;  %v6052_v57 = vmax.f32 %v5484_v4, 0.0  ;;  %v14580_v4 = vld [vmem:[#allocation10_spill] sm:$0xff] }
0x1d20   :  { %6424 = vmatmul.mubr.f32.vlgmr.msra.gmra.mxu1 %v6034_v48  ;;  %6509 = vmatmul.mubr.f32.vlgmr.msra.gmra.mxu0 %v6036_v15  ;;  %v6187_v48 = vld [vmem:[%s14441_s15 + $0xac8] sm:$0xff] }
0x1d21   :  { %v6051_v38 = vmax.f32 %v5397_v52, 0.0  ;;  %v6053_v49 = vmax.f32 %v5486_v20, 0.0  ;;  %9469 = vmatpush3.msra.mxu1 %v6177_v51  ;;  %9513 = vmatpush3.msra.mxu0 %v6209_v54  ;;  %v6219_v15 = vld [vmem:[%s14441_s15 + $0xbc8] sm:$0xff]  ;;  %v14579_v52 = vld [vmem:[#allocation9_spill] sm:$0xff] }
0x1d22   :  { %9470 = vmatprep.subr.mxu1 %v6192_v56  ;;  %9514 = vmatprep.subr.mxu0 %v6224_v12  ;;  %v13399_v20 = vrot.slane %v13283_v53, %v14579_v52  ;;  %v6186_v56 = vld [vmem:[%s14441_s15 + $0xac0] sm:$0xff] }
0x1d23   :  { %9471 = vmatpush3.msra.mxu1 %v6176_v28  ;;  %9515 = vmatpush3.msra.mxu0 %v6208_v2  ;;  %v6218_v12 = vld [vmem:[%s14441_s15 + $0xbc0] sm:$0xff]  ;;  %v13409_v28 = vrot.slane %v13283_v53, %v14580_v4 }
0x1d24   :  { %6428 = vmatprep.mubr.f32.mxu1 %v6051_v38  ;;  %6513 = vmatprep.mubr.f32.mxu0 %v6053_v49  ;;  %v5400_v23 = vpop.f32.mrf.mxu1  ;;  %v5489_v34 = vpop.f32.mrf.mxu0 }
0x1d25   :  { %9472 = vmatprep.subr.mxu1 %v6191_v17  ;;  %9516 = vmatprep.subr.mxu0 %v6223_v24  ;;  %v5401_v60 = vadd.f32 %v5400_v23, %v13287_v40  ;;  %v5490_v50 = vadd.f32 %v5489_v34, %v13291_v25  ;;  %v6217_v23 = vld [vmem:[%s14441_s15 + $0xbb8] sm:$0xff] }
0x1d26   :  { %6429 = vmatmul.mubr.f32.gmra.mxu1 %v6050_v1  ;;  %6514 = vmatmul.mubr.f32.gmra.mxu0 %v6052_v57  ;;  %v5402_v58 = vpop.f32.mrf.mxu1  ;;  %v5491_v43 = vpop.f32.mrf.mxu0  ;;  %v6170_v1 = vld [vmem:[%s14441_s15 + $0xa40] sm:$0xff] }
0x1d27   :  { %9473 = vmatpush3.msra.mxu1 %v6175_v62  ;;  %9517 = vmatpush3.msra.mxu0 %v6207_v29  ;;  %v5403_v3 = vadd.f32 %v5402_v58, %v13295_v46  ;;  %v5492_v21 = vadd.f32 %v5491_v43, %v13299_v13  ;;  %v6066_v51 = vmax.f32 %v5401_v60, 0.0  ;;  %v6068_v54 = vmax.f32 %v5490_v50, 0.0  ;;  %v6202_v57 = vld [vmem:[%s14441_s15 + $0xb40] sm:$0xff]  ;;  %v6184_v58 = vld [vmem:[%s14441_s15 + $0xab0] sm:$0xff] }
0x1d28   :  { %9474 = vmatprep.subr.mxu1 %v6190_v18  ;;  %9518 = vmatprep.subr.mxu0 %v6222_v22  ;;  %v5406_v35 = vpop.f32.mrf.mxu1  ;;  %v5495_v16 = vpop.f32.mrf.mxu0  ;;  %v6169_v18 = vld [vmem:[%s14441_s15 + $0xa38] sm:$0xff]  ;;  %v6216_v43 = vld [vmem:[%s14441_s15 + $0xbb0] sm:$0xff]  ;;  %v6214_v60 = vld [vmem:[%s14441_s15 + $0xba0] sm:$0xff] }
0x1d29   :  { %9475 = vmatpush3.msra.mxu1 %v6174_v33  ;;  %9519 = vmatpush3.msra.mxu0 %v6206_v42  ;;  %v6067_v61 = vmax.f32 %v5403_v3, 0.0  ;;  %v6069_v32 = vmax.f32 %v5492_v21, 0.0  ;;  %v5407_v2 = vadd.f32 %v5406_v35, %v13287_v40  ;;  %v5496_v38 = vadd.f32 %v5495_v16, %v13291_v25  ;;  %v6185_v25 = vld [vmem:[%s14441_s15 + $0xab8] sm:$0xff]  ;;  %v6168_v3 = vld [vmem:[%s14441_s15 + $0xa30] sm:$0xff]  ;;  %v6183_v35 = vld [vmem:[%s14441_s15 + $0xaa8] sm:$0xff] }
0x1d2a   :  { %9476 = vmatprep.subr.mxu1 %v6189_v9  ;;  %9520 = vmatprep.subr.mxu0 %v6221_v27  ;;  %v5408_v26 = vpop.f32.mrf.mxu1  ;;  %v5497_v30 = vpop.f32.mrf.mxu0  ;;  %v6201_v22 = vld [vmem:[%s14441_s15 + $0xb38] sm:$0xff]  ;;  %v6200_v21 = vld [vmem:[%s14441_s15 + $0xb30] sm:$0xff]  ;;  %v6215_v16 = vld [vmem:[%s14441_s15 + $0xba8] sm:$0xff] }
0x1d2b   :  { %9477 = vmatpush3.msra.mxu1 %v6173_v5  ;;  %9521 = vmatpush3.msra.mxu0 %v6205_v63  ;;  %v5409_v6 = vadd.f32 %v5408_v26, %v13295_v46  ;;  %v5498_v45 = vadd.f32 %v5497_v30, %v13299_v13  ;;  %v6171_v46 = vld [vmem:[%s14441_s15 + $0xa48] sm:$0xff]  ;;  %v6082_v62 = vmax.f32 %v5407_v2, 0.0  ;;  %v6084_v29 = vmax.f32 %v5496_v38, 0.0  ;;  %v6181_v26 = vld [vmem:[%s14441_s15 + $0xa98] sm:$0xff] }
0x1d2c   :  { %9478 = vmatprep.subr.mxu1 %v6188_v47  ;;  %9522 = vmatprep.subr.mxu0 %v6220_v44  ;;  %v13387_v59 = vpop.f32.mrf.mxu1  ;;  %v13389_v41 = vpop.f32.mrf.mxu0  ;;  %v6203_v13 = vld [vmem:[%s14441_s15 + $0xb48] sm:$0xff]  ;;  %v6182_v44 = vld [vmem:[%s14441_s15 + $0xaa0] sm:$0xff]  ;;  %v6213_v30 = vld [vmem:[%s14441_s15 + $0xb98] sm:$0xff] }
0x1d2d   :  { %9479 = vmatpush3.msra.mxu1 %v6172_v36  ;;  %9523 = vmatpush3.msra.mxu0 %v6204_v14  ;;  %v6083_v49 = vmax.f32 %v5409_v6, 0.0  ;;  %v6085_v17 = vmax.f32 %v5498_v45, 0.0  ;;  %v6167_v5 = vld [vmem:[%s14441_s15 + $0xa28] sm:$0xff] }
0x1d2e   :  { %6433 = vmatprep.mubr.f32.mxu1 %v6067_v61  ;;  %6518 = vmatprep.mubr.f32.mxu0 %v6069_v32  ;;  %v5568_v37 = vpop.f32.mrf.mxu1  ;;  %v5657_v24 = vpop.f32.mrf.mxu0  ;;  %v6199_v63 = vld [vmem:[%s14441_s15 + $0xb28] sm:$0xff]  ;;  %v6166_v61 = vld [vmem:[%s14441_s15 + $0xa20] sm:$0xff] }
0x1d2f   :  { %9480 = vmatprep.subr.mxu1 %v6187_v48  ;;  %9524 = vmatprep.subr.mxu0 %v6219_v15  ;;  %v5569_v40 = vadd.f32 %v5568_v37, %v13399_v20  ;;  %v5658_v34 = vadd.f32 %v5657_v24, %v13409_v28  ;;  %v6198_v32 = vld [vmem:[%s14441_s15 + $0xb20] sm:$0xff]  ;;  %v14582_v6 = vld [vmem:[#allocation12_spill] sm:$0xff]  ;;  %v6165_v48 = vld [vmem:[%s14441_s15 + $0xa18] sm:$0xff] }
0x1d30   :  { %6434 = vmatmul.mubr.f32.gmra.mxu1 %v6066_v51  ;;  %6519 = vmatmul.mubr.f32.gmra.mxu0 %v6068_v54  ;;  %v13439_v42 = vpop.f32.mrf.mxu1  ;;  %v13447_v27 = vpop.f32.mrf.mxu0  ;;  %v14581_v36 = vld [vmem:[#allocation11_spill] sm:$0xff]  ;;  %v13485_v45 = vrot.slane %v13283_v53, %v14582_v6  ;;  %v6197_v15 = vld [vmem:[%s14441_s15 + $0xb18] sm:$0xff]  ;;  %v6180_v54 = vld [vmem:[%s14441_s15 + $0xa90] sm:$0xff] }
0x1d31   :  { %9481 = vmatpush3.msra.mxu1 %v6171_v46  ;;  %9525 = vmatpush3.msra.mxu0 %v6203_v13  ;;  %v6039_v33 = vmax.f32 %v5569_v40, 0.0  ;;  %v6041_v9 = vmax.f32 %v5658_v34, 0.0  ;;  %v13481_v14 = vrot.slane %v13283_v53, %v14581_v36  ;;  %v6212_v53 = vld [vmem:[%s14441_s15 + $0xb90] sm:$0xff]  ;;  %v6211_v37 = vld [vmem:[%s14441_s15 + $0xb88] sm:$0xff] }
0x1d32   :  { %9482 = vmatprep.subr.mxu1 %v6186_v56  ;;  %9526 = vmatprep.subr.mxu0 %v6218_v12  ;;  %v5574_v47 = vpop.f32.mrf.mxu1  ;;  %v5663_v50 = vpop.f32.mrf.mxu0  ;;  %v6164_v13 = vld [vmem:[%s14441_s15 + $0xa10] sm:$0xff]  ;;  %v6179_v12 = vld [vmem:[%s14441_s15 + $0xa88] sm:$0xff]  ;;  %v5656_v38 = vadd.f32 %v13389_v41, %v13485_v45  ;;  %v6210_v41 = vld [vmem:[%s14441_s15 + $0xb80] sm:$0xff] }
0x1d33   :  { %9483 = vmatpush3.msra.mxu1 %v6170_v1  ;;  %9527 = vmatpush3.msra.mxu0 %v6202_v57  ;;  %v6196_v56 = vld [vmem:[%s14441_s15 + $0xb10] sm:$0xff]  ;;  %v5567_v2 = vadd.f32 %v13387_v59, %v13481_v14  ;;  %v6178_v59 = vld [vmem:[%s14441_s15 + $0xa80] sm:$0xff]  ;;  %v5575_v1 = vadd.f32 %v5574_v47, %v13399_v20  ;;  %v5664_v57 = vadd.f32 %v5663_v50, %v13409_v28 }
0x1d34   :  { %6438 = vmatprep.mubr.f32.mxu1 %v6083_v49  ;;  %6523 = vmatprep.mubr.f32.mxu0 %v6085_v17  ;;  %v13493_v51 = vpop.f32.mrf.mxu1  ;;  %v13501_v46 = vpop.f32.mrf.mxu0  ;;  %v6163_v49 = vld [vmem:[%s14441_s15 + $0xa08] sm:$0xff]  ;;  %v6272_v47 = vld [vmem:[%s14441_s15 + $0xd70] sm:$0xff] }
0x1d35   :  { %9484 = vmatprep.subr.mxu1 %v6185_v25  ;;  %9528 = vmatprep.subr.mxu0 %v6217_v23  ;;  %v6195_v17 = vld [vmem:[%s14441_s15 + $0xb08] sm:$0xff]  ;;  %v6162_v25 = vld [vmem:[%s14441_s15 + $0xa00] sm:$0xff]  ;;  %v6038_v34 = vmax.f32 %v5567_v2, 0.0 }
0x1d36   :  { %6439 = vmatmul.mubr.f32.gmra.mxu1 %v6082_v62  ;;  %6524 = vmatmul.mubr.f32.gmra.mxu0 %v6084_v29  ;;  %v5580_v24 = vpop.f32.mrf.mxu1  ;;  %v5669_v40 = vpop.f32.mrf.mxu0  ;;  %v6194_v23 = vld [vmem:[%s14441_s15 + $0xb00] sm:$0xff]  ;;  %v6040_v62 = vmax.f32 %v5656_v38, 0.0  ;;  %v6257_v29 = vld [vmem:[%s14441_s15 + $0xcf8] sm:$0xff] }
0x1d37   :  { %9485 = vmatpush3.msra.mxu1 %v6169_v18  ;;  %9529 = vmatpush3.msra.mxu0 %v6201_v22  ;;  %v6289_v18 = vld [vmem:[%s14441_s15 + $0xdf8] sm:$0xff]  ;;  %v6238_v38 = vld [vmem:[%s14441_s15 + $0xc60] sm:$0xff] }
0x1d38   :  { %9486 = vmatprep.subr.mxu1 %v6184_v58  ;;  %9530 = vmatprep.subr.mxu0 %v6216_v43  ;;  %v13545_v22 = vpop.f32.mrf.mxu1  ;;  %v5573_v58 = vadd.f32 %v13439_v42, %v13481_v14  ;;  %v5662_v43 = vadd.f32 %v13447_v27, %v13485_v45  ;;  %v6256_v42 = vld [vmem:[%s14441_s15 + $0xcf0] sm:$0xff] }
0x1d39   :  { %9487 = vmatpush3.msra.mxu1 %v6168_v3  ;;  %9531 = vmatpush3.msra.mxu0 %v6200_v21  ;;  %v6057_v3 = vmax.f32 %v5664_v57, 0.0  ;;  %v5673_v21 = vpop.f32.mrf.mxu0  ;;  %v6288_v27 = vld [vmem:[%s14441_s15 + $0xdf0] sm:$0xff] }
0x1d3a   :  { %9488 = vmatprep.subr.mxu1 %v6183_v35  ;;  %6593 = vmatprep.mubr.f32.mxu1 %v6039_v33  ;;  %v6055_v33 = vmax.f32 %v5575_v1, 0.0  ;;  %v6273_v35 = vld [vmem:[%s14441_s15 + $0xd78] sm:$0xff]  ;;  %v6056_v50 = vmax.f32 %v5662_v43, 0.0 }
0x1d3b   :  { %9532 = vmatprep.subr.mxu0 %v6215_v16  ;;  %6678 = vmatprep.mubr.f32.mxu0 %v6041_v9  ;;  %v6241_v9 = vld [vmem:[%s14441_s15 + $0xc78] sm:$0xff]  ;;  %v5581_v16 = vadd.f32 %v5580_v24, %v13399_v20 }
0x1d3c   :  { %9489 = vmatpush3.msra.mxu1 %v6167_v5  ;;  %9533 = vmatpush3.msra.mxu0 %v6199_v63  ;;  %v5670_v5 = vadd.f32 %v5669_v40, %v13409_v28  ;;  %v6240_v63 = vld [vmem:[%s14441_s15 + $0xc70] sm:$0xff]  ;;  %v5674_v40 = vadd.f32 %v5673_v21, %v13485_v45  ;;  %v6283_v21 = vld [vmem:[%s14441_s15 + $0xdc8] sm:$0xff] }
0x1d3d   :  { %9490 = vmatprep.subr.mxu1 %v6182_v44  ;;  %9534 = vmatprep.subr.mxu0 %v6214_v60  ;;  %v5586_v44 = vpop.f32.mrf.mxu1  ;;  %v6054_v60 = vmax.f32 %v5573_v58, 0.0 }
0x1d3e   :  { %9491 = vmatpush3.msra.mxu1 %v6166_v61  ;;  %9535 = vmatpush3.msra.mxu0 %v6198_v32  ;;  %v5675_v61 = vpop.f32.mrf.mxu0  ;;  %v6255_v32 = vld [vmem:[%s14441_s15 + $0xce8] sm:$0xff] }
0x1d3f   :  { %9492 = vmatprep.subr.mxu1 %v6181_v26  ;;  %9536 = vmatprep.subr.mxu0 %v6213_v30  ;;  %v6287_v26 = vld [vmem:[%s14441_s15 + $0xde8] sm:$0xff]  ;;  %v5579_v30 = vadd.f32 %v13493_v51, %v13481_v14  ;;  %v6254_v51 = vld [vmem:[%s14441_s15 + $0xce0] sm:$0xff] }
0x1d40   :  { %9493 = vmatpush3.msra.mxu1 %v6165_v48  ;;  %9537 = vmatpush3.msra.mxu0 %v6197_v15  ;;  %v5668_v48 = vadd.f32 %v13501_v46, %v13485_v45  ;;  %v6071_v15 = vmax.f32 %v5581_v16, 0.0  ;;  %v6286_v46 = vld [vmem:[%s14441_s15 + $0xde0] sm:$0xff]  ;;  %v13597_v2 = vpop.f32.mrf.mxu0  ;;  %v6284_v45 = vld [vmem:[%s14441_s15 + $0xdd0] sm:$0xff] }
0x1d41   :  { %9494 = vmatprep.subr.mxu1 %v6180_v54  ;;  %9538 = vmatprep.subr.mxu0 %v6212_v53  ;;  %v6073_v54 = vmax.f32 %v5670_v5, 0.0  ;;  %v6239_v53 = vld [vmem:[%s14441_s15 + $0xc68] sm:$0xff]  ;;  %v6250_v16 = vld [vmem:[%s14441_s15 + $0xcc0] sm:$0xff] }
0x1d42   :  { %9495 = vmatpush3.msra.mxu1 %v6164_v13  ;;  %9539 = vmatpush3.msra.mxu0 %v6196_v56  ;;  %v6271_v13 = vld [vmem:[%s14441_s15 + $0xd68] sm:$0xff]  ;;  %v13587_v56 = vpop.f32.mrf.mxu1  ;;  %v6282_v5 = vld [vmem:[%s14441_s15 + $0xdc0] sm:$0xff] }
0x1d43   :  { %9496 = vmatprep.subr.mxu1 %v6179_v12  ;;  %9540 = vmatprep.subr.mxu0 %v6211_v37  ;;  %v5587_v12 = vadd.f32 %v5586_v44, %v13399_v20  ;;  %v5676_v37 = vadd.f32 %v5675_v61, %v13409_v28  ;;  %v6070_v20 = vmax.f32 %v5579_v30, 0.0  ;;  %v6072_v28 = vmax.f32 %v5668_v48, 0.0  ;;  %v6249_v44 = vld [vmem:[%s14441_s15 + $0xcb8] sm:$0xff]  ;;  %v6280_v30 = vld [vmem:[%s14441_s15 + $0xdb0] sm:$0xff] }
0x1d44   :  { %9497 = vmatpush3.msra.mxu1 %v6163_v49  ;;  %9541 = vmatpush3.msra.mxu0 %v6195_v17  ;;  %v6270_v49 = vld [vmem:[%s14441_s15 + $0xd60] sm:$0xff]  ;;  %v13608_v17 = vld [vmem:[%s14442_s14 + $0x11] ss:$2 sm:$0xff]  ;;  %v5746_v1 = vpop.f32.mrf.mxu1  ;;  %s14592_s14 = sld [smem:[#allocation29_spill]] }
0x1d45   :  { %9498 = vmatprep.subr.mxu1 %v6178_v59  ;;  %9542 = vmatprep.subr.mxu0 %v6210_v41  ;;  %v13612_v24 = vrot.slane %v13608_v17, %v14577_v19  ;;  %v6253_v59 = vld [vmem:[%s14441_s15 + $0xcd8] sm:$0xff]  ;;  %v13622_v57 = vrot.slane %v13608_v17, %v14578_v55  ;;  %v5585_v19 = vadd.f32 %v13545_v22, %v13481_v14  ;;  %v6252_v14 = vld [vmem:[%s14441_s15 + $0xcd0] sm:$0xff] }
0x1d46   :  { %9499 = vmatpush3.msra.mxu1 %v6162_v25  ;;  %9543 = vmatpush3.msra.mxu0 %v6194_v23  ;;  %v6285_v41 = vld [vmem:[%s14441_s15 + $0xdd8] sm:$0xff]  ;;  %v6087_v25 = vmax.f32 %v5587_v12, 0.0  ;;  %v6089_v23 = vmax.f32 %v5676_v37, 0.0  ;;  %v6268_v22 = vld [vmem:[%s14441_s15 + $0xd50] sm:$0xff]  ;;  %v6246_v37 = vld [vmem:[%s14441_s15 + $0xca0] sm:$0xff] }
0x1d47   :  { %6594 = vmatmul.mubr.f32.vlgmr.msra.gmra.mxu1 %v6038_v34  ;;  %6679 = vmatmul.mubr.f32.vlgmr.msra.gmra.mxu0 %v6040_v62  ;;  %v5835_v34 = vpop.f32.mrf.mxu0  ;;  %v6237_v62 = vld [vmem:[%s14441_s15 + $0xc58] sm:$0xff]  ;;  %v6086_v43 = vmax.f32 %v5585_v19, 0.0  ;;  %v13735_v19 = vrot.slane %v13608_v17, %v14576_v10  ;;  %v6276_v10 = vld [vmem:[%s14441_s15 + $0xd90] sm:$0xff] }
0x1d48   :  { %9556 = vmatprep.subr.mxu1 %v6257_v29  ;;  %9600 = vmatprep.subr.mxu0 %v6289_v18  ;;  %v6269_v55 = vld [vmem:[%s14441_s15 + $0xd58] sm:$0xff]  ;;  %v5747_v29 = vadd.f32 %v5746_v1, %v13612_v24  ;;  %v6236_v18 = vld [vmem:[%s14441_s15 + $0xc50] sm:$0xff]  ;;  %v5836_v58 = vadd.f32 %v5835_v34, %v13622_v57  ;;  %v13731_v1 = vrot.slane %v13608_v17, %v14575_v31 }
0x1d49   :  { %6598 = vmatprep.mubr.f32.mxu1 %v6055_v33  ;;  %6683 = vmatprep.mubr.f32.mxu0 %v6057_v3  ;;  %v6088_v33 = vmax.f32 %v5674_v40, 0.0  ;;  %v6251_v3 = vld [vmem:[%s14441_s15 + $0xcc8] sm:$0xff]  ;;  %v6265_v61 = vld [vmem:[%s14441_s15 + $0xd38] sm:$0xff]  ;;  %v13691_v48 = vpop.f32.mrf.mxu0  ;;  %v6244_v31 = vld [vmem:[%s14441_s15 + $0xc90] sm:$0xff] }
0x1d4a   :  { %9557 = vmatpush3.msra.mxu1 %v6241_v9  ;;  %9601 = vmatpush3.msra.mxu0 %v6273_v35  ;;  %v6235_v9 = vld [vmem:[%s14441_s15 + $0xc48] sm:$0xff]  ;;  %v6043_v35 = vmax.f32 %v5747_v29, 0.0  ;;  %v6229_v40 = vld [vmem:[%s14441_s15 + $0xc18] sm:$0xff]  ;;  %v5745_v29 = vadd.f32 %v13587_v56, %v13731_v1  ;;  %v6242_v56 = vld [vmem:[%s14441_s15 + $0xc80] sm:$0xff] }
0x1d4b   :  { %9558 = vmatprep.subr.mxu1 %v6256_v42  ;;  %9602 = vmatprep.subr.mxu0 %v6288_v27  ;;  %v6267_v42 = vld [vmem:[%s14441_s15 + $0xd48] sm:$0xff]  ;;  %v6045_v27 = vmax.f32 %v5836_v58, 0.0 }
0x1d4c   :  { %9559 = vmatpush3.msra.mxu1 %v6240_v63  ;;  %9603 = vmatpush3.msra.mxu0 %v6272_v47  ;;  %v6234_v63 = vld [vmem:[%s14441_s15 + $0xc40] sm:$0xff]  ;;  %v6259_v58 = vld [vmem:[%s14441_s15 + $0xd08] sm:$0xff] }
0x1d4d   :  { %6599 = vmatmul.mubr.f32.gmra.mxu1 %v6054_v60  ;;  %6684 = vmatmul.mubr.f32.gmra.mxu0 %v6056_v50  ;;  %v6266_v47 = vld [vmem:[%s14441_s15 + $0xd40] sm:$0xff]  ;;  %v6281_v60 = vld [vmem:[%s14441_s15 + $0xdb8] sm:$0xff] }
0x1d4e   :  { %9560 = vmatprep.subr.mxu1 %v6255_v32  ;;  %9604 = vmatprep.subr.mxu0 %v6287_v26  ;;  %v6233_v50 = vld [vmem:[%s14441_s15 + $0xc38] sm:$0xff]  ;;  %v13683_v32 = vpop.f32.mrf.mxu1  ;;  %v6248_v26 = vld [vmem:[%s14441_s15 + $0xcb0] sm:$0xff] }
0x1d4f   :  { %6603 = vmatprep.mubr.f32.mxu1 %v6071_v15  ;;  %6688 = vmatprep.mubr.f32.mxu0 %v6073_v54  ;;  %v6232_v15 = vld [vmem:[%s14441_s15 + $0xc30] sm:$0xff] }
0x1d50   :  { %9561 = vmatpush3.msra.mxu1 %v6239_v53  ;;  %9605 = vmatpush3.msra.mxu0 %v6271_v13  ;;  %v6264_v54 = vld [vmem:[%s14441_s15 + $0xd30] sm:$0xff]  ;;  %v6247_v53 = vld [vmem:[%s14441_s15 + $0xca8] sm:$0xff]  ;;  %v5752_v12 = vpop.f32.mrf.mxu1 }
0x1d51   :  { %9562 = vmatprep.subr.mxu1 %v6254_v51  ;;  %9606 = vmatprep.subr.mxu0 %v6286_v46  ;;  %v6279_v13 = vld [vmem:[%s14441_s15 + $0xda8] sm:$0xff] }
0x1d52   :  { %9563 = vmatpush3.msra.mxu1 %v6238_v38  ;;  %9607 = vmatpush3.msra.mxu0 %v6270_v49  ;;  %v6231_v51 = vld [vmem:[%s14441_s15 + $0xc28] sm:$0xff]  ;;  %v6278_v38 = vld [vmem:[%s14441_s15 + $0xda0] sm:$0xff]  ;;  %v5841_v49 = vpop.f32.mrf.mxu0 }
0x1d53   :  { %6604 = vmatmul.mubr.f32.gmra.mxu1 %v6070_v20  ;;  %6689 = vmatmul.mubr.f32.gmra.mxu0 %v6072_v28  ;;  %v6263_v46 = vld [vmem:[%s14441_s15 + $0xd28] sm:$0xff]  ;;  %v6230_v20 = vld [vmem:[%s14441_s15 + $0xc20] sm:$0xff] }
0x1d54   :  { %9564 = vmatprep.subr.mxu1 %v6253_v59  ;;  %9608 = vmatprep.subr.mxu0 %v6285_v41  ;;  %v6262_v28 = vld [vmem:[%s14441_s15 + $0xd20] sm:$0xff]  ;;  %v6245_v59 = vld [vmem:[%s14441_s15 + $0xc98] sm:$0xff]  ;;  %v13751_v34 = vpop.f32.mrf.mxu0 }
0x1d55   :  { %6608 = vmatprep.mubr.f32.mxu1 %v6087_v25  ;;  %6693 = vmatprep.mubr.f32.mxu0 %v6089_v23  ;;  %v6277_v41 = vld [vmem:[%s14441_s15 + $0xd98] sm:$0xff]  ;;  %v13743_v23 = vpop.f32.mrf.mxu1 }
0x1d56   :  { %9565 = vmatpush3.msra.mxu1 %v6237_v62  ;;  %9609 = vmatpush3.msra.mxu0 %v6269_v55  ;;  %v6261_v25 = vld [vmem:[%s14441_s15 + $0xd18] sm:$0xff]  ;;  %v6228_v62 = vld [vmem:[%s14441_s15 + $0xc10] sm:$0xff] }
0x1d57   :  { %9566 = vmatprep.subr.mxu1 %v6252_v14  ;;  %9610 = vmatprep.subr.mxu0 %v6284_v45  ;;  %v6260_v55 = vld [vmem:[%s14441_s15 + $0xd10] sm:$0xff]  ;;  %v6243_v14 = vld [vmem:[%s14441_s15 + $0xc88] sm:$0xff] }
0x1d58   :  { %9567 = vmatpush3.msra.mxu1 %v6236_v18  ;;  %9611 = vmatpush3.msra.mxu0 %v6268_v22  ;;  %v6275_v45 = vld [vmem:[%s14441_s15 + $0xd88] sm:$0xff]  ;;  %v5834_v18 = vadd.f32 %v13597_v2, %v13735_v19  ;;  %v6274_v2 = vld [vmem:[%s14441_s15 + $0xd80] sm:$0xff] }
0x1d59   :  { %6609 = vmatmul.mubr.f32.gmra.mxu1 %v6086_v43  ;;  %6694 = vmatmul.mubr.f32.gmra.mxu0 %v6088_v33  ;;  %v6227_v22 = vld [vmem:[%s14441_s15 + $0xc08] sm:$0xff]  ;;  %v5758_v43 = vpop.f32.mrf.mxu1  ;;  %v5753_v33 = vadd.f32 %v5752_v12, %v13612_v24 }
0x1d5a   :  { %9568 = vmatprep.subr.mxu1 %v6251_v3  ;;  %9612 = vmatprep.subr.mxu0 %v6283_v21  ;;  %v5842_v3 = vadd.f32 %v5841_v49, %v13622_v57  ;;  %v5847_v21 = vpop.f32.mrf.mxu0  ;;  %v6351_v49 = vld [vmem:[%s14441_s15 + $0xfe8] sm:$0xff] }
0x1d5b   :  { %9569 = vmatpush3.msra.mxu1 %v6235_v9  ;;  %6763 = vmatprep.mubr.f32.mxu1 %v6043_v35  ;;  %v6226_v9 = vld [vmem:[%s14441_s15 + $0xc00] sm:$0xff] }
0x1d5c   :  { %9613 = vmatpush3.msra.mxu0 %v6267_v42  ;;  %6848 = vmatprep.mubr.f32.mxu0 %v6045_v27  ;;  %v6258_v35 = vld [vmem:[%s14441_s15 + $0xd00] sm:$0xff]  ;;  %v6042_v42 = vmax.f32 %v5745_v29, 0.0  ;;  %v6044_v27 = vmax.f32 %v5834_v18, 0.0 }
0x1d5d   :  { %9570 = vmatprep.subr.mxu1 %v6250_v16  ;;  %9614 = vmatprep.subr.mxu0 %v6282_v5  ;;  %v6321_v16 = vld [vmem:[%s14441_s15 + $0xef8] sm:$0xff] }
0x1d5e   :  { %9571 = vmatpush3.msra.mxu1 %v6234_v63  ;;  %9615 = vmatpush3.msra.mxu0 %v6266_v47  ;;  %v6353_v5 = vld [vmem:[%s14441_s15 + $0xff8] sm:$0xff]  ;;  %v13795_v63 = vpop.f32.mrf.mxu1  ;;  %v5751_v47 = vadd.f32 %v13683_v32, %v13731_v1  ;;  %v6320_v32 = vld [vmem:[%s14441_s15 + $0xef0] sm:$0xff] }
0x1d5f   :  { %9572 = vmatprep.subr.mxu1 %v6249_v44  ;;  %9616 = vmatprep.subr.mxu0 %v6281_v60  ;;  %v5840_v44 = vadd.f32 %v13691_v48, %v13735_v19  ;;  %v6059_v60 = vmax.f32 %v5753_v33, 0.0  ;;  %v6352_v48 = vld [vmem:[%s14441_s15 + $0xff0] sm:$0xff] }
0x1d60   :  { %9573 = vmatpush3.msra.mxu1 %v6233_v50  ;;  %9617 = vmatpush3.msra.mxu0 %v6265_v61  ;;  %v6061_v50 = vmax.f32 %v5842_v3, 0.0  ;;  %v5851_v61 = vpop.f32.mrf.mxu0 }
0x1d61   :  { %9574 = vmatprep.subr.mxu1 %v6248_v26  ;;  %9618 = vmatprep.subr.mxu0 %v6280_v30  ;;  %v6305_v26 = vld [vmem:[%s14441_s15 + $0xe78] sm:$0xff]  ;;  %v6060_v12 = vmax.f32 %v5840_v44, 0.0  ;;  %v6299_v44 = vld [vmem:[%s14441_s15 + $0xe48] sm:$0xff] }
0x1d62   :  { %9575 = vmatpush3.msra.mxu1 %v6232_v15  ;;  %9619 = vmatpush3.msra.mxu0 %v6264_v54  ;;  %v6337_v30 = vld [vmem:[%s14441_s15 + $0xf78] sm:$0xff]  ;;  %v5759_v15 = vadd.f32 %v5758_v43, %v13612_v24  ;;  %v5848_v54 = vadd.f32 %v5847_v21, %v13622_v57  ;;  %v13867_v43 = vrot.slane %v13608_v17, %v14580_v4 }
0x1d63   :  { %9576 = vmatprep.subr.mxu1 %v6247_v53  ;;  %9620 = vmatprep.subr.mxu0 %v6279_v13  ;;  %v6304_v53 = vld [vmem:[%s14441_s15 + $0xe70] sm:$0xff]  ;;  %v6301_v21 = vld [vmem:[%s14441_s15 + $0xe58] sm:$0xff] }
0x1d64   :  { %9577 = vmatpush3.msra.mxu1 %v6231_v51  ;;  %9621 = vmatpush3.msra.mxu0 %v6263_v46  ;;  %v6336_v13 = vld [vmem:[%s14441_s15 + $0xf70] sm:$0xff]  ;;  %v5764_v51 = vpop.f32.mrf.mxu1  ;;  %v6058_v46 = vmax.f32 %v5751_v47, 0.0  ;;  %v6333_v4 = vld [vmem:[%s14441_s15 + $0xf58] sm:$0xff]  ;;  %v6347_v47 = vld [vmem:[%s14441_s15 + $0xfc8] sm:$0xff] }
0x1d65   :  { %9578 = vmatprep.subr.mxu1 %v6246_v37  ;;  %9622 = vmatprep.subr.mxu0 %v6278_v38  ;;  %v5853_v37 = vpop.f32.mrf.mxu0  ;;  %v6319_v38 = vld [vmem:[%s14441_s15 + $0xee8] sm:$0xff] }
0x1d66   :  { %9579 = vmatpush3.msra.mxu1 %v6230_v20  ;;  %9623 = vmatpush3.msra.mxu0 %v6262_v28  ;;  %v5757_v20 = vadd.f32 %v13743_v23, %v13731_v1  ;;  %v5846_v28 = vadd.f32 %v13751_v34, %v13735_v19  ;;  %v6318_v23 = vld [vmem:[%s14441_s15 + $0xee0] sm:$0xff]  ;;  %v5765_v34 = vadd.f32 %v5764_v51, %v13612_v24  ;;  %v6297_v51 = vld [vmem:[%s14441_s15 + $0xe38] sm:$0xff] }
0x1d67   :  { %9580 = vmatprep.subr.mxu1 %v6245_v59  ;;  %9624 = vmatprep.subr.mxu0 %v6277_v41  ;;  %v6075_v59 = vmax.f32 %v5759_v15, 0.0  ;;  %v6077_v41 = vmax.f32 %v5848_v54, 0.0  ;;  %v13857_v24 = vrot.slane %v13608_v17, %v14579_v52  ;;  %v5763_v52 = vadd.f32 %v13795_v63, %v13731_v1  ;;  %v6316_v1 = vld [vmem:[%s14441_s15 + $0xed0] sm:$0xff]  ;;  %v6315_v63 = vld [vmem:[%s14441_s15 + $0xec8] sm:$0xff]  ;;  %v6298_v15 = vld [vmem:[%s14441_s15 + $0xe40] sm:$0xff] }
0x1d68   :  { %9581 = vmatpush3.msra.mxu1 %v6229_v40  ;;  %9625 = vmatpush3.msra.mxu0 %v6261_v25  ;;  %v6303_v40 = vld [vmem:[%s14441_s15 + $0xe68] sm:$0xff]  ;;  %v6074_v29 = vmax.f32 %v5757_v20, 0.0  ;;  %v6076_v18 = vmax.f32 %v5846_v28, 0.0  ;;  %v6330_v54 = vld [vmem:[%s14441_s15 + $0xf40] sm:$0xff]  ;;  %v6296_v20 = vld [vmem:[%s14441_s15 + $0xe30] sm:$0xff] }
0x1d69   :  { %9582 = vmatprep.subr.mxu1 %v6244_v31  ;;  %9626 = vmatprep.subr.mxu0 %v6276_v10  ;;  %v6335_v25 = vld [vmem:[%s14441_s15 + $0xf68] sm:$0xff]  ;;  %v13837_v31 = vpop.f32.mrf.mxu1  ;;  %v6350_v10 = vld [vmem:[%s14441_s15 + $0xfe0] sm:$0xff]  ;;  %v6328_v28 = vld [vmem:[%s14441_s15 + $0xf30] sm:$0xff] }
0x1d6a   :  { %9583 = vmatpush3.msra.mxu1 %v6228_v62  ;;  %9627 = vmatpush3.msra.mxu0 %v6260_v55  ;;  %v5854_v62 = vadd.f32 %v5853_v37, %v13622_v57  ;;  %v13847_v55 = vpop.f32.mrf.mxu0  ;;  %v6317_v57 = vld [vmem:[%s14441_s15 + $0xed8] sm:$0xff]  ;;  %v6344_v37 = vld [vmem:[%s14441_s15 + $0xfb0] sm:$0xff] }
0x1d6b   :  { %9584 = vmatprep.subr.mxu1 %v6243_v14  ;;  %9628 = vmatprep.subr.mxu0 %v6275_v45  ;;  %v6302_v14 = vld [vmem:[%s14441_s15 + $0xe60] sm:$0xff] }
0x1d6c   :  { %9585 = vmatpush3.msra.mxu1 %v6227_v22  ;;  %9629 = vmatpush3.msra.mxu0 %v6259_v58  ;;  %v6334_v45 = vld [vmem:[%s14441_s15 + $0xf60] sm:$0xff]  ;;  %v6349_v22 = vld [vmem:[%s14441_s15 + $0xfd8] sm:$0xff]  ;;  %v5924_v58 = vpop.f32.mrf.mxu1  ;;  %v6093_v33 = vmax.f32 %v5854_v62, 0.0  ;;  %v6013_v3 = vpop.f32.mrf.mxu0 }
0x1d6d   :  { %9586 = vmatprep.subr.mxu1 %v6242_v56  ;;  %9630 = vmatprep.subr.mxu0 %v6274_v2  ;;  %v5852_v56 = vadd.f32 %v5851_v61, %v13735_v19  ;;  %v6091_v2 = vmax.f32 %v5765_v34, 0.0  ;;  %v6348_v19 = vld [vmem:[%s14441_s15 + $0xfd0] sm:$0xff] }
0x1d6e   :  { %9587 = vmatpush3.msra.mxu1 %v6226_v9  ;;  %9631 = vmatpush3.msra.mxu0 %v6258_v35  ;;  %v5925_v9 = vadd.f32 %v5924_v58, %v13857_v24  ;;  %v6300_v35 = vld [vmem:[%s14441_s15 + $0xe50] sm:$0xff]  ;;  %v6293_v58 = vld [vmem:[%s14441_s15 + $0xe18] sm:$0xff] }
0x1d6f   :  { %6764 = vmatmul.mubr.f32.vlgmr.msra.gmra.mxu1 %v6042_v42  ;;  %6849 = vmatmul.mubr.f32.vlgmr.msra.gmra.mxu0 %v6044_v27  ;;  %v6332_v42 = vld [vmem:[%s14441_s15 + $0xf50] sm:$0xff]  ;;  %v6014_v27 = vadd.f32 %v6013_v3, %v13867_v43  ;;  %v6307_v3 = vld [vmem:[%s14441_s15 + $0xe88] sm:$0xff] }
0x1d70   :  { %9644 = vmatprep.subr.mxu1 %v6321_v16  ;;  %9688 = vmatprep.subr.mxu0 %v6353_v5  ;;  %v6090_v16 = vmax.f32 %v5763_v52, 0.0  ;;  %v6092_v5 = vmax.f32 %v5852_v56, 0.0  ;;  %v6325_v52 = vld [vmem:[%s14441_s15 + $0xf18] sm:$0xff] }
0x1d71   :  { %6768 = vmatprep.mubr.f32.mxu1 %v6059_v60  ;;  %6853 = vmatprep.mubr.f32.mxu0 %v6061_v50  ;;  %v6047_v60 = vmax.f32 %v5925_v9, 0.0  ;;  %v6331_v50 = vld [vmem:[%s14441_s15 + $0xf48] sm:$0xff]  ;;  %v6049_v61 = vmax.f32 %v6014_v27, 0.0 }
0x1d72   :  { %9645 = vmatpush3.msra.mxu1 %v6305_v26  ;;  %9689 = vmatpush3.msra.mxu0 %v6337_v30  ;;  %v6314_v26 = vld [vmem:[%s14441_s15 + $0xec0] sm:$0xff]  ;;  %v6323_v9 = vld [vmem:[%s14441_s15 + $0xf08] sm:$0xff] }
0x1d73   :  { %9646 = vmatprep.subr.mxu1 %v6320_v32  ;;  %9690 = vmatprep.subr.mxu0 %v6352_v48  ;;  %v6346_v30 = vld [vmem:[%s14441_s15 + $0xfc0] sm:$0xff]  ;;  %v13910_v32 = vpop.f32.mrf.mxu1  ;;  %v13912_v48 = vpop.f32.mrf.mxu0 }
0x1d74   :  { %9647 = vmatpush3.msra.mxu1 %v6304_v53  ;;  %9691 = vmatpush3.msra.mxu0 %v6336_v13  ;;  %v6313_v53 = vld [vmem:[%s14441_s15 + $0xeb8] sm:$0xff] }
0x1d75   :  { %6769 = vmatmul.mubr.f32.gmra.mxu1 %v6058_v46  ;;  %6854 = vmatmul.mubr.f32.gmra.mxu0 %v6060_v12  ;;  %v6345_v13 = vld [vmem:[%s14441_s15 + $0xfb8] sm:$0xff]  ;;  %v6312_v12 = vld [vmem:[%s14441_s15 + $0xeb0] sm:$0xff] }
0x1d76   :  { %9648 = vmatprep.subr.mxu1 %v6319_v38  ;;  %9692 = vmatprep.subr.mxu0 %v6351_v49  ;;  %v6329_v46 = vld [vmem:[%s14441_s15 + $0xf38] sm:$0xff]  ;;  %v5930_v38 = vpop.f32.mrf.mxu1  ;;  %v6019_v49 = vpop.f32.mrf.mxu0 }
0x1d77   :  { %6773 = vmatprep.mubr.f32.mxu1 %v6075_v59  ;;  %6858 = vmatprep.mubr.f32.mxu0 %v6077_v41  ;;  %v6311_v59 = vld [vmem:[%s14441_s15 + $0xea8] sm:$0xff] }
0x1d78   :  { %9649 = vmatpush3.msra.mxu1 %v6303_v40  ;;  %9693 = vmatpush3.msra.mxu0 %v6335_v25  ;;  %v6343_v41 = vld [vmem:[%s14441_s15 + $0xfa8] sm:$0xff]  ;;  %v13962_v34 = vpop.f32.mrf.mxu1  ;;  %v13964_v62 = vpop.f32.mrf.mxu0 }
0x1d79   :  { %9650 = vmatprep.subr.mxu1 %v6318_v23  ;;  %9694 = vmatprep.subr.mxu0 %v6350_v10  ;;  %v6295_v40 = vld [vmem:[%s14441_s15 + $0xe28] sm:$0xff]  ;;  %v6310_v23 = vld [vmem:[%s14441_s15 + $0xea0] sm:$0xff] }
0x1d7a   :  { %9651 = vmatpush3.msra.mxu1 %v6302_v14  ;;  %9695 = vmatpush3.msra.mxu0 %v6334_v45  ;;  %v6327_v25 = vld [vmem:[%s14441_s15 + $0xf28] sm:$0xff]  ;;  %v6342_v10 = vld [vmem:[%s14441_s15 + $0xfa0] sm:$0xff]  ;;  %v6025_v56 = vpop.f32.mrf.mxu0 }
0x1d7b   :  { %6774 = vmatmul.mubr.f32.gmra.mxu1 %v6074_v29  ;;  %6859 = vmatmul.mubr.f32.gmra.mxu0 %v6076_v18  ;;  %v6294_v14 = vld [vmem:[%s14441_s15 + $0xe20] sm:$0xff]  ;;  %v6309_v29 = vld [vmem:[%s14441_s15 + $0xe98] sm:$0xff] }
0x1d7c   :  { %9652 = vmatprep.subr.mxu1 %v6317_v57  ;;  %9696 = vmatprep.subr.mxu0 %v6349_v22  ;;  %v6326_v45 = vld [vmem:[%s14441_s15 + $0xf20] sm:$0xff]  ;;  %v6341_v18 = vld [vmem:[%s14441_s15 + $0xf98] sm:$0xff]  ;;  %v13980_v57 = vrot.slane %v13608_v17, %v14581_v36  ;;  %v13984_v22 = vrot.slane %v13608_v17, %v14582_v6  ;;  %v6308_v36 = vld [vmem:[%s14441_s15 + $0xe90] sm:$0xff]  ;;  %v5936_v17 = vpop.f32.mrf.mxu1 }
0x1d7d   :  { %6778 = vmatprep.mubr.f32.mxu1 %v6091_v2  ;;  %6863 = vmatprep.mubr.f32.mxu0 %v6093_v33  ;;  %v6340_v6 = vld [vmem:[%s14441_s15 + $0xf90] sm:$0xff] }
0x1d7e   :  { %9653 = vmatpush3.msra.mxu1 %v6301_v21  ;;  %9697 = vmatpush3.msra.mxu0 %v6333_v4  ;;  %v6292_v2 = vld [vmem:[%s14441_s15 + $0xe10] sm:$0xff]  ;;  %v6339_v21 = vld [vmem:[%s14441_s15 + $0xf88] sm:$0xff]  ;;  %v5923_v4 = vadd.f32 %v13837_v31, %v13980_v57  ;;  %v6306_v31 = vld [vmem:[%s14441_s15 + $0xe80] sm:$0xff]  ;;  %v5940_v27 = vpop.f32.mrf.mxu1 }
0x1d7f   :  { %9654 = vmatprep.subr.mxu1 %v6316_v1  ;;  %9698 = vmatprep.subr.mxu0 %v6348_v19  ;;  %v6324_v33 = vld [vmem:[%s14441_s15 + $0xf10] sm:$0xff]  ;;  %v6012_v1 = vadd.f32 %v13847_v55, %v13984_v22  ;;  %v6291_v19 = vld [vmem:[%s14441_s15 + $0xe08] sm:$0xff]  ;;  %v6338_v55 = vld [vmem:[%s14441_s15 + $0xf80] sm:$0xff] }
0x1d80   :  { %9655 = vmatpush3.msra.mxu1 %v6300_v35  ;;  %9699 = vmatpush3.msra.mxu0 %v6332_v42  ;;  %v5931_v35 = vadd.f32 %v5930_v38, %v13857_v24  ;;  %v6020_v42 = vadd.f32 %v6019_v49, %v13867_v43 }
0x1d81   :  { %6779 = vmatmul.mubr.f32.gmra.mxu1 %v6090_v16  ;;  %6864 = vmatmul.mubr.f32.gmra.mxu0 %v6092_v5  ;;  %v6029_v16 = vpop.f32.mrf.mxu0  ;;  %v6290_v5 = vld [vmem:[%s14441_s15 + $0xe00] sm:$0xff] }
0x1d82   :  { %9656 = vmatprep.subr.mxu1 %v6315_v63  ;;  %9700 = vmatprep.subr.mxu0 %v6347_v47  ;;  %v6322_v63 = vld [vmem:[%s14441_s15 + $0xf00] sm:$0xff]  ;;  %v6046_v47 = vmax.f32 %v5923_v4, 0.0 }
0x1d83   :  { %9657 = vmatpush3.msra.mxu1 %v6299_v44  ;;  %6933 = vmatprep.mubr.f32.mxu1 %v6047_v60  ;;  %v6048_v44 = vmax.f32 %v6012_v1, 0.0  ;;  %v5929_v60 = vadd.f32 %v13910_v32, %v13980_v57  ;;  %v7224_v32 = vld [vmem:[%s14446_s21 + $0x18] sm:$0xff] }
0x1d84   :  { %9701 = vmatpush3.msra.mxu0 %v6331_v50  ;;  %7018 = vmatprep.mubr.f32.mxu0 %v6049_v61  ;;  %v6018_v50 = vadd.f32 %v13912_v48, %v13984_v22  ;;  %v6063_v61 = vmax.f32 %v5931_v35, 0.0 }
0x1d85   :  { %9658 = vmatprep.subr.mxu1 %v6314_v26  ;;  %9702 = vmatprep.subr.mxu0 %v6346_v30  ;;  %v6065_v26 = vmax.f32 %v6020_v42, 0.0  ;;  %v5937_v30 = vadd.f32 %v5936_v17, %v13857_v24  ;;  %v6062_v48 = vmax.f32 %v5929_v60, 0.0 }
0x1d86   :  { %9659 = vmatpush3.msra.mxu1 %v6298_v15  ;;  %9703 = vmatpush3.msra.mxu0 %v6330_v54  ;;  %v6026_v15 = vadd.f32 %v6025_v56, %v13867_v43  ;;  %v5942_v54 = vpop.f32.mrf.mxu1 }
0x1d87   :  { %9660 = vmatprep.subr.mxu1 %v6313_v53  ;;  %9704 = vmatprep.subr.mxu0 %v6345_v13  ;;  %v6031_v53 = vpop.f32.mrf.mxu0  ;;  %v6064_v13 = vmax.f32 %v6018_v50, 0.0  ;;  %v5943_v38 = vadd.f32 %v5942_v54, %v13857_v24 }
0x1d88   :  { %9661 = vmatpush3.msra.mxu1 %v6297_v51  ;;  %9705 = vmatpush3.msra.mxu0 %v6329_v46  ;;  %v5935_v51 = vadd.f32 %v13962_v34, %v13980_v57  ;;  %v6024_v46 = vadd.f32 %v13964_v62, %v13984_v22  ;;  %v6032_v49 = vadd.f32 %v6031_v53, %v13867_v43  ;;  %v7222_v43 = vld [vmem:[%s14446_s21 + $0x8] sm:$0xff]  ;;  %v8608_v34 = vld [vmem:[%s14447_s5] ss:$0 sm:$0xff] }
0x1d89   :  { %9662 = vmatprep.subr.mxu1 %v6312_v12  ;;  %9706 = vmatprep.subr.mxu0 %v6344_v37  ;;  %v6079_v12 = vmax.f32 %v5937_v30, 0.0  ;;  %v6081_v37 = vmax.f32 %v6026_v15, 0.0  ;;  %v6095_v24 = vmax.f32 %v5943_v38, 0.0  ;;  %v7221_v62 = vld [vmem:[%s14446_s21] sm:$0xff] }
0x1d8a   :  { %9663 = vmatpush3.msra.mxu1 %v6296_v20  ;;  %9707 = vmatpush3.msra.mxu0 %v6328_v28  ;;  %v7223_v20 = vld [vmem:[%s14446_s21 + $0x10] sm:$0xff]  ;;  %v6078_v28 = vmax.f32 %v5935_v51, 0.0 }
0x1d8b   :  { %9664 = vmatprep.subr.mxu1 %v6311_v59  ;;  %9708 = vmatprep.subr.mxu0 %v6343_v41  ;;  %v6080_v59 = vmax.f32 %v6024_v46, 0.0  ;;  %v5941_v41 = vadd.f32 %v5940_v27, %v13980_v57  ;;  %v7114_v57 = vld [vmem:[%s14448_s19 + $0x8] sm:$0xff] }
0x1d8c   :  { %9665 = vmatpush3.msra.mxu1 %v6295_v40  ;;  %9709 = vmatpush3.msra.mxu0 %v6327_v25  ;;  %v6030_v40 = vadd.f32 %v6029_v16, %v13984_v22  ;;  %v6097_v25 = vmax.f32 %v6032_v49, 0.0  ;;  %v7113_v22 = vld [vmem:[%s14448_s19] sm:$0xff] }
0x1d8d   :  { %9666 = vmatprep.subr.mxu1 %v6310_v23  ;;  %9710 = vmatprep.subr.mxu0 %v6342_v10  ;;  %v6094_v23 = vmax.f32 %v5941_v41, 0.0 }
0x1d8e   :  { %9667 = vmatpush3.msra.mxu1 %v6294_v14  ;;  %9711 = vmatpush3.msra.mxu0 %v6326_v45  ;;  %v6096_v10 = vmax.f32 %v6030_v40, 0.0  ;;  %v14583_v14 = vld [vmem:[#allocation3_spill] sm:$0xff] }
0x1d8f   :  { %9668 = vmatprep.subr.mxu1 %v6309_v29  ;;  %9712 = vmatprep.subr.mxu0 %v6341_v18  ;;  %v288_v45 = vadd.f32 %v8608_v34, %v14583_v14  ;;  %v7116_v29 = vld [vmem:[%s14448_s19 + $0x18] sm:$0xff]  ;;  %v7115_v18 = vld [vmem:[%s14448_s19 + $0x10] sm:$0xff] }
0x1d90   :  { %9669 = vmatpush3.msra.mxu1 %v6293_v58  ;;  %9713 = vmatpush3.msra.mxu0 %v6325_v52 }
0x1d91   :  { %9670 = vmatprep.subr.mxu1 %v6308_v36  ;;  %9714 = vmatprep.subr.mxu0 %v6340_v6 }
0x1d92   :  { %9671 = vmatpush3.msra.mxu1 %v6292_v2  ;;  %9715 = vmatpush3.msra.mxu0 %v6324_v33 }
0x1d93   :  { %9672 = vmatprep.subr.mxu1 %v6307_v3  ;;  %9716 = vmatprep.subr.mxu0 %v6339_v21 }
0x1d94   :  { %9673 = vmatpush3.msra.mxu1 %v6291_v19  ;;  %9717 = vmatpush3.msra.mxu0 %v6323_v9 }
0x1d95   :  { %9674 = vmatprep.subr.mxu1 %v6306_v31  ;;  %9718 = vmatprep.subr.mxu0 %v6338_v55 }
0x1d96   :  { %9675 = vmatpush3.msra.mxu1 %v6290_v5  ;;  %9719 = vmatpush3.msra.mxu0 %v6322_v63 }
0x1d97   :  { %6934 = vmatmul.mubr.f32.vlgmr.msra.gmra.mxu1 %v6046_v47  ;;  %7019 = vmatmul.mubr.f32.vlgmr.msra.gmra.mxu0 %v6048_v44 }
0x1d98   :  { %6938 = vmatprep.mubr.f32.mxu1 %v6063_v61  ;;  %7023 = vmatprep.mubr.f32.mxu0 %v6065_v26 }
0x1d99   :  { %10111 = vmatprep.subr.mxu0 %v14569_v8  ;;  %10097 = vmatprep.subr.mxu1 %v7116_v29 }
0x1d9a   :  { %10112 = vmatpush3.msra.mxu0 %v7224_v32  ;;  %10098 = vmatpush3.msra.mxu1 %v7116_v29 }
0x1d9b   :  { %6939 = vmatmul.mubr.f32.gmra.mxu1 %v6062_v48  ;;  %7024 = vmatmul.mubr.f32.gmra.mxu0 %v6064_v13 }
0x1d9c   :  { %6943 = vmatprep.mubr.f32.mxu1 %v6079_v12  ;;  %7028 = vmatprep.mubr.f32.mxu0 %v6081_v37 }
0x1d9d   :  { %10113 = vmatprep.subr.mxu0 %v14569_v8  ;;  %10099 = vmatprep.subr.mxu1 %v7115_v18 }
0x1d9e   :  { %10114 = vmatpush3.msra.mxu0 %v7223_v20  ;;  %10100 = vmatpush3.msra.mxu1 %v7115_v18  ;;  %v8801_v20 = vld [vmem:[%s14443_s16 + $0x1] ss:$0 sm:$0xff] }
0x1d9f   :  { %6944 = vmatmul.mubr.f32.gmra.mxu1 %v6078_v28  ;;  %7029 = vmatmul.mubr.f32.gmra.mxu0 %v6080_v59 }
0x1da0   :  { %6948 = vmatprep.mubr.f32.mxu1 %v6095_v24  ;;  %7033 = vmatprep.mubr.f32.mxu0 %v6097_v25 }
0x1da1   :  { %10115 = vmatprep.subr.mxu0 %v14569_v8  ;;  %10101 = vmatprep.subr.mxu1 %v7114_v57 }
0x1da2   :  { %10116 = vmatpush3.msra.mxu0 %v7222_v43  ;;  %10102 = vmatpush3.msra.mxu1 %v7114_v57 }
0x1da3   :  { %6949 = vmatmul.mubr.f32.gmra.mxu1 %v6094_v23  ;;  %7034 = vmatmul.mubr.f32.gmra.mxu0 %v6096_v10 }
0x1da4   :  { %10117 = vmatprep.subr.mxu0 %v14569_v8  ;;  %10119 = vmatprep.mubr.msk.f32.mxu0 %vm10460_vm3, %v14569_v8 }
0x1da5   :  { %10118 = vmatpush3.msra.mxu0 %v7221_v62  ;;  %10103 = vmatprep.subr.mxu1 %v7113_v22 }
0x1da6   :  { %10104 = vmatpush3.msra.mxu1 %v7113_v22 }
0x1da7   :  { %10120 = vmatmul.mubr.msk.f32.vlgmr.msra.gmra.mxu0 %vm304_vm2, %v288_v45 }
0x1de0   :  { %v9412_v58 = vpop.f32.mrf.mxu1  ;;  %v9456_v52 = vpop.f32.mrf.mxu0 }
0x1de2   :  { %v9413_v36 = vpop.f32.mrf.mxu1  ;;  %v9457_v6 = vpop.f32.mrf.mxu0 }
0x1de3   :  { %v9414_v49 = vadd.f32 %v9413_v36, %v9412_v58  ;;  %v9458_v24 = vadd.f32 %v9457_v6, %v9456_v52 }
0x1de5   :  { %v6426_v41 = vadd.f32 %v9414_v49, %v8801_v20 }
0x1de6   :  { %v9415_v17 = vpop.f32.mrf.mxu1  ;;  %v9459_v56 = vpop.f32.mrf.mxu0 }
0x1de7   :  { %v6511_v34 = vadd.f32 %v9458_v24, %v6426_v41 }
0x1de8   :  { %v9416_v2 = vpop.f32.mrf.mxu1  ;;  %v9460_v33 = vpop.f32.mrf.mxu0 }
0x1de9   :  { %v9417_v40 = vadd.f32 %v9416_v2, %v9415_v17  ;;  %v9461_v14 = vadd.f32 %v9460_v33, %v9459_v56 }
0x1deb   :  { %v6431_v62 = vadd.f32 %v9417_v40, %v8801_v20 }
0x1ded   :  { %v6516_v58 = vadd.f32 %v9461_v14, %v6431_v62 }
0x1df0   :  { %v9418_v3 = vpop.f32.mrf.mxu1  ;;  %v9462_v21 = vpop.f32.mrf.mxu0 }
0x1df2   :  { %v9419_v4 = vpop.f32.mrf.mxu1  ;;  %v9463_v1 = vpop.f32.mrf.mxu0 }
0x1df3   :  { %v9420_v43 = vadd.f32 %v9419_v4, %v9418_v3  ;;  %v9464_v49 = vadd.f32 %v9463_v1, %v9462_v21 }
0x1df5   :  { %v6436_v18 = vadd.f32 %v9420_v43, %v8801_v20 }
0x1df6   :  { %v9421_v19 = vpop.f32.mrf.mxu1  ;;  %v14083_v9 = vpop.f32.mrf.mxu0 }
0x1df7   :  { %v6521_v2 = vadd.f32 %v9464_v49, %v6436_v18 }
0x1df8   :  { %v9422_v35 = vpop.f32.mrf.mxu1  ;;  %v9466_v42 = vpop.f32.mrf.mxu0 }
0x1df9   :  { %v9423_v36 = vadd.f32 %v9422_v35, %v9421_v19  ;;  %v9467_v40 = vadd.f32 %v9466_v42, %v14083_v9 }
0x1e07   :  { %v9500_v31 = vpop.f32.mrf.mxu1  ;;  %v9544_v55 = vpop.f32.mrf.mxu0 }
0x1e09   :  { %v9501_v27 = vpop.f32.mrf.mxu1  ;;  %v9545_v16 = vpop.f32.mrf.mxu0 }
0x1e0a   :  { %v9502_v25 = vadd.f32 %v9501_v27, %v9500_v31  ;;  %v9546_v8 = vadd.f32 %v9545_v16, %v9544_v55  ;;  %v6441_v31 = vadd.f32 %v9423_v36, %v8801_v20 }
0x1e0c   :  { %v6596_v45 = vadd.f32 %v9502_v25, %v6511_v34  ;;  %v6526_v16 = vadd.f32 %v9467_v40, %v6441_v31 }
0x1e0d   :  { %v9503_v5 = vpop.f32.mrf.mxu1  ;;  %v9547_v63 = vpop.f32.mrf.mxu0 }
0x1e0e   :  { %v6681_v52 = vadd.f32 %v9546_v8, %v6596_v45 }
0x1e0f   :  { %v9504_v47 = vpop.f32.mrf.mxu1  ;;  %v9548_v44 = vpop.f32.mrf.mxu0 }
0x1e10   :  { %v9505_v29 = vadd.f32 %v9504_v47, %v9503_v5  ;;  %v9549_v27 = vadd.f32 %v9548_v44, %v9547_v63 }
0x1e12   :  { %v6601_v6 = vadd.f32 %v9505_v29, %v6516_v58 }
0x1e13   :  { %v9506_v60 = vpop.f32.mrf.mxu1  ;;  %v9550_v50 = vpop.f32.mrf.mxu0 }
0x1e14   :  { %v6686_v24 = vadd.f32 %v9549_v27, %v6601_v6 }
0x1e15   :  { %v9507_v61 = vpop.f32.mrf.mxu1  ;;  %v9551_v26 = vpop.f32.mrf.mxu0 }
0x1e16   :  { %v9508_v17 = vadd.f32 %v9507_v61, %v9506_v60  ;;  %v9552_v55 = vadd.f32 %v9551_v26, %v9550_v50 }
0x1e18   :  { %v6606_v5 = vadd.f32 %v9508_v17, %v6521_v2 }
0x1e19   :  { %v9509_v30 = vpop.f32.mrf.mxu1  ;;  %v14085_v15 = vpop.f32.mrf.mxu0 }
0x1e1b   :  { %v9510_v54 = vpop.f32.mrf.mxu1  ;;  %v14087_v53 = vpop.f32.mrf.mxu0 }
0x1e1c   :  { %v9511_v19 = vadd.f32 %v9510_v54, %v9509_v30  ;;  %v9555_v9 = vadd.f32 %v14087_v53, %v14085_v15 }
0x1e1e   :  { %v6611_v44 = vadd.f32 %v9511_v19, %v6526_v16 }
0x1e2f   :  { %v9588_v32 = vpop.f32.mrf.mxu1  ;;  %v9632_v48 = vpop.f32.mrf.mxu0 }
0x1e31   :  { %v9589_v13 = vpop.f32.mrf.mxu1  ;;  %v9633_v51 = vpop.f32.mrf.mxu0 }
0x1e32   :  { %v9590_v7 = vadd.f32 %v9589_v13, %v9588_v32  ;;  %v9634_v35 = vadd.f32 %v9633_v51, %v9632_v48  ;;  %v6691_v13 = vadd.f32 %v9552_v55, %v6606_v5 }
0x1e34   :  { %v6766_v56 = vadd.f32 %v9590_v7, %v6681_v52 }
0x1e35   :  { %v9591_v46 = vpop.f32.mrf.mxu1  ;;  %v9635_v12 = vpop.f32.mrf.mxu0 }
0x1e36   :  { %v6851_v60 = vadd.f32 %v9634_v35, %v6766_v56 }
0x1e37   :  { %v9592_v37 = vpop.f32.mrf.mxu1  ;;  %v9636_v38 = vpop.f32.mrf.mxu0 }
0x1e38   :  { %v9593_v33 = vadd.f32 %v9592_v37, %v9591_v46  ;;  %v9637_v46 = vadd.f32 %v9636_v38, %v9635_v12 }
0x1e3a   :  { %v6771_v61 = vadd.f32 %v9593_v33, %v6686_v24 }
0x1e3b   :  { %v9594_v28 = vpop.f32.mrf.mxu1  ;;  %v9638_v59 = vpop.f32.mrf.mxu0 }
0x1e3c   :  { %v6856_v26 = vadd.f32 %v9637_v46, %v6771_v61 }
0x1e3d   :  { %v9595_v23 = vpop.f32.mrf.mxu1  ;;  %v9639_v10 = vpop.f32.mrf.mxu0 }
0x1e3e   :  { %v9596_v21 = vadd.f32 %v9595_v23, %v9594_v28  ;;  %v9640_v28 = vadd.f32 %v9639_v10, %v9638_v59  ;;  %v6696_v23 = vadd.f32 %v9555_v9, %v6611_v44 }
0x1e40   :  { %v6776_v42 = vadd.f32 %v9596_v21, %v6691_v13 }
0x1e41   :  { %v9597_v57 = vpop.f32.mrf.mxu1  ;;  %v14092_v22 = vpop.f32.mrf.mxu0 }
0x1e42   :  { %v6861_v38 = vadd.f32 %v9640_v28, %v6776_v42 }
0x1e43   :  { %v9598_v3 = vpop.f32.mrf.mxu1  ;;  %v9642_v4 = vpop.f32.mrf.mxu0 }
0x1e44   :  { %v9599_v54 = vadd.f32 %v9598_v3, %v9597_v57  ;;  %v9643_v59 = vadd.f32 %v9642_v4, %v14092_v22 }
0x1e46   :  { %v6781_v29 = vadd.f32 %v9599_v54, %v6696_v23 }
0x1e48   :  { %v6866_v6 = vadd.f32 %v9643_v59, %v6781_v29 }
0x1e57   :  { %v9676_v47 = vpop.f32.mrf.mxu1  ;;  %v9720_v41 = vpop.f32.mrf.mxu0 }
0x1e59   :  { %v9677_v1 = vpop.f32.mrf.mxu1  ;;  %v9721_v8 = vpop.f32.mrf.mxu0 }
0x1e5a   :  { %v9678_v32 = vadd.f32 %v9677_v1, %v9676_v47  ;;  %v9722_v20 = vadd.f32 %v9721_v8, %v9720_v41  ;;  %v14584_v41 = vld [vmem:[#allocation4_spill] sm:$0xff] }
0x1e5b   :  { %v9679_v63 = vpop.f32.mrf.mxu1  ;;  %v9723_v7 = vpop.f32.mrf.mxu0 }
0x1e5c   :  { %v6936_v37 = vadd.f32 %v9678_v32, %v6851_v60 }
0x1e5d   :  { %v9680_v30 = vpop.f32.mrf.mxu1  ;;  %v9724_v50 = vpop.f32.mrf.mxu0 }
0x1e5e   :  { %v7021_v48 = vadd.f32 %v9722_v20, %v6936_v37  ;;  %v9681_v51 = vadd.f32 %v9680_v30, %v9679_v63  ;;  %v9725_v62 = vadd.f32 %v9724_v50, %v9723_v7 }
0x1e5f   :  { %v9682_v25 = vpop.f32.mrf.mxu1  ;;  %v9726_v43 = vpop.f32.mrf.mxu0 }
0x1e60   :  { %v6941_v34 = vadd.f32 %v9681_v51, %v6856_v26  ;;  %v7039_v12 = vadd.f32 %v7021_v48, %v12840_v0  ;;  %v8809_v0 = vld [vmem:[%s14449_s22] ss:$0 sm:$0xff]  ;;  %s14591_s22 = sld [smem:[#allocation28_spill]] }
0x1e61   :  { %v9683_v14 = vpop.f32.mrf.mxu1  ;;  %v9727_v45 = vpop.f32.mrf.mxu0 }
0x1e62   :  { %v7026_v15 = vadd.f32 %v9725_v62, %v6941_v34  ;;  %v9684_v53 = vadd.f32 %v9683_v14, %v9682_v25  ;;  %v7045_v18 = vsel %vm304_vm2, %v7039_v12, 0.0  ;;  %v9728_v36 = vadd.f32 %v9727_v45, %v9726_v43  ;;  %v8803_v45 = vld [vmem:[%s14445_s18 + $0x1] ss:$0 sm:$0xff] }
0x1e63   :  { %v9685_v58 = vpop.f32.mrf.mxu1  ;;  %v9729_v57 = vpop.f32.mrf.mxu0  ;;  %7046 = vadd.xlane.f32.xlu1 %v7045_v18 }
0x1e64   :  { %v6946_v10 = vadd.f32 %v9684_v53, %v6861_v38  ;;  %v7040_v49 = vadd.f32 %v7026_v15, %v12860_v39  ;;  %v8802_v38 = vld [vmem:[%s14444_s17 + $0x1] ss:$0 sm:$0xff] }
0x1e65   :  { %v9686_v17 = vpop.f32.mrf.mxu1  ;;  %v9730_v52 = vpop.f32.mrf.mxu0 }
0x1e66   :  { %v7031_v2 = vadd.f32 %v9728_v36, %v6946_v10  ;;  %v9687_v3 = vadd.f32 %v9686_v17, %v9685_v58  ;;  %v7048_v31 = vsel %vm304_vm2, %v7040_v49, 0.0  ;;  %v9731_v33 = vadd.f32 %v9730_v52, %v9729_v57 }
0x1e67   :  { %v7301_v27 = vpop.f32.mrf.mxu0  ;;  %7049 = vadd.xlane.f32.xlu0 %v7048_v31 }
0x1e68   :  { %v6951_v56 = vadd.f32 %v9687_v3, %v6866_v6  ;;  %v14105_v22 = vadd.f32 %v8809_v0, %v7301_v27  ;;  %v7041_v4 = vadd.f32 %v7031_v2, %v12905_v11  ;;  %v8804_v3 = vld [vmem:[%s14450_s20] ss:$0 sm:$0xff]  ;;  %s14585_s20 = smov 72  }
0x1e69   :  { %v10121_v39 = vpop.f32.mrf.mxu0 }
0x1e6a   :  { %v7036_v5 = vadd.f32 %v9731_v33, %v6951_v56  ;;  %10122 = vmatprep.subr.msk.mxu1 %vm414_vm5, %v14105_v22  ;;  %v7051_v47 = vsel %vm304_vm2, %v7041_v4, 0.0 }
0x1e6b   :  { %7052 = vadd.xlane.f32.xlu1 %v7051_v47 }
0x1e6c   :  { %v7042_v40 = vadd.f32 %v7036_v5, %v14584_v41 }
0x1e6e   :  { %v7054_v24 = vsel %vm304_vm2, %v7042_v40, 0.0 }
0x1e6f   :  { %7055 = vadd.xlane.f32.xlu0 %v7054_v24 }
0x1eec   :  { %v7047_v19 = vpop.xlane.xlu1 %7046 }
0x1eed   :  { %v7057_v35 = vmul.f32 0.03125, %v7047_v19 }
0x1eef   :  { %v7061_v55 = vsub.f32 %v7039_v12, %v7057_v35 }
0x1ef0   :  { %v7050_v21 = vpop.xlane.xlu0 %7049 }
0x1ef1   :  { %v7058_v1 = vmul.f32 0.03125, %v7050_v21  ;;  %v7065_v8 = vmul.f32 %v7061_v55, %v7061_v55 }
0x1ef3   :  { %v7062_v11 = vsub.f32 %v7040_v49, %v7058_v1  ;;  %v7069_v16 = vsel %vm304_vm2, %v7065_v8, 0.0 }
0x1ef4   :  { %7070 = vadd.xlane.f32.xlu1 %v7069_v16  ;;  %v7053_v60 = vpop.xlane.xlu1 %7052 }
0x1ef5   :  { %v7059_v61 = vmul.f32 0.03125, %v7053_v60  ;;  %v7066_v32 = vmul.f32 %v7062_v11, %v7062_v11 }
0x1ef7   :  { %v7063_v13 = vsub.f32 %v7041_v4, %v7059_v61  ;;  %v7072_v63 = vsel %vm304_vm2, %v7066_v32, 0.0 }
0x1ef8   :  { %7073 = vadd.xlane.f32.xlu0 %v7072_v63  ;;  %v7056_v7 = vpop.xlane.xlu0 %7055 }
0x1ef9   :  { %v7060_v44 = vmul.f32 0.03125, %v7056_v7  ;;  %v7067_v46 = vmul.f32 %v7063_v13, %v7063_v13 }
0x1efb   :  { %v7064_v37 = vsub.f32 %v7042_v40, %v7060_v44  ;;  %v7075_v20 = vsel %vm304_vm2, %v7067_v46, 0.0 }
0x1efc   :  { %7076 = vadd.xlane.f32.xlu1 %v7075_v20 }
0x1efd   :  { %v7068_v9 = vmul.f32 %v7064_v37, %v7064_v37 }
0x1eff   :  { %v7078_v42 = vsel %vm304_vm2, %v7068_v9, 0.0 }
0x1f00   :  { %7079 = vadd.xlane.f32.xlu0 %v7078_v42 }
0x1f0d   :  { %7564 = vrot.lane.b32.xlu1 %v14105_v22, %s14561_s2 }
0x1f11   :  { %7818 = vrot.lane.b32.xlu1 %v14105_v22, %s14565_s24 }
0x1f7d   :  { %v7071_v30 = vpop.xlane.xlu1 %7070 }
0x1f7e   :  { %v7081_v50 = vmul.f32 0.03125, %v7071_v30 }
0x1f80   :  { %v7085_v26 = vadd.f32 1e-05, %v7081_v50 }
0x1f81   :  { %v7074_v54 = vpop.xlane.xlu0 %7073 }
0x1f82   :  { %10379 = vrsqrt.f32 %v7085_v26  ;;  %v7082_v48 = vmul.f32 0.03125, %v7074_v54 }
0x1f84   :  { %v7086_v51 = vadd.f32 1e-05, %v7082_v48 }
0x1f85   :  { %v7077_v28 = vpop.xlane.xlu1 %7076 }
0x1f86   :  { %10381 = vrsqrt.f32 %v7086_v51  ;;  %v7083_v25 = vmul.f32 0.03125, %v7077_v28 }
0x1f88   :  { %v7087_v43 = vadd.f32 1e-05, %v7083_v25 }
0x1f89   :  { %v7080_v23 = vpop.xlane.xlu0 %7079  ;;  %v7565_v17 = vpop.permute.xlu1 %7564 }
0x1f8a   :  { %10383 = vrsqrt.f32 %v7087_v43  ;;  %v7084_v34 = vmul.f32 0.03125, %v7080_v23 }
0x1f8c   :  { %v7088_v62 = vadd.f32 1e-05, %v7084_v34 }
0x1f8d   :  { %v7819_v4 = vpop.permute.xlu1 %7818 }
0x1f8e   :  { %10385 = vrsqrt.f32 %v7088_v62 }
0x1f8f   :  { %v10380_v12 = vpop.eup %10379 }
0x1f90   :  { %v7093_v14 = vmul.f32 %v10380_v12, %v7061_v55 }
0x1f92   :  { %v7101_v29 = vmul.f32 %v8802_v38, %v7093_v14 }
0x1f93   :  { %v10382_v15 = vpop.eup %10381 }
0x1f94   :  { %v7094_v53 = vmul.f32 %v10382_v15, %v7062_v11  ;;  %v7109_v18 = vadd.f32 %v8803_v45, %v7101_v29 }
0x1f96   :  { %v7102_v58 = vmul.f32 %v8802_v38, %v7094_v53  ;;  %10105 = vmatprep.mubr.msk.f32.mxu1 %vm304_vm2, %v7109_v18 }
0x1f97   :  { %v10384_v57 = vpop.eup %10383 }
0x1f98   :  { %v7110_v59 = vadd.f32 %v8803_v45, %v7102_v58  ;;  %v7095_v10 = vmul.f32 %v10384_v57, %v7063_v13 }
0x1f9a   :  { %10106 = vmatmul.mubr.msk.f32.vlgmr.msra.gmra.mxu1 %vm304_vm2, %v7110_v59  ;;  %v7103_v36 = vmul.f32 %v8802_v38, %v7095_v10 }
0x1f9b   :  { %v10386_v49 = vpop.eup %10385  ;;  %10123 = vmatpush3.xpose.msk.msra.mxu1 %vm414_vm5, %v14105_v22 }
0x1f9c   :  { %v7096_v52 = vmul.f32 %v10386_v49, %v7064_v37  ;;  %10138 = vmatprep.subr.msk.mxu1 %vm414_vm5, %v7565_v17  ;;  %v7111_v0 = vadd.f32 %v8803_v45, %v7103_v36 }
0x1f9e   :  { %10108 = vmatprep.mubr.msk.f32.mxu1 %vm304_vm2, %v7111_v0  ;;  %v7104_v6 = vmul.f32 %v8802_v38, %v7096_v52 }
0x1fa0   :  { %v7112_v2 = vadd.f32 %v8803_v45, %v7104_v6 }
0x1fa2   :  { %10109 = vmatmul.mubr.msk.f32.gmra.mxu1 %vm304_vm2, %v7112_v2 }
0x205a   :  { %v10107_v31 = vpop.f32.mrf.mxu1 }
0x205b   :  { %v7208_v27 = vadd.f32 %v10107_v31, %v8804_v3 }
0x205c   :  { %v7202_v56 = vpop.f32.mrf.mxu1 }
0x205d   :  { %v7203_v33 = vadd.f32 %v8804_v3, %v7202_v56  ;;  %7558 = vrot.lane.b32.xlu1 %v7208_v27, %s14561_s2 }
0x205f   :  { %7556 = vrot.lane.b32.xlu0 %v7203_v33, %s14561_s2  ;;  %10124 = vmatprep.mubr.msk.f32.mxu1 %vm414_vm5, %v7203_v33 }
0x2060   :  { %10125 = vmatmul.mubr.msk.f32.vlgmr.msra.gmra.mxu1 %vm414_vm5, %v7208_v27 }
0x2061   :  { %10139 = vmatpush3.xpose.msk.msra.mxu1 %vm414_vm5, %v7565_v17 }
0x2062   :  { %10154 = vmatprep.subr.msk.mxu1 %vm414_vm5, %v7819_v4  ;;  %v10110_v39 = vpop.f32.mrf.mxu1 }
0x2063   :  { %7810 = vrot.lane.b32.xlu0 %v7203_v33, %s14565_s24  ;;  %v7218_v47 = vadd.f32 %v10110_v39, %v8804_v3 }
0x2064   :  { %v7212_v5 = vpop.f32.mrf.mxu1 }
0x2065   :  { %v7213_v41 = vadd.f32 %v8804_v3, %v7212_v5 }
0x2067   :  { %7562 = vrot.lane.b32.xlu0 %v7218_v47, %s14561_s2  ;;  %7560 = vrot.lane.b32.xlu1 %v7213_v41, %s14561_s2  ;;  %s14587_s2 = sld [smem:[#allocation25_spill]] }
0x2068   :  { %10127 = vmatprep.mubr.msk.f32.mxu1 %vm414_vm5, %v7213_v41 }
0x2069   :  { %10128 = vmatmul.mubr.msk.f32.gmra.mxu1 %vm414_vm5, %v7218_v47 }
0x206b   :  { %7814 = vrot.lane.b32.xlu0 %v7213_v41, %s14565_s24  ;;  %7812 = vrot.lane.b32.xlu1 %v7208_v27, %s14565_s24 }
0x206f   :  { %8072 = vrot.lane.b32.xlu0 %v14105_v22, %s14568_s8  ;;  %7816 = vrot.lane.b32.xlu1 %v7218_v47, %s14565_s24 }
0x2073   :  { %8066 = vrot.lane.b32.xlu0 %v7208_v27, %s14568_s8  ;;  %8064 = vrot.lane.b32.xlu1 %v7203_v33, %s14568_s8 }
0x2077   :  { %8070 = vrot.lane.b32.xlu0 %v7218_v47, %s14568_s8  ;;  %8068 = vrot.lane.b32.xlu1 %v7213_v41, %s14568_s8 }
0x20cf   :  { %v7559_v24 = vpop.permute.xlu1 %7558 }
0x20d1   :  { %v7557_v40 = vpop.permute.xlu0 %7556 }
0x20d2   :  { %10140 = vmatprep.mubr.msk.f32.mxu1 %vm414_vm5, %v7557_v40 }
0x20d3   :  { %10141 = vmatmul.mubr.msk.f32.vlgmr.msra.gmra.mxu1 %vm414_vm5, %v7559_v24 }
0x20d4   :  { %10155 = vmatpush3.xpose.msk.msra.mxu1 %vm414_vm5, %v7819_v4 }
0x20d5   :  { %v7811_v19 = vpop.permute.xlu0 %7810 }
0x20d9   :  { %v7561_v35 = vpop.permute.xlu1 %7560  ;;  %v7563_v55 = vpop.permute.xlu0 %7562 }
0x20da   :  { %10143 = vmatprep.mubr.msk.f32.mxu1 %vm414_vm5, %v7561_v35 }
0x20db   :  { %10144 = vmatmul.mubr.msk.f32.gmra.mxu1 %vm414_vm5, %v7563_v55 }
0x20dc   :  { %10156 = vmatprep.mubr.msk.f32.mxu1 %vm414_vm5, %v7811_v19 }
0x20dd   :  { %v7813_v21 = vpop.permute.xlu1 %7812  ;;  %v7815_v1 = vpop.permute.xlu0 %7814 }
0x20df   :  { %10157 = vmatmul.mubr.msk.f32.vlgmr.msra.gmra.mxu1 %vm414_vm5, %v7813_v21 }
0x20e0   :  { %10159 = vmatprep.mubr.msk.f32.mxu1 %vm414_vm5, %v7815_v1 }
0x20e1   :  { %v7817_v8 = vpop.permute.xlu1 %7816  ;;  %v8073_v11 = vpop.permute.xlu0 %8072 }
0x20e2   :  { %10170 = vmatprep.subr.msk.mxu1 %vm414_vm5, %v8073_v11 }
0x20e3   :  { %10160 = vmatmul.mubr.msk.f32.gmra.mxu1 %vm414_vm5, %v7817_v8 }
0x20e4   :  { %10171 = vmatpush3.xpose.msk.msra.mxu1 %vm414_vm5, %v8073_v11 }
0x20e5   :  { %v8065_v16 = vpop.permute.xlu1 %8064  ;;  %v8067_v60 = vpop.permute.xlu0 %8066 }
0x20e6   :  { %10172 = vmatprep.mubr.msk.f32.mxu1 %vm414_vm5, %v8065_v16 }
0x20e7   :  { %10173 = vmatmul.mubr.msk.f32.vlgmr.msra.gmra.mxu1 %vm414_vm5, %v8067_v60 }
0x20e9   :  { %v8069_v61 = vpop.permute.xlu1 %8068  ;;  %v8071_v32 = vpop.permute.xlu0 %8070 }
0x20ea   :  { %10175 = vmatprep.mubr.msk.f32.mxu1 %vm414_vm5, %v8069_v61 }
0x20eb   :  { %10176 = vmatmul.mubr.msk.f32.gmra.mxu1 %vm414_vm5, %v8071_v32 }
0x2120   :  { %v10126_v13 = vpop.f32.mrf.mxu1 }
0x2121   :  { %v14172_v63 = vmul.f32 0.35355338, %v10126_v13 }
0x2122   :  { %v7386_v7 = vpop.f32.mrf.mxu1 }
0x2123   :  { %v14174_v44 = vmul.f32 0.35355338, %v7386_v7  ;;  %v7413_v46 = vsel %vm7409_vm8, %v14172_v63, -inf }
0x2124   :  { %7414 = vmax.xlane.f32.xlu0 %v7413_v46 }
0x2125   :  { %v7410_v37 = vsel %vm7409_vm8, %v14174_v44, -inf }
0x2126   :  { %7411 = vmax.xlane.f32.xlu1 %v7410_v37 }
0x2129   :  { %v10129_v20 = vpop.f32.mrf.mxu1 }
0x212a   :  { %v7408_v9 = vmul.f32 0.35355338, %v10129_v20 }
0x212b   :  { %v7396_v42 = vpop.f32.mrf.mxu1 }
0x212c   :  { %v14180_v30 = vmul.f32 0.35355338, %v7396_v42  ;;  %v7419_v50 = vsel %vm7409_vm8, %v7408_v9, -inf }
0x212d   :  { %7420 = vmax.xlane.f32.xlu1 %v7419_v50 }
0x212e   :  { %v7416_v26 = vsel %vm7409_vm8, %v14180_v30, -inf }
0x212f   :  { %7417 = vmax.xlane.f32.xlu0 %v7416_v26 }
0x2193   :  { %v10142_v54 = vpop.f32.mrf.mxu1 }
0x2194   :  { %v14185_v48 = vmul.f32 0.35355338, %v10142_v54 }
0x2195   :  { %v7642_v51 = vpop.f32.mrf.mxu1 }
0x2196   :  { %v14187_v28 = vmul.f32 0.35355338, %v7642_v51  ;;  %v7668_v25 = vsel %vm7409_vm8, %v14185_v48, -inf }
0x2197   :  { %7669 = vmax.xlane.f32.xlu1 %v7668_v25 }
0x2198   :  { %v7665_v43 = vsel %vm7409_vm8, %v14187_v28, -inf }
0x2199   :  { %7666 = vmax.xlane.f32.xlu0 %v7665_v43 }
0x219b   :  { %v10145_v23 = vpop.f32.mrf.mxu1 }
0x219c   :  { %v14193_v34 = vmul.f32 0.35355338, %v10145_v23 }
0x219d   :  { %v7652_v62 = vpop.f32.mrf.mxu1 }
0x219e   :  { %v14195_v12 = vmul.f32 0.35355338, %v7652_v62  ;;  %v7674_v38 = vsel %vm7409_vm8, %v14193_v34, -inf }
0x219f   :  { %7675 = vmax.xlane.f32.xlu1 %v7674_v38  ;;  %v10158_v14 = vpop.f32.mrf.mxu1 }
0x21a0   :  { %v14199_v45 = vmul.f32 0.35355338, %v10158_v14  ;;  %v7671_v29 = vsel %vm7409_vm8, %v14195_v12, -inf }
0x21a1   :  { %v7896_v15 = vpop.f32.mrf.mxu1  ;;  %7672 = vmax.xlane.f32.xlu0 %v7671_v29 }
0x21a2   :  { %v14203_v53 = vmul.f32 0.35355338, %v7896_v15  ;;  %v7922_v18 = vsel %vm7409_vm8, %v14199_v45, -inf }
0x21a3   :  { %7923 = vmax.xlane.f32.xlu1 %v7922_v18  ;;  %v10161_v58 = vpop.f32.mrf.mxu1 }
0x21a4   :  { %v14207_v57 = vmul.f32 0.35355338, %v10161_v58  ;;  %v7919_v59 = vsel %vm7409_vm8, %v14203_v53, -inf }
0x21a5   :  { %7920 = vmax.xlane.f32.xlu0 %v7919_v59  ;;  %v7906_v10 = vpop.f32.mrf.mxu1 }
0x21a6   :  { %v14211_v36 = vmul.f32 0.35355338, %v7906_v10  ;;  %v7928_v49 = vsel %vm7409_vm8, %v14207_v57, -inf }
0x21a7   :  { %7929 = vmax.xlane.f32.xlu1 %v7928_v49  ;;  %v10174_v17 = vpop.f32.mrf.mxu1 }
0x21a8   :  { %v14215_v52 = vmul.f32 0.35355338, %v10174_v17  ;;  %v7925_v0 = vsel %vm7409_vm8, %v14211_v36, -inf }
0x21a9   :  { %7926 = vmax.xlane.f32.xlu0 %v7925_v0  ;;  %v8150_v6 = vpop.f32.mrf.mxu1 }
0x21aa   :  { %v14219_v2 = vmul.f32 0.35355338, %v8150_v6  ;;  %v8176_v3 = vsel %vm7409_vm8, %v14215_v52, -inf }
0x21ab   :  { %8177 = vmax.xlane.f32.xlu1 %v8176_v3  ;;  %v10177_v31 = vpop.f32.mrf.mxu1 }
0x21ac   :  { %v14223_v27 = vmul.f32 0.35355338, %v10177_v31  ;;  %v8173_v56 = vsel %vm7409_vm8, %v14219_v2, -inf }
0x21ad   :  { %8174 = vmax.xlane.f32.xlu0 %v8173_v56  ;;  %v8160_v33 = vpop.f32.mrf.mxu1  ;;  %v7415_v4 = vpop.xlane.xlu0 %7414 }
0x21ae   :  { %v14227_v39 = vmul.f32 0.35355338, %v8160_v33  ;;  %v7423_v5 = vsub.f32 %v14172_v63, %v7415_v4  ;;  %v8182_v47 = vsel %vm7409_vm8, %v14223_v27, -inf }
0x21af   :  { %8183 = vmax.xlane.f32.xlu1 %v8182_v47  ;;  %v7412_v24 = vpop.xlane.xlu1 %7411 }
0x21b0   :  { %v7428_v41 = vmul.f32 1.442695, %v7423_v5  ;;  %v8179_v40 = vsel %vm7409_vm8, %v14227_v39, -inf  ;;  %v7422_v16 = vsub.f32 %v14174_v44, %v7412_v24 }
0x21b1   :  { %8180 = vmax.xlane.f32.xlu0 %v8179_v40 }
0x21b2   :  { %10387 = vpow2.f32 %v7428_v41  ;;  %v7426_v61 = vmul.f32 1.442695, %v7422_v16 }
0x21b6   :  { %v7421_v19 = vpop.xlane.xlu1 %7420 }
0x21b7   :  { %v7425_v35 = vsub.f32 %v7408_v9, %v7421_v19 }
0x21b8   :  { %v7418_v60 = vpop.xlane.xlu0 %7417 }
0x21b9   :  { %v7432_v55 = vmul.f32 1.442695, %v7425_v35  ;;  %v7424_v32 = vsub.f32 %v14180_v30, %v7418_v60 }
0x21bb   :  { %10389 = vpow2.f32 %v7432_v55  ;;  %v7430_v13 = vmul.f32 1.442695, %v7424_v32 }
0x21bc   :  { %10391 = vpow2.f32 %v7426_v61 }
0x21bd   :  { %10393 = vpow2.f32 %v7430_v13 }
0x21bf   :  { %v14234_v21 = vpop.eup %10387 }
0x21c0   :  { %v7437_v1 = vsel %vm7409_vm8, %v14234_v21, 0.0 }
0x21c1   :  { %7438 = vadd.xlane.f32.xlu1 %v7437_v1 }
0x21c7   :  { %7454 = vrot.lane.b32.xlu0 %v14105_v22, %s14559_s1 }
0x21c8   :  { %v14240_v8 = vpop.eup %10389 }
0x21c9   :  { %v7443_v11 = vsel %vm7409_vm8, %v14240_v8, 0.0  ;;  %v14246_v63 = vpop.eup %10391 }
0x21ca   :  { %7444 = vadd.xlane.f32.xlu1 %v7443_v11  ;;  %v7434_v7 = vsel %vm7409_vm8, %v14246_v63, 0.0  ;;  %v14250_v46 = vpop.eup %10393 }
0x21cb   :  { %v7440_v37 = vsel %vm7409_vm8, %v14250_v46, 0.0 }
0x21e6   :  { %7435 = vadd.xlane.f32.xlu0 %v7434_v7 }
0x21ea   :  { %7441 = vadd.xlane.f32.xlu0 %v7440_v37 }
0x2220   :  { %v7670_v44 = vpop.xlane.xlu1 %7669 }
0x2221   :  { %v7678_v20 = vsub.f32 %v14185_v48, %v7670_v44 }
0x2222   :  { %v7667_v9 = vpop.xlane.xlu0 %7666 }
0x2223   :  { %v7683_v42 = vmul.f32 1.442695, %v7678_v20  ;;  %v7677_v30 = vsub.f32 %v14187_v28, %v7667_v9 }
0x2225   :  { %10395 = vpow2.f32 %v7683_v42  ;;  %v7681_v50 = vmul.f32 1.442695, %v7677_v30 }
0x2227   :  { %10397 = vpow2.f32 %v7681_v50 }
0x2228   :  { %v7676_v26 = vpop.xlane.xlu1 %7675 }
0x2229   :  { %v7680_v54 = vsub.f32 %v14193_v34, %v7676_v26 }
0x222a   :  { %v7673_v51 = vpop.xlane.xlu0 %7672 }
0x222b   :  { %v7687_v25 = vmul.f32 1.442695, %v7680_v54  ;;  %v7679_v43 = vsub.f32 %v14195_v12, %v7673_v51 }
0x222c   :  { %v7924_v23 = vpop.xlane.xlu1 %7923 }
0x222d   :  { %10399 = vpow2.f32 %v7687_v25  ;;  %v7685_v62 = vmul.f32 1.442695, %v7679_v43  ;;  %v7932_v38 = vsub.f32 %v14199_v45, %v7924_v23 }
0x222e   :  { %v7921_v48 = vpop.xlane.xlu0 %7920 }
0x222f   :  { %10401 = vpow2.f32 %v7685_v62  ;;  %v7937_v14 = vmul.f32 1.442695, %v7932_v38  ;;  %v7931_v28 = vsub.f32 %v14203_v53, %v7921_v48 }
0x2230   :  { %v7930_v29 = vpop.xlane.xlu1 %7929 }
0x2231   :  { %10403 = vpow2.f32 %v7937_v14  ;;  %v7935_v15 = vmul.f32 1.442695, %v7931_v28  ;;  %v7934_v18 = vsub.f32 %v14207_v57, %v7930_v29 }
0x2232   :  { %v14261_v34 = vpop.eup %10395  ;;  %v7927_v58 = vpop.xlane.xlu0 %7926 }
0x2233   :  { %10405 = vpow2.f32 %v7935_v15  ;;  %v7941_v12 = vmul.f32 1.442695, %v7934_v18  ;;  %v7933_v59 = vsub.f32 %v14211_v36, %v7927_v58  ;;  %v7692_v45 = vsel %vm7409_vm8, %v14261_v34, 0.0 }
0x2234   :  { %v14266_v10 = vpop.eup %10397  ;;  %v8178_v49 = vpop.xlane.xlu1 %8177  ;;  %7693 = vadd.xlane.f32.xlu1 %v7692_v45 }
0x2235   :  { %10407 = vpow2.f32 %v7941_v12  ;;  %v7939_v53 = vmul.f32 1.442695, %v7933_v59  ;;  %v8186_v17 = vsub.f32 %v14215_v52, %v8178_v49  ;;  %v7689_v57 = vsel %vm7409_vm8, %v14266_v10, 0.0 }
0x2236   :  { %7690 = vadd.xlane.f32.xlu0 %v7689_v57  ;;  %v8175_v0 = vpop.xlane.xlu0 %8174 }
0x2237   :  { %10409 = vpow2.f32 %v7939_v53  ;;  %v8191_v6 = vmul.f32 1.442695, %v8186_v17  ;;  %v8185_v36 = vsub.f32 %v14219_v2, %v8175_v0 }
0x2238   :  { %v8184_v3 = vpop.xlane.xlu1 %8183 }
0x2239   :  { %10411 = vpow2.f32 %v8191_v6  ;;  %v8189_v31 = vmul.f32 1.442695, %v8185_v36  ;;  %v8188_v56 = vsub.f32 %v14223_v27, %v8184_v3 }
0x223a   :  { %v14273_v33 = vpop.eup %10399  ;;  %v8181_v4 = vpop.xlane.xlu0 %8180 }
0x223b   :  { %10413 = vpow2.f32 %v8189_v31  ;;  %v8195_v5 = vmul.f32 1.442695, %v8188_v56  ;;  %v8187_v52 = vsub.f32 %v14227_v39, %v8181_v4  ;;  %v7698_v47 = vsel %vm7409_vm8, %v14273_v33, 0.0 }
0x223c   :  { %v14278_v41 = vpop.eup %10401  ;;  %7699 = vadd.xlane.f32.xlu1 %v7698_v47 }
0x223d   :  { %10415 = vpow2.f32 %v8195_v5  ;;  %v8193_v2 = vmul.f32 1.442695, %v8187_v52  ;;  %v7695_v40 = vsel %vm7409_vm8, %v14278_v41, 0.0 }
0x223e   :  { %v14282_v27 = vpop.eup %10403  ;;  %7696 = vadd.xlane.f32.xlu0 %v7695_v40  ;;  %v7455_v24 = vpop.permute.xlu0 %7454 }
0x223f   :  { %10417 = vpow2.f32 %v8193_v2  ;;  %10130 = vmatprep.subr.msk.mxu0 %vm7468_vm9, %v7455_v24  ;;  %v7946_v39 = vsel %vm7409_vm8, %v14282_v27, 0.0 }
0x2240   :  { %v14287_v19 = vpop.eup %10405  ;;  %7947 = vadd.xlane.f32.xlu1 %v7946_v39  ;;  %10131 = vmatpush3.msk.msra.mxu0 %vm7468_vm9, %v7455_v24 }
0x2241   :  { %v7943_v35 = vsel %vm7409_vm8, %v14287_v19, 0.0 }
0x2242   :  { %v14292_v55 = vpop.eup %10407  ;;  %7944 = vadd.xlane.f32.xlu0 %v7943_v35 }
0x2243   :  { %v7952_v1 = vsel %vm7409_vm8, %v14292_v55, 0.0 }
0x2244   :  { %v14296_v11 = vpop.eup %10409  ;;  %7953 = vadd.xlane.f32.xlu1 %v7952_v1 }
0x2245   :  { %v7949_v16 = vsel %vm7409_vm8, %v14296_v11, 0.0 }
0x2246   :  { %v14300_v60 = vpop.eup %10411  ;;  %7950 = vadd.xlane.f32.xlu0 %v7949_v16 }
0x2247   :  { %v8200_v61 = vsel %vm7409_vm8, %v14300_v60, 0.0 }
0x2248   :  { %v14304_v32 = vpop.eup %10413  ;;  %8201 = vadd.xlane.f32.xlu1 %v8200_v61 }
0x2249   :  { %v8197_v13 = vsel %vm7409_vm8, %v14304_v32, 0.0 }
0x224a   :  { %v14308_v7 = vpop.eup %10415  ;;  %8198 = vadd.xlane.f32.xlu0 %v8197_v13  ;;  %v7439_v9 = vpop.xlane.xlu1 %7438  ;;  %v8380_v13 = vld [vmem:[%s14587_s2 + $0x10] sm:$0xff] }
0x224b   :  { %v8206_v37 = vsel %vm7409_vm8, %v14308_v7, 0.0  ;;  %10419 = vrcp.f32 %v7439_v9 }
0x224c   :  { %v14312_v44 = vpop.eup %10417  ;;  %8207 = vadd.xlane.f32.xlu1 %v8206_v37  ;;  %v8379_v37 = vld [vmem:[%s14587_s2 + $0x8] sm:$0xff] }
0x224d   :  { %v8203_v20 = vsel %vm7409_vm8, %v14312_v44, 0.0 }
0x2250   :  { %8204 = vadd.xlane.f32.xlu1 %v8203_v20  ;;  %v8378_v20 = vld [vmem:[%s14587_s2] sm:$0xff] }
0x2253   :  { %v7445_v30 = vpop.xlane.xlu1 %7444 }
0x2258   :  { %v10420_v26 = vpop.eup %10419 }
0x2259   :  { %v7449_v25 = vmul.f32 %v10420_v26, %v14234_v21 }
0x2260   :  { %7963 = vrot.lane.b32.xlu0 %v14105_v22, %s14564_s4 }
0x2261   :  { %7709 = vrot.lane.b32.xlu1 %v14105_v22, %s14560_s29 }
0x2264   :  { %8217 = vrot.lane.b32.xlu0 %v14105_v22, %s14585_s20 }
0x226f   :  { %v7436_v42 = vpop.xlane.xlu0 %7435 }
0x2270   :  { %10421 = vrcp.f32 %v7436_v42 }
0x2271   :  { %10423 = vrcp.f32 %v7445_v30 }
0x2273   :  { %v7442_v50 = vpop.xlane.xlu0 %7441 }
0x2274   :  { %10425 = vrcp.f32 %v7442_v50 }
0x227d   :  { %v10422_v54 = vpop.eup %10421 }
0x227e   :  { %v7447_v51 = vmul.f32 %v10422_v54, %v14246_v63  ;;  %v10424_v43 = vpop.eup %10423 }
0x227f   :  { %v7453_v62 = vmul.f32 %v10424_v43, %v14240_v8 }
0x2280   :  { %10132 = vmatprep.mubr.msk.f32.mxu0 %vm7409_vm8, %v7447_v51 }
0x2281   :  { %v10426_v23 = vpop.eup %10425  ;;  %10133 = vmatmul.mubr.msk.f32.vlgmr.msra.gmra.mxu0 %vm7409_vm8, %v7449_v25 }
0x2282   :  { %v7451_v22 = vmul.f32 %v10426_v23, %v14250_v46 }
0x2284   :  { %10135 = vmatprep.mubr.msk.f32.mxu0 %vm7409_vm8, %v7451_v22 }
0x2285   :  { %10136 = vmatmul.mubr.msk.f32.gmra.mxu0 %vm7409_vm8, %v7453_v62 }
0x22bd   :  { %v7694_v48 = vpop.xlane.xlu1 %7693 }
0x22bf   :  { %v7691_v38 = vpop.xlane.xlu0 %7690 }
0x22c0   :  { %10427 = vrcp.f32 %v7691_v38 }
0x22c1   :  { %10429 = vrcp.f32 %v7694_v48 }
0x22c5   :  { %v7700_v63 = vpop.xlane.xlu1 %7699 }
0x22c7   :  { %v7697_v14 = vpop.xlane.xlu0 %7696 }
0x22c8   :  { %10431 = vrcp.f32 %v7697_v14 }
0x22c9   :  { %v7948_v21 = vpop.xlane.xlu1 %7947  ;;  %10433 = vrcp.f32 %v7700_v63 }
0x22cb   :  { %v7945_v28 = vpop.xlane.xlu0 %7944 }
0x22cc   :  { %10435 = vrcp.f32 %v7945_v28 }
0x22cd   :  { %v10428_v29 = vpop.eup %10427  ;;  %v7954_v15 = vpop.xlane.xlu1 %7953  ;;  %10437 = vrcp.f32 %v7948_v21 }
0x22ce   :  { %v7702_v18 = vmul.f32 %v10428_v29, %v14266_v10  ;;  %v10430_v45 = vpop.eup %10429 }
0x22cf   :  { %v7951_v46 = vpop.xlane.xlu0 %7950  ;;  %v7704_v10 = vmul.f32 %v10430_v45, %v14261_v34 }
0x22d0   :  { %10148 = vmatprep.mubr.msk.f32.mxu0 %vm7409_vm8, %v7702_v18  ;;  %10439 = vrcp.f32 %v7951_v46 }
0x22d1   :  { %v8202_v8 = vpop.xlane.xlu1 %8201  ;;  %10441 = vrcp.f32 %v7954_v15 }
0x22d3   :  { %v8199_v58 = vpop.xlane.xlu0 %8198 }
0x22d4   :  { %10443 = vrcp.f32 %v8199_v58 }
0x22d5   :  { %v8208_v12 = vpop.xlane.xlu1 %8207  ;;  %v10432_v53 = vpop.eup %10431  ;;  %10445 = vrcp.f32 %v8202_v8 }
0x22d6   :  { %v10434_v57 = vpop.eup %10433  ;;  %v7706_v0 = vmul.f32 %v10432_v53, %v14278_v41  ;;  %v14586_v41 = vmov 0.0  }
0x22d7   :  { %v7964_v49 = vpop.permute.xlu0 %7963  ;;  %v7708_v34 = vmul.f32 %v10434_v57, %v14273_v33 }
0x22d9   :  { %v8205_v59 = vpop.xlane.xlu1 %8204  ;;  %v10436_v6 = vpop.eup %10435 }
0x22da   :  { %10447 = vrcp.f32 %v8205_v59  ;;  %v10438_v3 = vpop.eup %10437  ;;  %v7956_v31 = vmul.f32 %v10436_v6, %v14287_v19  ;;  %v8508_v6 = vld [vmem:[%s14589_s23 + $0x10] sm:$0xff] }
0x22db   :  { %v8218_v36 = vpop.permute.xlu0 %8217  ;;  %10449 = vrcp.f32 %v8208_v12  ;;  %v7958_v4 = vmul.f32 %v10438_v3, %v14282_v27  ;;  %v32_v3 = vstv %s14590_s9 }
0x22dc   :  { %33 = vst [vmem:[#allocation2] sm:$0x1] %v32_v3 }
0x22dd   :  { %v7710_v17 = vpop.permute.xlu1 %7709  ;;  %v10440_v56 = vpop.eup %10439 }
0x22de   :  { %10146 = vmatprep.subr.msk.mxu0 %vm7468_vm9, %v7710_v17  ;;  %v10442_v5 = vpop.eup %10441  ;;  %v7960_v52 = vmul.f32 %v10440_v56, %v14296_v11  ;;  %v8851_v56 = vld [vmem:[%s14591_s22] ss:$0 sm:$0xff] }
0x22df   :  { %10147 = vmatpush3.msk.msra.mxu0 %vm7468_vm9, %v7710_v17  ;;  %v7962_v33 = vmul.f32 %v10442_v5, %v14292_v55 }
0x22e0   :  { %10149 = vmatmul.mubr.msk.f32.vlgmr.msra.gmra.mxu0 %vm7409_vm8, %v7704_v10  ;;  %10162 = vmatprep.subr.msk.mxu0 %vm7468_vm9, %v7964_v49 }
0x22e1   :  { %10151 = vmatprep.mubr.msk.f32.mxu0 %vm7409_vm8, %v7706_v0  ;;  %10163 = vmatpush3.msk.msra.mxu0 %vm7468_vm9, %v7964_v49  ;;  %v10444_v47 = vpop.eup %10443  ;;  %v8509_v0 = vld [vmem:[%s14589_s23 + $0x18] sm:$0xff] }
0x22e2   :  { %10178 = vmatprep.subr.msk.mxu0 %vm7468_vm9, %v8218_v36  ;;  %v10446_v2 = vpop.eup %10445  ;;  %v8210_v40 = vmul.f32 %v10444_v47, %v14304_v32 }
0x22e3   :  { %v8212_v27 = vmul.f32 %v10446_v2, %v14300_v60  ;;  %v8381_v60 = vld [vmem:[%s14587_s2 + $0x18] sm:$0xff] }
0x22e4   :  { %10152 = vmatmul.mubr.msk.f32.gmra.mxu0 %vm7409_vm8, %v7708_v34  ;;  %10186 = vmatprep.subr.mxu1 %v8381_v60  ;;  %v8506_v34 = vld [vmem:[%s14589_s23] sm:$0xff] }
0x22e5   :  { %10164 = vmatprep.mubr.msk.f32.mxu0 %vm7409_vm8, %v7956_v31  ;;  %10187 = vmatpush3.msra.mxu1 %v8381_v60 }
0x22e6   :  { %10188 = vmatprep.subr.mxu1 %v8380_v13 }
0x22e7   :  { %v10448_v24 = vpop.eup %10447  ;;  %10189 = vmatpush3.msra.mxu1 %v8380_v13 }
0x22e8   :  { %10165 = vmatmul.mubr.msk.f32.vlgmr.msra.gmra.mxu0 %vm7409_vm8, %v7958_v4  ;;  %v10450_v39 = vpop.eup %10449  ;;  %v8214_v19 = vmul.f32 %v10448_v24, %v14312_v44  ;;  %10190 = vmatprep.subr.mxu1 %v8379_v37 }
0x22e9   :  { %10179 = vmatpush3.msk.msra.mxu0 %vm7468_vm9, %v8218_v36  ;;  %10167 = vmatprep.mubr.msk.f32.mxu0 %vm7409_vm8, %v7960_v52  ;;  %v8216_v35 = vmul.f32 %v10450_v39, %v14308_v7  ;;  %v8507_v36 = vld [vmem:[%s14589_s23 + $0x8] sm:$0xff] }
0x22ea   :  { %10200 = vmatprep.subr.mxu0 %v14586_v41  ;;  %10191 = vmatpush3.msra.mxu1 %v8379_v37 }
0x22eb   :  { %10192 = vmatprep.subr.mxu1 %v8378_v20 }
0x22ec   :  { %10168 = vmatmul.mubr.msk.f32.gmra.mxu0 %vm7409_vm8, %v7962_v33  ;;  %10193 = vmatpush3.msra.mxu1 %v8378_v20 }
0x22ed   :  { %10180 = vmatprep.mubr.msk.f32.mxu0 %vm7409_vm8, %v8210_v40 }
0x22f0   :  { %10181 = vmatmul.mubr.msk.f32.vlgmr.msra.gmra.mxu0 %vm7409_vm8, %v8212_v27 }
0x22f1   :  { %10183 = vmatprep.mubr.msk.f32.mxu0 %vm7409_vm8, %v8214_v19  ;;  %10201 = vmatpush3.msra.mxu0 %v8509_v0 }
0x22f2   :  { %10202 = vmatprep.subr.mxu0 %v14586_v41 }
0x22f3   :  { %10203 = vmatpush3.msra.mxu0 %v8508_v6 }
0x22f4   :  { %10184 = vmatmul.mubr.msk.f32.gmra.mxu0 %vm7409_vm8, %v8216_v35  ;;  %10204 = vmatprep.subr.mxu0 %v14586_v41 }
0x22f5   :  { %10208 = vmatprep.mubr.msk.f32.mxu0 %vm10460_vm3, %v14586_v41  ;;  %10205 = vmatpush3.msra.mxu0 %v8507_v36 }
0x22f6   :  { %10206 = vmatprep.subr.mxu0 %v14586_v41 }
0x22f7   :  { %10207 = vmatpush3.msra.mxu0 %v8506_v34 }
0x2341   :  { %v10134_v55 = vpop.f32.mrf.mxu0 }
0x2343   :  { %v7537_v1 = vpop.f32.mrf.mxu0 }
0x2345   :  { %v10137_v11 = vpop.f32.mrf.mxu0 }
0x2347   :  { %v7547_v16 = vpop.f32.mrf.mxu0 }
0x23a0   :  { %v10150_v61 = vpop.f32.mrf.mxu0 }
0x23a1   :  { %8324 = vrot.lane.b32.xlu0 %v10150_v61, %s14571_s13 }
0x23a2   :  { %v7791_v32 = vpop.f32.mrf.mxu0 }
0x23a3   :  { %8322 = vrot.lane.b32.xlu1 %v7791_v32, %s14571_s13  ;;  %v8856_v32 = vld [vmem:[#allocation2] ss:$0 sm:$0xff] }
0x23a4   :  { %v10153_v7 = vpop.f32.mrf.mxu0 }
0x23a5   :  { %8328 = vrot.lane.b32.xlu0 %v10153_v7, %s14571_s13 }
0x23a6   :  { %v7801_v44 = vpop.f32.mrf.mxu0 }
0x23a7   :  { %8326 = vrot.lane.b32.xlu1 %v7801_v44, %s14571_s13 }
0x23a8   :  { %v10166_v9 = vpop.f32.mrf.mxu0 }
0x23a9   :  { %8340 = vrot.lane.b32.xlu0 %v10166_v9, %s14572_s10 }
0x23aa   :  { %v8045_v42 = vpop.f32.mrf.mxu0 }
0x23ab   :  { %8338 = vrot.lane.b32.xlu1 %v8045_v42, %s14572_s10 }
0x23ac   :  { %v10169_v30 = vpop.f32.mrf.mxu0 }
0x23ad   :  { %8344 = vrot.lane.b32.xlu0 %v10169_v30, %s14572_s10 }
0x23ae   :  { %v8055_v50 = vpop.f32.mrf.mxu0 }
0x23af   :  { %8342 = vrot.lane.b32.xlu1 %v8055_v50, %s14572_s10 }
0x23b0   :  { %v10182_v26 = vpop.f32.mrf.mxu0 }
0x23b1   :  { %8356 = vrot.lane.b32.xlu0 %v10182_v26, %s14588_s30 }
0x23b2   :  { %v8299_v54 = vpop.f32.mrf.mxu0 }
0x23b3   :  { %8354 = vrot.lane.b32.xlu1 %v8299_v54, %s14588_s30 }
0x23b4   :  { %v10185_v51 = vpop.f32.mrf.mxu0 }
0x23b5   :  { %8360 = vrot.lane.b32.xlu0 %v10185_v51, %s14588_s30 }
0x23b6   :  { %v8309_v25 = vpop.f32.mrf.mxu0 }
0x23b7   :  { %8358 = vrot.lane.b32.xlu1 %v8309_v25, %s14588_s30 }
0x2413   :  { %v8325_v43 = vpop.permute.xlu0 %8324 }
0x2414   :  { %v8367_v29 = vsel %vm414_vm5, %v10134_v55, %v8325_v43 }
0x2415   :  { %v8323_v23 = vpop.permute.xlu1 %8322 }
0x2416   :  { %v8366_v28 = vsel %vm414_vm5, %v7537_v1, %v8323_v23 }
0x2417   :  { %v8329_v22 = vpop.permute.xlu0 %8328 }
0x2418   :  { %v8369_v45 = vsel %vm414_vm5, %v10137_v11, %v8329_v22 }
0x2419   :  { %v8327_v62 = vpop.permute.xlu1 %8326 }
0x241a   :  { %v8368_v12 = vsel %vm414_vm5, %v7547_v16, %v8327_v62 }
0x241b   :  { %v8341_v38 = vpop.permute.xlu0 %8340 }
0x241c   :  { %v8371_v46 = vsel %vm1563_vm6, %v8367_v29, %v8341_v38 }
0x241d   :  { %v8339_v48 = vpop.permute.xlu1 %8338 }
0x241e   :  { %v8370_v15 = vsel %vm1563_vm6, %v8366_v28, %v8339_v48 }
0x241f   :  { %v8345_v63 = vpop.permute.xlu0 %8344 }
0x2420   :  { %v8373_v17 = vsel %vm1563_vm6, %v8369_v45, %v8345_v63 }
0x2421   :  { %v8343_v14 = vpop.permute.xlu1 %8342 }
0x2422   :  { %v8372_v49 = vsel %vm1563_vm6, %v8368_v12, %v8343_v14 }
0x2423   :  { %v8357_v21 = vpop.permute.xlu0 %8356 }
0x2424   :  { %v8375_v58 = vsel %vm1568_vm7, %v8371_v46, %v8357_v21 }
0x2425   :  { %v8355_v18 = vpop.permute.xlu1 %8354 }
0x2426   :  { %v8374_v8 = vsel %vm1568_vm7, %v8370_v15, %v8355_v18 }
0x2427   :  { %10194 = vmatprep.mubr.msk.f32.mxu1 %vm304_vm2, %v8374_v8  ;;  %v8361_v59 = vpop.permute.xlu0 %8360 }
0x2428   :  { %10195 = vmatmul.mubr.msk.f32.vlgmr.msra.gmra.mxu1 %vm304_vm2, %v8375_v58  ;;  %v8377_v57 = vsel %vm1568_vm7, %v8373_v17, %v8361_v59 }
0x2429   :  { %v8359_v53 = vpop.permute.xlu1 %8358 }
0x242a   :  { %v8376_v10 = vsel %vm1568_vm7, %v8372_v49, %v8359_v53 }
0x242b   :  { %10197 = vmatprep.mubr.msk.f32.mxu1 %vm304_vm2, %v8376_v10 }
0x242c   :  { %10198 = vmatmul.mubr.msk.f32.gmra.mxu1 %vm304_vm2, %v8377_v57 }
0x24e8   :  { %v10196_v31 = vpop.f32.mrf.mxu1 }
0x24e9   :  { %v8473_v5 = vadd.f32 %v10196_v31, %v8851_v56 }
0x24ea   :  { %v8467_v4 = vpop.f32.mrf.mxu1 }
0x24eb   :  { %v8468_v52 = vadd.f32 %v8851_v56, %v8467_v4  ;;  %v8491_v24 = vrot.slane %v8473_v5, 4 }
0x24ec   :  { %v10199_v47 = vpop.f32.mrf.mxu1 }
0x24ed   :  { %v8487_v33 = vrot.slane %v8468_v52, 4  ;;  %v8483_v2 = vadd.f32 %v10199_v47, %v8851_v56  ;;  %v8493_v35 = vadd.f32 %v8491_v24, %v8473_v5 }
0x24ee   :  { %v8477_v40 = vpop.f32.mrf.mxu1 }
0x24ef   :  { %v8499_v41 = vrot.slane %v8483_v2, 4  ;;  %v8478_v27 = vadd.f32 %v8851_v56, %v8477_v40  ;;  %v8489_v39 = vadd.f32 %v8487_v33, %v8468_v52 }
0x24f1   :  { %v8495_v19 = vrot.slane %v8478_v27, 4  ;;  %v8501_v55 = vadd.f32 %v8499_v41, %v8483_v2  ;;  %v8502_v11 = vadd.f32 %v8493_v35, %v8489_v39 }
0x24f3   :  { %v8497_v1 = vadd.f32 %v8495_v19, %v8478_v27 }
0x24f5   :  { %v8503_v16 = vadd.f32 %v8501_v55, %v8497_v1 }
0x24f7   :  { %v8504_v61 = vadd.f32 %v8503_v16, %v8502_v11 }
0x24f9   :  { %v8505_v60 = vmul.f32 0.125, %v8504_v61 }
0x24fb   :  { %10209 = vmatmul.mubr.msk.f32.vlgmr.msra.gmra.mxu0 %vm304_vm2, %v8505_v60 }
0x25bb   :  { %v8586_v13 = vpop.f32.mrf.mxu0 }
0x25bc   :  { %v8587_v7 = vadd.f32 %v8856_v32, %v8586_v13 }
0x25bd   :  { %v10210_v37 = vpop.f32.mrf.mxu0 }
0x25be   :  { %v8590_v44 = vsub.f32 0.0, %v8587_v7 }
0x25c0   :  { %v8591_v20 = vmul.f32 1.442695, %v8590_v44 }
0x25c2   :  { %10451 = vpow2.f32 %v8591_v20 }
0x25cf   :  { %v10452_v9 = vpop.eup %10451 }
0x25d0   :  { %v8593_v42 = vadd.f32 1.0, %v10452_v9 }
0x25d2   :  { %10453 = vrcp.f32 %v8593_v42 }
0x25df   :  { %v10454_v30 = vpop.eup %10453 }
0x25e0   :  { %8597 = vst.msk [vmem:[%s14592_s14] sm:$0xf] %vm8596_vm10, %v10454_v30 }

</bundles_post_ra>
